<compile_context>
chip_gen: v5e
topology: v5e:2x2
jax: 0.10.0
libtpu: 0.0.40
codegen_flags: <defaults>
</compile_context>

<pallas_src>
import functools

import jax
import jax.numpy as jnp
from jax import lax
from jax.experimental import pallas as pl
from jax.experimental.pallas import tpu as pltpu


def _basic_conv_kernel(Bt, H, W, Ho, Wo, Cin, Cout, KH, KW, P, apply_relu,
                       x_ref, w_ref, sb_ref, o_ref, xp_ref, acc_ref):
    """One grid step processes Bt images.

    x_ref  : (Bt, H, W, Cin)        unpadded NHWC images
    w_ref  : (KH*KW, Cin, Cout)     per-tap weight planes, tap = kh*KW + kw
    sb_ref : (2, Cout)              row 0 = folded scale, row 1 = folded bias
    o_ref  : (Bt, Ho*Wo, Cout)      lane-dense output (lane dim = Cout)
    xp_ref : (Bt, Hp, Wp, Cin)      VMEM scratch: zero-padded images (MXU dtype)
    acc_ref: (Bt*Ho*Wo, Cout)       VMEM scratch: f32 accumulator
    """
    Hp, Wp = H + 2 * P, W + 2 * P
    zdt = xp_ref.dtype

    # ---- zero halo + copy interior -----------------------------------------
    # Re-done every step: the scratch persists across grid steps, and with
    # "parallel" batch sharding a core may never execute program_id == 0, so
    # an init-once guard would be unsafe.  The halo strips are tiny.
    if P > 0:
        xp_ref[:, 0:P, :, :] = jnp.zeros((Bt, P, Wp, Cin), zdt)
        xp_ref[:, P + H:Hp, :, :] = jnp.zeros((Bt, P, Wp, Cin), zdt)
        xp_ref[:, P:P + H, 0:P, :] = jnp.zeros((Bt, H, P, Cin), zdt)
        xp_ref[:, P:P + H, P + W:Wp, :] = jnp.zeros((Bt, H, P, Cin), zdt)
    xp_ref[:, P:P + H, P:P + W, :] = x_ref[...].astype(zdt)

    # ---- KH*KW shifted (M, Cin) @ (Cin, Cout) matmuls, accumulated in f32 ---
    # No im2col materialization: each tap is a static slice (sublane offset
    # only) + a layout-preserving leading-dim merge, fed straight to the MXU.
    for kh in range(KH):
        for kw in range(KW):
            k = kh * KW + kw
            lhs = xp_ref[:, kh:kh + Ho, kw:kw + Wo, :].reshape(Bt * Ho * Wo, Cin)
            contrib = jnp.dot(lhs, w_ref[k], preferred_element_type=jnp.float32)
            if k == 0:
                acc_ref[...] = contrib
            else:
                acc_ref[...] = acc_ref[...] + contrib

    # ---- folded BatchNorm (+ conv bias) and ReLU epilogue, kept in f32 -----
    y = acc_ref[...] * sb_ref[0:1, :] + sb_ref[1:2, :]
    if apply_relu:
        y = jnp.maximum(y, 0.0)
    o_ref[...] = y.reshape(Bt, Ho * Wo, Cout).astype(o_ref.dtype)


def basic_conv_pallas_nhwc(x_nhwc, weight, scale, bias, *, padding, relu=True,
                           mxu_dtype=jnp.bfloat16, b_tile=None):
    """y = relu( conv2d(x) * scale + bias ), NHWC in, NHWC out.

    x_nhwc : (B, H, W, Cin) float32
    weight : (Cout, Cin, KH, KW)  torch Conv2d weight layout
    scale, bias : (Cout,) folded per-channel affine (see BN folding note above)
    mxu_dtype: matmul operand dtype.  bfloat16 (default) = MXU fast path with
               f32 accumulation/epilogue on v5e/v6e/v7x; float32 = exact parity.
    b_tile : images per grid step (default: whole batch; use B//2 on v7x).
    Returns (B, Ho, Wo, Cout) in x's dtype.
    """
    B, H, W, Cin = x_nhwc.shape
    Cout, Cin_w, KH, KW = weight.shape
    assert Cin_w == Cin, "groups != 1 is not supported"
    P = int(padding)
    Ho = H + 2 * P - KH + 1
    Wo = W + 2 * P - KW + 1
    assert Ho > 0 and Wo > 0
    if b_tile is None:
        b_tile = B                     # fold whole batch into one matmul M dim
    assert B % b_tile == 0

    # (Cout, Cin, KH, KW) -> (KH*KW, Cin, Cout): one contiguous weight plane
    # per conv tap.
    w = jnp.transpose(weight, (2, 3, 1, 0)).reshape(KH * KW, Cin, Cout)
    w = w.astype(mxu_dtype)
    sb = jnp.stack([scale, bias]).astype(jnp.float32)            # (2, Cout)

    kernel = functools.partial(_basic_conv_kernel, b_tile, H, W, Ho, Wo,
                               Cin, Cout, KH, KW, P, relu)

    # Rough per-step VMEM footprint (lane-padded to 128, in/out double
    # buffered) -> explicit limit with 2x headroom, floor 16 MiB.
    mxu_bytes = jnp.dtype(mxu_dtype).itemsize
    lane = 128
    est_vmem = (2 * b_tile * H * W * max(Cin, lane) * 4                 # x blocks
                + b_tile * (H + 2 * P) * (W + 2 * P) * max(Cin, lane) * mxu_bytes
                + b_tile * Ho * Wo * max(Cout, lane) * 4                # f32 acc
                + 2 * b_tile * Ho * Wo * max(Cout, lane) * 4            # out blocks
                + KH * KW * max(Cin, 8) * max(Cout, lane) * mxu_bytes   # weights
                + 8 * lane * 4)                                         # scale/bias
    vmem_limit = int(min(100 * 2**20, max(16 * 2**20, 2 * est_vmem)))

    flops = 2 * B * Ho * Wo * KH * KW * Cin * Cout
    bytes_accessed = (x_nhwc.size * x_nhwc.dtype.itemsize
                      + w.size * mxu_bytes + sb.size * 4
                      + B * Ho * Wo * Cout * x_nhwc.dtype.itemsize)

    out = pl.pallas_call(
        kernel,
        out_shape=jax.ShapeDtypeStruct((B, Ho * Wo, Cout), x_nhwc.dtype),
        grid_spec=pltpu.PrefetchScalarGridSpec(
            num_scalar_prefetch=0,
            grid=(B // b_tile,),
            in_specs=[
                pl.BlockSpec((b_tile, H, W, Cin), lambda b: (b, 0, 0, 0)),
                # constant index_maps -> weights / scale+bias are DMA'd once
                pl.BlockSpec((KH * KW, Cin, Cout), lambda b: (0, 0, 0)),
                pl.BlockSpec((2, Cout), lambda b: (0, 0)),
            ],
            out_specs=pl.BlockSpec((b_tile, Ho * Wo, Cout), lambda b: (b, 0, 0)),
            scratch_shapes=[
                pltpu.VMEM((b_tile, H + 2 * P, W + 2 * P, Cin), mxu_dtype),
                pltpu.VMEM((b_tile * Ho * Wo, Cout), jnp.float32),
            ],
        ),
        compiler_params=pltpu.CompilerParams(
            dimension_semantics=("parallel",),
            vmem_limit_bytes=vmem_limit),
        cost_estimate=pl.CostEstimate(flops=flops, transcendentals=0,
                                      bytes_accessed=bytes_accessed),
    )(x_nhwc, w, sb)

    return out.reshape(B, Ho, Wo, Cout)   # free: lane dim (Cout) unchanged


def basic_conv_pallas(x_nchw, weight, scale, bias, *, padding, relu=True,
                      mxu_dtype=jnp.bfloat16, b_tile=None):
    """PyTorch-layout (NCHW) wrapper for parity with BasicConv.forward.

    Prefer basic_conv_pallas_nhwc in an NHWC-native network to skip the two
    per-layer transposes.
    """
    x = jnp.transpose(x_nchw, (0, 2, 3, 1))              # NCHW -> NHWC
    y = basic_conv_pallas_nhwc(x, weight, scale, bias, padding=padding,
                               relu=relu, mxu_dtype=mxu_dtype, b_tile=b_tile)
    return jnp.transpose(y, (0, 3, 1, 2))                # NHWC -> NCHW


# ---------------- pure-JAX reference (for correctness check) ----------------
def _ref_basic_conv(x_nchw, weight, scale, bias, *, padding, relu=True):
    x = jnp.transpose(x_nchw, (0, 2, 3, 1))
    w = jnp.transpose(weight, (2, 3, 1, 0))                      # HWIO
    y = lax.conv_general_dilated(
        x, w, window_strides=(1, 1),
        padding=[(padding, padding), (padding, padding)],
        dimension_numbers=("NHWC", "HWIO", "NHWC"))
    y = y * scale.reshape(1, 1, 1, -1) + bias.reshape(1, 1, 1, -1)
    if relu:
        y = jnp.maximum(y, 0.0)
    return jnp.transpose(y, (0, 3, 1, 2))


if __name__ == "__main__":
    # BasicConv(in_planes=32, out_planes=128, kernel_size=3, stride=1,
    #           padding=1, relu=True, bn=True, bias=False)
    B, Cin, Cout, H, W = 2, 32, 128, 16, 16
    K, P = 3, 1
    eps = 1e-5

    key = jax.random.PRNGKey(0)
    keys = jax.random.split(key, 6)

    x = jax.random.normal(keys[0], (B, Cin, H, W), jnp.float32)
    weight = 0.1 * jax.random.normal(keys[1], (Cout, Cin, K, K), jnp.float32)

    # BatchNorm2d params (affine=True) folded to inference-mode scale/bias.
    gamma = 1.0 + 0.1 * jax.random.normal(keys[2], (Cout,), jnp.float32)
    beta = 0.1 * jax.random.normal(keys[3], (Cout,), jnp.float32)
    rmean = 0.1 * jax.random.normal(keys[4], (Cout,), jnp.float32)
    rvar = 1.0 + 0.1 * jnp.abs(jax.random.normal(keys[5], (Cout,), jnp.float32))
    scale = gamma / jnp.sqrt(rvar + eps)
    bias = beta - rmean * scale                                  # conv bias=False

    ref = jax.block_until_ready(
        _ref_basic_conv(x, weight, scale, bias, padding=P, relu=True))

    # default path: bf16 MXU operands, whole batch folded into one grid step
    out = jax.block_until_ready(
        basic_conv_pallas(x, weight, scale, bias, padding=P, relu=True))
    assert out.shape == (B, Cout, H, W)
    assert jnp.allclose(out, ref, atol=5e-2, rtol=5e-2), "bf16 mismatch vs ref"

    # exact-parity path: f32 MXU operands
    out_f32 = jax.block_until_ready(
        basic_conv_pallas(x, weight, scale, bias, padding=P, relu=True,
                          mxu_dtype=jnp.float32))
    assert jnp.allclose(out_f32, ref, atol=5e-3, rtol=5e-3), "f32 mismatch vs ref"

    # v7x-style split: 2-step "parallel" grid (one image per TensorCore)
    out_b1 = jax.block_until_ready(
        basic_conv_pallas(x, weight, scale, bias, padding=P, relu=True,
                          b_tile=1))
    assert jnp.allclose(out_b1, ref, atol=5e-2, rtol=5e-2), "b_tile=1 mismatch"

    print("KERNEL_OK")
</pallas_src>

<mosaic_0001>
module attributes {stable_mosaic.version = 11 : i64} {
  func.func @_basic_conv_kernel(%arg0: i32, %arg1: memref<2x16x16x32xf32, #tpu.memory_space<vmem>>, %arg2: memref<9x32x128xbf16, #tpu.memory_space<vmem>>, %arg3: memref<2x128xf32, #tpu.memory_space<vmem>>, %arg4: memref<2x256x128xf32, #tpu.memory_space<vmem>>, %arg5: memref<2x18x18x32xbf16, #tpu.memory_space<vmem>>, %arg6: memref<512x128xf32, #tpu.memory_space<vmem>>) attributes {dimension_semantics = [#tpu.dimension_semantics<parallel>], iteration_bounds = array<i64: 1>, scalar_prefetch = 0 : i64, scratch_operands = 2 : i64, tpu.core_type = #tpu.core_type<tc>, window_params = [{transform_indices = @transform_0, window_bounds = array<i64: 2, 16, 16, 32>}, {pipeline_mode = #tpu.pipeline_mode<synchronous>, transform_indices = @transform_1, window_bounds = array<i64: 9, 32, 128>}, {pipeline_mode = #tpu.pipeline_mode<synchronous>, transform_indices = @transform_2, window_bounds = array<i64: 2, 128>}, {transform_indices = @transform_3, window_bounds = array<i64: 2, 256, 128>}]} {
    %cst = arith.constant 0.000000e+00 : bf16
    %0 = vector.broadcast %cst : bf16 to vector<2x1x18x32xbf16>
    %c0 = arith.constant 0 : index
    %c0_0 = arith.constant 0 : index
    %c0_1 = arith.constant 0 : index
    %c0_2 = arith.constant 0 : index
    %1 = vector.load %arg5[%c0, %c0_0, %c0_1, %c0_2] : memref<2x18x18x32xbf16, #tpu.memory_space<vmem>>, vector<2x1x18x32xbf16>
    tpu.vector_store %arg5[%c0, %c0_0, %c0_1, %c0_2], %0 {strides = array<i32>} : memref<2x18x18x32xbf16, #tpu.memory_space<vmem>>, vector<2x1x18x32xbf16>,
    %cst_3 = arith.constant 0.000000e+00 : bf16
    %2 = vector.broadcast %cst_3 : bf16 to vector<2x1x18x32xbf16>
    %c0_4 = arith.constant 0 : index
    %c17 = arith.constant 17 : index
    %c0_5 = arith.constant 0 : index
    %c0_6 = arith.constant 0 : index
    %3 = vector.load %arg5[%c0_4, %c17, %c0_5, %c0_6] : memref<2x18x18x32xbf16, #tpu.memory_space<vmem>>, vector<2x1x18x32xbf16>
    tpu.vector_store %arg5[%c0_4, %c17, %c0_5, %c0_6], %2 {strides = array<i32>} : memref<2x18x18x32xbf16, #tpu.memory_space<vmem>>, vector<2x1x18x32xbf16>,
    %cst_7 = arith.constant 0.000000e+00 : bf16
    %4 = vector.broadcast %cst_7 : bf16 to vector<2x16x1x32xbf16>
    %c0_8 = arith.constant 0 : index
    %c1 = arith.constant 1 : index
    %c0_9 = arith.constant 0 : index
    %c0_10 = arith.constant 0 : index
    %5 = vector.load %arg5[%c0_8, %c1, %c0_9, %c0_10] : memref<2x18x18x32xbf16, #tpu.memory_space<vmem>>, vector<2x16x1x32xbf16>
    tpu.vector_store %arg5[%c0_8, %c1, %c0_9, %c0_10], %4 {strides = array<i32>} : memref<2x18x18x32xbf16, #tpu.memory_space<vmem>>, vector<2x16x1x32xbf16>,
    %cst_11 = arith.constant 0.000000e+00 : bf16
    %6 = vector.broadcast %cst_11 : bf16 to vector<2x16x1x32xbf16>
    %c0_12 = arith.constant 0 : index
    %c1_13 = arith.constant 1 : index
    %c17_14 = arith.constant 17 : index
    %c0_15 = arith.constant 0 : index
    %7 = vector.load %arg5[%c0_12, %c1_13, %c17_14, %c0_15] : memref<2x18x18x32xbf16, #tpu.memory_space<vmem>>, vector<2x16x1x32xbf16>
    tpu.vector_store %arg5[%c0_12, %c1_13, %c17_14, %c0_15], %6 {strides = array<i32>} : memref<2x18x18x32xbf16, #tpu.memory_space<vmem>>, vector<2x16x1x32xbf16>,
    %c0_16 = arith.constant 0 : index
    %c0_17 = arith.constant 0 : index
    %c0_18 = arith.constant 0 : index
    %c0_19 = arith.constant 0 : index
    %8 = vector.load %arg1[%c0_16, %c0_17, %c0_18, %c0_19] : memref<2x16x16x32xf32, #tpu.memory_space<vmem>>, vector<2x16x16x32xf32>
    %9 = arith.truncf %8 : vector<2x16x16x32xf32> to vector<2x16x16x32xbf16>
    %c0_20 = arith.constant 0 : index
    %c1_21 = arith.constant 1 : index
    %c1_22 = arith.constant 1 : index
    %c0_23 = arith.constant 0 : index
    %10 = vector.load %arg5[%c0_20, %c1_21, %c1_22, %c0_23] : memref<2x18x18x32xbf16, #tpu.memory_space<vmem>>, vector<2x16x16x32xbf16>
    tpu.vector_store %arg5[%c0_20, %c1_21, %c1_22, %c0_23], %9 {strides = array<i32>} : memref<2x18x18x32xbf16, #tpu.memory_space<vmem>>, vector<2x16x16x32xbf16>,
    %c0_24 = arith.constant 0 : index
    %c0_25 = arith.constant 0 : index
    %c0_26 = arith.constant 0 : index
    %c0_27 = arith.constant 0 : index
    %11 = vector.load %arg5[%c0_24, %c0_25, %c0_26, %c0_27] : memref<2x18x18x32xbf16, #tpu.memory_space<vmem>>, vector<2x16x16x32xbf16>
    %12 = vector.shape_cast %11 : vector<2x16x16x32xbf16> to vector<512x32xbf16>
    %c0_28 = arith.constant 0 : index
    %c0_29 = arith.constant 0 : index
    %c0_30 = arith.constant 0 : index
    %13 = vector.load %arg2[%c0_28, %c0_29, %c0_30] : memref<9x32x128xbf16, #tpu.memory_space<vmem>>, vector<1x32x128xbf16>
    %14 = vector.shape_cast %13 : vector<1x32x128xbf16> to vector<32x128xbf16>
    %cst_31 = arith.constant dense<0.000000e+00> : vector<512x128xf32>
    %15 = tpu.matmul %12, %14, %cst_31 {dimension_numbers = #tpu.dot_dimension_numbers<[1], [0], [0], [1], [0, 0, 1, 1], [], []>} : vector<512x32xbf16>, vector<32x128xbf16>, vector<512x128xf32> -> vector<512x128xf32>
    %c0_32 = arith.constant 0 : index
    %c0_33 = arith.constant 0 : index
    %16 = vector.load %arg6[%c0_32, %c0_33] : memref<512x128xf32, #tpu.memory_space<vmem>>, vector<512x128xf32>
    tpu.vector_store %arg6[%c0_32, %c0_33], %15 {strides = array<i32>} : memref<512x128xf32, #tpu.memory_space<vmem>>, vector<512x128xf32>,
    %c0_34 = arith.constant 0 : index
    %c0_35 = arith.constant 0 : index
    %c1_36 = arith.constant 1 : index
    %c0_37 = arith.constant 0 : index
    %17 = vector.load %arg5[%c0_34, %c0_35, %c1_36, %c0_37] : memref<2x18x18x32xbf16, #tpu.memory_space<vmem>>, vector<2x16x16x32xbf16>
    %18 = vector.shape_cast %17 : vector<2x16x16x32xbf16> to vector<512x32xbf16>
    %c1_38 = arith.constant 1 : index
    %c0_39 = arith.constant 0 : index
    %c0_40 = arith.constant 0 : index
    %19 = vector.load %arg2[%c1_38, %c0_39, %c0_40] : memref<9x32x128xbf16, #tpu.memory_space<vmem>>, vector<1x32x128xbf16>
    %20 = vector.shape_cast %19 : vector<1x32x128xbf16> to vector<32x128xbf16>
    %cst_41 = arith.constant dense<0.000000e+00> : vector<512x128xf32>
    %21 = tpu.matmul %18, %20, %cst_41 {dimension_numbers = #tpu.dot_dimension_numbers<[1], [0], [0], [1], [0, 0, 1, 1], [], []>} : vector<512x32xbf16>, vector<32x128xbf16>, vector<512x128xf32> -> vector<512x128xf32>
    %c0_42 = arith.constant 0 : index
    %c0_43 = arith.constant 0 : index
    %22 = vector.load %arg6[%c0_42, %c0_43] : memref<512x128xf32, #tpu.memory_space<vmem>>, vector<512x128xf32>
    %23 = arith.addf %22, %21 : vector<512x128xf32>
    %c0_44 = arith.constant 0 : index
    %c0_45 = arith.constant 0 : index
    %24 = vector.load %arg6[%c0_44, %c0_45] : memref<512x128xf32, #tpu.memory_space<vmem>>, vector<512x128xf32>
    tpu.vector_store %arg6[%c0_44, %c0_45], %23 {strides = array<i32>} : memref<512x128xf32, #tpu.memory_space<vmem>>, vector<512x128xf32>,
    %c0_46 = arith.constant 0 : index
    %c0_47 = arith.constant 0 : index
    %c2 = arith.constant 2 : index
    %c0_48 = arith.constant 0 : index
    %25 = vector.load %arg5[%c0_46, %c0_47, %c2, %c0_48] : memref<2x18x18x32xbf16, #tpu.memory_space<vmem>>, vector<2x16x16x32xbf16>
    %26 = vector.shape_cast %25 : vector<2x16x16x32xbf16> to vector<512x32xbf16>
    %c2_49 = arith.constant 2 : index
    %c0_50 = arith.constant 0 : index
    %c0_51 = arith.constant 0 : index
    %27 = vector.load %arg2[%c2_49, %c0_50, %c0_51] : memref<9x32x128xbf16, #tpu.memory_space<vmem>>, vector<1x32x128xbf16>
    %28 = vector.shape_cast %27 : vector<1x32x128xbf16> to vector<32x128xbf16>
    %cst_52 = arith.constant dense<0.000000e+00> : vector<512x128xf32>
    %29 = tpu.matmul %26, %28, %cst_52 {dimension_numbers = #tpu.dot_dimension_numbers<[1], [0], [0], [1], [0, 0, 1, 1], [], []>} : vector<512x32xbf16>, vector<32x128xbf16>, vector<512x128xf32> -> vector<512x128xf32>
    %c0_53 = arith.constant 0 : index
    %c0_54 = arith.constant 0 : index
    %30 = vector.load %arg6[%c0_53, %c0_54] : memref<512x128xf32, #tpu.memory_space<vmem>>, vector<512x128xf32>
    %31 = arith.addf %30, %29 : vector<512x128xf32>
    %c0_55 = arith.constant 0 : index
    %c0_56 = arith.constant 0 : index
    %32 = vector.load %arg6[%c0_55, %c0_56] : memref<512x128xf32, #tpu.memory_space<vmem>>, vector<512x128xf32>
    tpu.vector_store %arg6[%c0_55, %c0_56], %31 {strides = array<i32>} : memref<512x128xf32, #tpu.memory_space<vmem>>, vector<512x128xf32>,
    %c0_57 = arith.constant 0 : index
    %c1_58 = arith.constant 1 : index
    %c0_59 = arith.constant 0 : index
    %c0_60 = arith.constant 0 : index
    %33 = vector.load %arg5[%c0_57, %c1_58, %c0_59, %c0_60] : memref<2x18x18x32xbf16, #tpu.memory_space<vmem>>, vector<2x16x16x32xbf16>
    %34 = vector.shape_cast %33 : vector<2x16x16x32xbf16> to vector<512x32xbf16>
    %c3 = arith.constant 3 : index
    %c0_61 = arith.constant 0 : index
    %c0_62 = arith.constant 0 : index
    %35 = vector.load %arg2[%c3, %c0_61, %c0_62] : memref<9x32x128xbf16, #tpu.memory_space<vmem>>, vector<1x32x128xbf16>
    %36 = vector.shape_cast %35 : vector<1x32x128xbf16> to vector<32x128xbf16>
    %cst_63 = arith.constant dense<0.000000e+00> : vector<512x128xf32>
    %37 = tpu.matmul %34, %36, %cst_63 {dimension_numbers = #tpu.dot_dimension_numbers<[1], [0], [0], [1], [0, 0, 1, 1], [], []>} : vector<512x32xbf16>, vector<32x128xbf16>, vector<512x128xf32> -> vector<512x128xf32>
    %c0_64 = arith.constant 0 : index
    %c0_65 = arith.constant 0 : index
    %38 = vector.load %arg6[%c0_64, %c0_65] : memref<512x128xf32, #tpu.memory_space<vmem>>, vector<512x128xf32>
    %39 = arith.addf %38, %37 : vector<512x128xf32>
    %c0_66 = arith.constant 0 : index
    %c0_67 = arith.constant 0 : index
    %40 = vector.load %arg6[%c0_66, %c0_67] : memref<512x128xf32, #tpu.memory_space<vmem>>, vector<512x128xf32>
    tpu.vector_store %arg6[%c0_66, %c0_67], %39 {strides = array<i32>} : memref<512x128xf32, #tpu.memory_space<vmem>>, vector<512x128xf32>,
    %c0_68 = arith.constant 0 : index
    %c1_69 = arith.constant 1 : index
    %c1_70 = arith.constant 1 : index
    %c0_71 = arith.constant 0 : index
    %41 = vector.load %arg5[%c0_68, %c1_69, %c1_70, %c0_71] : memref<2x18x18x32xbf16, #tpu.memory_space<vmem>>, vector<2x16x16x32xbf16>
    %42 = vector.shape_cast %41 : vector<2x16x16x32xbf16> to vector<512x32xbf16>
    %c4 = arith.constant 4 : index
    %c0_72 = arith.constant 0 : index
    %c0_73 = arith.constant 0 : index
    %43 = vector.load %arg2[%c4, %c0_72, %c0_73] : memref<9x32x128xbf16, #tpu.memory_space<vmem>>, vector<1x32x128xbf16>
    %44 = vector.shape_cast %43 : vector<1x32x128xbf16> to vector<32x128xbf16>
    %cst_74 = arith.constant dense<0.000000e+00> : vector<512x128xf32>
    %45 = tpu.matmul %42, %44, %cst_74 {dimension_numbers = #tpu.dot_dimension_numbers<[1], [0], [0], [1], [0, 0, 1, 1], [], []>} : vector<512x32xbf16>, vector<32x128xbf16>, vector<512x128xf32> -> vector<512x128xf32>
    %c0_75 = arith.constant 0 : index
    %c0_76 = arith.constant 0 : index
    %46 = vector.load %arg6[%c0_75, %c0_76] : memref<512x128xf32, #tpu.memory_space<vmem>>, vector<512x128xf32>
    %47 = arith.addf %46, %45 : vector<512x128xf32>
    %c0_77 = arith.constant 0 : index
    %c0_78 = arith.constant 0 : index
    %48 = vector.load %arg6[%c0_77, %c0_78] : memref<512x128xf32, #tpu.memory_space<vmem>>, vector<512x128xf32>
    tpu.vector_store %arg6[%c0_77, %c0_78], %47 {strides = array<i32>} : memref<512x128xf32, #tpu.memory_space<vmem>>, vector<512x128xf32>,
    %c0_79 = arith.constant 0 : index
    %c1_80 = arith.constant 1 : index
    %c2_81 = arith.constant 2 : index
    %c0_82 = arith.constant 0 : index
    %49 = vector.load %arg5[%c0_79, %c1_80, %c2_81, %c0_82] : memref<2x18x18x32xbf16, #tpu.memory_space<vmem>>, vector<2x16x16x32xbf16>
    %50 = vector.shape_cast %49 : vector<2x16x16x32xbf16> to vector<512x32xbf16>
    %c5 = arith.constant 5 : index
    %c0_83 = arith.constant 0 : index
    %c0_84 = arith.constant 0 : index
    %51 = vector.load %arg2[%c5, %c0_83, %c0_84] : memref<9x32x128xbf16, #tpu.memory_space<vmem>>, vector<1x32x128xbf16>
    %52 = vector.shape_cast %51 : vector<1x32x128xbf16> to vector<32x128xbf16>
    %cst_85 = arith.constant dense<0.000000e+00> : vector<512x128xf32>
    %53 = tpu.matmul %50, %52, %cst_85 {dimension_numbers = #tpu.dot_dimension_numbers<[1], [0], [0], [1], [0, 0, 1, 1], [], []>} : vector<512x32xbf16>, vector<32x128xbf16>, vector<512x128xf32> -> vector<512x128xf32>
    %c0_86 = arith.constant 0 : index
    %c0_87 = arith.constant 0 : index
    %54 = vector.load %arg6[%c0_86, %c0_87] : memref<512x128xf32, #tpu.memory_space<vmem>>, vector<512x128xf32>
    %55 = arith.addf %54, %53 : vector<512x128xf32>
    %c0_88 = arith.constant 0 : index
    %c0_89 = arith.constant 0 : index
    %56 = vector.load %arg6[%c0_88, %c0_89] : memref<512x128xf32, #tpu.memory_space<vmem>>, vector<512x128xf32>
    tpu.vector_store %arg6[%c0_88, %c0_89], %55 {strides = array<i32>} : memref<512x128xf32, #tpu.memory_space<vmem>>, vector<512x128xf32>,
    %c0_90 = arith.constant 0 : index
    %c2_91 = arith.constant 2 : index
    %c0_92 = arith.constant 0 : index
    %c0_93 = arith.constant 0 : index
    %57 = vector.load %arg5[%c0_90, %c2_91, %c0_92, %c0_93] : memref<2x18x18x32xbf16, #tpu.memory_space<vmem>>, vector<2x16x16x32xbf16>
    %58 = vector.shape_cast %57 : vector<2x16x16x32xbf16> to vector<512x32xbf16>
    %c6 = arith.constant 6 : index
    %c0_94 = arith.constant 0 : index
    %c0_95 = arith.constant 0 : index
    %59 = vector.load %arg2[%c6, %c0_94, %c0_95] : memref<9x32x128xbf16, #tpu.memory_space<vmem>>, vector<1x32x128xbf16>
    %60 = vector.shape_cast %59 : vector<1x32x128xbf16> to vector<32x128xbf16>
    %cst_96 = arith.constant dense<0.000000e+00> : vector<512x128xf32>
    %61 = tpu.matmul %58, %60, %cst_96 {dimension_numbers = #tpu.dot_dimension_numbers<[1], [0], [0], [1], [0, 0, 1, 1], [], []>} : vector<512x32xbf16>, vector<32x128xbf16>, vector<512x128xf32> -> vector<512x128xf32>
    %c0_97 = arith.constant 0 : index
    %c0_98 = arith.constant 0 : index
    %62 = vector.load %arg6[%c0_97, %c0_98] : memref<512x128xf32, #tpu.memory_space<vmem>>, vector<512x128xf32>
    %63 = arith.addf %62, %61 : vector<512x128xf32>
    %c0_99 = arith.constant 0 : index
    %c0_100 = arith.constant 0 : index
    %64 = vector.load %arg6[%c0_99, %c0_100] : memref<512x128xf32, #tpu.memory_space<vmem>>, vector<512x128xf32>
    tpu.vector_store %arg6[%c0_99, %c0_100], %63 {strides = array<i32>} : memref<512x128xf32, #tpu.memory_space<vmem>>, vector<512x128xf32>,
    %c0_101 = arith.constant 0 : index
    %c2_102 = arith.constant 2 : index
    %c1_103 = arith.constant 1 : index
    %c0_104 = arith.constant 0 : index
    %65 = vector.load %arg5[%c0_101, %c2_102, %c1_103, %c0_104] : memref<2x18x18x32xbf16, #tpu.memory_space<vmem>>, vector<2x16x16x32xbf16>
    %66 = vector.shape_cast %65 : vector<2x16x16x32xbf16> to vector<512x32xbf16>
    %c7 = arith.constant 7 : index
    %c0_105 = arith.constant 0 : index
    %c0_106 = arith.constant 0 : index
    %67 = vector.load %arg2[%c7, %c0_105, %c0_106] : memref<9x32x128xbf16, #tpu.memory_space<vmem>>, vector<1x32x128xbf16>
    %68 = vector.shape_cast %67 : vector<1x32x128xbf16> to vector<32x128xbf16>
    %cst_107 = arith.constant dense<0.000000e+00> : vector<512x128xf32>
    %69 = tpu.matmul %66, %68, %cst_107 {dimension_numbers = #tpu.dot_dimension_numbers<[1], [0], [0], [1], [0, 0, 1, 1], [], []>} : vector<512x32xbf16>, vector<32x128xbf16>, vector<512x128xf32> -> vector<512x128xf32>
    %c0_108 = arith.constant 0 : index
    %c0_109 = arith.constant 0 : index
    %70 = vector.load %arg6[%c0_108, %c0_109] : memref<512x128xf32, #tpu.memory_space<vmem>>, vector<512x128xf32>
    %71 = arith.addf %70, %69 : vector<512x128xf32>
    %c0_110 = arith.constant 0 : index
    %c0_111 = arith.constant 0 : index
    %72 = vector.load %arg6[%c0_110, %c0_111] : memref<512x128xf32, #tpu.memory_space<vmem>>, vector<512x128xf32>
    tpu.vector_store %arg6[%c0_110, %c0_111], %71 {strides = array<i32>} : memref<512x128xf32, #tpu.memory_space<vmem>>, vector<512x128xf32>,
    %c0_112 = arith.constant 0 : index
    %c2_113 = arith.constant 2 : index
    %c2_114 = arith.constant 2 : index
    %c0_115 = arith.constant 0 : index
    %73 = vector.load %arg5[%c0_112, %c2_113, %c2_114, %c0_115] : memref<2x18x18x32xbf16, #tpu.memory_space<vmem>>, vector<2x16x16x32xbf16>
    %74 = vector.shape_cast %73 : vector<2x16x16x32xbf16> to vector<512x32xbf16>
    %c8 = arith.constant 8 : index
    %c0_116 = arith.constant 0 : index
    %c0_117 = arith.constant 0 : index
    %75 = vector.load %arg2[%c8, %c0_116, %c0_117] : memref<9x32x128xbf16, #tpu.memory_space<vmem>>, vector<1x32x128xbf16>
    %76 = vector.shape_cast %75 : vector<1x32x128xbf16> to vector<32x128xbf16>
    %cst_118 = arith.constant dense<0.000000e+00> : vector<512x128xf32>
    %77 = tpu.matmul %74, %76, %cst_118 {dimension_numbers = #tpu.dot_dimension_numbers<[1], [0], [0], [1], [0, 0, 1, 1], [], []>} : vector<512x32xbf16>, vector<32x128xbf16>, vector<512x128xf32> -> vector<512x128xf32>
    %c0_119 = arith.constant 0 : index
    %c0_120 = arith.constant 0 : index
    %78 = vector.load %arg6[%c0_119, %c0_120] : memref<512x128xf32, #tpu.memory_space<vmem>>, vector<512x128xf32>
    %79 = arith.addf %78, %77 : vector<512x128xf32>
    %c0_121 = arith.constant 0 : index
    %c0_122 = arith.constant 0 : index
    %80 = vector.load %arg6[%c0_121, %c0_122] : memref<512x128xf32, #tpu.memory_space<vmem>>, vector<512x128xf32>
    tpu.vector_store %arg6[%c0_121, %c0_122], %79 {strides = array<i32>} : memref<512x128xf32, #tpu.memory_space<vmem>>, vector<512x128xf32>,
    %c0_123 = arith.constant 0 : index
    %c0_124 = arith.constant 0 : index
    %81 = vector.load %arg6[%c0_123, %c0_124] : memref<512x128xf32, #tpu.memory_space<vmem>>, vector<512x128xf32>
    %c0_125 = arith.constant 0 : index
    %c0_126 = arith.constant 0 : index
    %82 = vector.load %arg3[%c0_125, %c0_126] : memref<2x128xf32, #tpu.memory_space<vmem>>, vector<1x128xf32>
    %83 = vector.broadcast %82 : vector<1x128xf32> to vector<512x128xf32>
    %84 = arith.mulf %81, %83 : vector<512x128xf32>
    %c1_127 = arith.constant 1 : index
    %c0_128 = arith.constant 0 : index
    %85 = vector.load %arg3[%c1_127, %c0_128] : memref<2x128xf32, #tpu.memory_space<vmem>>, vector<1x128xf32>
    %86 = vector.broadcast %85 : vector<1x128xf32> to vector<512x128xf32>
    %87 = arith.addf %84, %86 : vector<512x128xf32>
    %cst_129 = arith.constant 0.000000e+00 : f32
    %88 = vector.broadcast %cst_129 : f32 to vector<512x128xf32>
    %89 = arith.maximumf %87, %88 : vector<512x128xf32>
    %90 = vector.shape_cast %89 : vector<512x128xf32> to vector<2x256x128xf32>
    %c0_130 = arith.constant 0 : index
    %c0_131 = arith.constant 0 : index
    %c0_132 = arith.constant 0 : index
    %91 = vector.load %arg4[%c0_130, %c0_131, %c0_132] : memref<2x256x128xf32, #tpu.memory_space<vmem>>, vector<2x256x128xf32>
    tpu.vector_store %arg4[%c0_130, %c0_131, %c0_132], %90 {strides = array<i32>} : memref<2x256x128xf32, #tpu.memory_space<vmem>>, vector<2x256x128xf32>,
    return
  }
  func.func @transform_0(%arg0: i32) -> (i32, i32, i32, i32) {
    %c0_i32 = arith.constant 0 : i32
    %c0_i32_0 = arith.constant 0 : i32
    %c0_i32_1 = arith.constant 0 : i32
    %c0_i32_2 = arith.constant 0 : i32
    return %arg0, %c0_i32, %c0_i32_0, %c0_i32_1 : i32, i32, i32, i32
  }
  func.func @transform_1(%arg0: i32) -> (i32, i32, i32) {
    %c0_i32 = arith.constant 0 : i32
    %c0_i32_0 = arith.constant 0 : i32
    %c0_i32_1 = arith.constant 0 : i32
    %c0_i32_2 = arith.constant 0 : i32
    return %c0_i32, %c0_i32_0, %c0_i32_1 : i32, i32, i32
  }
  func.func @transform_2(%arg0: i32) -> (i32, i32) {
    %c0_i32 = arith.constant 0 : i32
    %c0_i32_0 = arith.constant 0 : i32
    %c0_i32_1 = arith.constant 0 : i32
    return %c0_i32, %c0_i32_0 : i32, i32
  }
  func.func @transform_3(%arg0: i32) -> (i32, i32, i32) {
    %c0_i32 = arith.constant 0 : i32
    %c0_i32_0 = arith.constant 0 : i32
    %c0_i32_1 = arith.constant 0 : i32
    return %arg0, %c0_i32, %c0_i32_0 : i32, i32, i32
  }
}

</mosaic_0001>

<bundles_post_ra>
// kernel: tpu_custom_call.1
= control target key start
LH: loop header
LB: loop body
LE: loop exit
PB: predicated region body
PF: predicated region fallthrough
CT: control target
= control target key end

     0   :  { %8 = vsyncpa [#allocation5], 0  ;;  %s14498_s0 = inlined_call_operand.hbm [shape: f32[2,16,16,32], index: 0, kind: input, shape index: {}]   ;;  %s14499_s1 = inlined_call_operand.hbm [shape: bf16[9,32,128], index: 1, kind: input, shape index: {}]   ;;  %s14500_s2 = inlined_call_operand.hbm [shape: f32[2,128], index: 2, kind: input, shape index: {}]   ;;  %s14501_s3 = inlined_call_operand.hbm [shape: f32[2,256,128], index: 3, kind: output, shape index: {}]  }
   0x1   :  { %9 = vsyncpa [#allocation8], 0  ;;  %s28_s14 = sshll.u32 %s14499_s1, 4  ;;  %s29_s14 = int_to_ptr.hbm [resolvable:$true] %s28_s14 }
   0x2   :  { %10 = vsyncpa [#allocation6], 0  ;;  %s11926_s15 = smov [#allocation7]   ;;  %s15_s19 = sshll.u32 %s14498_s0, 4  ;;  %s16_s19 = int_to_ptr.hbm [resolvable:$true] %s15_s19 }
   0x3   :  { %s30_s16 = sshll.u32 %s11926_s15, 4  ;;  %s11927_s20 = smov 64   ;;  %s31_s16 = int_to_ptr.vmem [resolvable:$true] %s30_s16 }
   0x4   :  { %s11928_s21 = smov 4   ;;  %s11929_s22 = smov [#allocation4]  }
   0x5   :  { %36 = dma.hbm_to_vmem [thread:$0]  %s29_s14, 2304, %s31_s16, [#allocation8], %s11927_s20, %s11927_s20, %s11928_s21  }
   0x6   :  { %s17_s23 = sshll.u32 %s11929_s22, 4  ;;  %s11930_s24 = smov 128   ;;  %s18_s23 = int_to_ptr.vmem [resolvable:$true] %s17_s23 }
   0x7   :  { %s11931_s25 = smov 8   ;;  %s42_s27 = sshll.u32 %s14500_s2, 4  ;;  %s43_s27 = int_to_ptr.hbm [resolvable:$true] %s42_s27 }
   0x8   :  { %23 = dma.hbm_to_vmem [thread:$0]  %s16_s19, 8192, %s18_s23, [#allocation5], %s11930_s24, %s11930_s24, %s11931_s25  }
   0x9   :  { %s11932_s28 = smov [#allocation9]  }
   0xa   :  { %s44_s0 = sshll.u32 %s11932_s28, 4  ;;  %s45_s0 = int_to_ptr.vmem [resolvable:$true] %s44_s0 }
   0xb   :  { %47 = dma.hbm_to_vmem [thread:$0]  %s43_s27, 32, %s45_s0, [#allocation8]  }
   0xc   :  { %11920 = dma.done.wait [#allocation5], 8192  }
   0xd   :  { %11921 = vsyncadd [#allocation5], 4294959104 }
   0xe   :  { %11922 = dma.done.wait [#allocation8], 2336  }
   0xf   :  { %11923 = vsyncadd [#allocation8], 4294964960  ;;  %vm61_vm0 = vcmask 257024   ;;  %v11933_v0 = vmov 0   ;;  %vm64_vm1 = vcmask 253952   ;;  %v11720_v2 = vld [vmem:[#allocation7 + $0x8] sm:$0xff] }
  0x10   :  { %66 = vst.msk [vmem:[#allocation2 + $0xd8] sm:$0xf] %vm61_vm0, %v11933_v0  ;;  %vm78_vm2 = vsmask.f32 256  ;;  %vm176_vm4 = vsmask.f32 7938  ;;  %11802 = vmatpush.bf16.msra.mxu2 %v11720_v2  ;;  %1613 = vmatpush.bf16.msra.mxu0 %v11720_v2 }
  0x11   :  { %67 = vst.msk [vmem:[#allocation2 + $0xdc] sm:$0xf] %vm61_vm0, %v11933_v0  ;;  %vm11975_vm3 = vmand %vm64_vm1, %vm78_vm2  ;;  %v11719_v3 = vld [vmem:[#allocation7] sm:$0xff]  ;;  %vm402_vm5 = vsmask.f32 4368  ;;  %vm1510_vm7 = vcmask 261120   ;;  %11801 = vmatpush.bf16.msra.mxu1 %v11720_v2  ;;  %11803 = vmatpush.bf16.msra.mxu3 %v11720_v2 }
  0x12   :  { %62 = vst.msk [vmem:[#allocation2] sm:$0xf] %vm61_vm0, %v11933_v0  ;;  %v101_v4 = vld [vmem:[#allocation2 + $0x60] sm:$0x1]  ;;  %vm11983_vm6 = vmand %vm64_vm1, %vm176_vm4  ;;  %v199_v6 = vld [vmem:[#allocation2 + $0x68] sm:$0x1] }
  0x13   :  { %63 = vst.msk [vmem:[#allocation2 + $0x4] sm:$0xf] %vm61_vm0, %v11933_v0  ;;  %v11724_v7 = vld [vmem:[#allocation7 + $0x28] sm:$0xff]  ;;  %v102_v8 = vsel %vm11975_vm3, 0, %v101_v4  ;;  %v200_v9 = vsel %vm11983_vm6, 0, %v199_v6  ;;  %v288_v10 = vld [vmem:[#allocation4 + $0x70] sm:$0xff]  ;;  %vm11999_vm8 = vmor %vm78_vm2, %vm402_vm5 }
  0x14   :  { %70 = vst.msk [vmem:[#allocation2 + $0xcc] sm:$0xf] %vm61_vm0, %v11933_v0  ;;  %v289_v11 = vld [vmem:[#allocation4 + $0x78] sm:$0xff]  ;;  %v352_v12 = vpack.c.bf16 %v288_v10, %v288_v10  ;;  %v149_v14 = vld [vmem:[#allocation2 + $0x138] sm:$0x1]  ;;  %v320_v19 = vld [vmem:[#allocation4 + $0x170] sm:$0xff]  ;;  %11805 = vmatpush.bf16.msra.mxu2 %v11719_v3  ;;  %1614 = vmatpush.bf16.msra.mxu0 %v11719_v3 }
  0x15   :  { %71 = vst.msk [vmem:[#allocation2 + $0xd0] sm:$0xf] %vm61_vm0, %v11933_v0  ;;  %v353_v13 = vpack.c.bf16 %v289_v11, %v289_v11  ;;  %v247_v15 = vld [vmem:[#allocation2 + $0x140] sm:$0x1]  ;;  %v150_v18 = vsel %vm11975_vm3, 0, %v149_v14  ;;  %v321_v25 = vld [vmem:[#allocation4 + $0x178] sm:$0xff]  ;;  %v384_v26 = vpack.c.bf16 %v320_v19, %v320_v19  ;;  %11804 = vmatpush.bf16.msra.mxu1 %v11719_v3  ;;  %11806 = vmatpush.bf16.msra.mxu3 %v11719_v3  ;;  %vm12006_vm9 = vmand %vm61_vm0, %vm176_vm4 }
  0x16   :  { %73 = vst.msk [vmem:[#allocation2 + $0x1a4] sm:$0xf] %vm61_vm0, %v11933_v0  ;;  %v524_v20 = vshrl.u32 %v352_v12, 16  ;;  %v527_v21 = vshll.u32 %v352_v12, 16  ;;  %v248_v24 = vsel %vm11983_vm6, 0, %v247_v15  ;;  %v11758_v27 = vld [vmem:[#allocation7 + $0x38] sm:$0xff]  ;;  %v385_v32 = vpack.c.bf16 %v321_v25, %v321_v25 }
  0x17   :  { %74 = vst.msk [vmem:[#allocation2 + $0x1a8] sm:$0xf] %vm61_vm0, %v11933_v0  ;;  %v532_v22 = vshrl.u32 %v353_v13, 16  ;;  %v535_v23 = vshll.u32 %v353_v13, 16  ;;  %v11722_v28 = vld [vmem:[#allocation7 + $0x18] sm:$0xff]  ;;  %v796_v35 = vshrl.u32 %v384_v26, 16 }
  0x18   :  { %103 = vst [vmem:[#allocation2 + $0x60] sm:$0x1] %v102_v8  ;;  %v11703_v16 = vld [vmem:[#allocation2 + $0xd8] sm:$0xff]  ;;  %v526_v30 = vrot.slane %v524_v20, 7  ;;  %v128_v33 = vld [vmem:[#allocation2 + $0xe4] sm:$0x1]  ;;  %3911 = vmatpush.bf16.msrb.mxu2 %v11724_v7 }
  0x19   :  { %201 = vst [vmem:[#allocation2 + $0x68] sm:$0x1] %v200_v9  ;;  %v534_v31 = vrot.slane %v532_v22, 7  ;;  %v799_v36 = vshll.u32 %v384_v26, 16  ;;  %4609 = vmatpush.bf16.msrb.mxu3 %v11758_v27  ;;  %v129_v37 = vsel %vm11975_vm3, 0, %v128_v33  ;;  %v306_v38 = vld [vmem:[#allocation4 + $0x100] sm:$0xff]  ;;  %10999 = vmatmul.msk.bf16.vlgmr.msra.gmra.mxu2 %vm1510_vm7, %v11703_v16 }
  0x1a   :  { %v11687_v17 = vld [vmem:[#allocation2] sm:$0xff]  ;;  %65 = vst.msk [vmem:[#allocation2 + $0x8] sm:$0x1] %vm64_vm1, %v11933_v0  ;;  %v529_v39 = vor.u32 %v527_v21, %v526_v30  ;;  %v530_v40 = vrot.slane %v526_v30, 4  ;;  %v226_v43 = vld [vmem:[#allocation2 + $0xec] sm:$0x1]  ;;  %2922 = vmatpush.bf16.msrb.mxu1 %v11722_v28  ;;  %v370_v47 = vpack.c.bf16 %v306_v38, %v306_v38 }
  0x1b   :  { %68 = vst.msk [vmem:[#allocation2 + $0xe0] sm:$0x1] %vm64_vm1, %v11933_v0  ;;  %10983 = vmatmul.msk.bf16.vlgmr.msra.gmra.mxu0 %vm1510_vm7, %v11687_v17  ;;  %v537_v41 = vor.u32 %v535_v23, %v534_v31  ;;  %v539_v42 = vrot.slane %v534_v31, 4  ;;  %v798_v45 = vrot.slane %v796_v35, 7  ;;  %v804_v46 = vshrl.u32 %v385_v32, 16  ;;  %v307_v56 = vld [vmem:[#allocation4 + $0x108] sm:$0xff] }
  0x1c   :  { %72 = vst.msk [vmem:[#allocation2 + $0xd4] sm:$0x1] %vm64_vm1, %v11933_v0  ;;  %v807_v51 = vshll.u32 %v385_v32, 16  ;;  %v227_v52 = vsel %vm11983_vm6, 0, %v226_v43  ;;  %v11760_v57 = vld [vmem:[#allocation7 + $0x48] sm:$0xff]  ;;  %v371_v59 = vpack.c.bf16 %v307_v56, %v307_v56  ;;  %v677_v60 = vshrl.u32 %v370_v47, 16 }
  0x1d   :  { %75 = vst.msk [vmem:[#allocation2 + $0x1ac] sm:$0x1] %vm64_vm1, %v11933_v0  ;;  %v538_v48 = vsel %vm11999_vm8, %v530_v40, %v537_v41  ;;  %v802_v54 = vrot.slane %v798_v45, 4  ;;  %v806_v55 = vrot.slane %v804_v46, 7  ;;  %v801_v58 = vor.u32 %v799_v36, %v798_v45  ;;  %v80_v62 = vld [vmem:[#allocation2 + $0xc] sm:$0x1]  ;;  %6043 = vmatpush.bf16.msrb.mxu0 %v11760_v57 }
  0x1e   :  { %151 = vst [vmem:[#allocation2 + $0x138] sm:$0x1] %v150_v18  ;;  %v680_v61 = vshll.u32 %v370_v47, 16  ;;  %v81_v2 = vsel %vm11975_vm3, 0, %v80_v62  ;;  %v178_v3 = vld [vmem:[#allocation2 + $0x14] sm:$0x1] }
  0x1f   :  { %v1095_v44 = vld [vmem:[#allocation2 + $0x60] sm:$0xf]  ;;  %249 = vst [vmem:[#allocation2 + $0x140] sm:$0x1] %v248_v24  ;;  %v809_v63 = vor.u32 %v807_v51, %v806_v55  ;;  %v811_v0 = vrot.slane %v806_v55, 4  ;;  %v679_v4 = vrot.slane %v677_v60, 7 }
  0x20   :  { %v1096_v49 = vsel %vm12006_vm9, %v529_v39, %v1095_v44  ;;  %v1099_v50 = vld [vmem:[#allocation2 + $0x68] sm:$0x1]  ;;  %130 = vst [vmem:[#allocation2 + $0xe4] sm:$0x1] %v129_v37  ;;  %v685_v6 = vshrl.u32 %v371_v59, 16  ;;  %v688_v7 = vshll.u32 %v371_v59, 16 }
  0x21   :  { %1097 = vst [vmem:[#allocation2 + $0x60] sm:$0xf] %v1096_v49  ;;  %v1100_v53 = vsel %vm11975_vm3, %v539_v42, %v1099_v50  ;;  %v179_v8 = vsel %vm11983_vm6, 0, %v178_v3  ;;  %v810_v9 = vsel %vm11999_vm8, %v802_v54, %v809_v63  ;;  %v274_v11 = vld [vmem:[#allocation4] sm:$0xff]  ;;  %v275_v12 = vld [vmem:[#allocation4 + $0x8] sm:$0xff]  ;;  %v682_v15 = vor.u32 %v680_v61, %v679_v4  ;;  %s11934_s2 = smov [#allocation10]  }
  0x22   :  { %1098 = vst.msk [vmem:[#allocation2 + $0x64] sm:$0xf] %vm61_vm0, %v538_v48  ;;  %v683_v16 = vrot.slane %v679_v4, 4  ;;  %v687_v17 = vrot.slane %v685_v6, 7  ;;  %v338_v20 = vpack.c.bf16 %v274_v11, %v274_v11  ;;  %v339_v21 = vpack.c.bf16 %v275_v12, %v275_v12  ;;  %v104_v22 = vld [vmem:[#allocation2 + $0x6c] sm:$0x1] }
  0x23   :  { %1101 = vst [vmem:[#allocation2 + $0x68] sm:$0x1] %v1100_v53  ;;  %v105_v26 = vsel %vm11975_vm3, 0, %v104_v22  ;;  %v202_v27 = vld [vmem:[#allocation2 + $0x74] sm:$0x1]  ;;  %v291_v38 = vld [vmem:[#allocation4 + $0x88] sm:$0xff] }
  0x24   :  { %228 = vst [vmem:[#allocation2 + $0xec] sm:$0x1] %v227_v52  ;;  %v690_v23 = vor.u32 %v688_v7, %v687_v17  ;;  %v692_v24 = vrot.slane %v687_v17, 4  ;;  %v405_v30 = vshrl.u32 %v338_v20, 16  ;;  %v408_v31 = vshll.u32 %v338_v20, 16  ;;  %v290_v37 = vld [vmem:[#allocation4 + $0x80] sm:$0xff] }
  0x25   :  { %v1207_v10 = vld [vmem:[#allocation2 + $0x138] sm:$0xf]  ;;  %82 = vst [vmem:[#allocation2 + $0xc] sm:$0x1] %v81_v2  ;;  %v413_v32 = vshrl.u32 %v339_v21, 16  ;;  %v416_v35 = vshll.u32 %v339_v21, 16  ;;  %v354_v42 = vpack.c.bf16 %v290_v37, %v290_v37  ;;  %v355_v43 = vpack.c.bf16 %v291_v38, %v291_v38 }
  0x26   :  { %v1208_v13 = vsel %vm12006_vm9, %v801_v58, %v1207_v10  ;;  %1210 = vst.msk [vmem:[#allocation2 + $0x13c] sm:$0xf] %vm61_vm0, %v810_v9  ;;  %v1211_v14 = vld [vmem:[#allocation2 + $0x140] sm:$0x1]  ;;  %v691_v33 = vsel %vm11999_vm8, %v683_v16, %v690_v23  ;;  %v203_v36 = vsel %vm11983_vm6, 0, %v202_v27  ;;  %v407_v40 = vrot.slane %v405_v30, 7 }
  0x27   :  { %1209 = vst [vmem:[#allocation2 + $0x138] sm:$0xf] %v1208_v13  ;;  %v1212_v18 = vsel %vm11975_vm3, %v811_v0, %v1211_v14  ;;  %v1158_v19 = vld [vmem:[#allocation2 + $0xe4] sm:$0xf]  ;;  %v415_v41 = vrot.slane %v413_v32, 7  ;;  %v541_v53 = vshrl.u32 %v354_v42, 16 }
  0x28   :  { %1213 = vst [vmem:[#allocation2 + $0x140] sm:$0x1] %v1212_v18  ;;  %v1159_v25 = vsel %vm12006_vm9, %v682_v15, %v1158_v19  ;;  %v152_v46 = vld [vmem:[#allocation2 + $0x144] sm:$0x1]  ;;  %v410_v47 = vor.u32 %v408_v31, %v407_v40  ;;  %v411_v48 = vrot.slane %v407_v40, 4  ;;  %v544_v54 = vshll.u32 %v354_v42, 16 }
  0x29   :  { %v11695_v28 = vld [vmem:[#allocation2 + $0x60] sm:$0xff]  ;;  %1160 = vst [vmem:[#allocation2 + $0xe4] sm:$0xf] %v1159_v25  ;;  %v418_v49 = vor.u32 %v416_v35, %v415_v41  ;;  %v420_v50 = vrot.slane %v415_v41, 4  ;;  %v250_v51 = vld [vmem:[#allocation2 + $0x14c] sm:$0x1] }
  0x2a   :  { %180 = vst [vmem:[#allocation2 + $0x14] sm:$0x1] %v179_v8  ;;  %10991 = vmatmul.msk.bf16.vlgmr.msra.gmra.mxu1 %vm1510_vm7, %v11695_v28  ;;  %v549_v55 = vshrl.u32 %v355_v43, 16  ;;  %v552_v58 = vshll.u32 %v355_v43, 16  ;;  %v153_v59 = vsel %vm11975_vm3, 0, %v152_v46  ;;  %v322_v60 = vld [vmem:[#allocation4 + $0x180] sm:$0xff] }
  0x2b   :  { %1161 = vst.msk [vmem:[#allocation2 + $0xe8] sm:$0xf] %vm61_vm0, %v691_v33  ;;  %v1162_v39 = vld [vmem:[#allocation2 + $0xec] sm:$0x1]  ;;  %v419_v56 = vsel %vm11999_vm8, %v411_v48, %v418_v49  ;;  %v323_v61 = vld [vmem:[#allocation4 + $0x188] sm:$0xff]  ;;  %v543_v63 = vrot.slane %v541_v53, 7  ;;  %v386_v3 = vpack.c.bf16 %v322_v60, %v322_v60 }
  0x2c   :  { %v1163_v44 = vsel %vm11975_vm3, %v692_v24, %v1162_v39  ;;  %v1046_v45 = vld [vmem:[#allocation2 + $0xc] sm:$0xf]  ;;  %106 = vst [vmem:[#allocation2 + $0x6c] sm:$0x1] %v105_v26  ;;  %v131_v62 = vld [vmem:[#allocation2 + $0xf0] sm:$0x1]  ;;  %v387_v7 = vpack.c.bf16 %v323_v61, %v323_v61 }
  0x2d   :  { %1164 = vst [vmem:[#allocation2 + $0xec] sm:$0x1] %v1163_v44  ;;  %v1047_v57 = vsel %vm12006_vm9, %v410_v47, %v1046_v45  ;;  %v551_v0 = vrot.slane %v549_v55, 7  ;;  %v251_v2 = vsel %vm11983_vm6, 0, %v250_v51  ;;  %v308_v4 = vld [vmem:[#allocation4 + $0x110] sm:$0xff]  ;;  %v132_v8 = vsel %vm11975_vm3, 0, %v131_v62 }
  0x2e   :  { %v11711_v52 = vld [vmem:[#allocation2 + $0x138] sm:$0xff]  ;;  %204 = vst [vmem:[#allocation2 + $0x74] sm:$0x1] %v203_v36  ;;  %v309_v9 = vld [vmem:[#allocation4 + $0x118] sm:$0xff]  ;;  %v372_v10 = vpack.c.bf16 %v308_v4, %v308_v4  ;;  %v546_v13 = vor.u32 %v544_v54, %v543_v63  ;;  %v547_v14 = vrot.slane %v543_v63, 4  ;;  %v813_v19 = vshrl.u32 %v386_v3, 16 }
  0x2f   :  { %11007 = vmatmul.msk.bf16.vlgmr.msra.gmra.mxu3 %vm1510_vm7, %v11711_v52  ;;  %1048 = vst [vmem:[#allocation2 + $0xc] sm:$0xf] %v1047_v57  ;;  %v554_v15 = vor.u32 %v552_v58, %v551_v0  ;;  %v229_v16 = vld [vmem:[#allocation2 + $0xf8] sm:$0x1]  ;;  %v556_v17 = vrot.slane %v551_v0, 4  ;;  %v373_v20 = vpack.c.bf16 %v309_v9, %v309_v9  ;;  %v816_v23 = vshll.u32 %v386_v3, 16 }
  0x30   :  { %1049 = vst.msk [vmem:[#allocation2 + $0x10] sm:$0xf] %vm61_vm0, %v419_v56  ;;  %v821_v24 = vshrl.u32 %v387_v7, 16  ;;  %v83_v25 = vld [vmem:[#allocation2 + $0x18] sm:$0x1]  ;;  %v815_v27 = vrot.slane %v813_v19, 7 }
  0x31   :  { %v1050_v6 = vld [vmem:[#allocation2 + $0x14] sm:$0x1]  ;;  %154 = vst [vmem:[#allocation2 + $0x144] sm:$0x1] %v153_v59  ;;  %v555_v21 = vsel %vm11999_vm8, %v547_v14, %v554_v15  ;;  %v824_v28 = vshll.u32 %v387_v7, 16  ;;  %v230_v32 = vsel %vm11983_vm6, 0, %v229_v16 }
  0x32   :  { %v11704_v11 = vld [vmem:[#allocation2 + $0xe4] sm:$0xff]  ;;  %v1051_v12 = vsel %vm11975_vm3, %v420_v50, %v1050_v6  ;;  %252 = vst [vmem:[#allocation2 + $0x14c] sm:$0x1] %v251_v2  ;;  %v823_v31 = vrot.slane %v821_v24, 7  ;;  %v694_v33 = vshrl.u32 %v372_v10, 16  ;;  %v818_v36 = vor.u32 %v816_v23, %v815_v27  ;;  %s10831_s29 = sshll.u32 %s11934_s2, 4  ;;  %s10832_s29 = int_to_ptr.vmem [resolvable:$true] %s10831_s29 }
  0x33   :  { %1052 = vst [vmem:[#allocation2 + $0x14] sm:$0x1] %v1051_v12  ;;  %v1102_v18 = vld [vmem:[#allocation2 + $0x6c] sm:$0xf]  ;;  %11000 = vmatmul.msk.bf16.gmra.mxu2 %vm1510_vm7, %v11704_v11  ;;  %v276_v35 = vld [vmem:[#allocation4 + $0x10] sm:$0xff]  ;;  %v819_v37 = vrot.slane %v815_v27, 4 }
  0x34   :  { %v1103_v22 = vsel %vm12006_vm9, %v546_v13, %v1102_v18  ;;  %1105 = vst.msk [vmem:[#allocation2 + $0x70] sm:$0xf] %vm61_vm0, %v555_v21  ;;  %v697_v38 = vshll.u32 %v372_v10, 16  ;;  %v702_v39 = vshrl.u32 %v373_v20, 16  ;;  %v277_v40 = vld [vmem:[#allocation4 + $0x18] sm:$0xff]  ;;  %v826_v42 = vor.u32 %v824_v28, %v823_v31  ;;  %v292_v56 = vld [vmem:[#allocation4 + $0x90] sm:$0xff] }
  0x35   :  { %1104 = vst [vmem:[#allocation2 + $0x6c] sm:$0xf] %v1103_v22  ;;  %v1106_v26 = vld [vmem:[#allocation2 + $0x74] sm:$0x1]  ;;  %v828_v43 = vrot.slane %v823_v31, 4  ;;  %v696_v44 = vrot.slane %v694_v33, 7  ;;  %v340_v49 = vpack.c.bf16 %v276_v35, %v276_v35  ;;  %v341_v50 = vpack.c.bf16 %v277_v40, %v277_v40 }
  0x36   :  { %v1107_v30 = vsel %vm11975_vm3, %v556_v17, %v1106_v26  ;;  %133 = vst [vmem:[#allocation2 + $0xf0] sm:$0x1] %v132_v8  ;;  %v705_v45 = vshll.u32 %v373_v20, 16  ;;  %v704_v47 = vrot.slane %v702_v39, 7  ;;  %v84_v48 = vsel %vm11975_vm3, 0, %v83_v25  ;;  %v293_v3 = vld [vmem:[#allocation4 + $0x98] sm:$0xff] }
  0x37   :  { %1108 = vst [vmem:[#allocation2 + $0x74] sm:$0x1] %v1107_v30  ;;  %v11688_v41 = vld [vmem:[#allocation2 + $0xc] sm:$0xff]  ;;  %v827_v51 = vsel %vm11999_vm8, %v819_v37, %v826_v42  ;;  %v699_v53 = vor.u32 %v697_v38, %v696_v44  ;;  %v700_v54 = vrot.slane %v696_v44, 4  ;;  %v107_v55 = vld [vmem:[#allocation2 + $0x78] sm:$0x1]  ;;  %v356_v61 = vpack.c.bf16 %v292_v56, %v292_v56 }
  0x38   :  { %v1214_v46 = vld [vmem:[#allocation2 + $0x144] sm:$0xf]  ;;  %231 = vst [vmem:[#allocation2 + $0xf8] sm:$0x1] %v230_v32  ;;  %10984 = vmatmul.msk.bf16.gmra.mxu0 %vm1510_vm7, %v11688_v41  ;;  %v707_v58 = vor.u32 %v705_v45, %v704_v47  ;;  %v709_v59 = vrot.slane %v704_v47, 4  ;;  %v422_v60 = vshrl.u32 %v340_v49, 16  ;;  %v357_v9 = vpack.c.bf16 %v293_v3, %v293_v3 }
  0x39   :  { %v1215_v52 = vsel %vm12006_vm9, %v818_v36, %v1214_v46  ;;  %85 = vst [vmem:[#allocation2 + $0x18] sm:$0x1] %v84_v48  ;;  %v1218_v57 = vld [vmem:[#allocation2 + $0x14c] sm:$0x1]  ;;  %v425_v63 = vshll.u32 %v340_v49, 16  ;;  %v430_v0 = vshrl.u32 %v341_v50, 16 }
  0x3a   :  { %1216 = vst [vmem:[#allocation2 + $0x144] sm:$0xf] %v1215_v52  ;;  %v1219_v62 = vsel %vm11975_vm3, %v828_v43, %v1218_v57  ;;  %v433_v2 = vshll.u32 %v341_v50, 16  ;;  %v708_v6 = vsel %vm11999_vm8, %v700_v54, %v707_v58  ;;  %v424_v7 = vrot.slane %v422_v60, 7  ;;  %v324_v10 = vld [vmem:[#allocation4 + $0x190] sm:$0xff]  ;;  %v325_v38 = vld [vmem:[#allocation4 + $0x198] sm:$0xff] }
  0x3b   :  { %1217 = vst.msk [vmem:[#allocation2 + $0x148] sm:$0xf] %vm61_vm0, %v827_v51  ;;  %v108_v8 = vsel %vm11975_vm3, 0, %v107_v55  ;;  %v12086_v11 = vrot.slane %v430_v0, 7  ;;  %v205_v12 = vld [vmem:[#allocation2 + $0x80] sm:$0x1]  ;;  %v388_v22 = vpack.c.bf16 %v324_v10, %v324_v10  ;;  %v389_v40 = vpack.c.bf16 %v325_v38, %v325_v38 }
  0x3c   :  { %v11696_v4 = vld [vmem:[#allocation2 + $0x6c] sm:$0xff]  ;;  %1220 = vst [vmem:[#allocation2 + $0x14c] sm:$0x1] %v1219_v62  ;;  %v558_v13 = vshrl.u32 %v356_v61, 16  ;;  %v427_v15 = vor.u32 %v425_v63, %v424_v7  ;;  %v428_v16 = vrot.slane %v424_v7, 4  ;;  %v206_v17 = vsel %vm11983_vm6, 0, %v205_v12 }
  0x3d   :  { %1168 = vst.msk [vmem:[#allocation2 + $0xf4] sm:$0xf] %vm61_vm0, %v708_v6  ;;  %10992 = vmatmul.msk.bf16.gmra.mxu1 %vm1510_vm7, %v11696_v4  ;;  %v1165_v14 = vld [vmem:[#allocation2 + $0xf0] sm:$0xf]  ;;  %v435_v20 = vor.u32 %v433_v2, %v12086_v11  ;;  %v561_v25 = vshll.u32 %v356_v61, 16  ;;  %v566_v26 = vshrl.u32 %v357_v9, 16 }
  0x3e   :  { %109 = vst [vmem:[#allocation2 + $0x78] sm:$0x1] %v108_v8  ;;  %v1166_v18 = vsel %vm12006_vm9, %v699_v53, %v1165_v14  ;;  %v560_v21 = vrot.slane %v558_v13, 7  ;;  %v569_v31 = vshll.u32 %v357_v9, 16  ;;  %v155_v32 = vld [vmem:[#allocation2 + $0x150] sm:$0x1] }
  0x3f   :  { %v1169_v19 = vld [vmem:[#allocation2 + $0xf8] sm:$0x1]  ;;  %207 = vst [vmem:[#allocation2 + $0x80] sm:$0x1] %v206_v17  ;;  %v436_v27 = vsel %vm11999_vm8, %v428_v16, %v435_v20  ;;  %v568_v36 = vrot.slane %v566_v26, 7  ;;  %v156_v37 = vsel %vm11975_vm3, 0, %v155_v32 }
  0x40   :  { %1167 = vst [vmem:[#allocation2 + $0xf0] sm:$0xf] %v1166_v18  ;;  %v1170_v23 = vsel %vm11975_vm3, %v709_v59, %v1169_v19  ;;  %v1053_v24 = vld [vmem:[#allocation2 + $0x18] sm:$0xf]  ;;  %v564_v30 = vrot.slane %v560_v21, 4  ;;  %v563_v35 = vor.u32 %v561_v25, %v560_v21  ;;  %v830_v41 = vshrl.u32 %v388_v22, 16 }
  0x41   :  { %1171 = vst [vmem:[#allocation2 + $0xf8] sm:$0x1] %v1170_v23  ;;  %v1054_v28 = vsel %vm12006_vm9, %v427_v15, %v1053_v24  ;;  %v253_v39 = vld [vmem:[#allocation2 + $0x158] sm:$0x1]  ;;  %v833_v42 = vshll.u32 %v388_v22, 16  ;;  %v571_v43 = vor.u32 %v569_v31, %v568_v36  ;;  %v573_v44 = vrot.slane %v568_v36, 4 }
  0x42   :  { %v11712_v33 = vld [vmem:[#allocation2 + $0x144] sm:$0xff]  ;;  %1055 = vst [vmem:[#allocation2 + $0x18] sm:$0xf] %v1054_v28  ;;  %v254_v45 = vsel %vm11983_vm6, 0, %v253_v39  ;;  %v134_v46 = vld [vmem:[#allocation2 + $0xfc] sm:$0x1] }
  0x43   :  { %1056 = vst.msk [vmem:[#allocation2 + $0x1c] sm:$0xf] %vm61_vm0, %v436_v27  ;;  %11008 = vmatmul.msk.bf16.gmra.mxu3 %vm1510_vm7, %v11712_v33  ;;  %v832_v48 = vrot.slane %v830_v41, 7  ;;  %v838_v49 = vshrl.u32 %v389_v40, 16  ;;  %v572_v50 = vsel %vm11999_vm8, %v564_v30, %v571_v43  ;;  %v841_v53 = vshll.u32 %v389_v40, 16  ;;  %v310_v60 = vld [vmem:[#allocation4 + $0x120] sm:$0xff] }
  0x44   :  { %157 = vst [vmem:[#allocation2 + $0x150] sm:$0x1] %v156_v37  ;;  %v135_v54 = vsel %vm11975_vm3, 0, %v134_v46  ;;  %v232_v55 = vld [vmem:[#allocation2 + $0x104] sm:$0x1]  ;;  %v311_v63 = vld [vmem:[#allocation4 + $0x128] sm:$0xff]  ;;  %v374_v0 = vpack.c.bf16 %v310_v60, %v310_v60 }
  0x45   :  { %v1109_v47 = vld [vmem:[#allocation2 + $0x78] sm:$0xf]  ;;  %255 = vst [vmem:[#allocation2 + $0x158] sm:$0x1] %v254_v45  ;;  %v836_v58 = vrot.slane %v832_v48, 4  ;;  %v840_v59 = vrot.slane %v838_v49, 7  ;;  %v835_v61 = vor.u32 %v833_v42, %v832_v48  ;;  %v375_v6 = vpack.c.bf16 %v311_v63, %v311_v63 }
  0x46   :  { %v1110_v51 = vsel %vm12006_vm9, %v563_v35, %v1109_v47  ;;  %v1113_v52 = vld [vmem:[#allocation2 + $0x80] sm:$0x1]  ;;  %1112 = vst.msk [vmem:[#allocation2 + $0x7c] sm:$0xf] %vm61_vm0, %v572_v50  ;;  %v233_v62 = vsel %vm11983_vm6, 0, %v232_v55  ;;  %v278_v8 = vld [vmem:[#allocation4 + $0x20] sm:$0xff] }
  0x47   :  { %v11705_v56 = vld [vmem:[#allocation2 + $0xf0] sm:$0xff]  ;;  %1111 = vst [vmem:[#allocation2 + $0x78] sm:$0xf] %v1110_v51  ;;  %v1114_v57 = vsel %vm11975_vm3, %v573_v44, %v1113_v52  ;;  %v86_v2 = vld [vmem:[#allocation2 + $0x24] sm:$0x1]  ;;  %v843_v3 = vor.u32 %v841_v53, %v840_v59  ;;  %v845_v4 = vrot.slane %v840_v59, 4  ;;  %v342_v14 = vpack.c.bf16 %v278_v8, %v278_v8 }
  0x48   :  { %11001 = vmatmul.msk.bf16.gmra.mxu2 %vm1510_vm7, %v11705_v56  ;;  %1115 = vst [vmem:[#allocation2 + $0x80] sm:$0x1] %v1114_v57  ;;  %v87_v7 = vsel %vm11975_vm3, 0, %v86_v2  ;;  %v279_v9 = vld [vmem:[#allocation4 + $0x28] sm:$0xff]  ;;  %v711_v12 = vshrl.u32 %v374_v0, 16  ;;  %v714_v13 = vshll.u32 %v374_v0, 16 }
  0x49   :  { %136 = vst [vmem:[#allocation2 + $0xfc] sm:$0x1] %v135_v54  ;;  %v343_v15 = vpack.c.bf16 %v279_v9, %v279_v9  ;;  %v294_v16 = vld [vmem:[#allocation4 + $0xa0] sm:$0xff]  ;;  %v844_v17 = vsel %vm11999_vm8, %v836_v58, %v843_v3  ;;  %v719_v19 = vshrl.u32 %v375_v6, 16  ;;  %v722_v20 = vshll.u32 %v375_v6, 16  ;;  %v295_v31 = vld [vmem:[#allocation4 + $0xa8] sm:$0xff] }
  0x4a   :  { %v11689_v10 = vld [vmem:[#allocation2 + $0x18] sm:$0xff]  ;;  %234 = vst [vmem:[#allocation2 + $0x104] sm:$0x1] %v233_v62  ;;  %v713_v23 = vrot.slane %v711_v12, 7  ;;  %v439_v24 = vshrl.u32 %v342_v14, 16  ;;  %v12126_v25 = vpack.c.bf16 %v294_v16, %v294_v16  ;;  %v442_v28 = vshll.u32 %v342_v14, 16 }
  0x4b   :  { %v1221_v18 = vld [vmem:[#allocation2 + $0x150] sm:$0xf]  ;;  %10985 = vmatmul.msk.bf16.gmra.mxu0 %vm1510_vm7, %v11689_v10  ;;  %1224 = vst.msk [vmem:[#allocation2 + $0x154] sm:$0xf] %vm61_vm0, %v844_v17  ;;  %v721_v27 = vrot.slane %v719_v19, 7  ;;  %v447_v30 = vshrl.u32 %v343_v15, 16  ;;  %v359_v42 = vpack.c.bf16 %v295_v31, %v295_v31 }
  0x4c   :  { %v1222_v21 = vsel %vm12006_vm9, %v835_v61, %v1221_v18  ;;  %v1225_v22 = vld [vmem:[#allocation2 + $0x158] sm:$0x1]  ;;  %v716_v32 = vor.u32 %v714_v13, %v713_v23  ;;  %v717_v33 = vrot.slane %v713_v23, 4  ;;  %v441_v35 = vrot.slane %v439_v24, 7  ;;  %v326_v37 = vld [vmem:[#allocation4 + $0x1a0] sm:$0xff]  ;;  %v312_v10 = vld [vmem:[#allocation4 + $0x130] sm:$0xff] }
  0x4d   :  { %1223 = vst [vmem:[#allocation2 + $0x150] sm:$0xf] %v1222_v21  ;;  %v1226_v26 = vsel %vm11975_vm3, %v845_v4, %v1225_v22  ;;  %v450_v36 = vshll.u32 %v343_v15, 16  ;;  %v724_v39 = vor.u32 %v722_v20, %v721_v27  ;;  %v726_v40 = vrot.slane %v721_v27, 4  ;;  %v327_v43 = vld [vmem:[#allocation4 + $0x1a8] sm:$0xff]  ;;  %v313_v24 = vld [vmem:[#allocation4 + $0x138] sm:$0xff] }
  0x4e   :  { %1227 = vst [vmem:[#allocation2 + $0x158] sm:$0x1] %v1226_v26  ;;  %v11697_v38 = vld [vmem:[#allocation2 + $0x78] sm:$0xff]  ;;  %v12130_v41 = vrot.slane %v447_v30, 7  ;;  %v444_v44 = vor.u32 %v442_v28, %v441_v35  ;;  %v445_v45 = vrot.slane %v441_v35, 4  ;;  %v575_v48 = vshrl.u32 %v12126_v25, 16 }
  0x4f   :  { %88 = vst [vmem:[#allocation2 + $0x24] sm:$0x1] %v87_v7  ;;  %v110_v46 = vld [vmem:[#allocation2 + $0x84] sm:$0x1]  ;;  %v208_v47 = vld [vmem:[#allocation2 + $0x8c] sm:$0x1]  ;;  %10993 = vmatmul.msk.bf16.gmra.mxu1 %vm1510_vm7, %v11697_v38  ;;  %v725_v49 = vsel %vm11999_vm8, %v717_v33, %v724_v39  ;;  %v12139_v54 = vpack.c.bf16 %v326_v37, %v326_v37  ;;  %v391_v59 = vpack.c.bf16 %v327_v43, %v327_v43 }
  0x50   :  { %v1172_v50 = vld [vmem:[#allocation2 + $0xfc] sm:$0xf]  ;;  %v452_v51 = vor.u32 %v450_v36, %v12130_v41  ;;  %v111_v52 = vsel %vm11975_vm3, 0, %v110_v46  ;;  %1175 = vst.msk [vmem:[#allocation2 + $0x100] sm:$0xf] %vm61_vm0, %v725_v49  ;;  %v209_v57 = vsel %vm11983_vm6, 0, %v208_v47  ;;  %v376_v15 = vpack.c.bf16 %v312_v10, %v312_v10 }
  0x51   :  { %v158_v53 = vld [vmem:[#allocation2 + $0x15c] sm:$0x1]  ;;  %v1173_v55 = vsel %vm12006_vm9, %v716_v32, %v1172_v50  ;;  %v1176_v56 = vld [vmem:[#allocation2 + $0x104] sm:$0x1]  ;;  %v577_v58 = vrot.slane %v575_v48, 7  ;;  %v578_v62 = vshll.u32 %v12126_v25, 16  ;;  %v377_v30 = vpack.c.bf16 %v313_v24, %v313_v24 }
  0x52   :  { %1174 = vst [vmem:[#allocation2 + $0xfc] sm:$0xf] %v1173_v55  ;;  %v1177_v60 = vsel %vm11975_vm3, %v726_v40, %v1176_v56  ;;  %v453_v61 = vsel %vm11999_vm8, %v445_v45, %v452_v51  ;;  %v583_v63 = vshrl.u32 %v359_v42, 16  ;;  %v256_v0 = vld [vmem:[#allocation2 + $0x164] sm:$0x1]  ;;  %v586_v4 = vshll.u32 %v359_v42, 16 }
  0x53   :  { %1178 = vst [vmem:[#allocation2 + $0x104] sm:$0x1] %v1177_v60  ;;  %v581_v3 = vrot.slane %v577_v58, 4  ;;  %v159_v6 = vsel %vm11975_vm3, 0, %v158_v53  ;;  %v257_v8 = vsel %vm11983_vm6, 0, %v256_v0  ;;  %v847_v9 = vshrl.u32 %v12139_v54, 16 }
  0x54   :  { %v11713_v2 = vld [vmem:[#allocation2 + $0x150] sm:$0xff]  ;;  %1063 = vst.msk [vmem:[#allocation2 + $0x28] sm:$0xf] %vm61_vm0, %v453_v61  ;;  %v585_v7 = vrot.slane %v583_v63, 7  ;;  %v850_v13 = vshll.u32 %v12139_v54, 16  ;;  %v855_v14 = vshrl.u32 %v391_v59, 16  ;;  %v580_v25 = vor.u32 %v578_v62, %v577_v58 }
  0x55   :  { %11009 = vmatmul.msk.bf16.gmra.mxu3 %vm1510_vm7, %v11713_v2  ;;  %112 = vst [vmem:[#allocation2 + $0x84] sm:$0x1] %v111_v52  ;;  %v849_v19 = vrot.slane %v847_v9, 7  ;;  %v137_v20 = vld [vmem:[#allocation2 + $0x108] sm:$0x1]  ;;  %v858_v22 = vshll.u32 %v391_v59, 16 }
  0x56   :  { %v1060_v12 = vld [vmem:[#allocation2 + $0x24] sm:$0xf]  ;;  %210 = vst [vmem:[#allocation2 + $0x8c] sm:$0x1] %v209_v57  ;;  %v588_v17 = vor.u32 %v586_v4, %v585_v7  ;;  %v590_v18 = vrot.slane %v585_v7, 4  ;;  %v12161_v21 = vrot.slane %v855_v14, 7 }
  0x57   :  { %v1061_v16 = vsel %vm12006_vm9, %v444_v44, %v1060_v12  ;;  %v138_v23 = vsel %vm11975_vm3, 0, %v137_v20  ;;  %160 = vst [vmem:[#allocation2 + $0x15c] sm:$0x1] %v159_v6  ;;  %v853_v27 = vrot.slane %v849_v19, 4  ;;  %v235_v28 = vld [vmem:[#allocation2 + $0x110] sm:$0x1]  ;;  %v852_v49 = vor.u32 %v850_v13, %v849_v19 }
  0x58   :  { %1062 = vst [vmem:[#allocation2 + $0x24] sm:$0xf] %v1061_v16  ;;  %v589_v26 = vsel %vm11999_vm8, %v581_v3, %v588_v17  ;;  %v11723_v31 = vld [vmem:[#allocation7 + $0x20] sm:$0xff]  ;;  %v860_v33 = vor.u32 %v858_v22, %v12161_v21  ;;  %v862_v35 = vrot.slane %v12161_v21, 4  ;;  %v236_v36 = vsel %vm11983_vm6, 0, %v235_v28  ;;  %v280_v42 = vld [vmem:[#allocation4 + $0x30] sm:$0xff] }
  0x59   :  { %v11706_v32 = vld [vmem:[#allocation2 + $0xfc] sm:$0xff]  ;;  %1119 = vst.msk [vmem:[#allocation2 + $0x88] sm:$0xf] %vm61_vm0, %v589_v26  ;;  %v728_v37 = vshrl.u32 %v376_v15, 16  ;;  %v731_v38 = vshll.u32 %v376_v15, 16  ;;  %v736_v39 = vshrl.u32 %v377_v30, 16  ;;  %3912 = vmatpush.bf16.msrb.mxu2 %v11723_v31  ;;  %v344_v47 = vpack.c.bf16 %v280_v42, %v280_v42 }
  0x5a   :  { %258 = vst [vmem:[#allocation2 + $0x164] sm:$0x1] %v257_v8  ;;  %v739_v40 = vshll.u32 %v377_v30, 16  ;;  %11002 = vmatmul.msk.bf16.gmra.mxu2 %vm1510_vm7, %v11706_v32  ;;  %v861_v43 = vsel %vm11999_vm8, %v853_v27, %v860_v33  ;;  %v89_v45 = vld [vmem:[#allocation2 + $0x30] sm:$0x1]  ;;  %v281_v46 = vld [vmem:[#allocation4 + $0x38] sm:$0xff] }
  0x5b   :  { %139 = vst [vmem:[#allocation2 + $0x108] sm:$0x1] %v138_v23  ;;  %v730_v44 = vrot.slane %v728_v37, 7  ;;  %v738_v50 = vrot.slane %v736_v39, 7  ;;  %v90_v51 = vsel %vm11975_vm3, 0, %v89_v45  ;;  %v345_v52 = vpack.c.bf16 %v281_v46, %v281_v46  ;;  %v296_v62 = vld [vmem:[#allocation4 + $0xb0] sm:$0xff] }
  0x5c   :  { %v1116_v48 = vld [vmem:[#allocation2 + $0x84] sm:$0xf]  ;;  %1231 = vst.msk [vmem:[#allocation2 + $0x160] sm:$0xf] %vm61_vm0, %v861_v43  ;;  %v456_v56 = vshrl.u32 %v344_v47, 16  ;;  %v459_v61 = vshll.u32 %v344_v47, 16  ;;  %v360_v4 = vpack.c.bf16 %v296_v62, %v296_v62 }
  0x5d   :  { %v1117_v53 = vsel %vm12006_vm9, %v580_v25, %v1116_v48  ;;  %v1120_v54 = vld [vmem:[#allocation2 + $0x8c] sm:$0x1]  ;;  %237 = vst [vmem:[#allocation2 + $0x110] sm:$0x1] %v236_v36  ;;  %v734_v55 = vrot.slane %v730_v44, 4  ;;  %v741_v59 = vor.u32 %v739_v40, %v738_v50  ;;  %v743_v60 = vrot.slane %v738_v50, 4 }
  0x5e   :  { %1118 = vst [vmem:[#allocation2 + $0x84] sm:$0xf] %v1117_v53  ;;  %v1121_v58 = vsel %vm11975_vm3, %v590_v18, %v1120_v54  ;;  %v1228_v63 = vld [vmem:[#allocation2 + $0x15c] sm:$0xf]  ;;  %v733_v0 = vor.u32 %v731_v38, %v730_v44  ;;  %v458_v2 = vrot.slane %v456_v56, 7  ;;  %v464_v3 = vshrl.u32 %v345_v52, 16 }
  0x5f   :  { %v11690_v57 = vld [vmem:[#allocation2 + $0x24] sm:$0xff]  ;;  %1122 = vst [vmem:[#allocation2 + $0x8c] sm:$0x1] %v1121_v58  ;;  %v1229_v6 = vsel %vm12006_vm9, %v852_v49, %v1228_v63  ;;  %v742_v7 = vsel %vm11999_vm8, %v734_v55, %v741_v59  ;;  %v467_v8 = vshll.u32 %v345_v52, 16  ;;  %v113_v9 = vld [vmem:[#allocation2 + $0x90] sm:$0x1] }
  0x60   :  { %10986 = vmatmul.msk.bf16.gmra.mxu0 %vm1510_vm7, %v11690_v57  ;;  %91 = vst [vmem:[#allocation2 + $0x30] sm:$0x1] %v90_v51  ;;  %v297_v10 = vld [vmem:[#allocation4 + $0xb8] sm:$0xff]  ;;  %v462_v13 = vrot.slane %v458_v2, 4  ;;  %v12187_v14 = vrot.slane %v464_v3, 7  ;;  %v114_v18 = vsel %vm11975_vm3, 0, %v113_v9  ;;  %v461_v25 = vor.u32 %v459_v61, %v458_v2 }
  0x61   :  { %1230 = vst [vmem:[#allocation2 + $0x15c] sm:$0xf] %v1229_v6  ;;  %v1232_v12 = vld [vmem:[#allocation2 + $0x164] sm:$0x1]  ;;  %v361_v15 = vpack.c.bf16 %v297_v10, %v297_v10  ;;  %v592_v19 = vshrl.u32 %v360_v4, 16  ;;  %v595_v23 = vshll.u32 %v360_v4, 16 }
  0x62   :  { %v1233_v16 = vsel %vm11975_vm3, %v862_v35, %v1232_v12  ;;  %v1179_v17 = vld [vmem:[#allocation2 + $0x108] sm:$0xf]  ;;  %1182 = vst.msk [vmem:[#allocation2 + $0x10c] sm:$0xf] %vm61_vm0, %v742_v7  ;;  %v469_v21 = vor.u32 %v467_v8, %v12187_v14  ;;  %v211_v22 = vld [vmem:[#allocation2 + $0x98] sm:$0x1] }
  0x63   :  { %1234 = vst [vmem:[#allocation2 + $0x164] sm:$0x1] %v1233_v16  ;;  %v1180_v20 = vsel %vm12006_vm9, %v733_v0, %v1179_v17  ;;  %v212_v26 = vsel %vm11983_vm6, 0, %v211_v22  ;;  %v594_v27 = vrot.slane %v592_v19, 7  ;;  %v600_v32 = vshrl.u32 %v361_v15, 16  ;;  %v328_v35 = vld [vmem:[#allocation4 + $0x1b0] sm:$0xff] }
  0x64   :  { %1181 = vst [vmem:[#allocation2 + $0x108] sm:$0xf] %v1180_v20  ;;  %v1183_v24 = vld [vmem:[#allocation2 + $0x110] sm:$0x1]  ;;  %v470_v31 = vsel %vm11999_vm8, %v462_v13, %v469_v21  ;;  %v603_v33 = vshll.u32 %v361_v15, 16  ;;  %v329_v38 = vld [vmem:[#allocation4 + $0x1b8] sm:$0xff]  ;;  %v392_v39 = vpack.c.bf16 %v328_v35, %v328_v35 }
  0x65   :  { %v11698_v28 = vld [vmem:[#allocation2 + $0x84] sm:$0xff]  ;;  %v1184_v30 = vsel %vm11975_vm3, %v743_v60, %v1183_v24  ;;  %115 = vst [vmem:[#allocation2 + $0x90] sm:$0x1] %v114_v18  ;;  %v598_v36 = vrot.slane %v594_v27, 4  ;;  %v602_v42 = vrot.slane %v600_v32, 7  ;;  %v393_v44 = vpack.c.bf16 %v329_v38, %v329_v38  ;;  %v314_v62 = vld [vmem:[#allocation4 + $0x140] sm:$0xff] }
  0x66   :  { %1185 = vst [vmem:[#allocation2 + $0x110] sm:$0x1] %v1184_v30  ;;  %v161_v37 = vld [vmem:[#allocation2 + $0x168] sm:$0x1]  ;;  %10994 = vmatmul.msk.bf16.gmra.mxu1 %vm1510_vm7, %v11698_v28  ;;  %v597_v47 = vor.u32 %v595_v23, %v594_v27  ;;  %v259_v48 = vld [vmem:[#allocation2 + $0x170] sm:$0x1]  ;;  %v378_v3 = vpack.c.bf16 %v314_v62, %v314_v62 }
  0x67   :  { %v1067_v40 = vld [vmem:[#allocation2 + $0x30] sm:$0xf]  ;;  %1070 = vst.msk [vmem:[#allocation2 + $0x34] sm:$0xf] %vm61_vm0, %v470_v31  ;;  %v162_v43 = vsel %vm11975_vm3, 0, %v161_v37  ;;  %v864_v49 = vshrl.u32 %v392_v39, 16  ;;  %v605_v50 = vor.u32 %v603_v33, %v602_v42 }
  0x68   :  { %v11714_v45 = vld [vmem:[#allocation2 + $0x15c] sm:$0xff]  ;;  %v1068_v46 = vsel %vm12006_vm9, %v461_v25, %v1067_v40  ;;  %213 = vst [vmem:[#allocation2 + $0x98] sm:$0x1] %v212_v26  ;;  %v607_v51 = vrot.slane %v602_v42, 4  ;;  %v260_v52 = vsel %vm11983_vm6, 0, %v259_v48  ;;  %v867_v53 = vshll.u32 %v392_v39, 16 }
  0x69   :  { %1069 = vst [vmem:[#allocation2 + $0x30] sm:$0xf] %v1068_v46  ;;  %v11757_v54 = vld [vmem:[#allocation7 + $0x30] sm:$0xff]  ;;  %11010 = vmatmul.msk.bf16.gmra.mxu3 %vm1510_vm7, %v11714_v45  ;;  %v866_v55 = vrot.slane %v864_v49, 7  ;;  %v872_v56 = vshrl.u32 %v393_v44, 16  ;;  %v875_v57 = vshll.u32 %v393_v44, 16  ;;  %v606_v60 = vsel %vm11999_vm8, %v598_v36, %v605_v50 }
  0x6a   :  { %163 = vst [vmem:[#allocation2 + $0x168] sm:$0x1] %v162_v43  ;;  %v11721_v58 = vld [vmem:[#allocation7 + $0x10] sm:$0xff]  ;;  %4610 = vmatpush.bf16.msrb.mxu3 %v11757_v54  ;;  %v140_v61 = vld [vmem:[#allocation2 + $0x114] sm:$0x1]  ;;  %v315_v9 = vld [vmem:[#allocation4 + $0x148] sm:$0xff] }
  0x6b   :  { %v11707_v59 = vld [vmem:[#allocation2 + $0x108] sm:$0xff]  ;;  %261 = vst [vmem:[#allocation2 + $0x170] sm:$0x1] %v260_v52  ;;  %v870_v0 = vrot.slane %v866_v55, 4  ;;  %v874_v2 = vrot.slane %v872_v56, 7  ;;  %2923 = vmatpush.bf16.msrb.mxu1 %v11721_v58  ;;  %v869_v6 = vor.u32 %v867_v53, %v866_v55  ;;  %v141_v7 = vsel %vm11975_vm3, 0, %v140_v61 }
  0x6c   :  { %v1123_v63 = vld [vmem:[#allocation2 + $0x90] sm:$0xf]  ;;  %1126 = vst.msk [vmem:[#allocation2 + $0x94] sm:$0xf] %vm61_vm0, %v606_v60  ;;  %11003 = vmatmul.msk.bf16.gmra.mxu2 %vm1510_vm7, %v11707_v59  ;;  %v238_v8 = vld [vmem:[#allocation2 + $0x11c] sm:$0x1]  ;;  %v379_v16 = vpack.c.bf16 %v315_v9, %v315_v9 }
  0x6d   :  { %v1124_v4 = vsel %vm12006_vm9, %v597_v47, %v1123_v63  ;;  %v11759_v10 = vld [vmem:[#allocation7 + $0x40] sm:$0xff]  ;;  %v877_v12 = vor.u32 %v875_v57, %v874_v2  ;;  %v879_v13 = vrot.slane %v874_v2, 4  ;;  %v239_v15 = vsel %vm11983_vm6, 0, %v238_v8  ;;  %v92_v17 = vld [vmem:[#allocation2 + $0x3c] sm:$0x1]  ;;  %s10833_s5 = sshll.u32 %s14501_s3, 4  ;;  %s10834_s5 = int_to_ptr.hbm [resolvable:$true] %s10833_s5 }
  0x6e   :  { %1125 = vst [vmem:[#allocation2 + $0x90] sm:$0xf] %v1124_v4  ;;  %v745_v19 = vshrl.u32 %v378_v3, 16  ;;  %v748_v20 = vshll.u32 %v378_v3, 16  ;;  %6044 = vmatpush.bf16.msrb.mxu0 %v11759_v10  ;;  %v753_v24 = vshrl.u32 %v379_v16, 16  ;;  %v756_v25 = vshll.u32 %v379_v16, 16 }
  0x6f   :  { %v1127_v18 = vld [vmem:[#allocation2 + $0x98] sm:$0x1]  ;;  %142 = vst [vmem:[#allocation2 + $0x114] sm:$0x1] %v141_v7  ;;  %v878_v23 = vsel %vm11999_vm8, %v870_v0, %v877_v12  ;;  %v282_v26 = vld [vmem:[#allocation4 + $0x40] sm:$0xff]  ;;  %v93_v30 = vsel %vm11975_vm3, 0, %v92_v17 }
  0x70   :  { %v11691_v21 = vld [vmem:[#allocation2 + $0x30] sm:$0xff]  ;;  %v1128_v22 = vsel %vm11975_vm3, %v607_v51, %v1127_v18  ;;  %240 = vst [vmem:[#allocation2 + $0x11c] sm:$0x1] %v239_v15  ;;  %v747_v28 = vrot.slane %v745_v19, 7  ;;  %v346_v31 = vpack.c.bf16 %v282_v26, %v282_v26  ;;  %v755_v35 = vrot.slane %v753_v24, 7  ;;  %v283_v36 = vld [vmem:[#allocation4 + $0x48] sm:$0xff] }
  0x71   :  { %1129 = vst [vmem:[#allocation2 + $0x98] sm:$0x1] %v1128_v22  ;;  %v1235_v27 = vld [vmem:[#allocation2 + $0x168] sm:$0xf]  ;;  %10987 = vmatmul.msk.bf16.gmra.mxu0 %vm1510_vm7, %v11691_v21  ;;  %v190_v40 = vld [vmem:[#allocation2 + $0x44] sm:$0x1]  ;;  %v347_v42 = vpack.c.bf16 %v283_v36, %v283_v36 }
  0x72   :  { %v1236_v32 = vsel %vm12006_vm9, %v869_v6, %v1235_v27  ;;  %1238 = vst.msk [vmem:[#allocation2 + $0x16c] sm:$0xf] %vm61_vm0, %v878_v23  ;;  %v1239_v33 = vld [vmem:[#allocation2 + $0x170] sm:$0x1]  ;;  %v750_v38 = vor.u32 %v748_v20, %v747_v28  ;;  %v751_v39 = vrot.slane %v747_v28, 4  ;;  %v758_v44 = vor.u32 %v756_v25, %v755_v35  ;;  %v299_v48 = vld [vmem:[#allocation4 + $0xc8] sm:$0xff] }
  0x73   :  { %1237 = vst [vmem:[#allocation2 + $0x168] sm:$0xf] %v1236_v32  ;;  %v1240_v37 = vsel %vm11975_vm3, %v879_v13, %v1239_v33  ;;  %v298_v43 = vld [vmem:[#allocation4 + $0xc0] sm:$0xff]  ;;  %v760_v45 = vrot.slane %v755_v35, 4  ;;  %v191_v46 = vsel %vm11983_vm6, 0, %v190_v40  ;;  %v473_v47 = vshrl.u32 %v346_v31, 16 }
  0x74   :  { %1241 = vst [vmem:[#allocation2 + $0x170] sm:$0x1] %v1240_v37  ;;  %v476_v50 = vshll.u32 %v346_v31, 16  ;;  %v481_v51 = vshrl.u32 %v347_v42, 16  ;;  %v484_v52 = vshll.u32 %v347_v42, 16  ;;  %v362_v53 = vpack.c.bf16 %v298_v43, %v298_v43  ;;  %v330_v58 = vld [vmem:[#allocation4 + $0x1c0] sm:$0xff] }
  0x75   :  { %v11699_v49 = vld [vmem:[#allocation2 + $0x90] sm:$0xff]  ;;  %94 = vst [vmem:[#allocation2 + $0x3c] sm:$0x1] %v93_v30  ;;  %v759_v54 = vsel %vm11999_vm8, %v751_v39, %v758_v44  ;;  %v475_v56 = vrot.slane %v473_v47, 7  ;;  %v363_v57 = vpack.c.bf16 %v299_v48, %v299_v48  ;;  %v116_v2 = vld [vmem:[#allocation2 + $0x9c] sm:$0x1]  ;;  %v12244_v4 = vpack.c.bf16 %v330_v58, %v330_v58 }
  0x76   :  { %v1186_v55 = vld [vmem:[#allocation2 + $0x114] sm:$0xf]  ;;  %192 = vst [vmem:[#allocation2 + $0x44] sm:$0x1] %v191_v46  ;;  %10995 = vmatmul.msk.bf16.gmra.mxu1 %vm1510_vm7, %v11699_v49  ;;  %v483_v61 = vrot.slane %v481_v51, 7  ;;  %v609_v62 = vshrl.u32 %v362_v53, 16 }
  0x77   :  { %v1187_v59 = vsel %vm12006_vm9, %v750_v38, %v1186_v55  ;;  %1189 = vst.msk [vmem:[#allocation2 + $0x118] sm:$0xf] %vm61_vm0, %v759_v54  ;;  %v1190_v60 = vld [vmem:[#allocation2 + $0x11c] sm:$0x1]  ;;  %v479_v0 = vrot.slane %v475_v56, 4  ;;  %v612_v3 = vshll.u32 %v362_v53, 16  ;;  %v478_v6 = vor.u32 %v476_v50, %v475_v56 }
  0x78   :  { %1188 = vst [vmem:[#allocation2 + $0x114] sm:$0xf] %v1187_v59  ;;  %v1191_v63 = vsel %vm11975_vm3, %v760_v45, %v1190_v60  ;;  %v486_v7 = vor.u32 %v484_v52, %v483_v61  ;;  %v488_v8 = vrot.slane %v483_v61, 4  ;;  %v117_v9 = vsel %vm11975_vm3, 0, %v116_v2  ;;  %v214_v10 = vld [vmem:[#allocation2 + $0xa4] sm:$0x1] }
  0x79   :  { %1192 = vst [vmem:[#allocation2 + $0x11c] sm:$0x1] %v1191_v63  ;;  %v215_v13 = vsel %vm11983_vm6, 0, %v214_v10  ;;  %v611_v15 = vrot.slane %v609_v62, 7  ;;  %v617_v16 = vshrl.u32 %v363_v57, 16  ;;  %v620_v18 = vshll.u32 %v363_v57, 16 }
  0x7a   :  { %v11715_v12 = vld [vmem:[#allocation2 + $0x168] sm:$0xff]  ;;  %118 = vst [vmem:[#allocation2 + $0x9c] sm:$0x1] %v117_v9  ;;  %v487_v17 = vsel %vm11999_vm8, %v479_v0, %v486_v7  ;;  %v164_v19 = vld [vmem:[#allocation2 + $0x174] sm:$0x1]  ;;  %v331_v20 = vld [vmem:[#allocation4 + $0x1c8] sm:$0xff] }
  0x7b   :  { %216 = vst [vmem:[#allocation2 + $0xa4] sm:$0x1] %v215_v13  ;;  %11011 = vmatmul.msk.bf16.gmra.mxu3 %vm1510_vm7, %v11715_v12  ;;  %v615_v22 = vrot.slane %v611_v15, 4  ;;  %v619_v23 = vrot.slane %v617_v16, 7  ;;  %v395_v24 = vpack.c.bf16 %v331_v20, %v331_v20  ;;  %v614_v27 = vor.u32 %v612_v3, %v611_v15  ;;  %v262_v30 = vld [vmem:[#allocation2 + $0x17c] sm:$0x1] }
  0x7c   :  { %v1074_v21 = vld [vmem:[#allocation2 + $0x3c] sm:$0xf]  ;;  %1077 = vst.msk [vmem:[#allocation2 + $0x40] sm:$0xf] %vm61_vm0, %v487_v17  ;;  %v165_v28 = vsel %vm11975_vm3, 0, %v164_v19  ;;  %v881_v31 = vshrl.u32 %v12244_v4, 16 }
  0x7d   :  { %v1075_v25 = vsel %vm12006_vm9, %v478_v6, %v1074_v21  ;;  %v1078_v26 = vld [vmem:[#allocation2 + $0x44] sm:$0x1]  ;;  %v622_v33 = vor.u32 %v620_v18, %v619_v23  ;;  %v624_v35 = vrot.slane %v619_v23, 4  ;;  %v263_v36 = vsel %vm11983_vm6, 0, %v262_v30  ;;  %v143_v37 = vld [vmem:[#allocation2 + $0x120] sm:$0x1] }
  0x7e   :  { %1076 = vst [vmem:[#allocation2 + $0x3c] sm:$0xf] %v1075_v25  ;;  %v1079_v32 = vsel %vm11975_vm3, %v488_v8, %v1078_v26  ;;  %v883_v39 = vrot.slane %v881_v31, 7  ;;  %v884_v40 = vshll.u32 %v12244_v4, 16  ;;  %v889_v42 = vshrl.u32 %v395_v24, 16  ;;  %v316_v53 = vld [vmem:[#allocation4 + $0x150] sm:$0xff] }
  0x7f   :  { %v11708_v38 = vld [vmem:[#allocation2 + $0x114] sm:$0xff]  ;;  %1080 = vst [vmem:[#allocation2 + $0x44] sm:$0x1] %v1079_v32  ;;  %v623_v43 = vsel %vm11999_vm8, %v615_v22, %v622_v33  ;;  %v892_v44 = vshll.u32 %v395_v24, 16  ;;  %v144_v45 = vsel %vm11975_vm3, 0, %v143_v37  ;;  %v317_v57 = vld [vmem:[#allocation4 + $0x158] sm:$0xff]  ;;  %v380_v58 = vpack.c.bf16 %v316_v53, %v316_v53 }
  0x80   :  { %166 = vst [vmem:[#allocation2 + $0x174] sm:$0x1] %v165_v28  ;;  %v241_v46 = vld [vmem:[#allocation2 + $0x128] sm:$0x1]  ;;  %11004 = vmatmul.msk.bf16.gmra.mxu2 %vm1510_vm7, %v11708_v38  ;;  %v887_v48 = vrot.slane %v883_v39, 4  ;;  %v891_v49 = vrot.slane %v889_v42, 7  ;;  %v886_v60 = vor.u32 %v884_v40, %v883_v39  ;;  %v381_v61 = vpack.c.bf16 %v317_v57, %v317_v57 }
  0x81   :  { %v1130_v47 = vld [vmem:[#allocation2 + $0x9c] sm:$0xf]  ;;  %1133 = vst.msk [vmem:[#allocation2 + $0xa0] sm:$0xf] %vm61_vm0, %v623_v43  ;;  %v242_v52 = vsel %vm11983_vm6, 0, %v241_v46  ;;  %v284_v0 = vld [vmem:[#allocation4 + $0x50] sm:$0xff] }
  0x82   :  { %v1131_v50 = vsel %vm12006_vm9, %v614_v27, %v1130_v47  ;;  %v1134_v51 = vld [vmem:[#allocation2 + $0xa4] sm:$0x1]  ;;  %264 = vst [vmem:[#allocation2 + $0x17c] sm:$0x1] %v263_v36  ;;  %v894_v55 = vor.u32 %v892_v44, %v891_v49  ;;  %v896_v56 = vrot.slane %v891_v49, 4  ;;  %v762_v4 = vshrl.u32 %v380_v58, 16 }
  0x83   :  { %1132 = vst [vmem:[#allocation2 + $0x9c] sm:$0xf] %v1131_v50  ;;  %v1135_v54 = vsel %vm11975_vm3, %v624_v35, %v1134_v51  ;;  %v95_v59 = vld [vmem:[#allocation2 + $0x48] sm:$0x1]  ;;  %v193_v63 = vld [vmem:[#allocation2 + $0x50] sm:$0x1]  ;;  %v348_v12 = vpack.c.bf16 %v284_v0, %v284_v0 }
  0x84   :  { %1136 = vst [vmem:[#allocation2 + $0xa4] sm:$0x1] %v1135_v54  ;;  %v96_v62 = vsel %vm11975_vm3, 0, %v95_v59  ;;  %v895_v3 = vsel %vm11999_vm8, %v887_v48, %v894_v55  ;;  %v765_v6 = vshll.u32 %v380_v58, 16  ;;  %v194_v7 = vsel %vm11983_vm6, 0, %v193_v63  ;;  %v285_v10 = vld [vmem:[#allocation4 + $0x58] sm:$0xff] }
  0x85   :  { %v11692_v2 = vld [vmem:[#allocation2 + $0x3c] sm:$0xff]  ;;  %145 = vst [vmem:[#allocation2 + $0x120] sm:$0x1] %v144_v45  ;;  %v770_v8 = vshrl.u32 %v381_v61, 16  ;;  %v773_v9 = vshll.u32 %v381_v61, 16  ;;  %v764_v16 = vrot.slane %v762_v4, 7  ;;  %v349_v17 = vpack.c.bf16 %v285_v10, %v285_v10 }
  0x86   :  { %1245 = vst.msk [vmem:[#allocation2 + $0x178] sm:$0xf] %vm61_vm0, %v895_v3  ;;  %v300_v13 = vld [vmem:[#allocation4 + $0xd0] sm:$0xff]  ;;  %10988 = vmatmul.msk.bf16.gmra.mxu0 %vm1510_vm7, %v11692_v2  ;;  %v301_v18 = vld [vmem:[#allocation4 + $0xd8] sm:$0xff]  ;;  %v490_v21 = vshrl.u32 %v348_v12, 16  ;;  %v493_v22 = vshll.u32 %v348_v12, 16 }
  0x87   :  { %v1242_v15 = vld [vmem:[#allocation2 + $0x174] sm:$0xf]  ;;  %243 = vst [vmem:[#allocation2 + $0x128] sm:$0x1] %v242_v52  ;;  %v772_v20 = vrot.slane %v770_v8, 7  ;;  %v332_v23 = vld [vmem:[#allocation4 + $0x1d0] sm:$0xff]  ;;  %v767_v25 = vor.u32 %v765_v6, %v764_v16  ;;  %v364_v28 = vpack.c.bf16 %v300_v13, %v300_v13  ;;  %v365_v40 = vpack.c.bf16 %v301_v18, %v301_v18 }
  0x88   :  { %v1243_v19 = vsel %vm12006_vm9, %v886_v60, %v1242_v15  ;;  %97 = vst [vmem:[#allocation2 + $0x48] sm:$0x1] %v96_v62  ;;  %v768_v26 = vrot.slane %v764_v16, 4  ;;  %v498_v27 = vshrl.u32 %v349_v17, 16  ;;  %v492_v35 = vrot.slane %v490_v21, 7  ;;  %v333_v36 = vld [vmem:[#allocation4 + $0x1d8] sm:$0xff] }
  0x89   :  { %1244 = vst [vmem:[#allocation2 + $0x174] sm:$0xf] %v1243_v19  ;;  %v1246_v24 = vld [vmem:[#allocation2 + $0x17c] sm:$0x1]  ;;  %v775_v32 = vor.u32 %v773_v9, %v772_v20  ;;  %v777_v33 = vrot.slane %v772_v20, 4  ;;  %v501_v38 = vshll.u32 %v349_v17, 16  ;;  %v12288_v42 = vpack.c.bf16 %v332_v23, %v332_v23 }
  0x8a   :  { %v11700_v30 = vld [vmem:[#allocation2 + $0x9c] sm:$0xff]  ;;  %v1247_v31 = vsel %vm11975_vm3, %v896_v56, %v1246_v24  ;;  %195 = vst [vmem:[#allocation2 + $0x50] sm:$0x1] %v194_v7  ;;  %v500_v37 = vrot.slane %v498_v27, 7  ;;  %v119_v39 = vld [vmem:[#allocation2 + $0xa8] sm:$0x1]  ;;  %v495_v45 = vor.u32 %v493_v22, %v492_v35  ;;  %v397_v57 = vpack.c.bf16 %v333_v36, %v333_v36 }
  0x8b   :  { %1248 = vst [vmem:[#allocation2 + $0x17c] sm:$0x1] %v1247_v31  ;;  %10996 = vmatmul.msk.bf16.gmra.mxu1 %vm1510_vm7, %v11700_v30  ;;  %v776_v43 = vsel %vm11999_vm8, %v768_v26, %v775_v32  ;;  %v496_v46 = vrot.slane %v492_v35, 4  ;;  %v120_v47 = vsel %vm11975_vm3, 0, %v119_v39  ;;  %v217_v48 = vld [vmem:[#allocation2 + $0xb0] sm:$0x1] }
  0x8c   :  { %v1193_v44 = vld [vmem:[#allocation2 + $0x120] sm:$0xf]  ;;  %1196 = vst.msk [vmem:[#allocation2 + $0x124] sm:$0xf] %vm61_vm0, %v776_v43  ;;  %v503_v50 = vor.u32 %v501_v38, %v500_v37  ;;  %v505_v51 = vrot.slane %v500_v37, 4  ;;  %v218_v52 = vsel %vm11983_vm6, 0, %v217_v48 }
  0x8d   :  { %v1194_v49 = vsel %vm12006_vm9, %v767_v25, %v1193_v44  ;;  %v167_v53 = vld [vmem:[#allocation2 + $0x180] sm:$0x1]  ;;  %v626_v55 = vshrl.u32 %v364_v28, 16  ;;  %v629_v56 = vshll.u32 %v364_v28, 16  ;;  %121 = vst [vmem:[#allocation2 + $0xa8] sm:$0x1] %v120_v47 }
  0x8e   :  { %1195 = vst [vmem:[#allocation2 + $0x120] sm:$0xf] %v1194_v49  ;;  %v1197_v54 = vld [vmem:[#allocation2 + $0x128] sm:$0x1]  ;;  %v504_v59 = vsel %vm11999_vm8, %v496_v46, %v503_v50  ;;  %v634_v61 = vshrl.u32 %v365_v40, 16  ;;  %v637_v62 = vshll.u32 %v365_v40, 16 }
  0x8f   :  { %v1198_v58 = vsel %vm11975_vm3, %v777_v33, %v1197_v54  ;;  %v1081_v60 = vld [vmem:[#allocation2 + $0x48] sm:$0xf]  ;;  %v628_v2 = vrot.slane %v626_v55, 7  ;;  %v168_v3 = vsel %vm11975_vm3, 0, %v167_v53  ;;  %v898_v4 = vshrl.u32 %v12288_v42, 16  ;;  %v318_v20 = vld [vmem:[#allocation4 + $0x160] sm:$0xff] }
  0x90   :  { %v11716_v63 = vld [vmem:[#allocation2 + $0x174] sm:$0xff]  ;;  %1199 = vst [vmem:[#allocation2 + $0x128] sm:$0x1] %v1198_v58  ;;  %v1082_v0 = vsel %vm12006_vm9, %v495_v45, %v1081_v60  ;;  %v636_v7 = vrot.slane %v634_v61, 7  ;;  %v901_v8 = vshll.u32 %v12288_v42, 16  ;;  %v906_v19 = vshrl.u32 %v397_v57, 16 }
  0x91   :  { %1083 = vst [vmem:[#allocation2 + $0x48] sm:$0xf] %v1082_v0  ;;  %v1085_v6 = vld [vmem:[#allocation2 + $0x50] sm:$0x1]  ;;  %11012 = vmatmul.msk.bf16.gmra.mxu3 %vm1510_vm7, %v11716_v63  ;;  %v631_v10 = vor.u32 %v629_v56, %v628_v2  ;;  %v632_v12 = vrot.slane %v628_v2, 4  ;;  %v900_v15 = vrot.slane %v898_v4, 7  ;;  %v382_v24 = vpack.c.bf16 %v318_v20, %v318_v20 }
  0x92   :  { %1084 = vst.msk [vmem:[#allocation2 + $0x4c] sm:$0xf] %vm61_vm0, %v504_v59  ;;  %v1086_v9 = vsel %vm11975_vm3, %v505_v51, %v1085_v6  ;;  %v265_v13 = vld [vmem:[#allocation2 + $0x188] sm:$0x1]  ;;  %v639_v16 = vor.u32 %v637_v62, %v636_v7  ;;  %v641_v17 = vrot.slane %v636_v7, 4  ;;  %v909_v22 = vshll.u32 %v397_v57, 16 }
  0x93   :  { %1087 = vst [vmem:[#allocation2 + $0x50] sm:$0x1] %v1086_v9  ;;  %v266_v18 = vsel %vm11983_vm6, 0, %v265_v13  ;;  %v904_v21 = vrot.slane %v900_v15, 4  ;;  %v146_v23 = vld [vmem:[#allocation2 + $0x12c] sm:$0x1]  ;;  %v903_v46 = vor.u32 %v901_v8, %v900_v15 }
  0x94   :  { %219 = vst [vmem:[#allocation2 + $0xb0] sm:$0x1] %v218_v52  ;;  %v640_v26 = vsel %vm11999_vm8, %v632_v12, %v639_v16  ;;  %v908_v27 = vrot.slane %v906_v19, 7  ;;  %v147_v28 = vsel %vm11975_vm3, 0, %v146_v23  ;;  %v319_v30 = vld [vmem:[#allocation4 + $0x168] sm:$0xff]  ;;  %v779_v40 = vshrl.u32 %v382_v24, 16 }
  0x95   :  { %v11709_v25 = vld [vmem:[#allocation2 + $0x120] sm:$0xff]  ;;  %169 = vst [vmem:[#allocation2 + $0x180] sm:$0x1] %v168_v3  ;;  %v1137_v31 = vld [vmem:[#allocation2 + $0xa8] sm:$0xf]  ;;  %v383_v33 = vpack.c.bf16 %v319_v30, %v319_v30  ;;  %v782_v42 = vshll.u32 %v382_v24, 16 }
  0x96   :  { %1140 = vst.msk [vmem:[#allocation2 + $0xac] sm:$0xf] %vm61_vm0, %v640_v26  ;;  %v244_v32 = vld [vmem:[#allocation2 + $0x134] sm:$0x1]  ;;  %11005 = vmatmul.msk.bf16.gmra.mxu2 %vm1510_vm7, %v11709_v25  ;;  %v1138_v35 = vsel %vm12006_vm9, %v631_v10, %v1137_v31  ;;  %v911_v36 = vor.u32 %v909_v22, %v908_v27  ;;  %v913_v37 = vrot.slane %v908_v27, 4  ;;  %v781_v50 = vrot.slane %v779_v40, 7 }
  0x97   :  { %267 = vst [vmem:[#allocation2 + $0x188] sm:$0x1] %v266_v18  ;;  %v245_v38 = vsel %vm11983_vm6, 0, %v244_v32  ;;  %v98_v39 = vld [vmem:[#allocation2 + $0x54] sm:$0x1]  ;;  %v787_v43 = vshrl.u32 %v383_v33, 16 }
  0x98   :  { %1139 = vst [vmem:[#allocation2 + $0xa8] sm:$0xf] %v1138_v35  ;;  %v790_v44 = vshll.u32 %v383_v33, 16  ;;  %v912_v47 = vsel %vm11999_vm8, %v904_v21, %v911_v36  ;;  %v99_v48 = vsel %vm11975_vm3, 0, %v98_v39  ;;  %v196_v49 = vld [vmem:[#allocation2 + $0x5c] sm:$0x1]  ;;  %v784_v60 = vor.u32 %v782_v42, %v781_v50 }
  0x99   :  { %v11693_v45 = vld [vmem:[#allocation2 + $0x48] sm:$0xff]  ;;  %148 = vst [vmem:[#allocation2 + $0x12c] sm:$0x1] %v147_v28  ;;  %v789_v51 = vrot.slane %v787_v43, 7  ;;  %v197_v52 = vsel %vm11983_vm6, 0, %v196_v49  ;;  %v286_v53 = vld [vmem:[#allocation4 + $0x60] sm:$0xff] }
  0x9a   :  { %1252 = vst.msk [vmem:[#allocation2 + $0x184] sm:$0xf] %vm61_vm0, %v912_v47  ;;  %10989 = vmatmul.msk.bf16.gmra.mxu0 %vm1510_vm7, %v11693_v45  ;;  %v287_v55 = vld [vmem:[#allocation4 + $0x68] sm:$0xff]  ;;  %v350_v56 = vpack.c.bf16 %v286_v53, %v286_v53  ;;  %v302_v57 = vld [vmem:[#allocation4 + $0xe0] sm:$0xff]  ;;  %v785_v61 = vrot.slane %v781_v50, 4  ;;  %vm3469_vm10 = vcmask 1042432  }
  0x9b   :  { %v1141_v54 = vld [vmem:[#allocation2 + $0xb0] sm:$0x1]  ;;  %246 = vst [vmem:[#allocation2 + $0x134] sm:$0x1] %v245_v38  ;;  %v792_v62 = vor.u32 %v790_v44, %v789_v51  ;;  %v303_v63 = vld [vmem:[#allocation4 + $0xe8] sm:$0xff]  ;;  %v794_v2 = vrot.slane %v789_v51, 4  ;;  %v351_v3 = vpack.c.bf16 %v287_v55, %v287_v55  ;;  %v366_v12 = vpack.c.bf16 %v302_v57, %v302_v57  ;;  %v12354_v38 = vpop.f32.mrf.mxu0 }
  0x9c   :  { %v1142_v58 = vsel %vm11975_vm3, %v641_v17, %v1141_v54  ;;  %v1249_v59 = vld [vmem:[#allocation2 + $0x180] sm:$0xf]  ;;  %100 = vst [vmem:[#allocation2 + $0x54] sm:$0x1] %v99_v48  ;;  %v507_v4 = vshrl.u32 %v350_v56, 16  ;;  %v510_v9 = vshll.u32 %v350_v56, 16  ;;  %v367_v21 = vpack.c.bf16 %v303_v63, %v303_v63 }
  0x9d   :  { %1143 = vst [vmem:[#allocation2 + $0xb0] sm:$0x1] %v1142_v58  ;;  %v1250_v0 = vsel %vm12006_vm9, %v903_v46, %v1249_v59  ;;  %v122_v6 = vld [vmem:[#allocation2 + $0xb4] sm:$0x1]  ;;  %v793_v8 = vsel %vm11999_vm8, %v785_v61, %v792_v62  ;;  %v515_v17 = vshrl.u32 %v351_v3, 16  ;;  %v518_v18 = vshll.u32 %v351_v3, 16 }
  0x9e   :  { %1251 = vst [vmem:[#allocation2 + $0x180] sm:$0xf] %v1250_v0  ;;  %v1253_v7 = vld [vmem:[#allocation2 + $0x188] sm:$0x1]  ;;  %v123_v10 = vsel %vm11975_vm3, 0, %v122_v6  ;;  %v509_v16 = vrot.slane %v507_v4, 7 }
  0x9f   :  { %v11701_v13 = vld [vmem:[#allocation2 + $0xa8] sm:$0xff]  ;;  %v1254_v15 = vsel %vm11975_vm3, %v913_v37, %v1253_v7  ;;  %1203 = vst.msk [vmem:[#allocation2 + $0x130] sm:$0xf] %vm61_vm0, %v793_v8  ;;  %v220_v20 = vld [vmem:[#allocation2 + $0xbc] sm:$0x1]  ;;  %v517_v25 = vrot.slane %v515_v17, 7  ;;  %v12352_v37 = vpop.f32.mrf.mxu2 }
  0xa0   :  { %1255 = vst [vmem:[#allocation2 + $0x188] sm:$0x1] %v1254_v15  ;;  %v1200_v19 = vld [vmem:[#allocation2 + $0x12c] sm:$0xf]  ;;  %10997 = vmatmul.msk.bf16.gmra.mxu1 %vm1510_vm7, %v11701_v13  ;;  %v512_v23 = vor.u32 %v510_v9, %v509_v16  ;;  %v513_v24 = vrot.slane %v509_v16, 4  ;;  %v221_v28 = vsel %vm11983_vm6, 0, %v220_v20 }
  0xa1   :  { %v1201_v22 = vsel %vm12006_vm9, %v784_v60, %v1200_v19  ;;  %198 = vst [vmem:[#allocation2 + $0x5c] sm:$0x1] %v197_v52  ;;  %v170_v26 = vld [vmem:[#allocation2 + $0x18c] sm:$0x1]  ;;  %v643_v30 = vshrl.u32 %v366_v12, 16  ;;  %v520_v32 = vor.u32 %v518_v18, %v517_v25  ;;  %v522_v33 = vrot.slane %v517_v25, 4 }
  0xa2   :  { %1202 = vst [vmem:[#allocation2 + $0x12c] sm:$0xf] %v1201_v22  ;;  %v1204_v27 = vld [vmem:[#allocation2 + $0x134] sm:$0x1]  ;;  %v646_v36 = vshll.u32 %v366_v12, 16  ;;  %v651_v42 = vshrl.u32 %v367_v21, 16 }
  0xa3   :  { %v1205_v31 = vsel %vm11975_vm3, %v794_v2, %v1204_v27  ;;  %v1088_v35 = vld [vmem:[#allocation2 + $0x54] sm:$0xf]  ;;  %124 = vst [vmem:[#allocation2 + $0xb4] sm:$0x1] %v123_v10  ;;  %v645_v40 = vrot.slane %v643_v30, 7  ;;  %v654_v43 = vshll.u32 %v367_v21, 16  ;;  %v521_v46 = vsel %vm11999_vm8, %v513_v24, %v520_v32  ;;  %v12383_v25 = vpop.f32.mrf.mxu0 }
  0xa4   :  { %14510 = vst [vmem:[#allocation14_spill] sm:$0xff] %v12352_v37  ;;  %v1089_v39 = vsel %vm12006_vm9, %v512_v23, %v1088_v35  ;;  %v334_v44 = vld [vmem:[#allocation4 + $0x1e0] sm:$0xff]  ;;  %v171_v47 = vsel %vm11975_vm3, 0, %v170_v26  ;;  %v653_v51 = vrot.slane %v651_v42, 7  ;;  %v335_v53 = vld [vmem:[#allocation4 + $0x1e8] sm:$0xff]  ;;  %vm3470_vm11 = vcmask 1046532  }
  0xa5   :  { %1206 = vst [vmem:[#allocation2 + $0x134] sm:$0x1] %v1205_v31  ;;  %v11717_v45 = vld [vmem:[#allocation2 + $0x180] sm:$0xff]  ;;  %v268_v48 = vld [vmem:[#allocation2 + $0x194] sm:$0x1]  ;;  %v398_v49 = vpack.c.bf16 %v334_v44, %v334_v44  ;;  %v649_v50 = vrot.slane %v645_v40, 4  ;;  %v648_v54 = vor.u32 %v646_v36, %v645_v40  ;;  %v399_v55 = vpack.c.bf16 %v335_v53, %v335_v53  ;;  %vm12377_vm12 = vmor %vm3469_vm10, %vm3470_vm11 }
  0xa6   :  { %1090 = vst [vmem:[#allocation2 + $0x54] sm:$0xf] %v1089_v39  ;;  %v269_v52 = vsel %vm11983_vm6, 0, %v268_v48  ;;  %11013 = vmatmul.msk.bf16.gmra.mxu3 %vm1510_vm7, %v11717_v45  ;;  %v3277_v58 = vld [vmem:[#allocation2] sm:$0xe]  ;;  %v656_v60 = vor.u32 %v654_v43, %v653_v51  ;;  %v658_v61 = vrot.slane %v653_v51, 4 }
  0xa7   :  { %1091 = vst.msk [vmem:[#allocation2 + $0x58] sm:$0xf] %vm61_vm0, %v521_v46  ;;  %v915_v56 = vshrl.u32 %v398_v49, 16  ;;  %v918_v57 = vshll.u32 %v398_v49, 16  ;;  %v12366_v62 = vpop.f32.mrf.mxu1  ;;  %v923_v3 = vshrl.u32 %v399_v55, 16  ;;  %v926_v4 = vshll.u32 %v399_v55, 16  ;;  %v12381_v24 = vpop.f32.mrf.mxu2 }
  0xa8   :  { %222 = vst [vmem:[#allocation2 + $0xbc] sm:$0x1] %v221_v28  ;;  %v1092_v59 = vld [vmem:[#allocation2 + $0x5c] sm:$0x1]  ;;  %v657_v6 = vsel %vm11999_vm8, %v649_v50, %v656_v60  ;;  %v3278_v8 = vld [vmem:[#allocation2 + $0x4] sm:$0xf] }
  0xa9   :  { %172 = vst [vmem:[#allocation2 + $0x18c] sm:$0x1] %v171_v47  ;;  %v11710_v63 = vld [vmem:[#allocation2 + $0x12c] sm:$0xff]  ;;  %v1093_v0 = vsel %vm11975_vm3, %v522_v33, %v1092_v59  ;;  %v917_v2 = vrot.slane %v915_v56, 7  ;;  %v925_v13 = vrot.slane %v923_v3, 7  ;;  %v11055_v16 = vrot.slane %v3277_v58, 9 }
  0xaa   :  { %270 = vst [vmem:[#allocation2 + $0x194] sm:$0x1] %v269_v52  ;;  %v1144_v7 = vld [vmem:[#allocation2 + $0xb4] sm:$0xf]  ;;  %11006 = vmatmul.msk.bf16.gmra.mxu2 %vm1510_vm7, %v11710_v63  ;;  %v3279_v15 = vld [vmem:[#allocation2 + $0x8] sm:$0x1] }
  0xab   :  { %1094 = vst [vmem:[#allocation2 + $0x5c] sm:$0x1] %v1093_v0  ;;  %v1145_v9 = vsel %vm12006_vm9, %v648_v54, %v1144_v7  ;;  %v920_v10 = vor.u32 %v918_v57, %v917_v2  ;;  %v921_v12 = vrot.slane %v917_v2, 4  ;;  %v3474_v17 = vrot.slane %v3278_v8, 5  ;;  %v11796_v23 = vld [vmem:[#allocation7 + $0x68] sm:$0xff]  ;;  %v11798_v7 = vld [vmem:[#allocation7 + $0x78] sm:$0xff] }
  0xac   :  { %1147 = vst.msk [vmem:[#allocation2 + $0xb8] sm:$0xf] %vm61_vm0, %v657_v6  ;;  %v3477_v18 = vrot.slane %v3279_v15, 5  ;;  %v928_v20 = vor.u32 %v926_v4, %v925_v13  ;;  %v930_v21 = vrot.slane %v925_v13, 4  ;;  %vm1936_vm13 = vsmask.f32 3328  ;;  %7728 = vmatpush.bf16.msra.mxu2 %v11796_v23  ;;  %9162 = vmatpush.bf16.msra.mxu3 %v11798_v7 }
  0xad   :  { %1146 = vst [vmem:[#allocation2 + $0xb4] sm:$0xf] %v1145_v9  ;;  %v3475_v27 = vsel %vm12377_vm12, %v11055_v16, %v3474_v17  ;;  %v3476_v28 = vrot.slane %v3474_v17, 4  ;;  %v1840_v30 = vld [vmem:[#allocation2] sm:$0xf]  ;;  %v11762_v13 = vld [vmem:[#allocation7 + $0x58] sm:$0xff] }
  0xae   :  { %v11694_v19 = vld [vmem:[#allocation2 + $0x54] sm:$0xff]  ;;  %14513 = vst [vmem:[#allocation15_spill] sm:$0xff] %v12381_v24  ;;  %v929_v32 = vsel %vm11999_vm8, %v921_v12, %v928_v20  ;;  %v1841_v35 = vld [vmem:[#allocation2 + $0x4] sm:$0xf]  ;;  %v1842_v36 = vld [vmem:[#allocation2 + $0x8] sm:$0x1]  ;;  %v3701_v43 = vunpack.c.l.b16 %v3475_v27  ;;  %7029 = vmatpush.bf16.msra.mxu1 %v11762_v13 }
  0xaf   :  { %v1148_v26 = vld [vmem:[#allocation2 + $0xbc] sm:$0x1]  ;;  %10990 = vmatmul.msk.bf16.gmra.mxu0 %vm1510_vm7, %v11694_v19  ;;  %v3478_v42 = vsel %vm12377_vm12, %v3476_v28, %v3477_v18  ;;  %vm1937_vm14 = vsmask.f32 7440  ;;  %v1940_v46 = vshrl.u32 %v1840_v30, 16  ;;  %v1943_v47 = vshll.u32 %v1840_v30, 16  ;;  %v12401_v54 = vpop.f32.mrf.mxu1 }
  0xb0   :  { %v1149_v31 = vsel %vm11975_vm3, %v658_v61, %v1148_v26  ;;  %v1256_v33 = vld [vmem:[#allocation2 + $0x18c] sm:$0xf]  ;;  %v3702_v45 = vunpack.c.l.b16 %v3478_v42  ;;  %1259 = vst.msk [vmem:[#allocation2 + $0x190] sm:$0xf] %vm61_vm0, %v929_v32  ;;  %v1949_v49 = vshll.u32 %v1841_v35, 16  ;;  %v1953_v50 = vshrl.u32 %v1841_v35, 16  ;;  %vm12406_vm15 = vmor %vm1936_vm13, %vm1937_vm14 }
  0xb1   :  { %1150 = vst [vmem:[#allocation2 + $0xbc] sm:$0x1] %v1149_v31  ;;  %v1257_v39 = vsel %vm12006_vm9, %v920_v10, %v1256_v33  ;;  %v1260_v40 = vld [vmem:[#allocation2 + $0x194] sm:$0x1]  ;;  %v4964_v48 = vld [vmem:[#allocation2 + $0xc] sm:$0xf] }
  0xb2   :  { %1258 = vst [vmem:[#allocation2 + $0x18c] sm:$0xf] %v1257_v39  ;;  %v1261_v44 = vsel %vm11975_vm3, %v930_v21, %v1260_v40  ;;  %v1959_v51 = vshll.u32 %v1842_v36, 16  ;;  %v5061_v52 = vshrl.u32 %v4964_v48, 16  ;;  %v12399_v53 = vpop.f32.mrf.mxu3  ;;  %v1942_v56 = vrot.slane %v1940_v46, 4  ;;  %v11800_v21 = vld [vmem:[#allocation7 + $0x88] sm:$0xff] }
  0xb3   :  { %14514 = vst [vmem:[#allocation16_spill] sm:$0xff] %v12399_v53  ;;  %v1945_v57 = vrot.slane %v1943_v47, 5  ;;  %v5064_v58 = vshll.u32 %v4964_v48, 16  ;;  %v1951_v59 = vrot.slane %v1949_v49, 5  ;;  %v1955_v60 = vrot.slane %v1953_v50, 4  ;;  %10148 = vmatpush.bf16.msra.mxu0 %v11800_v21 }
  0xb4   :  { %v11702_v55 = vld [vmem:[#allocation2 + $0xb4] sm:$0xff]  ;;  %1262 = vst [vmem:[#allocation2 + $0x194] sm:$0x1] %v1261_v44  ;;  %v4965_v61 = vld [vmem:[#allocation2 + $0x10] sm:$0xf]  ;;  %v5063_v63 = vrot.slane %v5061_v52, 4  ;;  %v3765_v8 = vpack.c.b16 %v3702_v45, %v3701_v43 }
  0xb5   :  { %10998 = vmatmul.msk.bf16.gmra.mxu1 %vm1510_vm7, %v11702_v55  ;;  %v1946_v0 = vor.u32 %v1945_v57, %v1942_v56  ;;  %v4966_v2 = vld [vmem:[#allocation2 + $0x14] sm:$0x1]  ;;  %v5066_v3 = vrot.slane %v5064_v58, 5  ;;  %v5070_v4 = vshll.u32 %v4965_v61, 16  ;;  %v5074_v6 = vshrl.u32 %v4965_v61, 16  ;;  %v12412_v26 = vpop.f32.mrf.mxu0 }
  0xb6   :  { %v1956_v9 = vor.u32 %v1955_v60, %v1951_v59  ;;  %v1961_v10 = vrot.slane %v1959_v51, 5  ;;  %v5080_v12 = vshll.u32 %v4966_v2, 16  ;;  %v3281_v15 = vld [vmem:[#allocation2 + $0x10] sm:$0xf]  ;;  %v12410_v23 = vpop.f32.mrf.mxu2  ;;  %v3280_v28 = vld [vmem:[#allocation2 + $0xc] sm:$0xe] }
  0xb7   :  { %v1947_v17 = vrot.slane %v1946_v0, 4  ;;  %v5067_v18 = vor.u32 %v5066_v3, %v5063_v63  ;;  %v5072_v19 = vrot.slane %v5070_v4, 5  ;;  %v5076_v20 = vrot.slane %v5074_v6, 4  ;;  %14517 = vst [vmem:[#allocation17_spill] sm:$0xff] %v12410_v23  ;;  %v3282_v30 = vld [vmem:[#allocation2 + $0x14] sm:$0x1] }
  0xb8   :  { %v1957_v27 = vrot.slane %v1956_v9, 4  ;;  %v3481_v31 = vrot.slane %v3281_v15, 5  ;;  %v5082_v36 = vrot.slane %v5080_v12, 5  ;;  %v1843_v39 = vld [vmem:[#allocation2 + $0xc] sm:$0xf]  ;;  %v11056_v46 = vrot.slane %v3280_v28, 9 }
  0xb9   :  { %v11718_v32 = vld [vmem:[#allocation2 + $0x18c] sm:$0xff]  ;;  %v5068_v33 = vrot.slane %v5067_v18, 4  ;;  %v5077_v35 = vor.u32 %v5076_v20, %v5072_v19  ;;  %v1952_v40 = vsel %vm12406_vm15, %v1947_v17, %v1951_v59  ;;  %v3484_v47 = vrot.slane %v3282_v30, 5  ;;  %v181_v56 = vld [vmem:[#allocation2 + $0x20] sm:$0x1] }
  0xba   :  { %v1962_v42 = vsel %vm12406_vm15, %v1957_v27, %v1961_v10  ;;  %v1844_v43 = vld [vmem:[#allocation2 + $0x10] sm:$0xf]  ;;  %11014 = vmatmul.msk.bf16.gmra.mxu3 %vm1510_vm7, %v11718_v32  ;;  %11095 = vmatmul.msk.bf16.vlgmr.msrb.gmra.mxu2 %vm1510_vm7, %v3765_v8  ;;  %v3483_v49 = vrot.slane %v3481_v31, 4  ;;  %v12422_v50 = vpop.f32.mrf.mxu3  ;;  %v12424_v51 = vpop.f32.mrf.mxu1  ;;  %v1964_v52 = vshrl.u32 %v1843_v39, 16  ;;  %v1967_v55 = vshll.u32 %v1843_v39, 16 }
  0xbb   :  { %v5073_v44 = vsel %vm12406_vm15, %v5068_v33, %v5072_v19  ;;  %v5078_v45 = vrot.slane %v5077_v35, 4  ;;  %14518 = vst [vmem:[#allocation18_spill] sm:$0xff] %v12422_v50  ;;  %v2712_v57 = vunpack.c.l.b16 %v1952_v40  ;;  %v2713_v58 = vunpack.c.l.b16 %v1962_v42  ;;  %v4967_v61 = vld [vmem:[#allocation2 + $0x18] sm:$0xf]  ;;  %v1845_v0 = vld [vmem:[#allocation2 + $0x14] sm:$0x1] }
  0xbc   :  { %v5833_v48 = vunpack.c.l.b16 %v5073_v44  ;;  %v1973_v60 = vshll.u32 %v1844_v43, 16  ;;  %v1966_v2 = vrot.slane %v1964_v52, 4  ;;  %v1969_v3 = vrot.slane %v1967_v55, 5  ;;  %v4968_v13 = vld [vmem:[#allocation2 + $0x1c] sm:$0xf]  ;;  %v11725_v42 = vld [vmem:[#allocation2 + $0xc] sm:$0xff] }
  0xbd   :  { %v5083_v59 = vsel %vm12406_vm15, %v5078_v45, %v5082_v36  ;;  %v1977_v4 = vshrl.u32 %v1844_v43, 16  ;;  %v3482_v6 = vsel %vm12377_vm12, %v11056_v46, %v3481_v31  ;;  %v182_v8 = vsel %vm11983_vm6, 0, %v181_v56  ;;  %v12438_v27 = vpop.f32.mrf.mxu0  ;;  %v1846_v35 = vld [vmem:[#allocation2 + $0x18] sm:$0xf]  ;;  %v184_v46 = vld [vmem:[#allocation2 + $0x2c] sm:$0x1] }
  0xbe   :  { %v5834_v63 = vunpack.c.l.b16 %v5083_v59  ;;  %v12430_v7 = vrot.slane %v1973_v60, 5  ;;  %v3485_v10 = vsel %vm12377_vm12, %v3483_v49, %v3484_v47  ;;  %183 = vst [vmem:[#allocation2 + $0x20] sm:$0x1] %v182_v8  ;;  %v5085_v15 = vshrl.u32 %v4967_v61, 16  ;;  %v12436_v21 = vpop.f32.mrf.mxu2  ;;  %v3283_v49 = vld [vmem:[#allocation2 + $0x18] sm:$0xe] }
  0xbf   :  { %v1979_v12 = vrot.slane %v1977_v4, 4  ;;  %v2776_v17 = vpack.c.b16 %v2713_v58, %v2712_v57  ;;  %v1970_v18 = vor.u32 %v1969_v3, %v1966_v2  ;;  %v1983_v19 = vshll.u32 %v1845_v0, 16  ;;  %14519 = vst [vmem:[#allocation19_spill] sm:$0xff] %v12436_v21  ;;  %v1847_v52 = vld [vmem:[#allocation2 + $0x1c] sm:$0xf] }
  0xc0   :  { %v5897_v9 = vpack.c.b16 %v5834_v63, %v5833_v48  ;;  %v5088_v20 = vshll.u32 %v4967_v61, 16  ;;  %v3703_v30 = vunpack.c.l.b16 %v3482_v6  ;;  %v3704_v31 = vunpack.c.l.b16 %v3485_v10  ;;  %v3284_v60 = vld [vmem:[#allocation2 + $0x1c] sm:$0xf]  ;;  %v4970_v2 = vld [vmem:[#allocation2 + $0x24] sm:$0xf] }
  0xc1   :  { %v1980_v28 = vor.u32 %v1979_v12, %v12430_v7  ;;  %v5094_v32 = vshll.u32 %v4968_v13, 16  ;;  %v5098_v33 = vshrl.u32 %v4968_v13, 16  ;;  %v437_v36 = vrot.slane %v12086_v11, 4  ;;  %v4978_v50 = vld [vmem:[#allocation2 + $0x44] sm:$0x1] }
  0xc2   :  { %11303 = vmatmul.msk.bf16.vlgmr.msrb.gmra.mxu0 %vm1510_vm7, %v5897_v9  ;;  %v5087_v39 = vrot.slane %v5085_v15, 4  ;;  %v5090_v40 = vrot.slane %v5088_v20, 5  ;;  %v1971_v43 = vrot.slane %v1970_v18, 4  ;;  %v1985_v45 = vrot.slane %v1983_v19, 5  ;;  %v12446_v48 = vpop.f32.mrf.mxu1  ;;  %v1935_v1 = vld [vmem:[#allocation2 + $0x194] sm:$0x1] }
  0xc3   :  { %v1981_v44 = vrot.slane %v1980_v28, 4  ;;  %v1988_v55 = vshrl.u32 %v1846_v35, 16  ;;  %v1991_v56 = vshll.u32 %v1846_v35, 16  ;;  %v3766_v57 = vpack.c.b16 %v3704_v31, %v3703_v30 }
  0xc4   :  { %v5096_v11 = vrot.slane %v5094_v32, 5  ;;  %v5100_v59 = vrot.slane %v5098_v33, 4  ;;  %v5091_v63 = vor.u32 %v5090_v40, %v5087_v39  ;;  %v185_v0 = vsel %vm11983_vm6, 0, %v184_v46 }
  0xc5   :  { %11023 = vmatmul.msk.bf16.vlgmr.msrb.gmra.mxu1 %vm1510_vm7, %v2776_v17  ;;  %v1057_v58 = vld [vmem:[#allocation2 + $0x20] sm:$0x1]  ;;  %v1976_v3 = vsel %vm12406_vm15, %v1971_v43, %v12430_v7  ;;  %v1986_v4 = vsel %vm12406_vm15, %v1981_v44, %v1985_v45  ;;  %v1997_v6 = vshll.u32 %v1847_v52, 16  ;;  %v2001_v8 = vshrl.u32 %v1847_v52, 16  ;;  %186 = vst [vmem:[#allocation2 + $0x2c] sm:$0x1] %v185_v0 }
  0xc6   :  { %v12444_v47 = vpop.f32.mrf.mxu3  ;;  %v1058_v61 = vsel %vm11975_vm3, %v437_v36, %v1057_v58  ;;  %v11057_v9 = vrot.slane %v3283_v49, 9  ;;  %v3488_v10 = vrot.slane %v3284_v60, 5  ;;  %v1990_v12 = vrot.slane %v1988_v55, 4  ;;  %v4971_v7 = vld [vmem:[#allocation2 + $0x28] sm:$0xf] }
  0xc7   :  { %14520 = vst [vmem:[#allocation20_spill] sm:$0xff] %v12444_v47  ;;  %v1993_v13 = vrot.slane %v1991_v56, 5  ;;  %v5101_v15 = vor.u32 %v5100_v59, %v5096_v11  ;;  %v5109_v19 = vshrl.u32 %v4970_v2, 16  ;;  %v5112_v20 = vshll.u32 %v4970_v2, 16 }
  0xc8   :  { %1059 = vst [vmem:[#allocation2 + $0x20] sm:$0x1] %v1058_v61  ;;  %v12461_v18 = vpop.f32.mrf.mxu0  ;;  %v2714_v28 = vunpack.c.l.b16 %v1976_v3  ;;  %v2715_v30 = vunpack.c.l.b16 %v1986_v4  ;;  %v5092_v31 = vrot.slane %v5091_v63, 4  ;;  %v454_v32 = vrot.slane %v12130_v41, 4 }
  0xc9   :  { %v1999_v33 = vrot.slane %v1997_v6, 5  ;;  %v2003_v35 = vrot.slane %v2001_v8, 4  ;;  %v3489_v36 = vsel %vm12377_vm12, %v11057_v9, %v3488_v10  ;;  %v3490_v39 = vrot.slane %v3488_v10, 4  ;;  %v187_v8 = vld [vmem:[#allocation2 + $0x38] sm:$0x1] }
  0xca   :  { %11263 = vmatmul.msk.bf16.vlgmr.msrb.gmra.mxu3 %vm1510_vm7, %v11725_v42  ;;  %11096 = vmatmul.msk.bf16.gmra.mxu2 %vm1510_vm7, %v3766_v57  ;;  %v1994_v40 = vor.u32 %v1993_v13, %v1990_v12  ;;  %v5118_v42 = vshll.u32 %v4971_v7, 16  ;;  %v5102_v43 = vrot.slane %v5101_v15, 4  ;;  %v5111_v44 = vrot.slane %v5109_v19, 4  ;;  %v12478_v13 = vld [vmem:[#allocation2 + $0x28] sm:$0xf] }
  0xcb   :  { %v12459_v17 = vpop.f32.mrf.mxu2  ;;  %v5114_v45 = vrot.slane %v5112_v20, 5  ;;  %v5122_v46 = vshrl.u32 %v4971_v7, 16  ;;  %v2777_v49 = vpack.c.b16 %v2715_v30, %v2714_v28  ;;  %v5097_v55 = vsel %vm12406_vm15, %v5092_v31, %v5096_v11  ;;  %v1849_v20 = vld [vmem:[#allocation2 + $0x24] sm:$0xf] }
  0xcc   :  { %14521 = vst [vmem:[#allocation21_spill] sm:$0xff] %v12459_v17  ;;  %v12470_v41 = vpop.f32.mrf.mxu1  ;;  %v2004_v61 = vor.u32 %v2003_v35, %v1999_v33  ;;  %v1064_v0 = vld [vmem:[#allocation2 + $0x2c] sm:$0x1]  ;;  %v3705_v2 = vunpack.c.l.b16 %v3489_v36  ;;  %v1995_v3 = vrot.slane %v1994_v40, 4  ;;  %v12474_v6 = vrot.slane %v5118_v42, 5 }
  0xcd   :  { %v1065_v4 = vsel %vm11975_vm3, %v454_v32, %v1064_v0  ;;  %v5115_v10 = vor.u32 %v5114_v45, %v5111_v44  ;;  %v5124_v12 = vrot.slane %v5122_v46, 4  ;;  %v5835_v15 = vunpack.c.l.b16 %v5097_v55  ;;  %v1850_v35 = vld [vmem:[#allocation2 + $0x28] sm:$0xf]  ;;  %v11726_v44 = vld [vmem:[#allocation2 + $0x18] sm:$0xff] }
  0xce   :  { %v12468_v57 = vpop.f32.mrf.mxu3  ;;  %1066 = vst [vmem:[#allocation2 + $0x2c] sm:$0x1] %v1065_v4  ;;  %v2005_v30 = vrot.slane %v2004_v61, 4  ;;  %v188_v36 = vsel %vm11983_vm6, 0, %v187_v8  ;;  %v2000_v40 = vsel %vm12406_vm15, %v1995_v3, %v1999_v33  ;;  %v3495_v42 = vrot.slane %v12478_v13, 5 }
  0xcf   :  { %v4969_v52 = vld [vmem:[#allocation2 + $0x20] sm:$0x1]  ;;  %14522 = vst [vmem:[#allocation22_spill] sm:$0xff] %v12468_v57  ;;  %v5116_v46 = vrot.slane %v5115_v10, 4  ;;  %v2025_v61 = vshrl.u32 %v1850_v35, 16 }
  0xd0   :  { %v3285_v56 = vld [vmem:[#allocation2 + $0x20] sm:$0x1]  ;;  %v5104_v59 = vshll.u32 %v4969_v52, 16  ;;  %v12485_v32 = vpop.f32.mrf.mxu0  ;;  %189 = vst [vmem:[#allocation2 + $0x38] sm:$0x1] %v188_v36  ;;  %v2012_v52 = vshrl.u32 %v1849_v20, 16 }
  0xd1   :  { %v1848_v58 = vld [vmem:[#allocation2 + $0x20] sm:$0x1]  ;;  %v3491_v60 = vrot.slane %v3285_v56, 5  ;;  %v2015_v56 = vshll.u32 %v1849_v20, 16  ;;  %v4973_v33 = vld [vmem:[#allocation2 + $0x30] sm:$0xf] }
  0xd2   :  { %v2007_v63 = vshll.u32 %v1848_v58, 16  ;;  %v5106_v11 = vrot.slane %v5104_v59, 5  ;;  %v2021_v58 = vshll.u32 %v1850_v35, 16  ;;  %v471_v59 = vrot.slane %v12187_v14, 4  ;;  %v4974_v13 = vld [vmem:[#allocation2 + $0x34] sm:$0xf] }
  0xd3   :  { %v3492_v9 = vsel %vm12377_vm12, %v3490_v39, %v3491_v60  ;;  %v12480_v19 = vpop.f32.mrf.mxu2  ;;  %v5121_v14 = vsel %vm12406_vm15, %v5116_v46, %v12474_v6  ;;  %v2017_v20 = vrot.slane %v2015_v56, 5  ;;  %v5133_v36 = vshrl.u32 %v4973_v33, 16 }
  0xd4   :  { %v3706_v7 = vunpack.c.l.b16 %v3492_v9  ;;  %14523 = vst [vmem:[#allocation23_spill] sm:$0xff] %v12480_v19  ;;  %v5107_v28 = vsel %vm12406_vm15, %v5102_v43, %v5106_v11  ;;  %v2009_v31 = vrot.slane %v2007_v63, 5  ;;  %v5125_v43 = vor.u32 %v5124_v12, %v12474_v6  ;;  %v12499_v3 = vpop.f32.mrf.mxu1 }
  0xd5   :  { %11024 = vmatmul.msk.bf16.gmra.mxu1 %vm1510_vm7, %v2777_v49  ;;  %v5836_v39 = vunpack.c.l.b16 %v5107_v28  ;;  %v3286_v49 = vld [vmem:[#allocation2 + $0x24] sm:$0xe]  ;;  %v2716_v63 = vunpack.c.l.b16 %v2000_v40  ;;  %v4972_v0 = vld [vmem:[#allocation2 + $0x2c] sm:$0x1]  ;;  %v3497_v11 = vrot.slane %v3495_v42, 4  ;;  %v2014_v12 = vrot.slane %v2012_v52, 4 }
  0xd6   :  { %v3767_v45 = vpack.c.b16 %v3706_v7, %v3705_v2  ;;  %v2010_v60 = vsel %vm12406_vm15, %v2005_v30, %v2009_v31  ;;  %v3288_v4 = vld [vmem:[#allocation2 + $0x2c] sm:$0x1]  ;;  %v11058_v8 = vrot.slane %v3286_v49, 9  ;;  %v5126_v9 = vrot.slane %v5125_v43, 4 }
  0xd7   :  { %v5898_v55 = vpack.c.b16 %v5836_v39, %v5835_v15  ;;  %v5128_v10 = vshll.u32 %v4972_v0, 16  ;;  %v2717_v15 = vunpack.c.l.b16 %v2010_v60  ;;  %v3498_v7 = vrot.slane %v3288_v4, 5  ;;  %v1071_v35 = vld [vmem:[#allocation2 + $0x38] sm:$0x1]  ;;  %v1851_v49 = vld [vmem:[#allocation2 + $0x2c] sm:$0x1] }
  0xd8   :  { %v12497_v2 = vpop.f32.mrf.mxu3  ;;  %v12506_v28 = vrot.slane %v2021_v58, 5  ;;  %v2027_v31 = vrot.slane %v2025_v61, 4  ;;  %v5136_v39 = vshll.u32 %v4973_v33, 16  ;;  %v5142_v6 = vshll.u32 %v4974_v13, 16 }
  0xd9   :  { %11304 = vmatmul.msk.bf16.gmra.mxu0 %vm1510_vm7, %v5898_v55  ;;  %14524 = vst [vmem:[#allocation24_spill] sm:$0xff] %v12497_v2  ;;  %v5130_v30 = vrot.slane %v5128_v10, 5  ;;  %v5837_v52 = vunpack.c.l.b16 %v5121_v14  ;;  %v3496_v55 = vsel %vm12377_vm12, %v11058_v8, %v3495_v42  ;;  %v3499_v56 = vsel %vm12377_vm12, %v3497_v11, %v3498_v7  ;;  %v1852_v42 = vld [vmem:[#allocation2 + $0x30] sm:$0xf]  ;;  %v3290_v11 = vld [vmem:[#allocation2 + $0x34] sm:$0xf] }
  0xda   :  { %11264 = vmatmul.msk.bf16.gmra.mxu3 %vm1510_vm7, %v11726_v44  ;;  %11097 = vmatmul.msk.bf16.gmra.mxu2 %vm1510_vm7, %v3767_v45  ;;  %v1072_v44 = vsel %vm11975_vm3, %v471_v59, %v1071_v35  ;;  %v5146_v45 = vshrl.u32 %v4974_v13, 16  ;;  %v2018_v58 = vor.u32 %v2017_v20, %v2014_v12  ;;  %v2778_v60 = vpack.c.b16 %v2717_v15, %v2716_v63  ;;  %v1853_v12 = vld [vmem:[#allocation2 + $0x34] sm:$0xf] }
  0xdb   :  { %v5131_v46 = vsel %vm12406_vm15, %v5126_v9, %v5130_v30  ;;  %1073 = vst [vmem:[#allocation2 + $0x38] sm:$0x1] %v1072_v44  ;;  %v2028_v59 = vor.u32 %v2027_v31, %v12506_v28  ;;  %v5135_v61 = vrot.slane %v5133_v36, 4  ;;  %v5138_v33 = vrot.slane %v5136_v39, 5  ;;  %v11727_v39 = vld [vmem:[#allocation2 + $0x24] sm:$0xff] }
  0xdc   :  { %v5838_v0 = vunpack.c.l.b16 %v5131_v46  ;;  %v2031_v4 = vshll.u32 %v1851_v49, 16  ;;  %v12521_v9 = vrot.slane %v5142_v6, 5  ;;  %v5148_v10 = vrot.slane %v5146_v45, 4  ;;  %v3289_v45 = vld [vmem:[#allocation2 + $0x30] sm:$0xe] }
  0xdd   :  { %v12508_v40 = vpop.f32.mrf.mxu2  ;;  %v12514_v43 = vpop.f32.mrf.mxu0  ;;  %v3707_v13 = vunpack.c.l.b16 %v3496_v55  ;;  %v3708_v30 = vunpack.c.l.b16 %v3499_v56  ;;  %v2019_v8 = vrot.slane %v2018_v58, 4  ;;  %v2029_v63 = vrot.slane %v2028_v59, 4 }
  0xde   :  { %14525 = vst [vmem:[#allocation25_spill] sm:$0xff] %v12508_v40  ;;  %v5899_v15 = vpack.c.b16 %v5838_v0, %v5837_v52  ;;  %v2033_v7 = vrot.slane %v2031_v4, 5  ;;  %v5139_v31 = vor.u32 %v5138_v33, %v5135_v61  ;;  %v5149_v36 = vor.u32 %v5148_v10, %v12521_v9  ;;  %v1858_v40 = vld [vmem:[#allocation2 + $0x48] sm:$0xf] }
  0xdf   :  { %v3768_v44 = vpack.c.b16 %v3708_v30, %v3707_v13  ;;  %v2036_v46 = vshrl.u32 %v1852_v42, 16  ;;  %v2039_v49 = vshll.u32 %v1852_v42, 16  ;;  %v3502_v56 = vrot.slane %v3290_v11, 5  ;;  %v4976_v42 = vld [vmem:[#allocation2 + $0x3c] sm:$0xf] }
  0xe0   :  { %v12523_v14 = vpop.f32.mrf.mxu3  ;;  %v2049_v58 = vshrl.u32 %v1853_v12, 16  ;;  %v2024_v52 = vsel %vm12406_vm15, %v2019_v8, %v12506_v28  ;;  %v2034_v61 = vsel %vm12406_vm15, %v2029_v63, %v2033_v7  ;;  %v5140_v33 = vrot.slane %v5139_v31, 4  ;;  %v4977_v8 = vld [vmem:[#allocation2 + $0x40] sm:$0xf] }
  0xe1   :  { %14526 = vst [vmem:[#allocation26_spill] sm:$0xff] %v12523_v14  ;;  %v11059_v0 = vrot.slane %v3289_v45, 9  ;;  %v5150_v4 = vrot.slane %v5149_v36, 4  ;;  %v2038_v13 = vrot.slane %v2036_v46, 4  ;;  %v2041_v30 = vrot.slane %v2039_v49, 5 }
  0xe2   :  { %v4975_v20 = vld [vmem:[#allocation2 + $0x38] sm:$0x1]  ;;  %v2051_v28 = vrot.slane %v2049_v58, 4  ;;  %v2718_v2 = vunpack.c.l.b16 %v2024_v52  ;;  %v2719_v63 = vunpack.c.l.b16 %v2034_v61  ;;  %v5145_v31 = vsel %vm12406_vm15, %v5140_v33, %v12521_v9 }
  0xe3   :  { %v12525_v35 = vpop.f32.mrf.mxu1  ;;  %v5152_v6 = vshll.u32 %v4975_v20, 16  ;;  %v3291_v14 = vld [vmem:[#allocation2 + $0x38] sm:$0x1]  ;;  %v3503_v36 = vsel %vm12377_vm12, %v11059_v0, %v3502_v56  ;;  %v2042_v45 = vor.u32 %v2041_v30, %v2038_v13  ;;  %v5166_v46 = vshll.u32 %v4977_v8, 16 }
  0xe4   :  { %14527 = vst [vmem:[#allocation27_spill] sm:$0xff] %v12525_v35  ;;  %v1854_v7 = vld [vmem:[#allocation2 + $0x38] sm:$0x1]  ;;  %v5170_v49 = vshrl.u32 %v4977_v8, 16  ;;  %v2779_v61 = vpack.c.b16 %v2719_v63, %v2718_v2  ;;  %v5839_v9 = vunpack.c.l.b16 %v5145_v31  ;;  %v1855_v2 = vld [vmem:[#allocation2 + $0x3c] sm:$0xf] }
  0xe5   :  { %11025 = vmatmul.msk.bf16.gmra.mxu1 %vm1510_vm7, %v2778_v60  ;;  %v12529_v55 = vpop.f32.mrf.mxu2  ;;  %v2045_v60 = vshll.u32 %v1853_v12, 16  ;;  %v12531_v59 = vpop.f32.mrf.mxu0  ;;  %v5154_v10 = vrot.slane %v5152_v6, 5  ;;  %v3504_v12 = vrot.slane %v3502_v56, 4  ;;  %v5160_v6 = vshll.u32 %v4976_v42, 16  ;;  %v11728_v31 = vld [vmem:[#allocation2 + $0x30] sm:$0xff] }
  0xe6   :  { %14528 = vst [vmem:[#allocation28_spill] sm:$0xff] %v12529_v55  ;;  %v2055_v52 = vshll.u32 %v1854_v7, 16  ;;  %v5172_v13 = vrot.slane %v5170_v49, 4  ;;  %v1856_v7 = vld [vmem:[#allocation2 + $0x40] sm:$0xf] }
  0xe7   :  { %v2047_v20 = vrot.slane %v2045_v60, 5  ;;  %v5162_v0 = vrot.slane %v5160_v6, 5  ;;  %v3292_v49 = vld [vmem:[#allocation2 + $0x3c] sm:$0xe] }
  0xe8   :  { %v2057_v8 = vrot.slane %v2055_v52, 5  ;;  %v2063_v52 = vshll.u32 %v1855_v2, 16 }
  0xe9   :  { %11305 = vmatmul.msk.bf16.gmra.mxu0 %vm1510_vm7, %v5899_v15  ;;  %v3505_v15 = vrot.slane %v3291_v14, 5  ;;  %v5155_v14 = vsel %vm12406_vm15, %v5150_v4, %v5154_v10  ;;  %v2052_v58 = vor.u32 %v2051_v28, %v2047_v20  ;;  %v2043_v4 = vrot.slane %v2042_v45, 4 }
  0xea   :  { %11265 = vmatmul.msk.bf16.gmra.mxu3 %vm1510_vm7, %v11727_v39  ;;  %11098 = vmatmul.msk.bf16.gmra.mxu2 %vm1510_vm7, %v3768_v44  ;;  %v5157_v44 = vshrl.u32 %v4976_v42, 16  ;;  %v5840_v33 = vunpack.c.l.b16 %v5155_v14  ;;  %v5168_v10 = vrot.slane %v5166_v46, 5  ;;  %v5176_v14 = vshll.u32 %v4978_v50, 16 }
  0xeb   :  { %v12541_v11 = vpop.f32.mrf.mxu1  ;;  %v3506_v60 = vsel %vm12377_vm12, %v3504_v12, %v3505_v15  ;;  %v2053_v30 = vrot.slane %v2052_v58, 4  ;;  %v3293_v12 = vld [vmem:[#allocation2 + $0x40] sm:$0xf]  ;;  %v2060_v58 = vshrl.u32 %v1855_v2, 16 }
  0xec   :  { %14529 = vst [vmem:[#allocation29_spill] sm:$0xff] %v12541_v11  ;;  %v12546_v39 = vpop.f32.mrf.mxu3  ;;  %v5159_v56 = vrot.slane %v5157_v44, 4  ;;  %v3710_v42 = vunpack.c.l.b16 %v3506_v60  ;;  %v5900_v15 = vpack.c.b16 %v5840_v33, %v5839_v9  ;;  %v2048_v44 = vsel %vm12406_vm15, %v2043_v4, %v2047_v20 }
  0xed   :  { %14530 = vst [vmem:[#allocation30_spill] sm:$0xff] %v12546_v39  ;;  %v3709_v39 = vunpack.c.l.b16 %v3503_v36  ;;  %v5173_v6 = vor.u32 %v5172_v13, %v5168_v10  ;;  %v2058_v46 = vsel %vm12406_vm15, %v2053_v30, %v2057_v8  ;;  %v3509_v60 = vrot.slane %v3293_v12, 5  ;;  %v4980_v13 = vld [vmem:[#allocation2 + $0x4c] sm:$0xf] }
  0xee   :  { %v12556_v47 = vpop.f32.mrf.mxu0  ;;  %v5163_v63 = vor.u32 %v5162_v0, %v5159_v56  ;;  %v2069_v9 = vshll.u32 %v1856_v7, 16  ;;  %v2073_v33 = vshrl.u32 %v1856_v7, 16  ;;  %v4979_v0 = vld [vmem:[#allocation2 + $0x48] sm:$0xf]  ;;  %v2721_v50 = vunpack.c.l.b16 %v2058_v46 }
  0xef   :  { %v12554_v57 = vpop.f32.mrf.mxu2  ;;  %v3769_v36 = vpack.c.b16 %v3710_v42, %v3709_v39  ;;  %v2720_v39 = vunpack.c.l.b16 %v2048_v44  ;;  %v5174_v20 = vrot.slane %v5173_v6, 4  ;;  %v5178_v42 = vrot.slane %v5176_v14, 5 }
  0xf0   :  { %14531 = vst [vmem:[#allocation31_spill] sm:$0xff] %v12554_v57  ;;  %v5164_v56 = vrot.slane %v5163_v63, 4  ;;  %v11060_v4 = vrot.slane %v3292_v49, 9  ;;  %v3511_v8 = vrot.slane %v3509_v60, 4  ;;  %v2062_v2 = vrot.slane %v2060_v58, 4 }
  0xf1   :  { %v2065_v7 = vrot.slane %v2063_v52, 5  ;;  %v12574_v63 = vrot.slane %v2069_v9, 5  ;;  %v2075_v44 = vrot.slane %v2073_v33, 4  ;;  %v5184_v53 = vshll.u32 %v4979_v0, 16 }
  0xf2   :  { %v5194_v46 = vshrl.u32 %v4980_v13, 16  ;;  %v5169_v6 = vsel %vm12406_vm15, %v5164_v56, %v5168_v10  ;;  %v5179_v14 = vsel %vm12406_vm15, %v5174_v20, %v5178_v42  ;;  %v2780_v49 = vpack.c.b16 %v2721_v50, %v2720_v39  ;;  %v4981_v20 = vld [vmem:[#allocation2 + $0x50] sm:$0x1] }
  0xf3   :  { %v12559_v28 = vpop.f32.mrf.mxu1  ;;  %v3510_v58 = vsel %vm12377_vm12, %v11060_v4, %v3509_v60  ;;  %v2066_v33 = vor.u32 %v2065_v7, %v2062_v2  ;;  %v5841_v57 = vunpack.c.l.b16 %v5169_v6  ;;  %v5842_v10 = vunpack.c.l.b16 %v5179_v14  ;;  %v3296_v60 = vld [vmem:[#allocation2 + $0x4c] sm:$0xf] }
  0xf4   :  { %14532 = vst [vmem:[#allocation32_spill] sm:$0xff] %v12559_v28  ;;  %v12563_v45 = vpop.f32.mrf.mxu3  ;;  %v5196_v50 = vrot.slane %v5194_v46, 4  ;;  %v3711_v42 = vunpack.c.l.b16 %v3510_v58  ;;  %v3516_v6 = vrot.slane %v3296_v60, 5  ;;  %v11729_v46 = vld [vmem:[#allocation2 + $0x3c] sm:$0xff] }
  0xf5   :  { %11026 = vmatmul.msk.bf16.gmra.mxu1 %vm1510_vm7, %v2779_v61  ;;  %14533 = vst [vmem:[#allocation33_spill] sm:$0xff] %v12563_v45  ;;  %v3294_v61 = vld [vmem:[#allocation2 + $0x44] sm:$0x1] }
  0xf6   :  { %v3512_v12 = vrot.slane %v3294_v61, 5  ;;  %v12572_v45 = vpop.f32.mrf.mxu0 }
  0xf7   :  { %v12570_v30 = vpop.f32.mrf.mxu2 }
  0xf8   :  { %14534 = vst [vmem:[#allocation34_spill] sm:$0xff] %v12570_v30  ;;  %v3513_v52 = vsel %vm12377_vm12, %v3511_v8, %v3512_v12  ;;  %v5186_v30 = vrot.slane %v5184_v53, 5  ;;  %v1859_v8 = vld [vmem:[#allocation2 + $0x4c] sm:$0xf]  ;;  %v2067_v12 = vrot.slane %v2066_v33, 4  ;;  %v5200_v53 = vshll.u32 %v4981_v20, 16 }
  0xf9   :  { %11306 = vmatmul.msk.bf16.gmra.mxu0 %vm1510_vm7, %v5900_v15  ;;  %v1857_v15 = vld [vmem:[#allocation2 + $0x44] sm:$0x1]  ;;  %v3712_v55 = vunpack.c.l.b16 %v3513_v52  ;;  %v3297_v52 = vld [vmem:[#allocation2 + $0x50] sm:$0x1]  ;;  %v2093_v19 = vshll.u32 %v1859_v8, 16 }
  0xfa   :  { %11266 = vmatmul.msk.bf16.gmra.mxu3 %vm1510_vm7, %v11728_v31  ;;  %11099 = vmatmul.msk.bf16.gmra.mxu2 %vm1510_vm7, %v3769_v36  ;;  %v5181_v31 = vshrl.u32 %v4979_v0, 16  ;;  %v5190_v36 = vshll.u32 %v4980_v13, 16  ;;  %v2079_v9 = vshll.u32 %v1857_v15, 16  ;;  %v2076_v0 = vor.u32 %v2075_v44, %v12574_v63  ;;  %v4982_v33 = vld [vmem:[#allocation2 + $0x54] sm:$0xf] }
  0xfb   :  { %v12580_v61 = vpop.f32.mrf.mxu1  ;;  %v5901_v15 = vpack.c.b16 %v5842_v10, %v5841_v57  ;;  %v3770_v14 = vpack.c.b16 %v3712_v55, %v3711_v42  ;;  %v2072_v57 = vsel %vm12406_vm15, %v2067_v12, %v12574_v63  ;;  %v4983_v10 = vld [vmem:[#allocation2 + $0x58] sm:$0xf]  ;;  %v3519_v42 = vrot.slane %v3297_v52, 5 }
  0xfc   :  { %14535 = vst [vmem:[#allocation35_spill] sm:$0xff] %v12580_v61  ;;  %v5183_v13 = vrot.slane %v5181_v31, 4  ;;  %v12589_v39 = vrot.slane %v5190_v36, 5  ;;  %v2081_v4 = vrot.slane %v2079_v9, 5  ;;  %v2077_v2 = vrot.slane %v2076_v0, 4 }
  0xfd   :  { %v3295_v36 = vld [vmem:[#allocation2 + $0x48] sm:$0xe]  ;;  %v2084_v9 = vshrl.u32 %v1858_v40, 16  ;;  %v5205_v12 = vshrl.u32 %v4982_v33, 16  ;;  %v2722_v17 = vunpack.c.l.b16 %v2072_v57  ;;  %v4984_v57 = vld [vmem:[#allocation2 + $0x5c] sm:$0x1] }
  0xfe   :  { %v12587_v56 = vpop.f32.mrf.mxu3  ;;  %v5187_v7 = vor.u32 %v5186_v30, %v5183_v13  ;;  %v5197_v31 = vor.u32 %v5196_v50, %v12589_v39  ;;  %v2082_v30 = vsel %vm12406_vm15, %v2077_v2, %v2081_v4  ;;  %v5202_v13 = vrot.slane %v5200_v53, 5  ;;  %v1860_v2 = vld [vmem:[#allocation2 + $0x50] sm:$0x1] }
  0xff   :  { %14536 = vst [vmem:[#allocation36_spill] sm:$0xff] %v12587_v56  ;;  %v2087_v56 = vshll.u32 %v1858_v40, 16  ;;  %v11061_v50 = vrot.slane %v3295_v36, 9  ;;  %v3518_v40 = vrot.slane %v3516_v6, 4  ;;  %v2086_v60 = vrot.slane %v2084_v9, 4 }
 0x100   :  { %v5188_v0 = vrot.slane %v5187_v7, 4  ;;  %v5198_v20 = vrot.slane %v5197_v31, 4  ;;  %v5208_v53 = vshll.u32 %v4982_v33, 16  ;;  %v2723_v31 = vunpack.c.l.b16 %v2082_v30 }
 0x101   :  { %v2089_v63 = vrot.slane %v2087_v56, 5  ;;  %v3520_v56 = vsel %vm12377_vm12, %v3518_v40, %v3519_v42  ;;  %v2103_v52 = vshll.u32 %v1860_v2, 16  ;;  %v5207_v9 = vrot.slane %v5205_v12, 4 }
 0x102   :  { %v5193_v36 = vsel %vm12406_vm15, %v5188_v0, %v12589_v39  ;;  %v5210_v30 = vrot.slane %v5208_v53, 5  ;;  %v2781_v0 = vpack.c.b16 %v2723_v31, %v2722_v17  ;;  %v5224_v40 = vshll.u32 %v4984_v57, 16  ;;  %v1861_v53 = vld [vmem:[#allocation2 + $0x54] sm:$0xf]  ;;  %v3300_v57 = vld [vmem:[#allocation2 + $0x5c] sm:$0x1] }
 0x103   :  { %v12592_v44 = vpop.f32.mrf.mxu2  ;;  %v12595_v58 = vpop.f32.mrf.mxu0 }
 0x104   :  { %14537 = vst [vmem:[#allocation37_spill] sm:$0xff] %v12592_v44  ;;  %v5218_v44 = vshrl.u32 %v4983_v10, 16  ;;  %v5211_v12 = vor.u32 %v5210_v30, %v5207_v9  ;;  %v2108_v30 = vshrl.u32 %v1861_v53, 16 }
 0x105   :  { %11027 = vmatmul.msk.bf16.gmra.mxu1 %vm1510_vm7, %v2780_v49  ;;  %v2097_v49 = vshrl.u32 %v1859_v8, 16  ;;  %v2095_v8 = vrot.slane %v2093_v19, 5  ;;  %v3517_v19 = vsel %vm12377_vm12, %v11061_v50, %v3516_v6  ;;  %v3714_v50 = vunpack.c.l.b16 %v3520_v56  ;;  %v1862_v56 = vld [vmem:[#allocation2 + $0x58] sm:$0xf] }
 0x106   :  { %v12607_v4 = vpop.f32.mrf.mxu3  ;;  %v5220_v39 = vrot.slane %v5218_v44, 4  ;;  %v3713_v6 = vunpack.c.l.b16 %v3517_v19 }
 0x107   :  { %14539 = vst [vmem:[#allocation39_spill] sm:$0xff] %v12607_v4  ;;  %v2099_v7 = vrot.slane %v2097_v49, 4 }
 0x108   :  { %v12603_v55 = vpop.f32.mrf.mxu1  ;;  %v3771_v31 = vpack.c.b16 %v3714_v50, %v3713_v6  ;;  %v2117_v6 = vshll.u32 %v1862_v56, 16 }
 0x109   :  { %11307 = vmatmul.msk.bf16.gmra.mxu0 %vm1510_vm7, %v5901_v15  ;;  %14538 = vst [vmem:[#allocation38_spill] sm:$0xff] %v12603_v55  ;;  %v5214_v15 = vshll.u32 %v4983_v10, 16  ;;  %v2100_v33 = vor.u32 %v2099_v7, %v2095_v8  ;;  %v3299_v7 = vld [vmem:[#allocation2 + $0x58] sm:$0xf] }
 0x10a   :  { %11267 = vmatmul.msk.bf16.gmra.mxu3 %vm1510_vm7, %v11729_v46  ;;  %11100 = vmatmul.msk.bf16.gmra.mxu2 %vm1510_vm7, %v3770_v14  ;;  %v5203_v46 = vsel %vm12406_vm15, %v5198_v20, %v5202_v13  ;;  %v2090_v14 = vor.u32 %v2089_v63, %v2086_v60  ;;  %v5843_v13 = vunpack.c.l.b16 %v5193_v36  ;;  %v2105_v63 = vrot.slane %v2103_v52, 5 }
 0x10b   :  { %v12618_v49 = vpop.f32.mrf.mxu2  ;;  %v12620_v10 = vrot.slane %v5214_v15, 5  ;;  %v12622_v4 = vpop.f32.mrf.mxu0  ;;  %v5844_v20 = vunpack.c.l.b16 %v5203_v46  ;;  %v2101_v60 = vrot.slane %v2100_v33, 4  ;;  %v11730_v15 = vld [vmem:[#allocation2 + $0x48] sm:$0xff]  ;;  %v5226_v46 = vrot.slane %v5224_v40, 5  ;;  %v3298_v33 = vld [vmem:[#allocation2 + $0x54] sm:$0xe] }
 0x10c   :  { %14540 = vst [vmem:[#allocation40_spill] sm:$0xff] %v12618_v49  ;;  %v2091_v21 = vrot.slane %v2090_v14, 4  ;;  %v3523_v19 = vrot.slane %v3299_v7, 5  ;;  %v5212_v52 = vrot.slane %v5211_v12, 4  ;;  %v3526_v12 = vrot.slane %v3300_v57, 5 }
 0x10d   :  { %v5221_v2 = vor.u32 %v5220_v39, %v12620_v10  ;;  %v5902_v44 = vpack.c.b16 %v5844_v20, %v5843_v13  ;;  %v2106_v14 = vsel %vm12406_vm15, %v2101_v60, %v2105_v63  ;;  %v2111_v39 = vshll.u32 %v1861_v53, 16  ;;  %v4987_v49 = vld [vmem:[#allocation2 + $0x68] sm:$0x1] }
 0x10e   :  { %v2096_v36 = vsel %vm12406_vm15, %v2091_v21, %v2095_v8  ;;  %v2121_v21 = vshrl.u32 %v1862_v56, 16  ;;  %v4986_v8 = vld [vmem:[#allocation2 + $0x64] sm:$0xf]  ;;  %v2725_v40 = vunpack.c.l.b16 %v2106_v14  ;;  %v11062_v60 = vrot.slane %v3298_v33, 9 }
 0x10f   :  { %v5222_v9 = vrot.slane %v5221_v2, 4  ;;  %v2724_v20 = vunpack.c.l.b16 %v2096_v36  ;;  %v3525_v63 = vrot.slane %v3523_v19, 4  ;;  %v5217_v2 = vsel %vm12406_vm15, %v5212_v52, %v12620_v10  ;;  %v1863_v10 = vld [vmem:[#allocation2 + $0x5c] sm:$0x1] }
 0x110   :  { %v12624_v42 = vpop.f32.mrf.mxu1  ;;  %v2110_v36 = vrot.slane %v2108_v30, 4  ;;  %v2113_v56 = vrot.slane %v2111_v39, 5  ;;  %v2123_v14 = vrot.slane %v2121_v21, 4  ;;  %v3524_v33 = vsel %vm12377_vm12, %v11062_v60, %v3523_v19  ;;  %v3302_v60 = vld [vmem:[#allocation2 + $0x64] sm:$0xf] }
 0x111   :  { %14541 = vst [vmem:[#allocation41_spill] sm:$0xff] %v12624_v42  ;;  %v5227_v7 = vsel %vm12406_vm15, %v5222_v9, %v5226_v46  ;;  %v3527_v57 = vsel %vm12377_vm12, %v3525_v63, %v3526_v12  ;;  %v2782_v46 = vpack.c.b16 %v2725_v40, %v2724_v20  ;;  %v5845_v9 = vunpack.c.l.b16 %v5217_v2  ;;  %v1864_v12 = vld [vmem:[#allocation2 + $0x60] sm:$0xf] }
 0x112   :  { %v2114_v39 = vor.u32 %v2113_v56, %v2110_v36  ;;  %v3715_v21 = vunpack.c.l.b16 %v3524_v33  ;;  %v3716_v24 = vunpack.c.l.b16 %v3527_v57  ;;  %v2127_v19 = vshll.u32 %v1863_v10, 16  ;;  %v3303_v33 = vld [vmem:[#allocation2 + $0x68] sm:$0x1] }
 0x113   :  { %v5248_v63 = vshll.u32 %v4987_v49, 16  ;;  %v2132_v57 = vshrl.u32 %v1864_v12, 16  ;;  %v2135_v49 = vshll.u32 %v1864_v12, 16 }
 0x114   :  { %v12628_v17 = vpop.f32.mrf.mxu3  ;;  %v2115_v2 = vrot.slane %v2114_v39, 4  ;;  %v2129_v56 = vrot.slane %v2127_v19, 5 }
 0x115   :  { %11028 = vmatmul.msk.bf16.gmra.mxu1 %vm1510_vm7, %v2781_v0  ;;  %14542 = vst [vmem:[#allocation42_spill] sm:$0xff] %v12628_v17  ;;  %v4985_v0 = vld [vmem:[#allocation2 + $0x60] sm:$0xf]  ;;  %v5242_v17 = vshrl.u32 %v4986_v8, 16  ;;  %v2137_v19 = vrot.slane %v2135_v49, 5 }
 0x116   :  { %v5232_v53 = vshll.u32 %v4985_v0, 16 }
 0x117   :  { %v12639_v50 = vpop.f32.mrf.mxu0 }
 0x119   :  { %11308 = vmatmul.msk.bf16.gmra.mxu0 %vm1510_vm7, %v5902_v44  ;;  %v12635_v13 = vpop.f32.mrf.mxu2  ;;  %v5229_v44 = vshrl.u32 %v4985_v0, 16  ;;  %v5846_v0 = vunpack.c.l.b16 %v5227_v7 }
 0x11a   :  { %14543 = vst [vmem:[#allocation43_spill] sm:$0xff] %v12635_v13  ;;  %11268 = vmatmul.msk.bf16.gmra.mxu3 %vm1510_vm7, %v11730_v15  ;;  %11101 = vmatmul.msk.bf16.gmra.mxu2 %vm1510_vm7, %v3771_v31  ;;  %v5238_v15 = vshll.u32 %v4986_v8, 16  ;;  %v2119_v13 = vrot.slane %v2117_v6, 5  ;;  %v5234_v8 = vrot.slane %v5232_v53, 5  ;;  %v5244_v6 = vrot.slane %v5242_v17, 4  ;;  %v11731_v17 = vld [vmem:[#allocation2 + $0x54] sm:$0xff] }
 0x11b   :  { %v5231_v30 = vrot.slane %v5229_v44, 4  ;;  %v5903_v20 = vpack.c.b16 %v5846_v0, %v5845_v9  ;;  %v3772_v53 = vpack.c.b16 %v3716_v24, %v3715_v21  ;;  %v4988_v21 = vld [vmem:[#allocation2 + $0x6c] sm:$0xf] }
 0x11c   :  { %v12652_v52 = vpop.f32.mrf.mxu3  ;;  %v12654_v23 = vrot.slane %v5238_v15, 5  ;;  %v2124_v37 = vor.u32 %v2123_v14, %v2119_v13  ;;  %v3301_v15 = vld [vmem:[#allocation2 + $0x60] sm:$0xe]  ;;  %v3530_v14 = vrot.slane %v3302_v60, 5  ;;  %v2120_v9 = vsel %vm12406_vm15, %v2115_v2, %v2119_v13  ;;  %v1866_v2 = vld [vmem:[#allocation2 + $0x68] sm:$0x1] }
 0x11d   :  { %v12646_v31 = vpop.f32.mrf.mxu1  ;;  %14545 = vst [vmem:[#allocation45_spill] sm:$0xff] %v12652_v52  ;;  %v1865_v52 = vld [vmem:[#allocation2 + $0x64] sm:$0xf]  ;;  %v5235_v7 = vor.u32 %v5234_v8, %v5231_v30  ;;  %v11063_v39 = vrot.slane %v3301_v15, 9  ;;  %v2726_v12 = vunpack.c.l.b16 %v2120_v9 }
 0x11e   :  { %14544 = vst [vmem:[#allocation44_spill] sm:$0xff] %v12646_v31  ;;  %v5245_v44 = vor.u32 %v5244_v6, %v12654_v23  ;;  %v2125_v36 = vrot.slane %v2124_v37, 4  ;;  %v2141_v10 = vshll.u32 %v1865_v52, 16  ;;  %v3532_v8 = vrot.slane %v3530_v14, 4 }
 0x11f   :  { %v12659_v40 = vpop.f32.mrf.mxu0  ;;  %v5236_v0 = vrot.slane %v5235_v7, 4  ;;  %v3533_v6 = vrot.slane %v3303_v33, 5 }
 0x120   :  { %v5246_v30 = vrot.slane %v5245_v44, 4  ;;  %v2130_v24 = vsel %vm12406_vm15, %v2125_v36, %v2129_v56  ;;  %v2143_v13 = vrot.slane %v2141_v10, 5  ;;  %v5256_v56 = vshll.u32 %v4988_v21, 16 }
 0x121   :  { %v12656_v31 = vpop.f32.mrf.mxu2  ;;  %v5241_v7 = vsel %vm12406_vm15, %v5236_v0, %v12654_v23  ;;  %v2151_v10 = vshll.u32 %v1866_v2, 16 }
 0x122   :  { %14546 = vst [vmem:[#allocation46_spill] sm:$0xff] %v12656_v31  ;;  %v2145_v31 = vshrl.u32 %v1865_v52, 16  ;;  %v2134_v52 = vrot.slane %v2132_v57, 4  ;;  %v5847_v0 = vunpack.c.l.b16 %v5241_v7 }
 0x124   :  { %v2147_v60 = vrot.slane %v2145_v31, 4  ;;  %v5253_v31 = vshrl.u32 %v4988_v21, 16  ;;  %v2138_v57 = vor.u32 %v2137_v19, %v2134_v52  ;;  %v2153_v21 = vrot.slane %v2151_v10, 5  ;;  %v3305_v19 = vld [vmem:[#allocation2 + $0x70] sm:$0xf] }
 0x125   :  { %11029 = vmatmul.msk.bf16.gmra.mxu1 %vm1510_vm7, %v2782_v46  ;;  %v12662_v42 = vpop.f32.mrf.mxu1  ;;  %v5250_v46 = vrot.slane %v5248_v63, 5  ;;  %v4989_v63 = vld [vmem:[#allocation2 + $0x70] sm:$0xf] }
 0x126   :  { %14547 = vst [vmem:[#allocation47_spill] sm:$0xff] %v12662_v42  ;;  %v5262_v15 = vshll.u32 %v4989_v63, 16  ;;  %v2148_v49 = vor.u32 %v2147_v60, %v2143_v13  ;;  %v5266_v23 = vshrl.u32 %v4989_v63, 16  ;;  %v4990_v42 = vld [vmem:[#allocation2 + $0x74] sm:$0x1] }
 0x127   :  { %v5251_v44 = vsel %vm12406_vm15, %v5246_v30, %v5250_v46  ;;  %v1867_v60 = vld [vmem:[#allocation2 + $0x6c] sm:$0xf]  ;;  %v5272_v7 = vshll.u32 %v4990_v42, 16  ;;  %v4991_v42 = vld [vmem:[#allocation2 + $0x78] sm:$0xf] }
 0x128   :  { %v5848_v46 = vunpack.c.l.b16 %v5251_v44  ;;  %v5268_v55 = vrot.slane %v5266_v23, 4  ;;  %v1868_v44 = vld [vmem:[#allocation2 + $0x70] sm:$0xf]  ;;  %v2156_v10 = vshrl.u32 %v1867_v60, 16  ;;  %v2159_v23 = vshll.u32 %v1867_v60, 16 }
 0x129   :  { %11309 = vmatmul.msk.bf16.gmra.mxu0 %vm1510_vm7, %v5903_v20  ;;  %v12667_v37 = vpop.f32.mrf.mxu3  ;;  %v2727_v20 = vunpack.c.l.b16 %v2130_v24 }
 0x12a   :  { %14548 = vst [vmem:[#allocation48_spill] sm:$0xff] %v12667_v37  ;;  %11269 = vmatmul.msk.bf16.gmra.mxu3 %vm1510_vm7, %v11731_v17  ;;  %11102 = vmatmul.msk.bf16.gmra.mxu2 %vm1510_vm7, %v3772_v53  ;;  %v3531_v17 = vsel %vm12377_vm12, %v11063_v39, %v3530_v14  ;;  %v3534_v53 = vsel %vm12377_vm12, %v3532_v8, %v3533_v6  ;;  %v5255_v39 = vrot.slane %v5253_v31, 4  ;;  %v5258_v37 = vrot.slane %v5256_v56, 5 }
 0x12b   :  { %v2783_v9 = vpack.c.b16 %v2727_v20, %v2726_v12  ;;  %v3717_v30 = vunpack.c.l.b16 %v3531_v17  ;;  %v3718_v14 = vunpack.c.l.b16 %v3534_v53  ;;  %v2139_v8 = vrot.slane %v2138_v57, 4  ;;  %v11732_v17 = vld [vmem:[#allocation2 + $0x60] sm:$0xff]  ;;  %v3304_v57 = vld [vmem:[#allocation2 + $0x6c] sm:$0xe] }
 0x12c   :  { %v12684_v33 = vpop.f32.mrf.mxu0  ;;  %v2149_v6 = vrot.slane %v2148_v49, 4  ;;  %v5904_v63 = vpack.c.b16 %v5848_v46, %v5847_v0  ;;  %v5259_v20 = vor.u32 %v5258_v37, %v5255_v39  ;;  %v3306_v49 = vld [vmem:[#allocation2 + $0x74] sm:$0x1]  ;;  %v2165_v0 = vshll.u32 %v1868_v44, 16 }
 0x12d   :  { %v12680_v36 = vpop.f32.mrf.mxu2  ;;  %v3773_v2 = vpack.c.b16 %v3718_v14, %v3717_v30  ;;  %v2144_v53 = vsel %vm12406_vm15, %v2139_v8, %v2143_v13  ;;  %v2169_v37 = vshrl.u32 %v1868_v44, 16  ;;  %v5274_v39 = vrot.slane %v5272_v7, 5  ;;  %v4992_v8 = vld [vmem:[#allocation2 + $0x7c] sm:$0xf] }
 0x12e   :  { %14549 = vst [vmem:[#allocation49_spill] sm:$0xff] %v12680_v36  ;;  %v12688_v36 = vrot.slane %v5262_v15, 5  ;;  %v2154_v31 = vsel %vm12406_vm15, %v2149_v6, %v2153_v21  ;;  %v3537_v15 = vrot.slane %v3305_v19, 5  ;;  %v2728_v13 = vunpack.c.l.b16 %v2144_v53 }
 0x12f   :  { %v2729_v30 = vunpack.c.l.b16 %v2154_v31  ;;  %v5260_v14 = vrot.slane %v5259_v20, 4  ;;  %v11064_v6 = vrot.slane %v3304_v57, 9  ;;  %v3540_v19 = vrot.slane %v3306_v49, 5 }
 0x130   :  { %v5269_v56 = vor.u32 %v5268_v55, %v12688_v36  ;;  %v3539_v21 = vrot.slane %v3537_v15, 4  ;;  %v2158_v60 = vrot.slane %v2156_v10, 4  ;;  %v2161_v44 = vrot.slane %v2159_v23, 5 }
 0x131   :  { %v12690_v52 = vpop.f32.mrf.mxu3  ;;  %v2171_v53 = vrot.slane %v2169_v37, 4  ;;  %v5286_v31 = vshll.u32 %v4992_v8, 16  ;;  %v5290_v20 = vshrl.u32 %v4992_v8, 16  ;;  %v3538_v57 = vsel %vm12377_vm12, %v11064_v6, %v3537_v15 }
 0x132   :  { %v12686_v24 = vpop.f32.mrf.mxu1  ;;  %14551 = vst [vmem:[#allocation51_spill] sm:$0xff] %v12690_v52  ;;  %v5270_v55 = vrot.slane %v5269_v56, 4  ;;  %v5277_v52 = vshrl.u32 %v4991_v42, 16  ;;  %v3541_v49 = vsel %vm12377_vm12, %v3539_v21, %v3540_v19  ;;  %v2162_v10 = vor.u32 %v2161_v44, %v2158_v60  ;;  %v3308_v19 = vld [vmem:[#allocation2 + $0x7c] sm:$0xf] }
 0x133   :  { %14550 = vst [vmem:[#allocation50_spill] sm:$0xff] %v12686_v24  ;;  %v12707_v24 = vrot.slane %v2165_v0, 5  ;;  %v4993_v0 = vld [vmem:[#allocation2 + $0x80] sm:$0x1]  ;;  %v5292_v8 = vrot.slane %v5290_v20, 4  ;;  %v3719_v15 = vunpack.c.l.b16 %v3538_v57  ;;  %v3720_v6 = vunpack.c.l.b16 %v3541_v49 }
 0x134   :  { %v5275_v56 = vsel %vm12406_vm15, %v5270_v55, %v5274_v39  ;;  %v5279_v37 = vrot.slane %v5277_v52, 4  ;;  %v5296_v21 = vshll.u32 %v4993_v0, 16  ;;  %v1870_v60 = vld [vmem:[#allocation2 + $0x78] sm:$0xf]  ;;  %v2163_v44 = vrot.slane %v2162_v10, 4  ;;  %v11733_v0 = vld [vmem:[#allocation2 + $0x6c] sm:$0xff] }
 0x135   :  { %11030 = vmatmul.msk.bf16.gmra.mxu1 %vm1510_vm7, %v2783_v9  ;;  %v12693_v12 = vpop.f32.mrf.mxu2  ;;  %v12700_v9 = vpop.f32.mrf.mxu0  ;;  %v1871_v20 = vld [vmem:[#allocation2 + $0x7c] sm:$0xf]  ;;  %v2180_v57 = vshrl.u32 %v1870_v60, 16  ;;  %v2183_v49 = vshll.u32 %v1870_v60, 16  ;;  %v3774_v61 = vpack.c.b16 %v3720_v6, %v3719_v15  ;;  %v3307_v10 = vld [vmem:[#allocation2 + $0x78] sm:$0xe] }
 0x136   :  { %14552 = vst [vmem:[#allocation52_spill] sm:$0xff] %v12693_v12  ;;  %v5280_v12 = vshll.u32 %v4991_v42, 16  ;;  %v2172_v42 = vor.u32 %v2171_v53, %v12707_v24  ;;  %v5298_v28 = vrot.slane %v5296_v21, 5  ;;  %v2189_v11 = vshll.u32 %v1871_v20, 16 }
 0x137   :  { %v2182_v6 = vrot.slane %v2180_v57, 4  ;;  %v2185_v21 = vrot.slane %v2183_v49, 5  ;;  %v1872_v49 = vld [vmem:[#allocation2 + $0x80] sm:$0x1] }
 0x139   :  { %11310 = vmatmul.msk.bf16.gmra.mxu0 %vm1510_vm7, %v5904_v63  ;;  %v1869_v63 = vld [vmem:[#allocation2 + $0x74] sm:$0x1] }
 0x13a   :  { %v12703_v46 = vpop.f32.mrf.mxu1  ;;  %11270 = vmatmul.msk.bf16.gmra.mxu3 %vm1510_vm7, %v11732_v17  ;;  %11103 = vmatmul.msk.bf16.gmra.mxu2 %vm1510_vm7, %v3773_v2  ;;  %v2784_v17 = vpack.c.b16 %v2729_v30, %v2728_v13  ;;  %v5265_v2 = vsel %vm12406_vm15, %v5260_v14, %v12688_v36  ;;  %v2175_v23 = vshll.u32 %v1869_v63, 16  ;;  %v5282_v13 = vrot.slane %v5280_v12, 5 }
 0x13b   :  { %14553 = vst [vmem:[#allocation53_spill] sm:$0xff] %v12703_v46  ;;  %v12721_v30 = vrot.slane %v5286_v31, 5  ;;  %v5849_v14 = vunpack.c.l.b16 %v5265_v2  ;;  %v2173_v63 = vrot.slane %v2172_v42, 4 }
 0x13c   :  { %v2177_v52 = vrot.slane %v2175_v23, 5  ;;  %v5283_v53 = vor.u32 %v5282_v13, %v5279_v37  ;;  %v3309_v23 = vld [vmem:[#allocation2 + $0x80] sm:$0x1]  ;;  %v2168_v37 = vsel %vm12406_vm15, %v2163_v44, %v12707_v24 }
 0x13d   :  { %v12709_v7 = vpop.f32.mrf.mxu3  ;;  %v3914_v46 = vpop.f32.mrf.mxu2  ;;  %v5293_v31 = vor.u32 %v5292_v8, %v12721_v30  ;;  %v4995_v8 = vld [vmem:[#allocation2 + $0x88] sm:$0xf]  ;;  %v3547_v24 = vrot.slane %v3309_v23, 5  ;;  %v2186_v23 = vor.u32 %v2185_v21, %v2182_v6  ;;  %v1873_v21 = vld [vmem:[#allocation2 + $0x84] sm:$0xf] }
 0x13e   :  { %14554 = vst [vmem:[#allocation54_spill] sm:$0xff] %v12709_v7  ;;  %v5850_v7 = vunpack.c.l.b16 %v5275_v56  ;;  %v2178_v42 = vsel %vm12406_vm15, %v2173_v63, %v2177_v52  ;;  %v12739_v52 = vrot.slane %v2189_v11, 5 }
 0x13f   :  { %v12724_v55 = vpop.f32.mrf.mxu0  ;;  %v5294_v13 = vrot.slane %v5293_v31, 4  ;;  %v5314_v31 = vshrl.u32 %v4995_v8, 16  ;;  %v2731_v57 = vunpack.c.l.b16 %v2178_v42 }
 0x142   :  { %v2925_v36 = vpop.f32.mrf.mxu1 }
 0x143   :  { %v3149_v39 = vadd.f32 %v2925_v36, %v12354_v38  ;;  %v5905_v38 = vpack.c.b16 %v5850_v7, %v5849_v14  ;;  %v3544_v36 = vrot.slane %v3308_v19, 5  ;;  %v5284_v7 = vrot.slane %v5283_v53, 4 }
 0x144   :  { %v5310_v53 = vshll.u32 %v4995_v8, 16 }
 0x145   :  { %11031 = vmatmul.msk.bf16.gmra.mxu1 %vm1510_vm7, %v2784_v17  ;;  %v4138_v12 = vadd.f32 %v3914_v46, %v3149_v39  ;;  %v12728_v2 = vpop.f32.mrf.mxu3  ;;  %v3916_v56 = vpop.f32.mrf.mxu2  ;;  %v2193_v17 = vshrl.u32 %v1871_v20, 16  ;;  %v4994_v46 = vld [vmem:[#allocation2 + $0x84] sm:$0xf]  ;;  %v11065_v39 = vrot.slane %v3307_v10, 9  ;;  %v3546_v15 = vrot.slane %v3544_v36, 4 }
 0x146   :  { %14555 = vst [vmem:[#allocation55_spill] sm:$0xff] %v12728_v2  ;;  %v5301_v60 = vshrl.u32 %v4994_v46, 16  ;;  %v5304_v44 = vshll.u32 %v4994_v46, 16  ;;  %v2730_v10 = vunpack.c.l.b16 %v2168_v37  ;;  %v4996_v46 = vld [vmem:[#allocation2 + $0x8c] sm:$0x1] }
 0x147   :  { %v2195_v63 = vrot.slane %v2193_v17, 4  ;;  %v12741_v20 = vpop.f32.mrf.mxu0  ;;  %v3545_v11 = vsel %vm12377_vm12, %v11065_v39, %v3544_v36  ;;  %v5320_v6 = vshll.u32 %v4996_v46, 16  ;;  %v2207_v46 = vshll.u32 %v1873_v21, 16 }
 0x148   :  { %v5303_v37 = vrot.slane %v5301_v60, 4  ;;  %v5306_v42 = vrot.slane %v5304_v44, 5 }
 0x149   :  { %11311 = vmatmul.msk.bf16.gmra.mxu0 %vm1510_vm7, %v5905_v38  ;;  %v2196_v8 = vor.u32 %v2195_v63, %v12739_v52 }
 0x14a   :  { %v2927_v14 = vpop.f32.mrf.mxu1  ;;  %11271 = vmatmul.msk.bf16.gmra.mxu3 %vm1510_vm7, %v11733_v0  ;;  %11104 = vmatmul.msk.bf16.gmra.mxu2 %vm1510_vm7, %v3774_v61  ;;  %v5299_v61 = vsel %vm12406_vm15, %v5294_v13, %v5298_v28  ;;  %v3311_v13 = vld [vmem:[#allocation2 + $0x88] sm:$0xf]  ;;  %v5307_v60 = vor.u32 %v5306_v42, %v5303_v37  ;;  %v4997_v37 = vld [vmem:[#allocation2 + $0x90] sm:$0xf] }
 0x14b   :  { %v3150_v19 = vadd.f32 %v2927_v14, %v12383_v25  ;;  %v5289_v25 = vsel %vm12406_vm15, %v5284_v7, %v12721_v30  ;;  %v2199_v14 = vshll.u32 %v1872_v49, 16  ;;  %v5316_v30 = vrot.slane %v5314_v31, 4  ;;  %v3310_v49 = vld [vmem:[#allocation2 + $0x84] sm:$0xe] }
 0x14c   :  { %v2785_v7 = vpack.c.b16 %v2731_v57, %v2730_v10  ;;  %v5851_v35 = vunpack.c.l.b16 %v5289_v25  ;;  %v5852_v28 = vunpack.c.l.b16 %v5299_v61  ;;  %v2197_v44 = vrot.slane %v2196_v8, 4  ;;  %v1874_v10 = vld [vmem:[#allocation2 + $0x88] sm:$0xf] }
 0x14d   :  { %v4139_v38 = vadd.f32 %v3916_v56, %v3150_v19  ;;  %v4612_v2 = vpop.f32.mrf.mxu3  ;;  %v3919_v0 = vpop.f32.mrf.mxu2  ;;  %v3548_v56 = vsel %vm12377_vm12, %v3546_v15, %v3547_v24  ;;  %v12753_v19 = vrot.slane %v5310_v53, 5  ;;  %v2187_v15 = vrot.slane %v2186_v23, 4 }
 0x14e   :  { %v4836_v17 = vadd.f32 %v4612_v2, %v4138_v12  ;;  %v3721_v2 = vunpack.c.l.b16 %v3545_v11  ;;  %v3722_v39 = vunpack.c.l.b16 %v3548_v56  ;;  %v2201_v63 = vrot.slane %v2199_v14, 5  ;;  %v3312_v56 = vld [vmem:[#allocation2 + $0x8c] sm:$0x1]  ;;  %v11734_v14 = vld [vmem:[#allocation2 + $0x78] sm:$0xff] }
 0x14f   :  { %v5317_v53 = vor.u32 %v5316_v30, %v12753_v19  ;;  %v3551_v31 = vrot.slane %v3311_v13, 5  ;;  %v5906_v57 = vpack.c.b16 %v5852_v28, %v5851_v35  ;;  %v2204_v25 = vshrl.u32 %v1873_v21, 16 }
 0x150   :  { %v12756_v36 = vadd.f32 %v12724_v55, %v4836_v17  ;;  %v3775_v23 = vpack.c.b16 %v3722_v39, %v3721_v2  ;;  %v5322_v17 = vrot.slane %v5320_v6, 5  ;;  %v5308_v30 = vrot.slane %v5307_v60, 4 }
 0x151   :  { %v2217_v35 = vshrl.u32 %v1874_v10, 16  ;;  %v2202_v28 = vsel %vm12406_vm15, %v2197_v44, %v2201_v63  ;;  %v5318_v13 = vrot.slane %v5317_v53, 4  ;;  %v3553_v2 = vrot.slane %v3551_v31, 4 }
 0x152   :  { %v2930_v12 = vpop.f32.mrf.mxu1  ;;  %v3554_v39 = vrot.slane %v3312_v56, 5  ;;  %v2209_v6 = vrot.slane %v2207_v46, 5  ;;  %v5328_v21 = vshll.u32 %v4997_v37, 16 }
 0x153   :  { %v3151_v24 = vadd.f32 %v2930_v12, %v12412_v26  ;;  %v2192_v26 = vsel %vm12406_vm15, %v2187_v15, %v12739_v52  ;;  %v11066_v12 = vrot.slane %v3310_v49, 9  ;;  %v5325_v52 = vshrl.u32 %v4997_v37, 16 }
 0x154   :  { %v2219_v53 = vrot.slane %v2217_v35, 4  ;;  %v2732_v49 = vunpack.c.l.b16 %v2192_v26 }
 0x155   :  { %11032 = vmatmul.msk.bf16.gmra.mxu1 %vm1510_vm7, %v2785_v7  ;;  %v4140_v55 = vadd.f32 %v3919_v0, %v3151_v24  ;;  %v4614_v61 = vpop.f32.mrf.mxu3  ;;  %v3921_v11 = vpop.f32.mrf.mxu2  ;;  %v2213_v7 = vshll.u32 %v1874_v10, 16  ;;  %v4998_v0 = vld [vmem:[#allocation2 + $0x94] sm:$0xf]  ;;  %v2206_v24 = vrot.slane %v2204_v25, 4  ;;  %v2733_v25 = vunpack.c.l.b16 %v2202_v28 }
 0x156   :  { %v4837_v42 = vadd.f32 %v4614_v61, %v4139_v38  ;;  %v6051_v8 = vpop.f32.mrf.mxu0  ;;  %v5334_v60 = vshll.u32 %v4998_v0, 16  ;;  %v5338_v10 = vshrl.u32 %v4998_v0, 16  ;;  %v1875_v61 = vld [vmem:[#allocation2 + $0x8c] sm:$0x1]  ;;  %v3552_v46 = vsel %vm12377_vm12, %v11066_v12, %v3551_v31 }
 0x157   :  { %v12773_v63 = vrot.slane %v2213_v7, 5  ;;  %v2210_v26 = vor.u32 %v2209_v6, %v2206_v24  ;;  %v5330_v7 = vrot.slane %v5328_v21, 5  ;;  %v2786_v28 = vpack.c.b16 %v2733_v25, %v2732_v49 }
 0x158   :  { %v12767_v15 = vadd.f32 %v12741_v20, %v4837_v42  ;;  %v5313_v20 = vsel %vm12406_vm15, %v5308_v30, %v12753_v19  ;;  %v12784_v35 = vrot.slane %v5334_v60, 5  ;;  %v5340_v19 = vrot.slane %v5338_v10, 4 }
 0x159   :  { %11312 = vmatmul.msk.bf16.gmra.mxu0 %vm1510_vm7, %v5906_v57  ;;  %v5323_v57 = vsel %vm12406_vm15, %v5318_v13, %v5322_v17  ;;  %v2220_v17 = vor.u32 %v2219_v53, %v12773_v63  ;;  %v5853_v13 = vunpack.c.l.b16 %v5313_v20  ;;  %v3723_v12 = vunpack.c.l.b16 %v3552_v46  ;;  %v1876_v53 = vld [vmem:[#allocation2 + $0x90] sm:$0xf] }
 0x15a   :  { %v2932_v38 = vpop.f32.mrf.mxu1  ;;  %11272 = vmatmul.msk.bf16.gmra.mxu3 %vm1510_vm7, %v11734_v14  ;;  %11105 = vmatmul.msk.bf16.gmra.mxu2 %vm1510_vm7, %v3775_v23  ;;  %v5327_v23 = vrot.slane %v5325_v52, 4  ;;  %v4999_v14 = vld [vmem:[#allocation2 + $0x98] sm:$0x1]  ;;  %v5854_v31 = vunpack.c.l.b16 %v5323_v57  ;;  %v2211_v24 = vrot.slane %v2210_v26, 4  ;;  %v5341_v21 = vor.u32 %v5340_v19, %v12784_v35 }
 0x15b   :  { %v3152_v44 = vadd.f32 %v2932_v38, %v12438_v27  ;;  %v3555_v27 = vsel %vm12377_vm12, %v3553_v2, %v3554_v39  ;;  %v5344_v2 = vshll.u32 %v4999_v14, 16 }
 0x15c   :  { %v3724_v38 = vunpack.c.l.b16 %v3555_v27  ;;  %v5331_v6 = vor.u32 %v5330_v7, %v5327_v23  ;;  %v5907_v49 = vpack.c.b16 %v5854_v31, %v5853_v13  ;;  %v11735_v27 = vld [vmem:[#allocation2 + $0x84] sm:$0xff]  ;;  %v2216_v23 = vsel %vm12406_vm15, %v2211_v24, %v12773_v63  ;;  %v5001_v7 = vld [vmem:[#allocation2 + $0xa0] sm:$0xf] }
 0x15d   :  { %v4141_v56 = vadd.f32 %v3921_v11, %v3152_v44  ;;  %v4617_v37 = vpop.f32.mrf.mxu3  ;;  %v3924_v42 = vpop.f32.mrf.mxu2  ;;  %v2223_v11 = vshll.u32 %v1875_v61, 16  ;;  %v3314_v44 = vld [vmem:[#allocation2 + $0x94] sm:$0xf]  ;;  %v5346_v57 = vrot.slane %v5344_v2, 5  ;;  %v5342_v26 = vrot.slane %v5341_v21, 4 }
 0x15e   :  { %v4838_v30 = vadd.f32 %v4617_v37, %v4140_v55  ;;  %v6053_v0 = vpop.f32.mrf.mxu0  ;;  %v2221_v55 = vrot.slane %v2220_v17, 4  ;;  %v3776_v20 = vpack.c.b16 %v3724_v38, %v3723_v12  ;;  %v1877_v61 = vld [vmem:[#allocation2 + $0x94] sm:$0xf]  ;;  %v3558_v14 = vrot.slane %v3314_v44, 5  ;;  %v3313_v17 = vld [vmem:[#allocation2 + $0x90] sm:$0xe] }
 0x15f   :  { %v2225_v10 = vrot.slane %v2223_v11, 5  ;;  %v3315_v11 = vld [vmem:[#allocation2 + $0x98] sm:$0x1]  ;;  %v2231_v13 = vshll.u32 %v1876_v53, 16  ;;  %v2237_v31 = vshll.u32 %v1877_v61, 16  ;;  %v2241_v12 = vshrl.u32 %v1877_v61, 16 }
 0x160   :  { %v12787_v39 = vadd.f32 %v6051_v8, %v4838_v30  ;;  %v5000_v8 = vld [vmem:[#allocation2 + $0x9c] sm:$0xf]  ;;  %v5362_v63 = vshrl.u32 %v5001_v7, 16  ;;  %v11067_v21 = vrot.slane %v3313_v17, 9 }
 0x161   :  { %v5349_v38 = vshrl.u32 %v5000_v8, 16  ;;  %v5352_v2 = vshll.u32 %v5000_v8, 16  ;;  %v2233_v61 = vrot.slane %v2231_v13, 5  ;;  %v2243_v8 = vrot.slane %v2241_v12, 4 }
 0x162   :  { %14556 = vst [vmem:[#allocation56_spill] sm:$0xff] %v12787_v39  ;;  %v2935_v52 = vpop.f32.mrf.mxu1 }
 0x163   :  { %v3153_v60 = vadd.f32 %v2935_v52, %v12461_v18  ;;  %v5332_v18 = vrot.slane %v5331_v6, 4  ;;  %v2734_v52 = vunpack.c.l.b16 %v2216_v23  ;;  %v5354_v23 = vrot.slane %v5352_v2, 5 }
 0x165   :  { %11033 = vmatmul.msk.bf16.gmra.mxu1 %vm1510_vm7, %v2786_v28  ;;  %v4142_v25 = vadd.f32 %v3924_v42, %v3153_v60  ;;  %v4619_v46 = vpop.f32.mrf.mxu3  ;;  %v3926_v37 = vpop.f32.mrf.mxu2  ;;  %v2226_v42 = vsel %vm12406_vm15, %v2221_v55, %v2225_v10  ;;  %v2228_v28 = vshrl.u32 %v1876_v53, 16  ;;  %v5358_v60 = vshll.u32 %v5001_v7, 16  ;;  %v1878_v7 = vld [vmem:[#allocation2 + $0x98] sm:$0x1] }
 0x166   :  { %v4839_v19 = vadd.f32 %v4619_v46, %v4141_v56  ;;  %v6056_v30 = vpop.f32.mrf.mxu0  ;;  %v5337_v6 = vsel %vm12406_vm15, %v5332_v18, %v12784_v35  ;;  %v3560_v55 = vrot.slane %v3558_v14, 4  ;;  %v3561_v10 = vrot.slane %v3315_v11, 5 }
 0x167   :  { %v2230_v53 = vrot.slane %v2228_v28, 4  ;;  %v5351_v46 = vrot.slane %v5349_v38, 4  ;;  %v2735_v18 = vunpack.c.l.b16 %v2226_v42  ;;  %v12810_v17 = vrot.slane %v5358_v60, 5  ;;  %v1880_v42 = vld [vmem:[#allocation2 + $0xa0] sm:$0xf] }
 0x168   :  { %v12797_v24 = vadd.f32 %v6053_v0, %v4839_v19  ;;  %v5347_v0 = vsel %vm12406_vm15, %v5342_v26, %v5346_v57  ;;  %v5002_v19 = vld [vmem:[#allocation2 + $0xa4] sm:$0x1]  ;;  %v3559_v57 = vsel %vm12377_vm12, %v11067_v21, %v3558_v14  ;;  %v2247_v2 = vshll.u32 %v1878_v7, 16 }
 0x169   :  { %11313 = vmatmul.msk.bf16.gmra.mxu0 %vm1510_vm7, %v5907_v49  ;;  %v12808_v49 = vrot.slane %v2237_v31, 5  ;;  %v5856_v13 = vunpack.c.l.b16 %v5347_v0  ;;  %v3562_v31 = vsel %vm12377_vm12, %v3560_v55, %v3561_v10  ;;  %v2234_v12 = vor.u32 %v2233_v61, %v2230_v53  ;;  %v5003_v53 = vld [vmem:[#allocation2 + $0xa8] sm:$0xf] }
 0x16a   :  { %14557 = vst [vmem:[#allocation57_spill] sm:$0xff] %v12797_v24  ;;  %v2937_v56 = vpop.f32.mrf.mxu1  ;;  %11273 = vmatmul.msk.bf16.gmra.mxu3 %vm1510_vm7, %v11735_v27  ;;  %11106 = vmatmul.msk.bf16.gmra.mxu2 %vm1510_vm7, %v3776_v20  ;;  %v5364_v27 = vrot.slane %v5362_v63, 4  ;;  %v5855_v20 = vunpack.c.l.b16 %v5337_v6  ;;  %v5355_v60 = vor.u32 %v5354_v23, %v5351_v46  ;;  %v5368_v63 = vshll.u32 %v5002_v19, 16  ;;  %v12818_v24 = vld [vmem:[#allocation2 + $0xa0] sm:$0xf] }
 0x16b   :  { %v3154_v44 = vadd.f32 %v2937_v56, %v12485_v32  ;;  %v2244_v38 = vor.u32 %v2243_v8, %v12808_v49  ;;  %v2787_v56 = vpack.c.b16 %v2735_v18, %v2734_v52  ;;  %v2261_v55 = vshll.u32 %v1880_v42, 16 }
 0x16c   :  { %v5365_v6 = vor.u32 %v5364_v27, %v12810_v17  ;;  %v2265_v10 = vshrl.u32 %v1880_v42, 16  ;;  %v5908_v8 = vpack.c.b16 %v5856_v13, %v5855_v20  ;;  %v3726_v7 = vunpack.c.l.b16 %v3562_v31 }
 0x16d   :  { %v4143_v35 = vadd.f32 %v3926_v37, %v3154_v44  ;;  %v4622_v32 = vpop.f32.mrf.mxu3  ;;  %v3929_v11 = vpop.f32.mrf.mxu2  ;;  %v1879_v37 = vld [vmem:[#allocation2 + $0x9c] sm:$0xf]  ;;  %v3725_v44 = vunpack.c.l.b16 %v3559_v57  ;;  %v2235_v46 = vrot.slane %v2234_v12, 4  ;;  %v2245_v23 = vrot.slane %v2244_v38, 4  ;;  %v11736_v38 = vld [vmem:[#allocation2 + $0x90] sm:$0xff] }
 0x16e   :  { %v4840_v26 = vadd.f32 %v4622_v32, %v4142_v25  ;;  %v6058_v28 = vpop.f32.mrf.mxu0  ;;  %v2252_v21 = vshrl.u32 %v1879_v37, 16  ;;  %v2255_v0 = vshll.u32 %v1879_v37, 16  ;;  %v2249_v52 = vrot.slane %v2247_v2, 5  ;;  %v3316_v32 = vld [vmem:[#allocation2 + $0x9c] sm:$0xe] }
 0x16f   :  { %v5356_v18 = vrot.slane %v5355_v60, 4  ;;  %v5370_v19 = vrot.slane %v5368_v63, 5  ;;  %v3565_v57 = vrot.slane %v12818_v24, 5  ;;  %v12825_v20 = vrot.slane %v2261_v55, 5  ;;  %v1881_v60 = vld [vmem:[#allocation2 + $0xa4] sm:$0x1] }
 0x170   :  { %v12820_v25 = vadd.f32 %v6056_v30, %v4840_v26  ;;  %v5366_v30 = vrot.slane %v5365_v6, 4  ;;  %v5373_v26 = vshrl.u32 %v5003_v53, 16  ;;  %v2254_v39 = vrot.slane %v2252_v21, 4 }
 0x171   :  { %v2267_v13 = vrot.slane %v2265_v10, 4  ;;  %v3777_v2 = vpack.c.b16 %v3726_v7, %v3725_v44  ;;  %v5376_v63 = vshll.u32 %v5003_v53, 16  ;;  %v2250_v24 = vsel %vm12406_vm15, %v2245_v23, %v2249_v52 }
 0x172   :  { %14558 = vst [vmem:[#allocation58_spill] sm:$0xff] %v12820_v25  ;;  %v2940_v14 = vpop.f32.mrf.mxu1  ;;  %v3318_v25 = vld [vmem:[#allocation2 + $0xa4] sm:$0x1]  ;;  %v11068_v6 = vrot.slane %v3316_v32, 9  ;;  %v3567_v21 = vrot.slane %v3565_v57, 4  ;;  %v2271_v53 = vshll.u32 %v1881_v60, 16  ;;  %v2737_v52 = vunpack.c.l.b16 %v2250_v24 }
 0x173   :  { %v3155_v61 = vadd.f32 %v2940_v14, %v12514_v43  ;;  %v2257_v43 = vrot.slane %v2255_v0, 5  ;;  %v5004_v14 = vld [vmem:[#allocation2 + $0xac] sm:$0xf]  ;;  %v3568_v44 = vrot.slane %v3318_v25, 5  ;;  %v2268_v10 = vor.u32 %v2267_v13, %v12825_v20  ;;  %v125_v25 = vld [vmem:[#allocation2 + $0xc0] sm:$0x1] }
 0x174   :  { %v5378_v7 = vrot.slane %v5376_v63, 5  ;;  %v5386_v23 = vshrl.u32 %v5004_v14, 16 }
 0x175   :  { %11034 = vmatmul.msk.bf16.gmra.mxu1 %vm1510_vm7, %v2787_v56  ;;  %v4144_v27 = vadd.f32 %v3929_v11, %v3155_v61  ;;  %v4624_v37 = vpop.f32.mrf.mxu3  ;;  %v3931_v42 = vpop.f32.mrf.mxu2  ;;  %v2240_v11 = vsel %vm12406_vm15, %v2235_v46, %v12808_v49  ;;  %v5361_v56 = vsel %vm12406_vm15, %v5356_v18, %v12810_v17  ;;  %v2258_v49 = vor.u32 %v2257_v43, %v2254_v39 }
 0x176   :  { %v4841_v31 = vadd.f32 %v4624_v37, %v4143_v35  ;;  %v6061_v12 = vpop.f32.mrf.mxu0  ;;  %v5371_v35 = vsel %vm12406_vm15, %v5366_v30, %v5370_v19  ;;  %v5375_v61 = vrot.slane %v5373_v26, 4  ;;  %v5382_v46 = vshll.u32 %v5004_v14, 16  ;;  %v5005_v30 = vld [vmem:[#allocation2 + $0xb0] sm:$0x1]  ;;  %v3320_v14 = vld [vmem:[#allocation2 + $0xac] sm:$0xf] }
 0x177   :  { %v12846_v18 = vunpack.c.l.b16 %v5361_v56  ;;  %v3566_v19 = vsel %vm12377_vm12, %v11068_v6, %v3565_v57  ;;  %v5858_v37 = vunpack.c.l.b16 %v5371_v35  ;;  %v2259_v43 = vrot.slane %v2258_v49, 4  ;;  %v305_v49 = vld [vmem:[#allocation4 + $0xf8] sm:$0xff] }
 0x178   :  { %v12837_v0 = vadd.f32 %v6058_v28, %v4841_v31  ;;  %v2736_v28 = vunpack.c.l.b16 %v2240_v11  ;;  %v2269_v13 = vrot.slane %v2268_v10, 4  ;;  %v2273_v31 = vrot.slane %v2271_v53, 5  ;;  %v304_v11 = vld [vmem:[#allocation4 + $0xf0] sm:$0xff] }
 0x179   :  { %11314 = vmatmul.msk.bf16.gmra.mxu0 %vm1510_vm7, %v5908_v8  ;;  %v126_v8 = vsel %vm11975_vm3, 0, %v125_v25  ;;  %v5379_v60 = vor.u32 %v5378_v7, %v5375_v61  ;;  %v12852_v63 = vrot.slane %v5382_v46, 5  ;;  %v3727_v24 = vunpack.c.l.b16 %v3566_v19  ;;  %v3319_v25 = vld [vmem:[#allocation2 + $0xa8] sm:$0xe] }
 0x17a   :  { %v2942_v55 = vpop.f32.mrf.mxu1  ;;  %11274 = vmatmul.msk.bf16.gmra.mxu3 %vm1510_vm7, %v11736_v38  ;;  %11107 = vmatmul.msk.bf16.gmra.mxu2 %vm1510_vm7, %v3777_v2  ;;  %127 = vst [vmem:[#allocation2 + $0xc0] sm:$0x1] %v126_v8  ;;  %v5392_v56 = vshll.u32 %v5005_v30, 16  ;;  %v2788_v6 = vpack.c.b16 %v2737_v52, %v2736_v28  ;;  %v368_v10 = vpack.c.bf16 %v304_v11, %v304_v11  ;;  %v3572_v28 = vrot.slane %v3320_v14, 5  ;;  %v5007_v14 = vld [vmem:[#allocation2 + $0xb8] sm:$0xf] }
 0x17b   :  { %v3156_v17 = vadd.f32 %v2942_v55, %v12531_v59  ;;  %v3569_v59 = vsel %vm12377_vm12, %v3567_v21, %v3568_v44  ;;  %v1882_v21 = vld [vmem:[#allocation2 + $0xa8] sm:$0xf]  ;;  %v2274_v55 = vsel %vm12406_vm15, %v2269_v13, %v2273_v31  ;;  %v5909_v61 = vpack.c.b16 %v5858_v37, %v12846_v18  ;;  %v5006_v18 = vld [vmem:[#allocation2 + $0xb4] sm:$0xf] }
 0x17c   :  { %v3728_v57 = vunpack.c.l.b16 %v3569_v59  ;;  %v12871_v19 = vunpack.c.l.b16 %v2274_v55  ;;  %v369_v59 = vpack.c.bf16 %v305_v49, %v305_v49  ;;  %v2279_v37 = vshll.u32 %v1882_v21, 16 }
 0x17d   :  { %v4145_v39 = vadd.f32 %v3931_v42, %v3156_v17  ;;  %v4627_v32 = vpop.f32.mrf.mxu3  ;;  %v3934_v26 = vpop.f32.mrf.mxu2  ;;  %v5388_v42 = vrot.slane %v5386_v23, 4  ;;  %v12863_v17 = vrot.slane %v5379_v60, 4  ;;  %v12866_v23 = vrot.slane %v5392_v56, 5 }
 0x17e   :  { %v4842_v38 = vadd.f32 %v4627_v32, %v4144_v27  ;;  %v6063_v2 = vpop.f32.mrf.mxu0  ;;  %v2264_v27 = vsel %vm12406_vm15, %v2259_v43, %v12825_v20  ;;  %v3778_v46 = vpack.c.b16 %v3728_v57, %v3727_v24  ;;  %v2276_v20 = vshrl.u32 %v1882_v21, 16 }
 0x17f   :  { %v5389_v7 = vor.u32 %v5388_v42, %v12852_v63  ;;  %v12869_v8 = vunpack.c.l.b16 %v2264_v27  ;;  %v660_v31 = vshrl.u32 %v368_v10, 16  ;;  %v11737_v42 = vld [vmem:[#allocation2 + $0x9c] sm:$0xff]  ;;  %v11069_v24 = vrot.slane %v3319_v25, 9 }
 0x180   :  { %v12854_v44 = vadd.f32 %v6061_v12, %v4842_v38  ;;  %v1883_v12 = vld [vmem:[#allocation2 + $0xac] sm:$0xf]  ;;  %v3574_v57 = vrot.slane %v3572_v28, 4  ;;  %v663_v27 = vshll.u32 %v368_v10, 16  ;;  %v668_v55 = vshrl.u32 %v369_v59, 16 }
 0x181   :  { %v2285_v43 = vshll.u32 %v1883_v12, 16  ;;  %v2289_v13 = vshrl.u32 %v1883_v12, 16  ;;  %v5390_v11 = vrot.slane %v5389_v7, 4  ;;  %v662_v21 = vrot.slane %v660_v31, 7 }
 0x182   :  { %v2945_v35 = vpop.f32.mrf.mxu1  ;;  %v5406_v7 = vshll.u32 %v5007_v14, 16  ;;  %v5410_v25 = vshrl.u32 %v5007_v14, 16  ;;  %v1151_v14 = vld [vmem:[#allocation2 + $0xc0] sm:$0xf] }
 0x183   :  { %v3157_v53 = vadd.f32 %v2945_v35, %v12556_v47  ;;  %v3321_v47 = vld [vmem:[#allocation2 + $0xb0] sm:$0x1]  ;;  %v5397_v35 = vshrl.u32 %v5006_v18, 16  ;;  %v12882_v12 = vrot.slane %v2285_v43, 5  ;;  %v5395_v10 = vsel %vm12406_vm15, %v5390_v11, %v12866_v23 }
 0x184   :  { %v3575_v56 = vrot.slane %v3321_v47, 5  ;;  %v666_v43 = vrot.slane %v662_v21, 4 }
 0x185   :  { %11035 = vmatmul.msk.bf16.gmra.mxu1 %vm1510_vm7, %v2788_v6  ;;  %v4146_v52 = vadd.f32 %v3934_v26, %v3157_v53  ;;  %v4629_v30 = vpop.f32.mrf.mxu3  ;;  %v3936_v32 = vpop.f32.mrf.mxu2  ;;  %v5385_v26 = vsel %vm12406_vm15, %v12863_v17, %v12852_v63  ;;  %v2278_v6 = vrot.slane %v2276_v20, 4  ;;  %v2281_v53 = vrot.slane %v2279_v37, 5 }
 0x186   :  { %v4843_v38 = vadd.f32 %v4629_v30, %v4145_v39  ;;  %v12873_v60 = vpop.f32.mrf.mxu0  ;;  %v2291_v30 = vrot.slane %v2289_v13, 4  ;;  %v5400_v63 = vshll.u32 %v5006_v18, 16  ;;  %v3576_v20 = vsel %vm12377_vm12, %v3574_v57, %v3575_v56 }
 0x187   :  { %v5399_v47 = vrot.slane %v5397_v35, 4  ;;  %v12894_v18 = vrot.slane %v668_v55, 7  ;;  %v12897_v57 = vrot.slane %v5406_v7, 5  ;;  %v5412_v56 = vrot.slane %v5410_v25, 4  ;;  %v3323_v55 = vld [vmem:[#allocation2 + $0xb8] sm:$0xf] }
 0x188   :  { %v12879_v49 = vadd.f32 %v6063_v2, %v4843_v38  ;;  %v1884_v2 = vld [vmem:[#allocation2 + $0xb0] sm:$0x1]  ;;  %v2282_v38 = vor.u32 %v2281_v53, %v2278_v6  ;;  %v2292_v23 = vor.u32 %v2291_v30, %v12882_v12  ;;  %v5402_v11 = vrot.slane %v5400_v63, 5 }
 0x189   :  { %11315 = vmatmul.msk.bf16.gmra.mxu0 %vm1510_vm7, %v5909_v61  ;;  %v3573_v61 = vsel %vm12377_vm12, %v11069_v24, %v3572_v28  ;;  %v5859_v35 = vunpack.c.l.b16 %v5385_v26  ;;  %v5413_v25 = vor.u32 %v5412_v56, %v12897_v57 }
 0x18a   :  { %14559 = vst [vmem:[#allocation59_spill] sm:$0xff] %v12879_v49  ;;  %v2947_v39 = vpop.f32.mrf.mxu1  ;;  %11275 = vmatmul.msk.bf16.gmra.mxu3 %vm1510_vm7, %v11737_v42  ;;  %11108 = vmatmul.msk.bf16.gmra.mxu2 %vm1510_vm7, %v3778_v46  ;;  %v671_v46 = vshll.u32 %v369_v59, 16  ;;  %v2295_v42 = vshll.u32 %v1884_v2, 16  ;;  %v5008_v49 = vld [vmem:[#allocation2 + $0xbc] sm:$0x1]  ;;  %v2789_v59 = vpack.c.b16 %v12871_v19, %v12869_v8  ;;  %v3729_v6 = vunpack.c.l.b16 %v3573_v61 }
 0x18b   :  { %v3158_v17 = vadd.f32 %v2947_v39, %v12572_v45  ;;  %v665_v45 = vor.u32 %v663_v27, %v662_v21  ;;  %v223_v39 = vld [vmem:[#allocation2 + $0xc8] sm:$0x1]  ;;  %v5860_v21 = vunpack.c.l.b16 %v5395_v10  ;;  %v3730_v27 = vunpack.c.l.b16 %v3576_v20  ;;  %v3322_v61 = vld [vmem:[#allocation2 + $0xb4] sm:$0xe] }
 0x18c   :  { %v224_v30 = vsel %vm11983_vm6, 0, %v223_v39  ;;  %v5403_v2 = vor.u32 %v5402_v11, %v5399_v47  ;;  %v5416_v7 = vshll.u32 %v5008_v49, 16  ;;  %v2293_v26 = vrot.slane %v2292_v23, 4  ;;  %v1885_v49 = vld [vmem:[#allocation2 + $0xb4] sm:$0xf]  ;;  %v11738_v39 = vld [vmem:[#allocation2 + $0xa8] sm:$0xff] }
 0x18d   :  { %v4147_v37 = vadd.f32 %v3936_v32, %v3158_v17  ;;  %v4632_v13 = vpop.f32.mrf.mxu3  ;;  %v3939_v31 = vpop.f32.mrf.mxu2  ;;  %v673_v32 = vor.u32 %v671_v46, %v12894_v18  ;;  %v2283_v17 = vrot.slane %v2282_v38, 4  ;;  %v2297_v10 = vrot.slane %v2295_v42, 5  ;;  %225 = vst [vmem:[#allocation2 + $0xc8] sm:$0x1] %v224_v30  ;;  %v3324_v23 = vld [vmem:[#allocation2 + $0xbc] sm:$0x1] }
 0x18e   :  { %v4844_v28 = vadd.f32 %v4632_v13, %v4146_v52  ;;  %v6068_v24 = vpop.f32.mrf.mxu0  ;;  %v1152_v52 = vsel %vm12006_vm9, %v665_v45, %v1151_v14  ;;  %v3579_v20 = vrot.slane %v3323_v55, 5  ;;  %v5910_v45 = vpack.c.b16 %v5860_v21, %v5859_v35  ;;  %v1886_v42 = vld [vmem:[#allocation2 + $0xb8] sm:$0xf] }
 0x18f   :  { %v674_v53 = vsel %vm11999_vm8, %v666_v43, %v673_v32  ;;  %1153 = vst [vmem:[#allocation2 + $0xc0] sm:$0xf] %v1152_v52  ;;  %v5404_v13 = vrot.slane %v5403_v2, 4  ;;  %v5418_v38 = vrot.slane %v5416_v7, 5  ;;  %v11070_v56 = vrot.slane %v3322_v61, 9 }
 0x190   :  { %v12909_v8 = vadd.f32 %v12873_v60, %v4844_v28  ;;  %1154 = vst.msk [vmem:[#allocation2 + $0xc4] sm:$0xf] %vm61_vm0, %v674_v53  ;;  %v3779_v60 = vpack.c.b16 %v3730_v27, %v3729_v6  ;;  %v2298_v28 = vsel %vm12406_vm15, %v2293_v26, %v2297_v10  ;;  %v3581_v32 = vrot.slane %v3579_v20, 4 }
 0x191   :  { %v2303_v35 = vshll.u32 %v1885_v49, 16  ;;  %v675_v21 = vrot.slane %v12894_v18, 4  ;;  %v3582_v6 = vrot.slane %v3324_v23, 5  ;;  %v2313_v27 = vshrl.u32 %v1886_v42, 16 }
 0x192   :  { %v2950_v63 = vpop.f32.mrf.mxu1  ;;  %v2741_v30 = vunpack.c.l.b16 %v2298_v28  ;;  %v5409_v18 = vsel %vm12406_vm15, %v5404_v13, %v12897_v57  ;;  %v3580_v7 = vsel %vm12377_vm12, %v11070_v56, %v3579_v20 }
 0x193   :  { %v3159_v19 = vadd.f32 %v2950_v63, %v12595_v58  ;;  %v2288_v58 = vsel %vm12406_vm15, %v2283_v17, %v12882_v12  ;;  %v2309_v12 = vshll.u32 %v1886_v42, 16  ;;  %v2305_v26 = vrot.slane %v2303_v35, 5 }
 0x194   :  { %v2740_v53 = vunpack.c.l.b16 %v2288_v58  ;;  %v2315_v57 = vrot.slane %v2313_v27, 4  ;;  %v5861_v42 = vunpack.c.l.b16 %v5409_v18  ;;  %v12947_v27 = vld [vmem:[#allocation2 + $0xdc] sm:$0xf] }
 0x195   :  { %11036 = vmatmul.msk.bf16.gmra.mxu1 %vm1510_vm7, %v2789_v59  ;;  %v4148_v47 = vadd.f32 %v3939_v31, %v3159_v19  ;;  %v4634_v43 = vpop.f32.mrf.mxu3  ;;  %v3941_v46 = vpop.f32.mrf.mxu2  ;;  %v5414_v31 = vrot.slane %v5413_v25, 4  ;;  %v2300_v59 = vshrl.u32 %v1885_v49, 16  ;;  %v3583_v25 = vsel %vm12377_vm12, %v3581_v32, %v3582_v6 }
 0x196   :  { %v4845_v11 = vadd.f32 %v4634_v43, %v4147_v37  ;;  %v12918_v14 = vpop.f32.mrf.mxu0  ;;  %v5009_v17 = vld [vmem:[#allocation2 + $0xc0] sm:$0xf]  ;;  %v12940_v61 = vrot.slane %v2309_v12, 5  ;;  %v1887_v43 = vld [vmem:[#allocation2 + $0xbc] sm:$0x1] }
 0x197   :  { %v5419_v63 = vsel %vm12406_vm15, %v5414_v31, %v5418_v38  ;;  %v5010_v2 = vld [vmem:[#allocation2 + $0xc4] sm:$0xf]  ;;  %v2302_v19 = vrot.slane %v2300_v59, 4  ;;  %v5424_v58 = vshll.u32 %v5009_v17, 16  ;;  %v2790_v31 = vpack.c.b16 %v2741_v30, %v2740_v53 }
 0x198   :  { %v12923_v55 = vadd.f32 %v6068_v24, %v4845_v11  ;;  %v1155_v24 = vld [vmem:[#allocation2 + $0xc8] sm:$0x1]  ;;  %v5430_v13 = vshll.u32 %v5010_v2, 16  ;;  %v5434_v20 = vshrl.u32 %v5010_v2, 16  ;;  %v5862_v11 = vunpack.c.l.b16 %v5419_v63 }
 0x199   :  { %11316 = vmatmul.msk.bf16.gmra.mxu0 %vm1510_vm7, %v5910_v45  ;;  %v2306_v28 = vor.u32 %v2305_v26, %v2302_v19  ;;  %v2316_v56 = vor.u32 %v2315_v57, %v12940_v61  ;;  %v2319_v32 = vshll.u32 %v1887_v43, 16  ;;  %v3586_v19 = vrot.slane %v12947_v27, 5  ;;  %v1890_v27 = vld [vmem:[#allocation2 + $0xe0] sm:$0x1] }
 0x19a   :  { %v2952_v37 = vpop.f32.mrf.mxu1  ;;  %11276 = vmatmul.msk.bf16.gmra.mxu3 %vm1510_vm7, %v11738_v39  ;;  %11109 = vmatmul.msk.bf16.gmra.mxu2 %vm1510_vm7, %v3779_v60  ;;  %v5421_v60 = vshrl.u32 %v5009_v17, 16  ;;  %v3732_v39 = vunpack.c.l.b16 %v3583_v25  ;;  %v12945_v6 = vrot.slane %v5430_v13, 5  ;;  %v5436_v12 = vrot.slane %v5434_v20, 4  ;;  %v1889_v17 = vld [vmem:[#allocation2 + $0xdc] sm:$0xf]  ;;  %v11739_v13 = vld [vmem:[#allocation2 + $0xb4] sm:$0xff] }
 0x19b   :  { %v3160_v52 = vadd.f32 %v2952_v37, %v12622_v4  ;;  %v1156_v4 = vsel %vm11975_vm3, %v675_v21, %v1155_v24  ;;  %v5426_v21 = vrot.slane %v5424_v58, 5  ;;  %v1888_v37 = vld [vmem:[#allocation2 + $0xd8] sm:$0xf]  ;;  %v2307_v63 = vrot.slane %v2306_v28, 4 }
 0x19c   :  { %1157 = vst [vmem:[#allocation2 + $0xc8] sm:$0x1] %v1156_v4  ;;  %v5423_v35 = vrot.slane %v5421_v60, 4  ;;  %v2317_v30 = vrot.slane %v2316_v56, 4  ;;  %v2321_v2 = vrot.slane %v2319_v32, 5  ;;  %v5437_v57 = vor.u32 %v5436_v12, %v12945_v6 }
 0x19d   :  { %v4149_v10 = vadd.f32 %v3941_v46, %v3160_v52  ;;  %v4637_v45 = vpop.f32.mrf.mxu3  ;;  %v3944_v49 = vpop.f32.mrf.mxu2  ;;  %v3731_v46 = vunpack.c.l.b16 %v3580_v7  ;;  %v5911_v52 = vpack.c.b16 %v5862_v11, %v5861_v42  ;;  %v3325_v7 = vld [vmem:[#allocation2 + $0xd8] sm:$0xe]  ;;  %v2327_v43 = vshll.u32 %v1888_v37, 16  ;;  %v11795_v42 = vld [vmem:[#allocation7 + $0x60] sm:$0xff]  ;;  %v5012_v32 = vld [vmem:[#allocation2 + $0xe4] sm:$0xf] }
 0x19e   :  { %v4846_v38 = vadd.f32 %v4637_v45, %v4148_v47  ;;  %v12942_v23 = vpop.f32.mrf.mxu0  ;;  %v5427_v25 = vor.u32 %v5426_v21, %v5423_v35  ;;  %v2324_v45 = vshrl.u32 %v1888_v37, 16  ;;  %v2337_v11 = vshrl.u32 %v1889_v17, 16  ;;  %7729 = vmatpush.bf16.msra.mxu2 %v11795_v42 }
 0x19f   :  { %v3780_v18 = vpack.c.b16 %v3732_v39, %v3731_v46  ;;  %v11071_v46 = vrot.slane %v3325_v7, 9  ;;  %v2312_v28 = vsel %vm12406_vm15, %v2307_v63, %v12940_v61  ;;  %v3588_v56 = vrot.slane %v3586_v19, 4 }
 0x1a0   :  { %v12956_v39 = vadd.f32 %v12918_v14, %v4846_v38  ;;  %v5428_v21 = vrot.slane %v5427_v25, 4  ;;  %v5438_v12 = vrot.slane %v5437_v57, 4  ;;  %v2326_v14 = vrot.slane %v2324_v45, 4 }
 0x1a1   :  { %v2329_v38 = vrot.slane %v2327_v43, 5  ;;  %v2339_v63 = vrot.slane %v2337_v11, 4  ;;  %v2742_v25 = vunpack.c.l.b16 %v2312_v28  ;;  %v11799_v28 = vld [vmem:[#allocation7 + $0x80] sm:$0xff] }
 0x1a2   :  { %v2955_v59 = vpop.f32.mrf.mxu1  ;;  %10149 = vmatpush.bf16.msra.mxu0 %v11799_v28  ;;  %v3328_v28 = vld [vmem:[#allocation2 + $0xe4] sm:$0xe] }
 0x1a3   :  { %v3161_v47 = vadd.f32 %v2955_v59, %v12639_v50  ;;  %v5011_v24 = vld [vmem:[#allocation2 + $0xc8] sm:$0x1]  ;;  %v3327_v50 = vld [vmem:[#allocation2 + $0xe0] sm:$0x1] }
 0x1a4   :  { %v5440_v20 = vshll.u32 %v5011_v24, 16  ;;  %v5013_v59 = vld [vmem:[#allocation2 + $0xe8] sm:$0xf]  ;;  %v11797_v24 = vld [vmem:[#allocation7 + $0x70] sm:$0xff] }
 0x1a5   :  { %11037 = vmatmul.msk.bf16.gmra.mxu1 %vm1510_vm7, %v2790_v31  ;;  %v4150_v53 = vadd.f32 %v3944_v49, %v3161_v47  ;;  %v4639_v26 = vpop.f32.mrf.mxu3  ;;  %v3946_v4 = vpop.f32.mrf.mxu2  ;;  %v2333_v49 = vshll.u32 %v1889_v17, 16  ;;  %v2322_v31 = vsel %vm12406_vm15, %v2317_v30, %v2321_v2  ;;  %v11761_v17 = vld [vmem:[#allocation7 + $0x50] sm:$0xff]  ;;  %v5445_v30 = vshrl.u32 %v5012_v32, 16  ;;  %9163 = vmatpush.bf16.msra.mxu3 %v11797_v24 }
 0x1a6   :  { %v4847_v60 = vadd.f32 %v4639_v26, %v4149_v10  ;;  %v12953_v58 = vpop.f32.mrf.mxu0  ;;  %v3589_v10 = vrot.slane %v3327_v50, 5  ;;  %v5442_v47 = vrot.slane %v5440_v20, 5  ;;  %v5454_v2 = vshll.u32 %v5013_v59, 16  ;;  %7030 = vmatpush.bf16.msra.mxu1 %v11761_v17 }
 0x1a7   :  { %v12967_v37 = vrot.slane %v2333_v49, 5  ;;  %v5458_v7 = vshrl.u32 %v5013_v59, 16  ;;  %v2743_v57 = vunpack.c.l.b16 %v2322_v31  ;;  %v2330_v49 = vor.u32 %v2329_v38, %v2326_v14 }
 0x1a8   :  { %v3590_v43 = vsel %vm12377_vm12, %v3588_v56, %v3589_v10  ;;  %v5447_v31 = vrot.slane %v5445_v30, 4  ;;  %v12979_v59 = vrot.slane %v5454_v2, 5 }
 0x1a9   :  { %11317 = vmatmul.msk.bf16.gmra.mxu0 %vm1510_vm7, %v5911_v52  ;;  %v5448_v52 = vshll.u32 %v5012_v32, 16  ;;  %v2340_v11 = vor.u32 %v2339_v63, %v12967_v37  ;;  %v2331_v14 = vrot.slane %v2330_v49, 4 }
 0x1aa   :  { %v2957_v35 = vpop.f32.mrf.mxu1  ;;  %11277 = vmatmul.msk.bf16.gmra.mxu3 %vm1510_vm7, %v11739_v13  ;;  %11110 = vmatmul.msk.bf16.gmra.mxu2 %vm1510_vm7, %v3780_v18  ;;  %v3587_v18 = vsel %vm12377_vm12, %v11071_v46, %v3586_v19  ;;  %v2343_v13 = vshll.u32 %v1890_v27, 16  ;;  %v5014_v19 = vld [vmem:[#allocation2 + $0xec] sm:$0x1]  ;;  %v12982_v46 = vadd.f32 %v12942_v23, %v4847_v60  ;;  %v3329_v23 = vld [vmem:[#allocation2 + $0xe8] sm:$0xf] }
 0x1ab   :  { %v3162_v61 = vadd.f32 %v2957_v35, %v12659_v40  ;;  %v5433_v40 = vsel %vm12406_vm15, %v5428_v21, %v12945_v6  ;;  %v5450_v32 = vrot.slane %v5448_v52, 5  ;;  %v5460_v6 = vrot.slane %v5458_v7, 4  ;;  %v1892_v7 = vld [vmem:[#allocation2 + $0xe8] sm:$0xf] }
 0x1ac   :  { %v2791_v35 = vpack.c.b16 %v2743_v57, %v2742_v25  ;;  %v5863_v56 = vunpack.c.l.b16 %v5433_v40  ;;  %v3733_v21 = vunpack.c.l.b16 %v3587_v18  ;;  %v2341_v38 = vrot.slane %v2340_v11, 4  ;;  %v11740_v18 = vld [vmem:[#allocation2 + $0xc0] sm:$0xff] }
 0x1ad   :  { %v4151_v26 = vadd.f32 %v3946_v4, %v3162_v61  ;;  %v4642_v50 = vpop.f32.mrf.mxu3  ;;  %v3949_v45 = vpop.f32.mrf.mxu2  ;;  %v5443_v4 = vsel %vm12406_vm15, %v5438_v12, %v5442_v47  ;;  %v3734_v12 = vunpack.c.l.b16 %v3590_v43  ;;  %v2345_v61 = vrot.slane %v2343_v13, 5  ;;  %v1891_v47 = vld [vmem:[#allocation2 + $0xe4] sm:$0xf] }
 0x1ae   :  { %v4848_v20 = vadd.f32 %v4642_v50, %v4150_v53  ;;  %v6078_v42 = vpop.f32.mrf.mxu0  ;;  %v5864_v10 = vunpack.c.l.b16 %v5443_v4  ;;  %v5451_v63 = vor.u32 %v5450_v32, %v5447_v31  ;;  %v5461_v24 = vor.u32 %v5460_v6, %v12979_v59  ;;  %v3330_v32 = vld [vmem:[#allocation2 + $0xec] sm:$0x1] }
 0x1af   :  { %v5464_v17 = vshll.u32 %v5014_v19, 16  ;;  %v2348_v25 = vshrl.u32 %v1891_v47, 16  ;;  %v2351_v57 = vshll.u32 %v1891_v47, 16  ;;  %v3781_v43 = vpack.c.b16 %v3734_v12, %v3733_v21  ;;  %v5016_v12 = vld [vmem:[#allocation2 + $0xf4] sm:$0xf] }
 0x1b0   :  { %v5912_v52 = vpack.c.b16 %v5864_v10, %v5863_v56  ;;  %v2336_v13 = vsel %vm12406_vm15, %v2331_v14, %v12967_v37  ;;  %v5452_v4 = vrot.slane %v5451_v63, 4  ;;  %v5462_v49 = vrot.slane %v5461_v24, 4 }
 0x1b1   :  { %v5466_v11 = vrot.slane %v5464_v17, 5  ;;  %v3593_v31 = vrot.slane %v3329_v23, 5  ;;  %v2357_v6 = vshll.u32 %v1892_v7, 16  ;;  %v2353_v19 = vrot.slane %v2351_v57, 5  ;;  %v1893_v23 = vld [vmem:[#allocation2 + $0xec] sm:$0x1] }
 0x1b2   :  { %v2960_v53 = vpop.f32.mrf.mxu1  ;;  %v2744_v56 = vunpack.c.l.b16 %v2336_v13  ;;  %v11072_v21 = vrot.slane %v3328_v28, 9 }
 0x1b3   :  { %v3163_v27 = vadd.f32 %v2960_v53, %v12684_v33  ;;  %v12988_v33 = vadd.f32 %v12953_v58, %v4848_v20  ;;  %v2361_v58 = vshrl.u32 %v1892_v7, 16  ;;  %v5015_v53 = vld [vmem:[#allocation2 + $0xf0] sm:$0xf]  ;;  %v3595_v14 = vrot.slane %v3593_v31, 4 }
 0x1b4   :  { %v2359_v47 = vrot.slane %v2357_v6, 5  ;;  %v5469_v24 = vshrl.u32 %v5015_v53, 16  ;;  %v5478_v7 = vshll.u32 %v5016_v12, 16  ;;  %v3594_v13 = vsel %vm12377_vm12, %v11072_v21, %v3593_v31  ;;  %v5017_v6 = vld [vmem:[#allocation2 + $0xf8] sm:$0x1] }
 0x1b5   :  { %11038 = vmatmul.msk.bf16.gmra.mxu1 %vm1510_vm7, %v2791_v35  ;;  %v4152_v30 = vadd.f32 %v3949_v45, %v3163_v27  ;;  %v4644_v60 = vpop.f32.mrf.mxu3  ;;  %v3951_v2 = vpop.f32.mrf.mxu2  ;;  %v2346_v45 = vsel %vm12406_vm15, %v2341_v38, %v2345_v61  ;;  %v2350_v35 = vrot.slane %v2348_v25, 4  ;;  %v5467_v27 = vsel %vm12406_vm15, %v5462_v49, %v5466_v11  ;;  %v3332_v31 = vld [vmem:[#allocation2 + $0xf4] sm:$0xf] }
 0x1b6   :  { %v4849_v50 = vadd.f32 %v4644_v60, %v4151_v26  ;;  %v6081_v40 = vpop.f32.mrf.mxu0  ;;  %v2745_v10 = vunpack.c.l.b16 %v2346_v45  ;;  %v3596_v38 = vrot.slane %v3330_v32, 5  ;;  %v2363_v63 = vrot.slane %v2361_v58, 4 }
 0x1b7   :  { %v2354_v60 = vor.u32 %v2353_v19, %v2350_v35  ;;  %v5482_v25 = vshrl.u32 %v5016_v12, 16  ;;  %v5471_v49 = vrot.slane %v5469_v24, 4  ;;  %v3735_v19 = vunpack.c.l.b16 %v3594_v13 }
 0x1b8   :  { %v12995_v20 = vadd.f32 %v6078_v42, %v4849_v50  ;;  %v5457_v42 = vsel %vm12406_vm15, %v5452_v4, %v12979_v59  ;;  %v2364_v45 = vor.u32 %v2363_v63, %v2359_v47  ;;  %v2367_v4 = vshll.u32 %v1893_v23, 16 }
 0x1b9   :  { %11318 = vmatmul.msk.bf16.gmra.mxu0 %vm1510_vm7, %v5912_v52  ;;  %v5472_v52 = vshll.u32 %v5015_v53, 16  ;;  %v5865_v59 = vunpack.c.l.b16 %v5457_v42  ;;  %v2355_v32 = vrot.slane %v2354_v60, 4  ;;  %v5488_v12 = vshll.u32 %v5017_v6, 16  ;;  %v1895_v42 = vld [vmem:[#allocation2 + $0xf4] sm:$0xf]  ;;  %v11741_v60 = vld [vmem:[#allocation2 + $0xe4] sm:$0xff] }
 0x1ba   :  { %v2962_v26 = vpop.f32.mrf.mxu1  ;;  %11278 = vmatmul.msk.bf16.gmra.mxu3 %vm1510_vm7, %v11740_v18  ;;  %11111 = vmatmul.msk.bf16.gmra.mxu2 %vm1510_vm7, %v3781_v43  ;;  %v2792_v18 = vpack.c.b16 %v2745_v10, %v2744_v56  ;;  %v5866_v43 = vunpack.c.l.b16 %v5467_v27  ;;  %v1894_v56 = vld [vmem:[#allocation2 + $0xf0] sm:$0xf]  ;;  %v2365_v21 = vrot.slane %v2364_v45, 4  ;;  %v3600_v24 = vrot.slane %v3332_v31, 5  ;;  %v5019_v6 = vld [vmem:[#allocation2 + $0x100] sm:$0xf] }
 0x1bb   :  { %v3164_v37 = vadd.f32 %v2962_v26, %v12700_v9  ;;  %v5474_v58 = vrot.slane %v5472_v52, 5  ;;  %v5484_v26 = vrot.slane %v5482_v25, 4  ;;  %v2372_v25 = vshrl.u32 %v1894_v56, 16 }
 0x1bd   :  { %v4153_v61 = vadd.f32 %v3951_v2, %v3164_v37  ;;  %v4647_v9 = vpop.f32.mrf.mxu3  ;;  %v3954_v17 = vpop.f32.mrf.mxu2  ;;  %v3597_v2 = vsel %vm12377_vm12, %v3595_v14, %v3596_v38  ;;  %v5913_v37 = vpack.c.b16 %v5866_v43, %v5865_v59  ;;  %v2360_v38 = vsel %vm12406_vm15, %v2355_v32, %v2359_v47  ;;  %v5018_v47 = vld [vmem:[#allocation2 + $0xfc] sm:$0xf] }
 0x1be   :  { %v4850_v57 = vadd.f32 %v4647_v9, %v4152_v30  ;;  %v6083_v50 = vpop.f32.mrf.mxu0  ;;  %v13012_v30 = vrot.slane %v5478_v7, 5  ;;  %v3736_v53 = vunpack.c.l.b16 %v3597_v2  ;;  %v5475_v63 = vor.u32 %v5474_v58, %v5471_v49  ;;  %v3331_v7 = vld [vmem:[#allocation2 + $0xf0] sm:$0xe] }
 0x1bf   :  { %v2385_v59 = vshrl.u32 %v1895_v42, 16  ;;  %v2746_v13 = vunpack.c.l.b16 %v2360_v38  ;;  %v5490_v2 = vrot.slane %v5488_v12, 5  ;;  %v3602_v32 = vrot.slane %v3600_v24, 4 }
 0x1c0   :  { %v13010_v11 = vadd.f32 %v6081_v40, %v4850_v57  ;;  %v2369_v40 = vrot.slane %v2367_v4, 5  ;;  %v3782_v52 = vpack.c.b16 %v3736_v53, %v3735_v19  ;;  %v3333_v57 = vld [vmem:[#allocation2 + $0xf8] sm:$0x1]  ;;  %v5476_v4 = vrot.slane %v5475_v63, 4 }
 0x1c1   :  { %v5493_v31 = vshrl.u32 %v5018_v47, 16  ;;  %v5502_v12 = vshll.u32 %v5019_v6, 16 }
 0x1c2   :  { %v2965_v28 = vpop.f32.mrf.mxu1  ;;  %v2370_v43 = vsel %vm12406_vm15, %v2365_v21, %v2369_v40  ;;  %v1896_v40 = vld [vmem:[#allocation2 + $0xf8] sm:$0x1] }
 0x1c3   :  { %v3165_v35 = vadd.f32 %v2965_v28, %v12366_v62  ;;  %v5485_v62 = vor.u32 %v5484_v26, %v13012_v30  ;;  %v11073_v28 = vrot.slane %v3331_v7, 9  ;;  %v3603_v26 = vrot.slane %v3333_v57, 5 }
 0x1c4   :  { %v2747_v21 = vunpack.c.l.b16 %v2370_v43 }
 0x1c5   :  { %11039 = vmatmul.msk.bf16.gmra.mxu1 %vm1510_vm7, %v2792_v18  ;;  %v4154_v10 = vadd.f32 %v3954_v17, %v3165_v35  ;;  %v4649_v27 = vpop.f32.mrf.mxu3  ;;  %v3956_v14 = vpop.f32.mrf.mxu2  ;;  %v2375_v17 = vshll.u32 %v1894_v56, 16  ;;  %v2381_v18 = vshll.u32 %v1895_v42, 16  ;;  %v5486_v49 = vrot.slane %v5485_v62, 4 }
 0x1c6   :  { %v4851_v9 = vadd.f32 %v4649_v27, %v4153_v61  ;;  %v6086_v23 = vpop.f32.mrf.mxu0  ;;  %v2374_v35 = vrot.slane %v2372_v25, 4  ;;  %v5506_v42 = vshrl.u32 %v5019_v6, 16  ;;  %v2391_v25 = vshll.u32 %v1896_v40, 16  ;;  %v1898_v40 = vld [vmem:[#allocation2 + $0x100] sm:$0xf] }
 0x1c7   :  { %v2377_v19 = vrot.slane %v2375_v17, 5  ;;  %v13027_v53 = vrot.slane %v2381_v18, 5  ;;  %v5491_v63 = vsel %vm12406_vm15, %v5486_v49, %v5490_v2  ;;  %v5495_v17 = vrot.slane %v5493_v31, 4 }
 0x1c8   :  { %v13021_v45 = vadd.f32 %v6083_v50, %v4851_v9  ;;  %v2387_v50 = vrot.slane %v2385_v59, 4  ;;  %v2793_v18 = vpack.c.b16 %v2747_v21, %v2746_v13  ;;  %v5020_v59 = vld [vmem:[#allocation2 + $0x104] sm:$0x1]  ;;  %v5508_v43 = vrot.slane %v5506_v42, 4 }
 0x1c9   :  { %11319 = vmatmul.msk.bf16.gmra.mxu0 %vm1510_vm7, %v5913_v37  ;;  %v5496_v37 = vshll.u32 %v5018_v47, 16  ;;  %v2393_v6 = vrot.slane %v2391_v25, 5  ;;  %v3336_v25 = vld [vmem:[#allocation2 + $0x104] sm:$0x1] }
 0x1ca   :  { %v2967_v61 = vpop.f32.mrf.mxu1  ;;  %11279 = vmatmul.msk.bf16.gmra.mxu3 %vm1510_vm7, %v11741_v60  ;;  %11112 = vmatmul.msk.bf16.gmra.mxu2 %vm1510_vm7, %v3782_v52  ;;  %v3601_v60 = vsel %vm12377_vm12, %v11073_v28, %v3600_v24  ;;  %v2378_v52 = vor.u32 %v2377_v19, %v2374_v35  ;;  %v2388_v7 = vor.u32 %v2387_v50, %v13027_v53  ;;  %v1897_v35 = vld [vmem:[#allocation2 + $0xfc] sm:$0xf] }
 0x1cb   :  { %v3166_v58 = vadd.f32 %v2967_v61, %v12401_v54  ;;  %v5481_v54 = vsel %vm12406_vm15, %v5476_v4, %v13012_v30  ;;  %v5498_v57 = vrot.slane %v5496_v37, 5  ;;  %v13039_v30 = vrot.slane %v5502_v12, 5 }
 0x1cc   :  { %v5867_v47 = vunpack.c.l.b16 %v5481_v54  ;;  %v5868_v61 = vunpack.c.l.b16 %v5491_v63  ;;  %v3737_v24 = vunpack.c.l.b16 %v3601_v60  ;;  %v2379_v28 = vrot.slane %v2378_v52, 4 }
 0x1cd   :  { %v4155_v56 = vadd.f32 %v3956_v14, %v3166_v58  ;;  %v4652_v27 = vpop.f32.mrf.mxu3  ;;  %v3959_v38 = vpop.f32.mrf.mxu2  ;;  %v3604_v14 = vsel %vm12377_vm12, %v3602_v32, %v3603_v26  ;;  %v2389_v32 = vrot.slane %v2388_v7, 4  ;;  %v5499_v58 = vor.u32 %v5498_v57, %v5495_v17  ;;  %v3334_v7 = vld [vmem:[#allocation2 + $0xfc] sm:$0xe] }
 0x1ce   :  { %v4852_v62 = vadd.f32 %v4652_v27, %v4154_v10  ;;  %v6088_v9 = vpop.f32.mrf.mxu0  ;;  %v3738_v4 = vunpack.c.l.b16 %v3604_v14  ;;  %v5512_v26 = vshll.u32 %v5020_v59, 16  ;;  %v5509_v19 = vor.u32 %v5508_v43, %v13039_v30 }
 0x1cf   :  { %v5914_v31 = vpack.c.b16 %v5868_v61, %v5867_v47  ;;  %v2384_v27 = vsel %vm12406_vm15, %v2379_v28, %v13027_v53  ;;  %v2396_v54 = vshrl.u32 %v1897_v35, 16  ;;  %v2399_v63 = vshll.u32 %v1897_v35, 16  ;;  %v5021_v53 = vld [vmem:[#allocation2 + $0x108] sm:$0xf] }
 0x1d0   :  { %v13041_v2 = vadd.f32 %v6086_v23, %v4852_v62  ;;  %v3335_v23 = vld [vmem:[#allocation2 + $0x100] sm:$0xf]  ;;  %v3783_v21 = vpack.c.b16 %v3738_v4, %v3737_v24  ;;  %v5500_v62 = vrot.slane %v5499_v58, 4  ;;  %v5514_v60 = vrot.slane %v5512_v26, 5  ;;  %v5022_v24 = vld [vmem:[#allocation2 + $0x10c] sm:$0xf] }
 0x1d1   :  { %v3607_v14 = vrot.slane %v3335_v23, 5  ;;  %v5510_v52 = vrot.slane %v5509_v19, 4  ;;  %v2405_v17 = vshll.u32 %v1898_v40, 16  ;;  %v2409_v59 = vshrl.u32 %v1898_v40, 16  ;;  %v1899_v19 = vld [vmem:[#allocation2 + $0x104] sm:$0x1] }
 0x1d2   :  { %v2970_v10 = vpop.f32.mrf.mxu1  ;;  %v2398_v47 = vrot.slane %v2396_v54, 4  ;;  %v2401_v61 = vrot.slane %v2399_v63, 5  ;;  %v11074_v4 = vrot.slane %v3334_v7, 9  ;;  %v3610_v28 = vrot.slane %v3336_v25, 5  ;;  %v5023_v25 = vld [vmem:[#allocation2 + $0x110] sm:$0x1] }
 0x1d3   :  { %v3167_v49 = vadd.f32 %v2970_v10, %v12424_v51  ;;  %v11742_v51 = vld [vmem:[#allocation2 + $0xf0] sm:$0xff]  ;;  %v2407_v58 = vrot.slane %v2405_v17, 5  ;;  %v5517_v26 = vshrl.u32 %v5021_v53, 16  ;;  %v2411_v23 = vrot.slane %v2409_v59, 4 }
 0x1d5   :  { %11040 = vmatmul.msk.bf16.gmra.mxu1 %vm1510_vm7, %v2793_v18  ;;  %v4156_v13 = vadd.f32 %v3959_v38, %v3167_v49  ;;  %v4654_v50 = vpop.f32.mrf.mxu3  ;;  %v3961_v37 = vpop.f32.mrf.mxu2  ;;  %v2394_v38 = vsel %vm12406_vm15, %v2389_v32, %v2393_v6  ;;  %v2748_v18 = vunpack.c.l.b16 %v2384_v27  ;;  %v3609_v49 = vrot.slane %v3607_v14, 4 }
 0x1d6   :  { %v4853_v12 = vadd.f32 %v4654_v50, %v4155_v56  ;;  %v6091_v42 = vpop.f32.mrf.mxu0  ;;  %v2749_v10 = vunpack.c.l.b16 %v2394_v38  ;;  %v5515_v6 = vsel %vm12406_vm15, %v5510_v52, %v5514_v60  ;;  %v5520_v50 = vshll.u32 %v5021_v53, 16 }
 0x1d7   :  { %v3611_v54 = vsel %vm12377_vm12, %v3609_v49, %v3610_v28  ;;  %v5870_v63 = vunpack.c.l.b16 %v5515_v6  ;;  %v2415_v38 = vshll.u32 %v1899_v19, 16  ;;  %v2412_v7 = vor.u32 %v2411_v23, %v2407_v58  ;;  %v11743_v19 = vld [vmem:[#allocation2 + $0xfc] sm:$0xff] }
 0x1d8   :  { %v13051_v57 = vadd.f32 %v6088_v9, %v4853_v12  ;;  %v5505_v9 = vsel %vm12406_vm15, %v5500_v62, %v13039_v30  ;;  %v2794_v30 = vpack.c.b16 %v2749_v10, %v2748_v18  ;;  %v5519_v62 = vrot.slane %v5517_v26, 4  ;;  %v1901_v26 = vld [vmem:[#allocation2 + $0x10c] sm:$0xf] }
 0x1d9   :  { %11320 = vmatmul.msk.bf16.gmra.mxu0 %vm1510_vm7, %v5914_v31  ;;  %v5526_v31 = vshll.u32 %v5022_v24, 16  ;;  %v5869_v27 = vunpack.c.l.b16 %v5505_v9  ;;  %v5522_v17 = vrot.slane %v5520_v50, 5  ;;  %v3740_v53 = vunpack.c.l.b16 %v3611_v54  ;;  %v5024_v54 = vld [vmem:[#allocation2 + $0x114] sm:$0xf] }
 0x1da   :  { %v2972_v56 = vpop.f32.mrf.mxu1  ;;  %11280 = vmatmul.msk.bf16.gmra.mxu3 %vm1510_vm7, %v11742_v51  ;;  %11113 = vmatmul.msk.bf16.gmra.mxu2 %vm1510_vm7, %v3783_v21  ;;  %v5530_v21 = vshrl.u32 %v5022_v24, 16  ;;  %v2402_v51 = vor.u32 %v2401_v61, %v2398_v47  ;;  %v5536_v61 = vshll.u32 %v5023_v25, 16  ;;  %v2417_v49 = vrot.slane %v2415_v38, 5 }
 0x1db   :  { %v3168_v43 = vadd.f32 %v2972_v56, %v12446_v48  ;;  %v5915_v10 = vpack.c.b16 %v5870_v63, %v5869_v27  ;;  %v5523_v28 = vor.u32 %v5522_v17, %v5519_v62  ;;  %v2429_v27 = vshll.u32 %v1901_v26, 16 }
 0x1dc   :  { %v5532_v56 = vrot.slane %v5530_v21, 4  ;;  %v3337_v21 = vld [vmem:[#allocation2 + $0x108] sm:$0xe] }
 0x1dd   :  { %v4157_v32 = vadd.f32 %v3961_v37, %v3168_v43  ;;  %v4657_v48 = vpop.f32.mrf.mxu3  ;;  %v3964_v35 = vpop.f32.mrf.mxu2  ;;  %v3608_v37 = vsel %vm12377_vm12, %v11074_v4, %v3607_v14  ;;  %v2403_v14 = vrot.slane %v2402_v51, 4  ;;  %v3338_v43 = vld [vmem:[#allocation2 + $0x10c] sm:$0xf]  ;;  %v2413_v4 = vrot.slane %v2412_v7, 4 }
 0x1de   :  { %v4854_v40 = vadd.f32 %v4657_v48, %v4156_v13  ;;  %v6093_v12 = vpop.f32.mrf.mxu0  ;;  %v13068_v13 = vrot.slane %v5526_v31, 5  ;;  %v3739_v59 = vunpack.c.l.b16 %v3608_v37  ;;  %v3614_v31 = vrot.slane %v3338_v43, 5 }
 0x1df   :  { %v2408_v50 = vsel %vm12406_vm15, %v2403_v14, %v2407_v58  ;;  %v2433_v37 = vshrl.u32 %v1901_v26, 16  ;;  %v2418_v38 = vsel %vm12406_vm15, %v2413_v4, %v2417_v49  ;;  %v11075_v25 = vrot.slane %v3337_v21, 9  ;;  %v1902_v49 = vld [vmem:[#allocation2 + $0x110] sm:$0x1] }
 0x1e0   :  { %v13066_v60 = vadd.f32 %v6091_v42, %v4854_v40  ;;  %v1900_v42 = vld [vmem:[#allocation2 + $0x108] sm:$0xf]  ;;  %v5533_v6 = vor.u32 %v5532_v56, %v13068_v13  ;;  %v3784_v23 = vpack.c.b16 %v3740_v53, %v3739_v59  ;;  %v2750_v62 = vunpack.c.l.b16 %v2408_v50 }
 0x1e1   :  { %v2420_v40 = vshrl.u32 %v1900_v42, 16  ;;  %v2423_v51 = vshll.u32 %v1900_v42, 16  ;;  %v3616_v17 = vrot.slane %v3614_v31, 4  ;;  %v5541_v53 = vshrl.u32 %v5024_v54, 16 }
 0x1e2   :  { %v2975_v52 = vpop.f32.mrf.mxu1  ;;  %v5534_v58 = vrot.slane %v5533_v6, 4  ;;  %v5544_v14 = vshll.u32 %v5024_v54, 16  ;;  %v2435_v42 = vrot.slane %v2433_v37, 4 }
 0x1e3   :  { %v3169_v18 = vadd.f32 %v2975_v52, %v12470_v41  ;;  %v5524_v52 = vrot.slane %v5523_v28, 4  ;;  %v2425_v59 = vrot.slane %v2423_v51, 5  ;;  %v5543_v21 = vrot.slane %v5541_v53, 4 }
 0x1e4   :  { %v2439_v51 = vshll.u32 %v1902_v49, 16  ;;  %v1904_v49 = vld [vmem:[#allocation2 + $0x118] sm:$0xf] }
 0x1e5   :  { %11041 = vmatmul.msk.bf16.gmra.mxu1 %vm1510_vm7, %v2794_v30  ;;  %v4158_v47 = vadd.f32 %v3964_v35, %v3169_v18  ;;  %v4659_v24 = vpop.f32.mrf.mxu3  ;;  %v3966_v9 = vpop.f32.mrf.mxu2  ;;  %v3339_v35 = vld [vmem:[#allocation2 + $0x110] sm:$0x1]  ;;  %v5538_v30 = vrot.slane %v5536_v61, 5  ;;  %v2422_v18 = vrot.slane %v2420_v40, 4  ;;  %v13083_v61 = vrot.slane %v2429_v27, 5 }
 0x1e6   :  { %v4855_v48 = vadd.f32 %v4659_v24, %v4157_v32  ;;  %v6096_v41 = vpop.f32.mrf.mxu0  ;;  %v3617_v56 = vrot.slane %v3339_v35, 5  ;;  %v5546_v35 = vrot.slane %v5544_v14, 5 }
 0x1e7   :  { %v2426_v50 = vor.u32 %v2425_v59, %v2422_v18  ;;  %v2441_v18 = vrot.slane %v2439_v51, 5  ;;  %v5027_v51 = vld [vmem:[#allocation2 + $0x120] sm:$0xf] }
 0x1e8   :  { %v13075_v63 = vadd.f32 %v6093_v12, %v4855_v48  ;;  %v5025_v12 = vld [vmem:[#allocation2 + $0x118] sm:$0xf]  ;;  %v5529_v48 = vsel %vm12406_vm15, %v5524_v52, %v13068_v13 }
 0x1e9   :  { %11321 = vmatmul.msk.bf16.gmra.mxu0 %vm1510_vm7, %v5915_v10  ;;  %v2751_v10 = vunpack.c.l.b16 %v2418_v38  ;;  %v5550_v28 = vshll.u32 %v5025_v12, 16  ;;  %v5871_v13 = vunpack.c.l.b16 %v5529_v48  ;;  %v14560_v38 = vld [vmem:[#allocation27_spill] sm:$0xff] }
 0x1ea   :  { %v2977_v32 = vpop.f32.mrf.mxu1  ;;  %11281 = vmatmul.msk.bf16.gmra.mxu3 %vm1510_vm7, %v11743_v19  ;;  %11114 = vmatmul.msk.bf16.gmra.mxu2 %vm1510_vm7, %v3784_v23  ;;  %v5539_v19 = vsel %vm12406_vm15, %v5534_v58, %v5538_v30  ;;  %v3618_v23 = vsel %vm12377_vm12, %v3616_v17, %v3617_v56  ;;  %v2427_v17 = vrot.slane %v2426_v50, 4  ;;  %v5547_v56 = vor.u32 %v5546_v35, %v5543_v21  ;;  %v3342_v21 = vld [vmem:[#allocation2 + $0x11c] sm:$0x1] }
 0x1eb   :  { %v3170_v7 = vadd.f32 %v2977_v32, %v12499_v3  ;;  %v5554_v3 = vshrl.u32 %v5025_v12, 16  ;;  %v2795_v40 = vpack.c.b16 %v2751_v10, %v2750_v62  ;;  %v5872_v54 = vunpack.c.l.b16 %v5539_v19  ;;  %v1903_v62 = vld [vmem:[#allocation2 + $0x114] sm:$0xf] }
 0x1ec   :  { %v13097_v32 = vrot.slane %v5550_v28, 5  ;;  %v3742_v58 = vunpack.c.l.b16 %v3618_v23  ;;  %v3340_v19 = vld [vmem:[#allocation2 + $0x114] sm:$0xe]  ;;  %v2447_v23 = vshll.u32 %v1903_v62, 16  ;;  %v5548_v50 = vrot.slane %v5547_v56, 4 }
 0x1ed   :  { %v4159_v43 = vadd.f32 %v3966_v9, %v3170_v7  ;;  %v4662_v24 = vpop.f32.mrf.mxu3  ;;  %v3969_v4 = vpop.f32.mrf.mxu2  ;;  %v3615_v9 = vsel %vm12377_vm12, %v11075_v25, %v3614_v31  ;;  %v5556_v30 = vrot.slane %v5554_v3, 4  ;;  %v5026_v7 = vld [vmem:[#allocation2 + $0x11c] sm:$0x1]  ;;  %v3341_v25 = vld [vmem:[#allocation2 + $0x118] sm:$0xf]  ;;  %v5916_v53 = vpack.c.b16 %v5872_v54, %v5871_v13 }
 0x1ee   :  { %v4856_v6 = vadd.f32 %v4662_v24, %v4158_v47  ;;  %v6098_v26 = vpop.f32.mrf.mxu0  ;;  %v2436_v47 = vor.u32 %v2435_v42, %v13083_v61  ;;  %v3741_v52 = vunpack.c.l.b16 %v3615_v9  ;;  %v5560_v42 = vshll.u32 %v5026_v7, 16 }
 0x1ef   :  { %v5557_v10 = vor.u32 %v5556_v30, %v13097_v32  ;;  %v3621_v24 = vrot.slane %v3341_v25, 5  ;;  %v2444_v9 = vshrl.u32 %v1903_v62, 16  ;;  %v11076_v30 = vrot.slane %v3340_v19, 9  ;;  %v5028_v25 = vld [vmem:[#allocation2 + $0x124] sm:$0xf] }
 0x1f0   :  { %v13095_v27 = vadd.f32 %v6096_v41, %v4856_v6  ;;  %v2437_v41 = vrot.slane %v2436_v47, 4  ;;  %v11744_v6 = vld [vmem:[#allocation2 + $0x108] sm:$0xff]  ;;  %v3785_v48 = vpack.c.b16 %v3742_v58, %v3741_v52  ;;  %v2457_v47 = vshrl.u32 %v1904_v49, 16 }
 0x1f1   :  { %v5558_v13 = vrot.slane %v5557_v10, 4  ;;  %v5562_v54 = vrot.slane %v5560_v42, 5  ;;  %v3624_v52 = vrot.slane %v3342_v21, 5  ;;  %v2446_v58 = vrot.slane %v2444_v9, 4 }
 0x1f2   :  { %v2980_v37 = vpop.f32.mrf.mxu1  ;;  %v2442_v35 = vsel %vm12406_vm15, %v2437_v41, %v2441_v18  ;;  %v2449_v7 = vrot.slane %v2447_v23, 5  ;;  %v5565_v56 = vshrl.u32 %v5027_v51, 16  ;;  %v5568_v62 = vshll.u32 %v5027_v51, 16 }
 0x1f3   :  { %v3171_v31 = vadd.f32 %v2980_v37, %v14560_v38  ;;  %v3623_v38 = vrot.slane %v3621_v24, 4  ;;  %v5553_v18 = vsel %vm12406_vm15, %v5548_v50, %v13097_v32  ;;  %v3622_v23 = vsel %vm12377_vm12, %v11076_v30, %v3621_v24  ;;  %v14564_v30 = vld [vmem:[#allocation32_spill] sm:$0xff] }
 0x1f4   :  { %v5873_v50 = vunpack.c.l.b16 %v5553_v18  ;;  %v5567_v21 = vrot.slane %v5565_v56, 4 }
 0x1f5   :  { %11042 = vmatmul.msk.bf16.gmra.mxu1 %vm1510_vm7, %v2795_v40  ;;  %v4160_v12 = vadd.f32 %v3969_v4, %v3171_v31  ;;  %v4664_v59 = vpop.f32.mrf.mxu3  ;;  %v3971_v14 = vpop.f32.mrf.mxu2  ;;  %v2432_v4 = vsel %vm12406_vm15, %v2427_v17, %v13083_v61  ;;  %v2453_v40 = vshll.u32 %v1904_v49, 16  ;;  %v14562_v61 = vld [vmem:[#allocation29_spill] sm:$0xff]  ;;  %v5563_v49 = vsel %vm12406_vm15, %v5558_v13, %v5562_v54 }
 0x1f6   :  { %v4857_v28 = vadd.f32 %v4664_v59, %v4159_v43  ;;  %v6101_v3 = vpop.f32.mrf.mxu0  ;;  %v2752_v17 = vunpack.c.l.b16 %v2432_v4  ;;  %v2450_v4 = vor.u32 %v2449_v7, %v2446_v58 }
 0x1f7   :  { %v2455_v59 = vrot.slane %v2453_v40, 5  ;;  %v5874_v40 = vunpack.c.l.b16 %v5563_v49 }
 0x1f8   :  { %v13107_v37 = vadd.f32 %v6098_v26, %v4857_v28  ;;  %v2753_v26 = vunpack.c.l.b16 %v2442_v35  ;;  %v1905_v28 = vld [vmem:[#allocation2 + $0x11c] sm:$0x1]  ;;  %v5570_v35 = vrot.slane %v5568_v62, 5 }
 0x1f9   :  { %11322 = vmatmul.msk.bf16.gmra.mxu0 %vm1510_vm7, %v5916_v53  ;;  %v2459_v53 = vrot.slane %v2457_v47, 4  ;;  %v2463_v51 = vshll.u32 %v1905_v28, 16  ;;  %v5917_v18 = vpack.c.b16 %v5874_v40, %v5873_v50 }
 0x1fa   :  { %14561 = vst [vmem:[#allocation27_spill] sm:$0xff] %v13107_v37  ;;  %v2982_v43 = vpop.f32.mrf.mxu1  ;;  %11282 = vmatmul.msk.bf16.gmra.mxu3 %vm1510_vm7, %v11744_v6  ;;  %11115 = vmatmul.msk.bf16.gmra.mxu2 %vm1510_vm7, %v3785_v48  ;;  %v5574_v6 = vshll.u32 %v5028_v25, 16  ;;  %v5578_v48 = vshrl.u32 %v5028_v25, 16  ;;  %v2796_v32 = vpack.c.b16 %v2753_v26, %v2752_v17  ;;  %v5571_v58 = vor.u32 %v5570_v35, %v5567_v21  ;;  %v1906_v17 = vld [vmem:[#allocation2 + $0x120] sm:$0xf] }
 0x1fb   :  { %v3172_v31 = vadd.f32 %v2982_v43, %v14562_v61  ;;  %v2460_v47 = vor.u32 %v2459_v53, %v2455_v59  ;;  %v5029_v43 = vld [vmem:[#allocation2 + $0x128] sm:$0x1]  ;;  %v2465_v62 = vrot.slane %v2463_v51, 5  ;;  %v2468_v21 = vshrl.u32 %v1906_v17, 16  ;;  %v1929_v37 = vld [vmem:[#allocation2 + $0x17c] sm:$0x1] }
 0x1fc   :  { %v5580_v24 = vrot.slane %v5578_v48, 4  ;;  %v5584_v7 = vshll.u32 %v5029_v43, 16  ;;  %v5030_v43 = vld [vmem:[#allocation2 + $0x12c] sm:$0xf] }
 0x1fd   :  { %v4161_v41 = vadd.f32 %v3971_v14, %v3172_v31  ;;  %v4667_v10 = vpop.f32.mrf.mxu3  ;;  %v3974_v42 = vpop.f32.mrf.mxu2  ;;  %v3625_v14 = vsel %vm12377_vm12, %v3623_v38, %v3624_v52  ;;  %v13124_v31 = vrot.slane %v5574_v6, 5  ;;  %v2451_v38 = vrot.slane %v2450_v4, 4  ;;  %v3344_v52 = vld [vmem:[#allocation2 + $0x124] sm:$0xf]  ;;  %v3343_v4 = vld [vmem:[#allocation2 + $0x120] sm:$0xe] }
 0x1fe   :  { %v4858_v19 = vadd.f32 %v4667_v10, %v4160_v12  ;;  %v6103_v9 = vpop.f32.mrf.mxu0  ;;  %v3743_v12 = vunpack.c.l.b16 %v3622_v23  ;;  %v3744_v61 = vunpack.c.l.b16 %v3625_v14  ;;  %v2461_v56 = vrot.slane %v2460_v47, 4  ;;  %v1907_v6 = vld [vmem:[#allocation2 + $0x124] sm:$0xf]  ;;  %v11745_v23 = vld [vmem:[#allocation2 + $0x114] sm:$0xff]  ;;  %v3345_v47 = vld [vmem:[#allocation2 + $0x128] sm:$0x1] }
 0x1ff   :  { %v5581_v49 = vor.u32 %v5580_v24, %v13124_v31  ;;  %v3628_v28 = vrot.slane %v3344_v52, 5  ;;  %v2456_v14 = vsel %vm12406_vm15, %v2451_v38, %v2455_v59  ;;  %v5586_v35 = vrot.slane %v5584_v7, 5 }
 0x200   :  { %v13122_v13 = vadd.f32 %v6101_v3, %v4858_v19  ;;  %v3786_v10 = vpack.c.b16 %v3744_v61, %v3743_v12  ;;  %v2466_v50 = vsel %vm12406_vm15, %v2461_v56, %v2465_v62  ;;  %v2477_v40 = vshll.u32 %v1907_v6, 16 }
 0x201   :  { %v2481_v51 = vshrl.u32 %v1907_v6, 16  ;;  %v2754_v61 = vunpack.c.l.b16 %v2456_v14  ;;  %v5582_v59 = vrot.slane %v5581_v49, 4  ;;  %v11077_v24 = vrot.slane %v3343_v4, 9  ;;  %v1908_v4 = vld [vmem:[#allocation2 + $0x128] sm:$0x1] }
 0x202   :  { %14563 = vst [vmem:[#allocation29_spill] sm:$0xff] %v13122_v13  ;;  %v2985_v54 = vpop.f32.mrf.mxu1  ;;  %v3631_v52 = vrot.slane %v3345_v47, 5  ;;  %v5592_v56 = vshll.u32 %v5030_v43, 16  ;;  %v2479_v6 = vrot.slane %v2477_v40, 5  ;;  %v3363_v13 = vld [vmem:[#allocation2 + $0x170] sm:$0x1] }
 0x203   :  { %v3173_v25 = vadd.f32 %v2985_v54, %v14564_v30  ;;  %v5031_v54 = vld [vmem:[#allocation2 + $0x130] sm:$0xf]  ;;  %v3630_v30 = vrot.slane %v3628_v28, 4  ;;  %v3629_v47 = vsel %vm12377_vm12, %v11077_v24, %v3628_v28  ;;  %v14568_v24 = vld [vmem:[#allocation38_spill] sm:$0xff] }
 0x204   :  { %v5602_v62 = vshrl.u32 %v5031_v54, 16 }
 0x205   :  { %11043 = vmatmul.msk.bf16.gmra.mxu1 %vm1510_vm7, %v2796_v32  ;;  %v4162_v26 = vadd.f32 %v3974_v42, %v3173_v25  ;;  %v4669_v3 = vpop.f32.mrf.mxu3  ;;  %v3976_v53 = vpop.f32.mrf.mxu2  ;;  %v2471_v32 = vshll.u32 %v1906_v17, 16  ;;  %v5572_v42 = vrot.slane %v5571_v58, 4  ;;  %v14566_v25 = vld [vmem:[#allocation35_spill] sm:$0xff]  ;;  %v2470_v58 = vrot.slane %v2468_v21, 4 }
 0x206   :  { %v4859_v48 = vadd.f32 %v4669_v3, %v4161_v41  ;;  %v6106_v19 = vpop.f32.mrf.mxu0  ;;  %v5589_v17 = vshrl.u32 %v5030_v43, 16 }
 0x207   :  { %v2473_v7 = vrot.slane %v2471_v32, 5 }
 0x208   :  { %v13133_v12 = vadd.f32 %v6103_v9, %v4859_v48  ;;  %v5598_v9 = vshll.u32 %v5031_v54, 16  ;;  %v2483_v48 = vrot.slane %v2481_v51, 4  ;;  %v5591_v40 = vrot.slane %v5589_v17, 4 }
 0x209   :  { %11323 = vmatmul.msk.bf16.gmra.mxu0 %vm1510_vm7, %v5917_v18  ;;  %v2755_v18 = vunpack.c.l.b16 %v2466_v50  ;;  %v2474_v50 = vor.u32 %v2473_v7, %v2470_v58  ;;  %v5594_v51 = vrot.slane %v5592_v56, 5  ;;  %v5604_v54 = vrot.slane %v5602_v62, 4  ;;  %v1909_v56 = vld [vmem:[#allocation2 + $0x12c] sm:$0xf] }
 0x20a   :  { %14565 = vst [vmem:[#allocation32_spill] sm:$0xff] %v13133_v12  ;;  %v2987_v41 = vpop.f32.mrf.mxu1  ;;  %11283 = vmatmul.msk.bf16.gmra.mxu3 %vm1510_vm7, %v11745_v23  ;;  %11116 = vmatmul.msk.bf16.gmra.mxu2 %vm1510_vm7, %v3786_v10  ;;  %v5577_v23 = vsel %vm12406_vm15, %v5572_v42, %v13124_v31  ;;  %v5587_v10 = vsel %vm12406_vm15, %v5582_v59, %v5586_v35  ;;  %v13148_v43 = vrot.slane %v5598_v9, 5  ;;  %v2487_v42 = vshll.u32 %v1908_v4, 16  ;;  %v1910_v4 = vld [vmem:[#allocation2 + $0x130] sm:$0xf] }
 0x20b   :  { %v3174_v38 = vadd.f32 %v2987_v41, %v14566_v25  ;;  %v2797_v41 = vpack.c.b16 %v2755_v18, %v2754_v61  ;;  %v2484_v31 = vor.u32 %v2483_v48, %v2479_v6  ;;  %v5032_v25 = vld [vmem:[#allocation2 + $0x134] sm:$0x1]  ;;  %v5875_v59 = vunpack.c.l.b16 %v5577_v23 }
 0x20c   :  { %v5595_v58 = vor.u32 %v5594_v51, %v5591_v40  ;;  %v5605_v7 = vor.u32 %v5604_v54, %v13148_v43  ;;  %v5608_v17 = vshll.u32 %v5032_v25, 16  ;;  %v3346_v40 = vld [vmem:[#allocation2 + $0x12c] sm:$0xe]  ;;  %v2492_v51 = vshrl.u32 %v1909_v56, 16 }
 0x20d   :  { %v4163_v3 = vadd.f32 %v3976_v53, %v3174_v38  ;;  %v4672_v49 = vpop.f32.mrf.mxu3  ;;  %v3979_v14 = vpop.f32.mrf.mxu2  ;;  %v3632_v53 = vsel %vm12377_vm12, %v3630_v30, %v3631_v52  ;;  %v5876_v38 = vunpack.c.l.b16 %v5587_v10  ;;  %v2475_v30 = vrot.slane %v2474_v50, 4  ;;  %v3347_v52 = vld [vmem:[#allocation2 + $0x130] sm:$0xf] }
 0x20e   :  { %v4860_v21 = vadd.f32 %v4672_v49, %v4162_v26  ;;  %v6108_v32 = vpop.f32.mrf.mxu0  ;;  %v3745_v49 = vunpack.c.l.b16 %v3629_v47  ;;  %v3746_v28 = vunpack.c.l.b16 %v3632_v53  ;;  %v2485_v9 = vrot.slane %v2484_v31, 4  ;;  %v11746_v53 = vld [vmem:[#allocation2 + $0x120] sm:$0xff] }
 0x20f   :  { %v5918_v18 = vpack.c.b16 %v5876_v38, %v5875_v59  ;;  %v3635_v10 = vrot.slane %v3347_v52, 5  ;;  %v2480_v50 = vsel %vm12406_vm15, %v2475_v30, %v2479_v6  ;;  %v2495_v54 = vshll.u32 %v1909_v56, 16  ;;  %v5033_v59 = vld [vmem:[#allocation2 + $0x138] sm:$0xf] }
 0x210   :  { %v13150_v35 = vadd.f32 %v6106_v19, %v4860_v21  ;;  %v2489_v19 = vrot.slane %v2487_v42, 5  ;;  %v3787_v23 = vpack.c.b16 %v3746_v28, %v3745_v49  ;;  %v5596_v25 = vrot.slane %v5595_v58, 4 }
 0x211   :  { %v2501_v42 = vshll.u32 %v1910_v4, 16  ;;  %v2756_v49 = vunpack.c.l.b16 %v2480_v50  ;;  %v11078_v6 = vrot.slane %v3346_v40, 9  ;;  %v3637_v28 = vrot.slane %v3635_v10, 4 }
 0x212   :  { %14567 = vst [vmem:[#allocation35_spill] sm:$0xff] %v13150_v35  ;;  %v2990_v26 = vpop.f32.mrf.mxu1  ;;  %v2490_v31 = vsel %vm12406_vm15, %v2485_v9, %v2489_v19  ;;  %v2494_v58 = vrot.slane %v2492_v51, 4  ;;  %v5613_v19 = vshrl.u32 %v5033_v59, 16 }
 0x213   :  { %v3175_v12 = vadd.f32 %v2990_v26, %v14568_v24  ;;  %v2505_v26 = vshrl.u32 %v1910_v4, 16  ;;  %v14570_v24 = vld [vmem:[#allocation41_spill] sm:$0xff]  ;;  %v2757_v56 = vunpack.c.l.b16 %v2490_v31  ;;  %v3636_v31 = vsel %vm12377_vm12, %v11078_v6, %v3635_v10  ;;  %v14572_v6 = vld [vmem:[#allocation44_spill] sm:$0xff] }
 0x215   :  { %11044 = vmatmul.msk.bf16.gmra.mxu1 %vm1510_vm7, %v2797_v41  ;;  %v4164_v61 = vadd.f32 %v3979_v14, %v3175_v12  ;;  %v4674_v62 = vpop.f32.mrf.mxu3  ;;  %v3981_v48 = vpop.f32.mrf.mxu2  ;;  %v5606_v41 = vrot.slane %v5605_v7, 4  ;;  %v5610_v12 = vrot.slane %v5608_v17, 5  ;;  %v3348_v14 = vld [vmem:[#allocation2 + $0x134] sm:$0x1]  ;;  %v2497_v7 = vrot.slane %v2495_v54, 5 }
 0x216   :  { %v4861_v21 = vadd.f32 %v4674_v62, %v4163_v3  ;;  %v6111_v47 = vpop.f32.mrf.mxu0  ;;  %v3638_v52 = vrot.slane %v3348_v14, 5  ;;  %v5034_v17 = vld [vmem:[#allocation2 + $0x13c] sm:$0xf]  ;;  %v2507_v4 = vrot.slane %v2505_v26, 4 }
 0x217   :  { %v5611_v9 = vsel %vm12406_vm15, %v5606_v41, %v5610_v12  ;;  %v5622_v40 = vshll.u32 %v5034_v17, 16  ;;  %v5626_v51 = vshrl.u32 %v5034_v17, 16  ;;  %v2798_v41 = vpack.c.b16 %v2757_v56, %v2756_v49 }
 0x218   :  { %v13159_v38 = vadd.f32 %v6108_v32, %v4861_v21  ;;  %v5601_v32 = vsel %vm12406_vm15, %v5596_v25, %v13148_v43  ;;  %v5616_v21 = vshll.u32 %v5033_v59, 16  ;;  %v3639_v43 = vsel %vm12377_vm12, %v3637_v28, %v3638_v52  ;;  %v3350_v52 = vld [vmem:[#allocation2 + $0x13c] sm:$0xf] }
 0x219   :  { %11324 = vmatmul.msk.bf16.gmra.mxu0 %vm1510_vm7, %v5918_v18  ;;  %v2503_v18 = vrot.slane %v2501_v42, 5  ;;  %v2498_v25 = vor.u32 %v2497_v7, %v2494_v58  ;;  %v5877_v12 = vunpack.c.l.b16 %v5601_v32  ;;  %v5615_v42 = vrot.slane %v5613_v19, 4  ;;  %v1912_v58 = vld [vmem:[#allocation2 + $0x138] sm:$0xf] }
 0x21a   :  { %14569 = vst [vmem:[#allocation38_spill] sm:$0xff] %v13159_v38  ;;  %v2992_v3 = vpop.f32.mrf.mxu1  ;;  %11284 = vmatmul.msk.bf16.gmra.mxu3 %vm1510_vm7, %v11746_v53  ;;  %11117 = vmatmul.msk.bf16.gmra.mxu2 %vm1510_vm7, %v3787_v23  ;;  %v1911_v23 = vld [vmem:[#allocation2 + $0x134] sm:$0x1]  ;;  %v13176_v38 = vrot.slane %v5622_v40, 5  ;;  %v5628_v10 = vrot.slane %v5626_v51, 4  ;;  %v3642_v51 = vrot.slane %v3350_v52, 5 }
 0x21b   :  { %v3176_v30 = vadd.f32 %v2992_v3, %v14570_v24  ;;  %v2508_v26 = vor.u32 %v2507_v4, %v2503_v18  ;;  %v2511_v59 = vshll.u32 %v1911_v23, 16  ;;  %v5035_v3 = vld [vmem:[#allocation2 + $0x140] sm:$0x1]  ;;  %v5618_v24 = vrot.slane %v5616_v21, 5 }
 0x21c   :  { %v2499_v28 = vrot.slane %v2498_v25, 4  ;;  %v5632_v49 = vshll.u32 %v5035_v3, 16  ;;  %v5629_v40 = vor.u32 %v5628_v10, %v13176_v38  ;;  %v3349_v3 = vld [vmem:[#allocation2 + $0x138] sm:$0xe]  ;;  %v3644_v10 = vrot.slane %v3642_v51, 4 }
 0x21d   :  { %v4165_v62 = vadd.f32 %v3981_v48, %v3176_v30  ;;  %v4677_v53 = vpop.f32.mrf.mxu3  ;;  %v3984_v50 = vpop.f32.mrf.mxu2  ;;  %v5878_v48 = vunpack.c.l.b16 %v5611_v9  ;;  %v2509_v56 = vrot.slane %v2508_v26, 4  ;;  %v2513_v32 = vrot.slane %v2511_v59, 5 }
 0x21e   :  { %v4862_v54 = vadd.f32 %v4677_v53, %v4164_v61  ;;  %v6113_v14 = vpop.f32.mrf.mxu0  ;;  %v3747_v61 = vunpack.c.l.b16 %v3636_v31  ;;  %v3748_v53 = vunpack.c.l.b16 %v3639_v43  ;;  %v5619_v9 = vor.u32 %v5618_v24, %v5615_v42  ;;  %v11747_v43 = vld [vmem:[#allocation2 + $0x12c] sm:$0xff]  ;;  %v5036_v24 = vld [vmem:[#allocation2 + $0x144] sm:$0xf] }
 0x21f   :  { %v5919_v4 = vpack.c.b16 %v5878_v48, %v5877_v12  ;;  %v2504_v25 = vsel %vm12406_vm15, %v2499_v28, %v2503_v18  ;;  %v2514_v12 = vsel %vm12406_vm15, %v2509_v56, %v2513_v32  ;;  %v5634_v59 = vrot.slane %v5632_v49, 5  ;;  %v14574_v28 = vld [vmem:[#allocation47_spill] sm:$0xff] }
 0x220   :  { %v13174_v30 = vadd.f32 %v6111_v47, %v4862_v54  ;;  %v1913_v47 = vld [vmem:[#allocation2 + $0x13c] sm:$0xf]  ;;  %v3788_v23 = vpack.c.b16 %v3748_v53, %v3747_v61  ;;  %v5620_v48 = vrot.slane %v5619_v9, 4  ;;  %v2758_v61 = vunpack.c.l.b16 %v2504_v25 }
 0x221   :  { %v2525_v26 = vshll.u32 %v1913_v47, 16  ;;  %v2529_v42 = vshrl.u32 %v1913_v47, 16  ;;  %v5630_v53 = vrot.slane %v5629_v40, 4  ;;  %v11079_v18 = vrot.slane %v3349_v3, 9  ;;  %v1914_v40 = vld [vmem:[#allocation2 + $0x140] sm:$0x1] }
 0x222   :  { %14571 = vst [vmem:[#allocation41_spill] sm:$0xff] %v13174_v30  ;;  %v2995_v17 = vpop.f32.mrf.mxu1  ;;  %v5637_v9 = vshrl.u32 %v5036_v24, 16  ;;  %v5640_v47 = vshll.u32 %v5036_v24, 16  ;;  %v5038_v24 = vld [vmem:[#allocation2 + $0x14c] sm:$0x1] }
 0x223   :  { %v3177_v35 = vadd.f32 %v2995_v17, %v14572_v6  ;;  %v5037_v6 = vld [vmem:[#allocation2 + $0x148] sm:$0xf]  ;;  %v13191_v32 = vrot.slane %v2525_v26, 5 }
 0x224   :  { %v5650_v25 = vshrl.u32 %v5037_v6, 16 }
 0x225   :  { %11045 = vmatmul.msk.bf16.gmra.mxu1 %vm1510_vm7, %v2798_v41  ;;  %v4166_v7 = vadd.f32 %v3984_v50, %v3177_v35  ;;  %v4679_v19 = vpop.f32.mrf.mxu3  ;;  %v3986_v21 = vpop.f32.mrf.mxu2  ;;  %v2516_v41 = vshrl.u32 %v1912_v58, 16  ;;  %v2519_v35 = vshll.u32 %v1912_v58, 16  ;;  %v3351_v50 = vld [vmem:[#allocation2 + $0x140] sm:$0x1] }
 0x226   :  { %v4863_v54 = vadd.f32 %v4679_v19, %v4165_v62  ;;  %v6116_v31 = vpop.f32.mrf.mxu0  ;;  %v3645_v58 = vrot.slane %v3351_v50, 5  ;;  %v3643_v50 = vsel %vm12377_vm12, %v11079_v18, %v3642_v51 }
 0x227   :  { %v2518_v56 = vrot.slane %v2516_v41, 4  ;;  %v2521_v49 = vrot.slane %v2519_v35, 5  ;;  %v3749_v51 = vunpack.c.l.b16 %v3643_v50 }
 0x228   :  { %v13185_v17 = vadd.f32 %v6113_v14, %v4863_v54  ;;  %v2531_v14 = vrot.slane %v2529_v42, 4  ;;  %v5646_v54 = vshll.u32 %v5037_v6, 16  ;;  %v5642_v6 = vrot.slane %v5640_v47, 5 }
 0x229   :  { %11325 = vmatmul.msk.bf16.gmra.mxu0 %vm1510_vm7, %v5919_v4  ;;  %v2759_v4 = vunpack.c.l.b16 %v2514_v12  ;;  %v2522_v26 = vor.u32 %v2521_v49, %v2518_v56  ;;  %v2535_v12 = vshll.u32 %v1914_v40, 16  ;;  %v5656_v49 = vshll.u32 %v5038_v24, 16 }
 0x22a   :  { %14573 = vst [vmem:[#allocation44_spill] sm:$0xff] %v13185_v17  ;;  %v2997_v62 = vpop.f32.mrf.mxu1  ;;  %11285 = vmatmul.msk.bf16.gmra.mxu3 %vm1510_vm7, %v11747_v43  ;;  %11118 = vmatmul.msk.bf16.gmra.mxu2 %vm1510_vm7, %v3788_v23  ;;  %v5625_v43 = vsel %vm12406_vm15, %v5620_v48, %v13176_v38  ;;  %v5635_v23 = vsel %vm12406_vm15, %v5630_v53, %v5634_v59  ;;  %v13203_v38 = vrot.slane %v5646_v54, 5  ;;  %v5652_v48 = vrot.slane %v5650_v25, 4  ;;  %v1916_v54 = vld [vmem:[#allocation2 + $0x148] sm:$0xf] }
 0x22b   :  { %v3178_v52 = vadd.f32 %v2997_v62, %v14574_v28  ;;  %v2532_v42 = vor.u32 %v2531_v14, %v13191_v32  ;;  %v5639_v62 = vrot.slane %v5637_v9, 4  ;;  %v2799_v28 = vpack.c.b16 %v2759_v4, %v2758_v61  ;;  %v1915_v14 = vld [vmem:[#allocation2 + $0x144] sm:$0xf] }
 0x22c   :  { %v5879_v53 = vunpack.c.l.b16 %v5625_v43  ;;  %v2523_v56 = vrot.slane %v2522_v26, 4  ;;  %v2537_v9 = vrot.slane %v2535_v12, 5  ;;  %v11748_v43 = vld [vmem:[#allocation2 + $0x138] sm:$0xff]  ;;  %v5658_v12 = vrot.slane %v5656_v49, 5 }
 0x22d   :  { %v4167_v19 = vadd.f32 %v3986_v21, %v3178_v52  ;;  %v4682_v3 = vpop.f32.mrf.mxu3  ;;  %v3989_v17 = vpop.f32.mrf.mxu2  ;;  %v3646_v21 = vsel %vm12377_vm12, %v3644_v10, %v3645_v58  ;;  %v5880_v52 = vunpack.c.l.b16 %v5635_v23  ;;  %v14576_v10 = vld [vmem:[#allocation50_spill] sm:$0xff]  ;;  %v2533_v40 = vrot.slane %v2532_v42, 4 }
 0x22e   :  { %v4864_v41 = vadd.f32 %v4682_v3, %v4166_v7  ;;  %v6118_v35 = vpop.f32.mrf.mxu0  ;;  %v3750_v18 = vunpack.c.l.b16 %v3646_v21  ;;  %v3353_v3 = vld [vmem:[#allocation2 + $0x148] sm:$0xf]  ;;  %v5643_v47 = vor.u32 %v5642_v6, %v5639_v62  ;;  %v3352_v21 = vld [vmem:[#allocation2 + $0x144] sm:$0xe]  ;;  %v2528_v42 = vsel %vm12406_vm15, %v2523_v56, %v13191_v32  ;;  %v3354_v62 = vld [vmem:[#allocation2 + $0x14c] sm:$0x1] }
 0x22f   :  { %v3649_v4 = vrot.slane %v3353_v3, 5  ;;  %v5920_v23 = vpack.c.b16 %v5880_v52, %v5879_v53  ;;  %v5039_v6 = vld [vmem:[#allocation2 + $0x150] sm:$0xf]  ;;  %v2549_v3 = vshll.u32 %v1916_v54, 16  ;;  %v2553_v53 = vshrl.u32 %v1916_v54, 16 }
 0x230   :  { %v13205_v59 = vadd.f32 %v6116_v31, %v4864_v41  ;;  %v5653_v31 = vor.u32 %v5652_v48, %v13203_v38  ;;  %v3789_v50 = vpack.c.b16 %v3750_v18, %v3749_v51  ;;  %v5644_v48 = vrot.slane %v5643_v47, 4  ;;  %v5040_v52 = vld [vmem:[#allocation2 + $0x154] sm:$0xf] }
 0x231   :  { %v11080_v18 = vrot.slane %v3352_v21, 9  ;;  %v3652_v32 = vrot.slane %v3354_v62, 5  ;;  %v5661_v49 = vshrl.u32 %v5039_v6, 16  ;;  %v5670_v47 = vshll.u32 %v5040_v52, 16  ;;  %v1917_v62 = vld [vmem:[#allocation2 + $0x14c] sm:$0x1] }
 0x232   :  { %14575 = vst [vmem:[#allocation47_spill] sm:$0xff] %v13205_v59  ;;  %v3000_v7 = vpop.f32.mrf.mxu1  ;;  %v5654_v51 = vrot.slane %v5653_v31, 4  ;;  %v5674_v31 = vshrl.u32 %v5040_v52, 16  ;;  %v2760_v54 = vunpack.c.l.b16 %v2528_v42  ;;  %v5041_v52 = vld [vmem:[#allocation2 + $0x158] sm:$0x1] }
 0x233   :  { %v3179_v58 = vadd.f32 %v3000_v7, %v14576_v10  ;;  %v2540_v7 = vshrl.u32 %v1915_v14, 16  ;;  %v3651_v10 = vrot.slane %v3649_v4, 4 }
 0x235   :  { %11046 = vmatmul.msk.bf16.gmra.mxu1 %vm1510_vm7, %v2799_v28  ;;  %v4168_v61 = vadd.f32 %v3989_v17, %v3179_v58  ;;  %v4684_v25 = vpop.f32.mrf.mxu3  ;;  %v3991_v41 = vpop.f32.mrf.mxu2  ;;  %v2543_v17 = vshll.u32 %v1915_v14, 16  ;;  %v2538_v28 = vsel %vm12406_vm15, %v2533_v40, %v2537_v9  ;;  %v2542_v56 = vrot.slane %v2540_v7, 4 }
 0x236   :  { %v4865_v26 = vadd.f32 %v4684_v25, %v4167_v19  ;;  %v6121_v24 = vpop.f32.mrf.mxu0  ;;  %v5664_v14 = vshll.u32 %v5039_v6, 16  ;;  %v14578_v25 = vld [vmem:[#allocation53_spill] sm:$0xff]  ;;  %v2761_v21 = vunpack.c.l.b16 %v2538_v28  ;;  %v5649_v7 = vsel %vm12406_vm15, %v5644_v48, %v13203_v38 }
 0x237   :  { %v2545_v9 = vrot.slane %v2543_v17, 5  ;;  %v3653_v42 = vsel %vm12377_vm12, %v3651_v10, %v3652_v32  ;;  %v5663_v17 = vrot.slane %v5661_v49, 4  ;;  %v5676_v38 = vrot.slane %v5674_v31, 4  ;;  %v14580_v49 = vld [vmem:[#allocation14_spill] sm:$0xff] }
 0x238   :  { %v13215_v19 = vadd.f32 %v6118_v35, %v4865_v26  ;;  %v13221_v35 = vrot.slane %v2549_v3, 5  ;;  %v2555_v26 = vrot.slane %v2553_v53, 4  ;;  %v5666_v28 = vrot.slane %v5664_v14, 5 }
 0x239   :  { %11326 = vmatmul.msk.bf16.gmra.mxu0 %vm1510_vm7, %v5920_v23  ;;  %v2546_v53 = vor.u32 %v2545_v9, %v2542_v56  ;;  %v2800_v48 = vpack.c.b16 %v2761_v21, %v2760_v54  ;;  %v3355_v21 = vld [vmem:[#allocation2 + $0x150] sm:$0xe] }
 0x23a   :  { %14577 = vst [vmem:[#allocation50_spill] sm:$0xff] %v13215_v19  ;;  %v3002_v58 = vpop.f32.mrf.mxu1  ;;  %11286 = vmatmul.msk.bf16.gmra.mxu3 %vm1510_vm7, %v11748_v43  ;;  %11119 = vmatmul.msk.bf16.gmra.mxu2 %vm1510_vm7, %v3789_v50  ;;  %v5659_v43 = vsel %vm12406_vm15, %v5654_v51, %v5658_v12  ;;  %v3650_v50 = vsel %vm12377_vm12, %v11080_v18, %v3649_v4  ;;  %v5881_v12 = vunpack.c.l.b16 %v5649_v7  ;;  %v3752_v4 = vunpack.c.l.b16 %v3653_v42  ;;  %v3356_v18 = vld [vmem:[#allocation2 + $0x154] sm:$0xf] }
 0x23b   :  { %v3180_v40 = vadd.f32 %v3002_v58, %v14578_v25  ;;  %v13232_v25 = vrot.slane %v5670_v47, 5  ;;  %v2556_v51 = vor.u32 %v2555_v26, %v13221_v35  ;;  %v5882_v19 = vunpack.c.l.b16 %v5659_v43  ;;  %v1918_v47 = vld [vmem:[#allocation2 + $0x150] sm:$0xf] }
 0x23c   :  { %v3751_v59 = vunpack.c.l.b16 %v3650_v50  ;;  %v5667_v32 = vor.u32 %v5666_v28, %v5663_v17  ;;  %v2547_v14 = vrot.slane %v2546_v53, 4  ;;  %v3656_v26 = vrot.slane %v3356_v18, 5  ;;  %v5042_v18 = vld [vmem:[#allocation2 + $0x15c] sm:$0xf] }
 0x23d   :  { %v4169_v23 = vadd.f32 %v3991_v41, %v3180_v40  ;;  %v4687_v6 = vpop.f32.mrf.mxu3  ;;  %v3994_v58 = vpop.f32.mrf.mxu2  ;;  %v2559_v40 = vshll.u32 %v1917_v62, 16  ;;  %v5677_v9 = vor.u32 %v5676_v38, %v13232_v25  ;;  %v2557_v31 = vrot.slane %v2556_v51, 4 }
 0x23e   :  { %v4866_v3 = vadd.f32 %v4687_v6, %v4168_v61  ;;  %v6123_v41 = vpop.f32.mrf.mxu0  ;;  %v5680_v61 = vshll.u32 %v5041_v52, 16  ;;  %v5921_v7 = vpack.c.b16 %v5882_v19, %v5881_v12  ;;  %v3790_v62 = vpack.c.b16 %v3752_v4, %v3751_v59  ;;  %v1919_v6 = vld [vmem:[#allocation2 + $0x154] sm:$0xf] }
 0x23f   :  { %v2561_v54 = vrot.slane %v2559_v40, 5  ;;  %v5668_v17 = vrot.slane %v5667_v32, 4  ;;  %v2567_v53 = vshll.u32 %v1918_v47, 16  ;;  %v2552_v51 = vsel %vm12406_vm15, %v2547_v14, %v13221_v35  ;;  %v5043_v14 = vld [vmem:[#allocation2 + $0x160] sm:$0xf] }
 0x240   :  { %v13235_v30 = vadd.f32 %v6121_v24, %v4866_v3  ;;  %v3357_v24 = vld [vmem:[#allocation2 + $0x158] sm:$0x1]  ;;  %v5682_v28 = vrot.slane %v5680_v61, 5  ;;  %v2564_v3 = vshrl.u32 %v1918_v47, 16  ;;  %v5678_v40 = vrot.slane %v5677_v9, 4  ;;  %v14582_v9 = vld [vmem:[#allocation15_spill] sm:$0xff] }
 0x241   :  { %v2562_v59 = vsel %vm12406_vm15, %v2557_v31, %v2561_v54  ;;  %v3658_v19 = vrot.slane %v3656_v26, 4  ;;  %v2573_v12 = vshll.u32 %v1919_v6, 16  ;;  %v2577_v4 = vshrl.u32 %v1919_v6, 16 }
 0x242   :  { %14579 = vst [vmem:[#allocation53_spill] sm:$0xff] %v13235_v30  ;;  %v3005_v10 = vpop.f32.mrf.mxu1  ;;  %v2762_v61 = vunpack.c.l.b16 %v2552_v51  ;;  %v5673_v35 = vsel %vm12406_vm15, %v5668_v17, %v13232_v25  ;;  %v2763_v31 = vunpack.c.l.b16 %v2562_v59 }
 0x243   :  { %v3181_v56 = vadd.f32 %v3005_v10, %v14580_v49  ;;  %v11749_v10 = vld [vmem:[#allocation2 + $0x144] sm:$0xff]  ;;  %v2566_v49 = vrot.slane %v2564_v3, 4  ;;  %v13260_v25 = vrot.slane %v2573_v12, 5  ;;  %v2579_v17 = vrot.slane %v2577_v4, 4 }
 0x244   :  { %v5694_v3 = vshll.u32 %v5043_v14, 16  ;;  %v2801_v59 = vpack.c.b16 %v2763_v31, %v2762_v61  ;;  %v3359_v61 = vld [vmem:[#allocation2 + $0x160] sm:$0xf]  ;;  %v1921_v31 = vld [vmem:[#allocation2 + $0x15c] sm:$0xf] }
 0x245   :  { %11047 = vmatmul.msk.bf16.gmra.mxu1 %vm1510_vm7, %v2800_v48  ;;  %v4170_v43 = vadd.f32 %v3994_v58, %v3181_v56  ;;  %v4689_v50 = vpop.f32.mrf.mxu3  ;;  %v3996_v42 = vpop.f32.mrf.mxu2  ;;  %v11081_v48 = vrot.slane %v3355_v21, 9  ;;  %v3659_v58 = vrot.slane %v3357_v24, 5  ;;  %v2569_v56 = vrot.slane %v2567_v53, 5 }
 0x246   :  { %v4867_v52 = vadd.f32 %v4689_v50, %v4169_v23  ;;  %v6126_v38 = vpop.f32.mrf.mxu0  ;;  %v5688_v24 = vshll.u32 %v5042_v18, 16  ;;  %v1920_v50 = vld [vmem:[#allocation2 + $0x158] sm:$0x1]  ;;  %v5698_v53 = vshrl.u32 %v5043_v14, 16 }
 0x247   :  { %v3657_v54 = vsel %vm12377_vm12, %v11081_v48, %v3656_v26  ;;  %v3660_v21 = vsel %vm12377_vm12, %v3658_v19, %v3659_v58  ;;  %v2570_v51 = vor.u32 %v2569_v56, %v2566_v49  ;;  %v2583_v58 = vshll.u32 %v1920_v50, 16  ;;  %v1922_v50 = vld [vmem:[#allocation2 + $0x160] sm:$0xf] }
 0x248   :  { %v13245_v32 = vadd.f32 %v6123_v41, %v4867_v52  ;;  %v5683_v41 = vsel %vm12406_vm15, %v5678_v40, %v5682_v28  ;;  %v3753_v48 = vunpack.c.l.b16 %v3657_v54  ;;  %v3754_v19 = vunpack.c.l.b16 %v3660_v21 }
 0x249   :  { %11327 = vmatmul.msk.bf16.gmra.mxu0 %vm1510_vm7, %v5921_v7  ;;  %v5685_v7 = vshrl.u32 %v5042_v18, 16  ;;  %v5884_v26 = vunpack.c.l.b16 %v5683_v41  ;;  %v13263_v18 = vrot.slane %v5694_v3, 5  ;;  %v5700_v4 = vrot.slane %v5698_v53, 4  ;;  %v5046_v53 = vld [vmem:[#allocation2 + $0x16c] sm:$0xf] }
 0x24a   :  { %14581 = vst [vmem:[#allocation14_spill] sm:$0xff] %v13245_v32  ;;  %v3007_v23 = vpop.f32.mrf.mxu1  ;;  %11287 = vmatmul.msk.bf16.gmra.mxu3 %vm1510_vm7, %v11749_v10  ;;  %11120 = vmatmul.msk.bf16.gmra.mxu2 %vm1510_vm7, %v3790_v62  ;;  %v5883_v10 = vunpack.c.l.b16 %v5673_v35  ;;  %v2571_v35 = vrot.slane %v2570_v51, 4  ;;  %v3791_v54 = vpack.c.b16 %v3754_v19, %v3753_v48  ;;  %v2585_v21 = vrot.slane %v2583_v58, 5 }
 0x24b   :  { %v3182_v47 = vadd.f32 %v3007_v23, %v14582_v9  ;;  %v5044_v23 = vld [vmem:[#allocation2 + $0x164] sm:$0x1]  ;;  %v5687_v12 = vrot.slane %v5685_v7, 4  ;;  %v5690_v9 = vrot.slane %v5688_v24, 5  ;;  %v5701_v3 = vor.u32 %v5700_v4, %v13263_v18 }
 0x24c   :  { %v5704_v49 = vshll.u32 %v5044_v23, 16  ;;  %v5922_v41 = vpack.c.b16 %v5884_v26, %v5883_v10  ;;  %v3358_v10 = vld [vmem:[#allocation2 + $0x15c] sm:$0xe]  ;;  %v3663_v26 = vrot.slane %v3359_v61, 5  ;;  %v2588_v48 = vshrl.u32 %v1921_v31, 16 }
 0x24d   :  { %v4171_v6 = vadd.f32 %v3996_v42, %v3182_v47  ;;  %v4692_v62 = vpop.f32.mrf.mxu3  ;;  %v3999_v52 = vpop.f32.mrf.mxu2  ;;  %v2580_v42 = vor.u32 %v2579_v17, %v13260_v25  ;;  %v5691_v17 = vor.u32 %v5690_v9, %v5687_v12  ;;  %v2597_v12 = vshll.u32 %v1922_v50, 16 }
 0x24e   :  { %v4868_v28 = vadd.f32 %v4692_v62, %v4170_v43  ;;  %v6128_v40 = vpop.f32.mrf.mxu0  ;;  %v14584_v43 = vld [vmem:[#allocation17_spill] sm:$0xff]  ;;  %v5706_v23 = vrot.slane %v5704_v49, 5  ;;  %v2601_v9 = vshrl.u32 %v1922_v50, 16  ;;  %v11082_v49 = vrot.slane %v3358_v10, 9  ;;  %v14586_v50 = vld [vmem:[#allocation19_spill] sm:$0xff] }
 0x24f   :  { %v2581_v24 = vrot.slane %v2580_v42, 4  ;;  %v2591_v42 = vshll.u32 %v1921_v31, 16  ;;  %v5692_v32 = vrot.slane %v5691_v17, 4  ;;  %v3665_v61 = vrot.slane %v3663_v26, 4 }
 0x250   :  { %v13265_v14 = vadd.f32 %v6126_v38, %v4868_v28  ;;  %v5045_v38 = vld [vmem:[#allocation2 + $0x168] sm:$0xf]  ;;  %v2576_v28 = vsel %vm12406_vm15, %v2571_v35, %v13260_v25  ;;  %v5702_v25 = vrot.slane %v5701_v3, 4  ;;  %v2590_v31 = vrot.slane %v2588_v48, 4  ;;  %v5047_v48 = vld [vmem:[#allocation2 + $0x170] sm:$0x1] }
 0x251   :  { %v5709_v4 = vshrl.u32 %v5045_v38, 16  ;;  %v13281_v30 = vrot.slane %v2597_v12, 5  ;;  %v3664_v12 = vsel %vm12377_vm12, %v11082_v49, %v3663_v26 }
 0x252   :  { %14583 = vst [vmem:[#allocation15_spill] sm:$0xff] %v13265_v14  ;;  %v3010_v47 = vpop.f32.mrf.mxu1  ;;  %v2586_v14 = vsel %vm12406_vm15, %v2581_v24, %v2585_v21  ;;  %v2603_v21 = vrot.slane %v2601_v9, 4  ;;  %v1923_v24 = vld [vmem:[#allocation2 + $0x164] sm:$0x1]  ;;  %v3362_v9 = vld [vmem:[#allocation2 + $0x16c] sm:$0xf] }
 0x253   :  { %v3183_v56 = vadd.f32 %v3010_v47, %v14584_v43  ;;  %v5712_v47 = vshll.u32 %v5045_v38, 16  ;;  %v5718_v43 = vshll.u32 %v5046_v53, 16 }
 0x255   :  { %11048 = vmatmul.msk.bf16.gmra.mxu1 %vm1510_vm7, %v2801_v59  ;;  %v4172_v7 = vadd.f32 %v3999_v52, %v3183_v56  ;;  %v4694_v62 = vpop.f32.mrf.mxu3  ;;  %v4001_v51 = vpop.f32.mrf.mxu2  ;;  %v11750_v59 = vld [vmem:[#allocation2 + $0x150] sm:$0xff]  ;;  %v3360_v52 = vld [vmem:[#allocation2 + $0x164] sm:$0x1]  ;;  %v5722_v56 = vshrl.u32 %v5046_v53, 16  ;;  %v2593_v53 = vrot.slane %v2591_v42, 5  ;;  %v5714_v17 = vrot.slane %v5712_v47, 5 }
 0x256   :  { %v4869_v19 = vadd.f32 %v4694_v62, %v4171_v6  ;;  %v6131_v58 = vpop.f32.mrf.mxu0  ;;  %v3666_v62 = vrot.slane %v3360_v52, 5  ;;  %v13283_v3 = vrot.slane %v5718_v43, 5  ;;  %v2765_v52 = vunpack.c.l.b16 %v2586_v14 }
 0x257   :  { %v5707_v42 = vsel %vm12406_vm15, %v5702_v25, %v5706_v23  ;;  %v2594_v14 = vor.u32 %v2593_v53, %v2590_v31  ;;  %v2604_v43 = vor.u32 %v2603_v21, %v13281_v30 }
 0x258   :  { %v13275_v35 = vadd.f32 %v6128_v40, %v4869_v19  ;;  %v5711_v40 = vrot.slane %v5709_v4, 4  ;;  %v2764_v19 = vunpack.c.l.b16 %v2576_v28  ;;  %v2607_v28 = vshll.u32 %v1923_v24, 16 }
 0x259   :  { %11328 = vmatmul.msk.bf16.gmra.mxu0 %vm1510_vm7, %v5922_v41  ;;  %v5724_v41 = vrot.slane %v5722_v56, 4  ;;  %v5886_v49 = vunpack.c.l.b16 %v5707_v42  ;;  %v2595_v31 = vrot.slane %v2594_v14, 4  ;;  %v2605_v21 = vrot.slane %v2604_v43, 4 }
 0x25a   :  { %14585 = vst [vmem:[#allocation17_spill] sm:$0xff] %v13275_v35  ;;  %v3012_v6 = vpop.f32.mrf.mxu1  ;;  %11288 = vmatmul.msk.bf16.gmra.mxu3 %vm1510_vm7, %v11750_v59  ;;  %11121 = vmatmul.msk.bf16.gmra.mxu2 %vm1510_vm7, %v3791_v54  ;;  %v5697_v54 = vsel %vm12406_vm15, %v5692_v32, %v13263_v18  ;;  %v5715_v56 = vor.u32 %v5714_v17, %v5711_v40  ;;  %v5728_v32 = vshll.u32 %v5047_v48, 16  ;;  %v2609_v53 = vrot.slane %v2607_v28, 5 }
 0x25b   :  { %v3184_v38 = vadd.f32 %v3012_v6, %v14586_v50  ;;  %v5725_v6 = vor.u32 %v5724_v41, %v13283_v3  ;;  %v2802_v18 = vpack.c.b16 %v2765_v52, %v2764_v19  ;;  %v3670_v50 = vrot.slane %v3362_v9, 5  ;;  %v1924_v41 = vld [vmem:[#allocation2 + $0x168] sm:$0xf] }
 0x25c   :  { %v5885_v26 = vunpack.c.l.b16 %v5697_v54  ;;  %v5716_v24 = vrot.slane %v5715_v56, 4  ;;  %v5730_v17 = vrot.slane %v5728_v32, 5  ;;  %v3673_v48 = vrot.slane %v3363_v13, 5  ;;  %v1925_v54 = vld [vmem:[#allocation2 + $0x16c] sm:$0xf] }
 0x25d   :  { %v4173_v10 = vadd.f32 %v4001_v51, %v3184_v38  ;;  %v4697_v35 = vpop.f32.mrf.mxu3  ;;  %v4004_v59 = vpop.f32.mrf.mxu2  ;;  %v3667_v51 = vsel %vm12377_vm12, %v3665_v61, %v3666_v62  ;;  %v3361_v38 = vld [vmem:[#allocation2 + $0x168] sm:$0xe]  ;;  %v14588_v61 = vld [vmem:[#allocation21_spill] sm:$0xff]  ;;  %v5726_v40 = vrot.slane %v5725_v6, 4  ;;  %v3672_v52 = vrot.slane %v3670_v50, 4 }
 0x25e   :  { %v4870_v4 = vadd.f32 %v4697_v35, %v4172_v7  ;;  %v6133_v47 = vpop.f32.mrf.mxu0  ;;  %v3755_v7 = vunpack.c.l.b16 %v3664_v12  ;;  %v3756_v35 = vunpack.c.l.b16 %v3667_v51  ;;  %v11083_v19 = vrot.slane %v3361_v38, 9  ;;  %v11751_v12 = vld [vmem:[#allocation2 + $0x15c] sm:$0xff]  ;;  %v5048_v6 = vld [vmem:[#allocation2 + $0x174] sm:$0xf]  ;;  %v5049_v32 = vld [vmem:[#allocation2 + $0x178] sm:$0xf] }
 0x25f   :  { %v5923_v9 = vpack.c.b16 %v5886_v49, %v5885_v26  ;;  %v2600_v28 = vsel %vm12406_vm15, %v2595_v31, %v13281_v30  ;;  %v2612_v43 = vshrl.u32 %v1924_v41, 16  ;;  %v2615_v56 = vshll.u32 %v1924_v41, 16  ;;  %v14590_v31 = vld [vmem:[#allocation23_spill] sm:$0xff] }
 0x260   :  { %v13296_v23 = vadd.f32 %v6131_v58, %v4870_v4  ;;  %v3792_v51 = vpack.c.b16 %v3756_v35, %v3755_v7  ;;  %v5721_v13 = vsel %vm12406_vm15, %v5716_v24, %v13283_v3  ;;  %v2625_v26 = vshrl.u32 %v1925_v54, 16 }
 0x261   :  { %v3671_v49 = vsel %vm12377_vm12, %v11083_v19, %v3670_v50  ;;  %v3674_v30 = vsel %vm12377_vm12, %v3672_v52, %v3673_v48  ;;  %v5733_v38 = vshrl.u32 %v5048_v6, 16  ;;  %v5746_v3 = vshrl.u32 %v5049_v32, 16 }
 0x262   :  { %14587 = vst [vmem:[#allocation19_spill] sm:$0xff] %v13296_v23  ;;  %v3015_v25 = vpop.f32.mrf.mxu1  ;;  %v2614_v50 = vrot.slane %v2612_v43, 4  ;;  %v2617_v24 = vrot.slane %v2615_v56, 5  ;;  %v2627_v41 = vrot.slane %v2625_v26, 4  ;;  %v3757_v48 = vunpack.c.l.b16 %v3671_v49  ;;  %v1927_v26 = vld [vmem:[#allocation2 + $0x174] sm:$0xf] }
 0x263   :  { %v3185_v62 = vadd.f32 %v3015_v25, %v14588_v61  ;;  %v5736_v61 = vshll.u32 %v5048_v6, 16  ;;  %v5735_v6 = vrot.slane %v5733_v38, 4  ;;  %v5748_v43 = vrot.slane %v5746_v3, 4 }
 0x265   :  { %11049 = vmatmul.msk.bf16.gmra.mxu1 %vm1510_vm7, %v2802_v18  ;;  %v4174_v58 = vadd.f32 %v4004_v59, %v3185_v62  ;;  %v4699_v42 = vpop.f32.mrf.mxu3  ;;  %v4006_v4 = vpop.f32.mrf.mxu2  ;;  %v2610_v59 = vsel %vm12406_vm15, %v2605_v21, %v2609_v53  ;;  %v2621_v18 = vshll.u32 %v1925_v54, 16  ;;  %v5742_v62 = vshll.u32 %v5049_v32, 16 }
 0x266   :  { %v4871_v25 = vadd.f32 %v4699_v42, %v4173_v10  ;;  %v6136_v14 = vpop.f32.mrf.mxu0  ;;  %v5731_v10 = vsel %vm12406_vm15, %v5726_v40, %v5730_v17  ;;  %v2766_v21 = vunpack.c.l.b16 %v2600_v28  ;;  %v2767_v40 = vunpack.c.l.b16 %v2610_v59  ;;  %v1926_v42 = vld [vmem:[#allocation2 + $0x170] sm:$0x1] }
 0x267   :  { %v13320_v17 = vunpack.c.l.b16 %v5721_v13  ;;  %v13324_v52 = vunpack.c.l.b16 %v5731_v10  ;;  %v3758_v54 = vunpack.c.l.b16 %v3674_v30  ;;  %v13326_v28 = vrot.slane %v5742_v62, 5  ;;  %v3365_v13 = vld [vmem:[#allocation2 + $0x178] sm:$0xf] }
 0x268   :  { %v13314_v7 = vadd.f32 %v6133_v47, %v4871_v25  ;;  %v13322_v47 = vrot.slane %v2621_v18, 5  ;;  %v5050_v25 = vld [vmem:[#allocation2 + $0x17c] sm:$0x1]  ;;  %v2618_v59 = vor.u32 %v2617_v24, %v2614_v50  ;;  %v2803_v10 = vpack.c.b16 %v2767_v40, %v2766_v21 }
 0x269   :  { %11329 = vmatmul.msk.bf16.gmra.mxu0 %vm1510_vm7, %v5923_v9  ;;  %v5924_v49 = vpack.c.b16 %v13324_v52, %v13320_v17  ;;  %v5752_v30 = vshll.u32 %v5050_v25, 16  ;;  %v3677_v3 = vrot.slane %v3365_v13, 5  ;;  %v14592_v50 = vld [vmem:[#allocation25_spill] sm:$0xff]  ;;  %v2639_v21 = vshll.u32 %v1927_v26, 16 }
 0x26a   :  { %14589 = vst [vmem:[#allocation21_spill] sm:$0xff] %v13314_v7  ;;  %v3017_v35 = vpop.f32.mrf.mxu1  ;;  %11289 = vmatmul.msk.bf16.gmra.mxu3 %vm1510_vm7, %v11751_v12  ;;  %11122 = vmatmul.msk.bf16.gmra.mxu2 %vm1510_vm7, %v3792_v51  ;;  %v5738_v51 = vrot.slane %v5736_v61, 5  ;;  %v2628_v18 = vor.u32 %v2627_v41, %v13322_v47  ;;  %v3793_v61 = vpack.c.b16 %v3758_v54, %v3757_v48  ;;  %v2619_v41 = vrot.slane %v2618_v59, 4  ;;  %v3366_v17 = vld [vmem:[#allocation2 + $0x17c] sm:$0x1] }
 0x26b   :  { %v3186_v53 = vadd.f32 %v3017_v35, %v14590_v31  ;;  %v1928_v35 = vld [vmem:[#allocation2 + $0x178] sm:$0xf]  ;;  %v5754_v48 = vrot.slane %v5752_v30, 5  ;;  %v3679_v59 = vrot.slane %v3677_v3, 4  ;;  %v2641_v23 = vrot.slane %v2639_v21, 5 }
 0x26c   :  { %v5739_v62 = vor.u32 %v5738_v51, %v5735_v6  ;;  %v2629_v40 = vrot.slane %v2628_v18, 4  ;;  %v2645_v52 = vshll.u32 %v1928_v35, 16  ;;  %v2649_v25 = vshrl.u32 %v1928_v35, 16  ;;  %v5052_v30 = vld [vmem:[#allocation2 + $0x184] sm:$0xf] }
 0x26d   :  { %v4175_v19 = vadd.f32 %v4006_v4, %v3186_v53  ;;  %v4702_v12 = vpop.f32.mrf.mxu3  ;;  %v4009_v9 = vpop.f32.mrf.mxu2  ;;  %v2631_v4 = vshll.u32 %v1926_v42, 16  ;;  %v5051_v53 = vld [vmem:[#allocation2 + $0x180] sm:$0xf]  ;;  %v3364_v42 = vld [vmem:[#allocation2 + $0x174] sm:$0xe]  ;;  %v3680_v18 = vrot.slane %v3366_v17, 5 }
 0x26e   :  { %v4872_v56 = vadd.f32 %v4702_v12, %v4174_v58  ;;  %v6138_v32 = vpop.f32.mrf.mxu0  ;;  %v5749_v58 = vor.u32 %v5748_v43, %v13326_v28  ;;  %v2636_v12 = vshrl.u32 %v1927_v26, 16  ;;  %v5757_v54 = vshrl.u32 %v5051_v53, 16  ;;  %v11752_v26 = vld [vmem:[#allocation2 + $0x168] sm:$0xff] }
 0x26f   :  { %v2633_v7 = vrot.slane %v2631_v4, 5  ;;  %v5760_v6 = vshll.u32 %v5051_v53, 16  ;;  %v13336_v35 = vrot.slane %v2645_v52, 5  ;;  %v2655_v21 = vshll.u32 %v1929_v37, 16 }
 0x270   :  { %v13331_v31 = vadd.f32 %v6136_v14, %v4872_v56  ;;  %v5740_v56 = vrot.slane %v5739_v62, 4  ;;  %v5750_v13 = vrot.slane %v5749_v58, 4  ;;  %v2638_v4 = vrot.slane %v2636_v12, 4 }
 0x271   :  { %v5759_v53 = vrot.slane %v5757_v54, 4  ;;  %v5762_v62 = vrot.slane %v5760_v6, 5  ;;  %v5766_v17 = vshll.u32 %v5052_v30, 16  ;;  %v5770_v52 = vshrl.u32 %v5052_v30, 16 }
 0x272   :  { %14591 = vst [vmem:[#allocation23_spill] sm:$0xff] %v13331_v31  ;;  %v3020_v38 = vpop.f32.mrf.mxu1  ;;  %v5755_v12 = vsel %vm12406_vm15, %v5750_v13, %v5754_v48 }
 0x273   :  { %v3187_v24 = vadd.f32 %v3020_v38, %v14592_v50  ;;  %v11084_v38 = vrot.slane %v3364_v42, 9  ;;  %v5745_v42 = vsel %vm12406_vm15, %v5740_v56, %v13326_v28  ;;  %v5763_v6 = vor.u32 %v5762_v62, %v5759_v53 }
 0x274   :  { %v5890_v13 = vunpack.c.l.b16 %v5755_v12  ;;  %v5768_v30 = vrot.slane %v5766_v17, 5  ;;  %v1931_v17 = vld [vmem:[#allocation2 + $0x184] sm:$0xf] }
 0x275   :  { %11050 = vmatmul.msk.bf16.gmra.mxu1 %vm1510_vm7, %v2803_v10  ;;  %v4176_v14 = vadd.f32 %v4009_v9, %v3187_v24  ;;  %v4704_v51 = vpop.f32.mrf.mxu3  ;;  %v4011_v43 = vpop.f32.mrf.mxu2  ;;  %v2651_v10 = vrot.slane %v2649_v25, 4  ;;  %v2624_v9 = vsel %vm12406_vm15, %v2619_v41, %v13322_v47  ;;  %v2634_v24 = vsel %vm12406_vm15, %v2629_v40, %v2633_v7  ;;  %v173_v40 = vld [vmem:[#allocation2 + $0x198] sm:$0x1] }
 0x276   :  { %v4873_v50 = vadd.f32 %v4704_v51, %v4175_v19  ;;  %v6141_v31 = vpop.f32.mrf.mxu0  ;;  %v3678_v47 = vsel %vm12377_vm12, %v11084_v38, %v3677_v3  ;;  %v2642_v7 = vor.u32 %v2641_v23, %v2638_v4  ;;  %v174_v25 = vsel %vm11975_vm3, 0, %v173_v40  ;;  %v5053_v38 = vld [vmem:[#allocation2 + $0x188] sm:$0x1] }
 0x277   :  { %v2652_v28 = vor.u32 %v2651_v10, %v13336_v35  ;;  %v2768_v48 = vunpack.c.l.b16 %v2624_v9  ;;  %v2769_v54 = vunpack.c.l.b16 %v2634_v24  ;;  %v3759_v37 = vunpack.c.l.b16 %v3678_v47  ;;  %175 = vst [vmem:[#allocation2 + $0x198] sm:$0x1] %v174_v25 }
 0x278   :  { %v13341_v58 = vadd.f32 %v6138_v32, %v4873_v50  ;;  %v14594_v32 = vld [vmem:[#allocation28_spill] sm:$0xff]  ;;  %v2657_v10 = vrot.slane %v2655_v21, 5  ;;  %v5764_v9 = vrot.slane %v5763_v6, 4  ;;  %v5776_v24 = vshll.u32 %v5053_v38, 16 }
 0x279   :  { %11330 = vmatmul.msk.bf16.gmra.mxu0 %vm1510_vm7, %v5924_v49  ;;  %v3681_v49 = vsel %vm12377_vm12, %v3679_v59, %v3680_v18  ;;  %v336_v18 = vld [vmem:[#allocation4 + $0x1f0] sm:$0xff]  ;;  %v2653_v4 = vrot.slane %v2652_v28, 4  ;;  %v11753_v6 = vld [vmem:[#allocation2 + $0x174] sm:$0xff] }
 0x27a   :  { %14593 = vst [vmem:[#allocation25_spill] sm:$0xff] %v13341_v58  ;;  %v3022_v19 = vpop.f32.mrf.mxu1  ;;  %11290 = vmatmul.msk.bf16.gmra.mxu3 %vm1510_vm7, %v11752_v26  ;;  %11123 = vmatmul.msk.bf16.gmra.mxu2 %vm1510_vm7, %v3793_v61  ;;  %v5889_v61 = vunpack.c.l.b16 %v5745_v42  ;;  %v3760_v50 = vunpack.c.l.b16 %v3681_v49  ;;  %v2643_v26 = vrot.slane %v2642_v7, 4  ;;  %v337_v42 = vld [vmem:[#allocation4 + $0x1f8] sm:$0xff]  ;;  %v400_v12 = vpack.c.bf16 %v336_v18, %v336_v18  ;;  %v1930_v49 = vld [vmem:[#allocation2 + $0x180] sm:$0xf] }
 0x27b   :  { %v3188_v41 = vadd.f32 %v3022_v19, %v14594_v32  ;;  %v5772_v19 = vrot.slane %v5770_v52, 4  ;;  %v14596_v32 = vld [vmem:[#allocation31_spill] sm:$0xff]  ;;  %v2658_v40 = vsel %vm12406_vm15, %v2653_v4, %v2657_v10  ;;  %v5769_v52 = vsel %vm12406_vm15, %v5764_v9, %v5768_v30 }
 0x27c   :  { %v2648_v47 = vsel %vm12406_vm15, %v2643_v26, %v13336_v35  ;;  %v5925_v7 = vpack.c.b16 %v5890_v13, %v5889_v61  ;;  %v3794_v21 = vpack.c.b16 %v3760_v50, %v3759_v37  ;;  %v13372_v25 = vrot.slane %v5776_v24, 5  ;;  %v5054_v10 = vld [vmem:[#allocation2 + $0x18c] sm:$0xf]  ;;  %v5055_v24 = vld [vmem:[#allocation2 + $0x190] sm:$0xf] }
 0x27d   :  { %v4177_v3 = vadd.f32 %v4011_v43, %v3188_v41  ;;  %v4707_v51 = vpop.f32.mrf.mxu3  ;;  %v4014_v56 = vpop.f32.mrf.mxu2  ;;  %v2804_v43 = vpack.c.b16 %v2769_v54, %v2768_v48  ;;  %v3368_v41 = vld [vmem:[#allocation2 + $0x184] sm:$0xf]  ;;  %v5773_v28 = vor.u32 %v5772_v19, %v5768_v30  ;;  %v3367_v48 = vld [vmem:[#allocation2 + $0x180] sm:$0xe]  ;;  %v401_v54 = vpack.c.bf16 %v337_v42, %v337_v42 }
 0x27e   :  { %v4874_v59 = vadd.f32 %v4707_v51, %v4176_v14  ;;  %v6143_v23 = vpop.f32.mrf.mxu0  ;;  %v13374_v61 = vunpack.c.l.b16 %v2648_v47  ;;  %v3684_v13 = vrot.slane %v3368_v41, 5  ;;  %v2660_v38 = vshrl.u32 %v1930_v49, 16 }
 0x27f   :  { %v13378_v26 = vunpack.c.l.b16 %v2658_v40  ;;  %v2663_v18 = vshll.u32 %v1930_v49, 16  ;;  %v2669_v4 = vshll.u32 %v1931_v17, 16  ;;  %v5774_v30 = vrot.slane %v5773_v28, 4  ;;  %v14598_v28 = vld [vmem:[#allocation34_spill] sm:$0xff] }
 0x280   :  { %v13361_v53 = vadd.f32 %v6141_v31, %v4874_v59  ;;  %v932_v59 = vshrl.u32 %v400_v12, 16  ;;  %v13380_v19 = vunpack.c.l.b16 %v5769_v52  ;;  %v2673_v9 = vshrl.u32 %v1931_v17, 16 }
 0x281   :  { %v935_v42 = vshll.u32 %v400_v12, 16  ;;  %v3686_v47 = vrot.slane %v3684_v13, 4  ;;  %v2662_v40 = vrot.slane %v2660_v38, 4  ;;  %v5781_v49 = vshrl.u32 %v5054_v10, 16 }
 0x282   :  { %14595 = vst [vmem:[#allocation28_spill] sm:$0xff] %v13361_v53  ;;  %v3025_v62 = vpop.f32.mrf.mxu1  ;;  %v2665_v17 = vrot.slane %v2663_v18, 5  ;;  %v5784_v12 = vshll.u32 %v5054_v10, 16  ;;  %v943_v53 = vshll.u32 %v401_v54, 16 }
 0x283   :  { %v3189_v14 = vadd.f32 %v3025_v62, %v14596_v32  ;;  %v934_v62 = vrot.slane %v932_v59, 7  ;;  %v940_v32 = vshrl.u32 %v401_v54, 16  ;;  %v5794_v59 = vshrl.u32 %v5055_v24, 16 }
 0x284   :  { %v5783_v10 = vrot.slane %v5781_v49, 4 }
 0x285   :  { %11051 = vmatmul.msk.bf16.gmra.mxu1 %vm1510_vm7, %v2804_v43  ;;  %v4178_v31 = vadd.f32 %v4014_v56, %v3189_v14  ;;  %v4709_v35 = vpop.f32.mrf.mxu3  ;;  %v4016_v51 = vpop.f32.mrf.mxu2  ;;  %v3369_v56 = vld [vmem:[#allocation2 + $0x188] sm:$0x1]  ;;  %v11085_v43 = vrot.slane %v3367_v48, 9  ;;  %v13388_v48 = vrot.slane %v2669_v4, 5  ;;  %v938_v38 = vrot.slane %v934_v62, 4 }
 0x286   :  { %v4875_v37 = vadd.f32 %v4709_v35, %v4177_v3  ;;  %v13376_v50 = vpop.f32.mrf.mxu0  ;;  %v3687_v41 = vrot.slane %v3369_v56, 5  ;;  %v2675_v35 = vrot.slane %v2673_v9, 4  ;;  %v937_v56 = vor.u32 %v935_v42, %v934_v62  ;;  %v1263_v9 = vld [vmem:[#allocation2 + $0x198] sm:$0xf] }
 0x287   :  { %v3685_v18 = vsel %vm12377_vm12, %v11085_v43, %v3684_v13  ;;  %v2666_v42 = vor.u32 %v2665_v17, %v2662_v40  ;;  %v5786_v62 = vrot.slane %v5784_v12, 5  ;;  %v2805_v13 = vpack.c.b16 %v13378_v26, %v13374_v61  ;;  %v3371_v40 = vld [vmem:[#allocation2 + $0x190] sm:$0xf]  ;;  %v14599_v17 = vld [vmem:[#allocation37_spill] sm:$0xff] }
 0x288   :  { %v13382_v14 = vadd.f32 %v6143_v23, %v4875_v37  ;;  %v5790_v23 = vshll.u32 %v5055_v24, 16  ;;  %v13390_v37 = vrot.slane %v940_v32, 7  ;;  %v3688_v4 = vsel %vm12377_vm12, %v3686_v47, %v3687_v41  ;;  %v271_v24 = vld [vmem:[#allocation2 + $0x1a0] sm:$0x1] }
 0x289   :  { %11331 = vmatmul.msk.bf16.gmra.mxu0 %vm1510_vm7, %v5925_v7  ;;  %v3761_v41 = vunpack.c.l.b16 %v3685_v18  ;;  %v2667_v26 = vrot.slane %v2666_v42, 4  ;;  %v5787_v29 = vor.u32 %v5786_v62, %v5783_v10  ;;  %v1933_v10 = vld [vmem:[#allocation2 + $0x18c] sm:$0xf] }
 0x28a   :  { %14597 = vst [vmem:[#allocation31_spill] sm:$0xff] %v13382_v14  ;;  %v3027_v3 = vpop.f32.mrf.mxu1  ;;  %11291 = vmatmul.msk.bf16.gmra.mxu3 %vm1510_vm7, %v11753_v6  ;;  %11124 = vmatmul.msk.bf16.gmra.mxu2 %vm1510_vm7, %v3794_v21  ;;  %v1932_v14 = vld [vmem:[#allocation2 + $0x188] sm:$0x1]  ;;  %v5779_v21 = vsel %vm12406_vm15, %v5774_v30, %v13372_v25  ;;  %v945_v54 = vor.u32 %v943_v53, %v13390_v37  ;;  %v13401_v25 = vrot.slane %v5790_v23, 5  ;;  %v5796_v30 = vrot.slane %v5794_v59, 4 }
 0x28b   :  { %v3190_v52 = vadd.f32 %v3027_v3, %v14598_v28  ;;  %v2676_v3 = vor.u32 %v2675_v35, %v13388_v48  ;;  %v2679_v28 = vshll.u32 %v1932_v14, 16  ;;  %v5892_v47 = vunpack.c.l.b16 %v5779_v21  ;;  %v3370_v59 = vld [vmem:[#allocation2 + $0x18c] sm:$0xe] }
 0x28c   :  { %v946_v43 = vsel %vm11999_vm8, %v938_v38, %v945_v54  ;;  %v3762_v14 = vunpack.c.l.b16 %v3688_v4  ;;  %v5797_v5 = vor.u32 %v5796_v30, %v13401_v25  ;;  %v3372_v4 = vld [vmem:[#allocation2 + $0x194] sm:$0x1]  ;;  %v2672_v42 = vsel %vm12406_vm15, %v2667_v26, %v13388_v48 }
 0x28d   :  { %v4179_v7 = vadd.f32 %v4016_v51, %v3190_v52  ;;  %v4712_v58 = vpop.f32.mrf.mxu3  ;;  %v4019_v6 = vpop.f32.mrf.mxu2  ;;  %v5056_v52 = vld [vmem:[#allocation2 + $0x194] sm:$0x1]  ;;  %1266 = vst.msk [vmem:[#allocation2 + $0x19c] sm:$0xf] %vm61_vm0, %v946_v43  ;;  %v2677_v34 = vrot.slane %v2676_v3, 4  ;;  %v2681_v35 = vrot.slane %v2679_v28, 5 }
 0x28e   :  { %v4876_v51 = vadd.f32 %v4712_v58, %v4178_v31  ;;  %v6148_v32 = vpop.f32.mrf.mxu0  ;;  %v1264_v58 = vsel %vm12006_vm9, %v937_v56, %v1263_v9  ;;  %v272_v31 = vsel %vm11983_vm6, 0, %v271_v24  ;;  %v5800_v12 = vshll.u32 %v5056_v52, 16  ;;  %v1934_v3 = vld [vmem:[#allocation2 + $0x190] sm:$0xf] }
 0x28f   :  { %1265 = vst [vmem:[#allocation2 + $0x198] sm:$0xf] %v1264_v58  ;;  %v3691_v56 = vrot.slane %v3371_v40, 5  ;;  %v3795_v18 = vpack.c.b16 %v3762_v14, %v3761_v41  ;;  %v5788_v62 = vrot.slane %v5787_v29, 4  ;;  %v5798_v28 = vrot.slane %v5797_v5, 4 }
 0x290   :  { %v13412_v49 = vadd.f32 %v13376_v50, %v4876_v51  ;;  %273 = vst [vmem:[#allocation2 + $0x1a0] sm:$0x1] %v272_v31  ;;  %v5926_v50 = vpack.c.b16 %v5892_v47, %v13380_v19  ;;  %v11754_v51 = vld [vmem:[#allocation2 + $0x180] sm:$0xff]  ;;  %v5802_v54 = vrot.slane %v5800_v12, 5  ;;  %v11086_v52 = vrot.slane %v3370_v59, 9  ;;  %v14600_v47 = vld [vmem:[#allocation40_spill] sm:$0xff] }
 0x291   :  { %v947_v19 = vrot.slane %v13390_v37, 4  ;;  %v3693_v30 = vrot.slane %v3691_v56, 4  ;;  %v2684_v43 = vshrl.u32 %v1933_v10, 16  ;;  %v2687_v31 = vshll.u32 %v1933_v10, 16 }
 0x292   :  { %v3030_v53 = vpop.f32.mrf.mxu1  ;;  %v2693_v48 = vshll.u32 %v1934_v3, 16  ;;  %v2772_v14 = vunpack.c.l.b16 %v2672_v42 }
 0x293   :  { %v3191_v61 = vadd.f32 %v3030_v53, %v14599_v17  ;;  %v2697_v53 = vshrl.u32 %v1934_v3, 16  ;;  %v2686_v5 = vrot.slane %v2684_v43, 4 }
 0x294   :  { %v5058_v29 = vld [vmem:[#allocation2 + $0x19c] sm:$0xf] }
 0x295   :  { %11052 = vmatmul.msk.bf16.gmra.mxu1 %vm1510_vm7, %v2805_v13  ;;  %v4180_v23 = vadd.f32 %v4019_v6, %v3191_v61  ;;  %v4714_v38 = vpop.f32.mrf.mxu3  ;;  %v4021_v21 = vpop.f32.mrf.mxu2  ;;  %v2682_v6 = vsel %vm12406_vm15, %v2677_v34, %v2681_v35  ;;  %v3694_v13 = vrot.slane %v3372_v4, 5  ;;  %v5803_v61 = vsel %vm12406_vm15, %v5798_v28, %v5802_v54 }
 0x296   :  { %v4877_v9 = vadd.f32 %v4714_v38, %v4179_v7  ;;  %v6151_v24 = vpop.f32.mrf.mxu0  ;;  %v5057_v37 = vld [vmem:[#allocation2 + $0x198] sm:$0xf]  ;;  %v2773_v17 = vunpack.c.l.b16 %v2682_v6  ;;  %v3692_v34 = vsel %vm12377_vm12, %v11086_v52, %v3691_v56  ;;  %v5814_v42 = vshll.u32 %v5058_v29, 16 }
 0x297   :  { %v1267_v40 = vld [vmem:[#allocation2 + $0x1a0] sm:$0x1]  ;;  %v3695_v35 = vsel %vm12377_vm12, %v3693_v30, %v3694_v13  ;;  %v5805_v4 = vshrl.u32 %v5057_v37, 16  ;;  %v5894_v56 = vunpack.c.l.b16 %v5803_v61  ;;  %v3763_v3 = vunpack.c.l.b16 %v3692_v34  ;;  %v11755_v34 = vld [vmem:[#allocation2 + $0x18c] sm:$0xff] }
 0x298   :  { %v13425_v7 = vadd.f32 %v6148_v32, %v4877_v9  ;;  %v5793_v32 = vsel %vm12406_vm15, %v5788_v62, %v13401_v25  ;;  %v1268_v26 = vsel %vm11975_vm3, %v947_v19, %v1267_v40  ;;  %v2695_v25 = vrot.slane %v2693_v48, 5 }
 0x299   :  { %11332 = vmatmul.msk.bf16.gmra.mxu0 %vm1510_vm7, %v5926_v50  ;;  %1269 = vst [vmem:[#allocation2 + $0x1a0] sm:$0x1] %v1268_v26  ;;  %v2689_v50 = vrot.slane %v2687_v31, 5  ;;  %v2806_v62 = vpack.c.b16 %v2773_v17, %v2772_v14  ;;  %v5893_v54 = vunpack.c.l.b16 %v5793_v32  ;;  %v3764_v6 = vunpack.c.l.b16 %v3695_v35 }
 0x29a   :  { %v3032_v58 = vpop.f32.mrf.mxu1  ;;  %11292 = vmatmul.msk.bf16.gmra.mxu3 %vm1510_vm7, %v11754_v51  ;;  %11125 = vmatmul.msk.bf16.gmra.mxu2 %vm1510_vm7, %v3795_v18  ;;  %v2699_v18 = vrot.slane %v2697_v53, 4  ;;  %v5808_v51 = vshll.u32 %v5057_v37, 16  ;;  %v2703_v13 = vshll.u32 %v1935_v1, 16  ;;  %v5807_v43 = vrot.slane %v5805_v4, 4 }
 0x29b   :  { %v3192_v41 = vadd.f32 %v3032_v58, %v14600_v47  ;;  %v2690_v19 = vor.u32 %v2689_v50, %v2686_v5  ;;  %v14601_v58 = vld [vmem:[#allocation43_spill] sm:$0xff]  ;;  %v5816_v48 = vrot.slane %v5814_v42, 5  ;;  %v3796_v17 = vpack.c.b16 %v3764_v6, %v3763_v3  ;;  %v8084_v3 = vld [vmem:[#allocation2 + $0x1c] sm:$0xf] }
 0x29c   :  { %v2700_v30 = vor.u32 %v2699_v18, %v2695_v25  ;;  %v2705_v61 = vrot.slane %v2703_v13, 5 }
 0x29d   :  { %v4181_v12 = vadd.f32 %v4021_v21, %v3192_v41  ;;  %v4717_v59 = vpop.f32.mrf.mxu3  ;;  %v4024_v38 = vpop.f32.mrf.mxu2  ;;  %v5818_v21 = vshrl.u32 %v5058_v29, 16  ;;  %v5927_v41 = vpack.c.b16 %v5894_v56, %v5893_v54 }
 0x29e   :  { %v4878_v10 = vadd.f32 %v4717_v59, %v4180_v23  ;;  %v6153_v9 = vpop.f32.mrf.mxu0  ;;  %v5810_v23 = vrot.slane %v5808_v51, 5  ;;  %v2701_v32 = vrot.slane %v2700_v30, 4 }
 0x29f   :  { %v5820_v53 = vrot.slane %v5818_v21, 4  ;;  %v8083_v21 = vld [vmem:[#allocation2 + $0x18] sm:$0xf] }
 0x2a0   :  { %v13442_v28 = vadd.f32 %v6151_v24, %v4878_v10  ;;  %v5059_v47 = vld [vmem:[#allocation2 + $0x1a0] sm:$0x1]  ;;  %v2691_v24 = vrot.slane %v2690_v19, 4  ;;  %v5811_v35 = vor.u32 %v5810_v23, %v5807_v43  ;;  %v14602_v10 = vld [vmem:[#allocation46_spill] sm:$0xff]  ;;  %v8180_v19 = vshrl.u32 %v8083_v21, 16 }
 0x2a1   :  { %v5821_v5 = vor.u32 %v5820_v53, %v5816_v48  ;;  %v5824_v59 = vshll.u32 %v5059_v47, 16  ;;  %v8193_v23 = vshrl.u32 %v8084_v3, 16 }
 0x2a2   :  { %v3035_v52 = vpop.f32.mrf.mxu1  ;;  %v2696_v18 = vsel %vm12406_vm15, %v2691_v24, %v2695_v25  ;;  %v5812_v1 = vrot.slane %v5811_v35, 4  ;;  %v6398_v24 = vld [vmem:[#allocation2 + $0xc] sm:$0xe] }
 0x2a3   :  { %v3193_v31 = vadd.f32 %v3035_v52, %v14601_v58  ;;  %v5822_v51 = vrot.slane %v5821_v5, 4  ;;  %v5826_v42 = vrot.slane %v5824_v59, 5  ;;  %v2774_v54 = vunpack.c.l.b16 %v2696_v18  ;;  %v6399_v52 = vld [vmem:[#allocation2 + $0x10] sm:$0xf] }
 0x2a4   :  { %v5817_v13 = vsel %vm12406_vm15, %v5812_v1, %v5816_v48  ;;  %v8183_v58 = vshll.u32 %v8083_v21, 16  ;;  %v6592_v47 = vrot.slane %v6399_v52, 5  ;;  %v9518_v48 = vld [vmem:[#allocation2 + $0x1c] sm:$0xf]  ;;  %v8195_v5 = vrot.slane %v8193_v23, 4 }
 0x2a5   :  { %11053 = vmatmul.msk.bf16.gmra.mxu1 %vm1510_vm7, %v2806_v62  ;;  %v4182_v14 = vadd.f32 %v4024_v38, %v3193_v31  ;;  %v4719_v40 = vpop.f32.mrf.mxu3  ;;  %v4026_v37 = vpop.f32.mrf.mxu2  ;;  %v2706_v38 = vsel %vm12406_vm15, %v2701_v32, %v2705_v61  ;;  %v5827_v43 = vsel %vm12406_vm15, %v5822_v51, %v5826_v42  ;;  %v8189_v31 = vshll.u32 %v8084_v3, 16  ;;  %v6400_v32 = vld [vmem:[#allocation2 + $0x14] sm:$0x1]  ;;  %v9517_v51 = vld [vmem:[#allocation2 + $0x18] sm:$0xe] }
 0x2a6   :  { %v4879_v26 = vadd.f32 %v4719_v40, %v4181_v12  ;;  %v6156_v29 = vpop.f32.mrf.mxu0  ;;  %v2775_v56 = vunpack.c.l.b16 %v2706_v38  ;;  %v6594_v18 = vrot.slane %v6592_v47, 4  ;;  %v8085_v38 = vld [vmem:[#allocation2 + $0x20] sm:$0x1]  ;;  %v9711_v42 = vrot.slane %v9518_v48, 5  ;;  %v11763_v3 = vld [vmem:[#allocation2 + $0x18] sm:$0xff] }
 0x2a7   :  { %v13463_v35 = vrot.slane %v8189_v31, 5  ;;  %v9519_v52 = vld [vmem:[#allocation2 + $0x20] sm:$0x1] }
 0x2a8   :  { %v13451_v4 = vadd.f32 %v6153_v9, %v4879_v26  ;;  %v2807_v53 = vpack.c.b16 %v2775_v56, %v2774_v54  ;;  %v8182_v26 = vrot.slane %v8180_v19, 4  ;;  %v11756_v56 = vld [vmem:[#allocation2 + $0x198] sm:$0xff]  ;;  %v9713_v31 = vrot.slane %v9711_v42, 4 }
 0x2a9   :  { %11333 = vmatmul.msk.bf16.gmra.mxu0 %vm1510_vm7, %v5927_v41  ;;  %v8196_v19 = vor.u32 %v8195_v5, %v13463_v35  ;;  %v9714_v23 = vrot.slane %v9519_v52, 5 }
 0x2aa   :  { %v3037_v50 = vpop.f32.mrf.mxu1  ;;  %11293 = vmatmul.msk.bf16.gmra.mxu3 %vm1510_vm7, %v11755_v34  ;;  %11126 = vmatmul.msk.bf16.gmra.mxu2 %vm1510_vm7, %v3796_v17  ;;  %v5896_v17 = vunpack.c.l.b16 %v5827_v43  ;;  %v8185_v34 = vrot.slane %v8183_v58, 5  ;;  %v11615_v43 = vrot.slane %v9517_v51, 9  ;;  %v6402_v51 = vld [vmem:[#allocation2 + $0x1c] sm:$0xf] }
 0x2ab   :  { %v3194_v12 = vadd.f32 %v3037_v50, %v14602_v10  ;;  %v11335_v50 = vrot.slane %v6398_v24, 9 }
 0x2ad   :  { %v4183_v62 = vadd.f32 %v4026_v37, %v3194_v12  ;;  %v4722_v25 = vpop.f32.mrf.mxu3  ;;  %v4029_v6 = vpop.f32.mrf.mxu2  ;;  %v5895_v37 = vunpack.c.l.b16 %v5817_v13 }
 0x2ae   :  { %v4880_v9 = vadd.f32 %v4722_v25, %v4182_v14  ;;  %v6158_v30 = vpop.f32.mrf.mxu0  ;;  %v14603_v14 = vld [vmem:[#allocation49_spill] sm:$0xff]  ;;  %v8186_v25 = vor.u32 %v8185_v34, %v8182_v26  ;;  %v9712_v26 = vsel %vm12377_vm12, %v11615_v43, %v9711_v42 }
 0x2af   :  { %v5928_v12 = vpack.c.b16 %v5896_v17, %v5895_v37 }
 0x2b0   :  { %v13460_v41 = vadd.f32 %v6156_v29, %v4880_v9  ;;  %v6595_v29 = vrot.slane %v6400_v32, 5  ;;  %v8199_v9 = vshll.u32 %v8085_v38, 16  ;;  %v8187_v17 = vrot.slane %v8186_v25, 4 }
 0x2b2   :  { %v3040_v40 = vpop.f32.mrf.mxu1  ;;  %v6596_v13 = vsel %vm12377_vm12, %v6594_v18, %v6595_v29  ;;  %v9715_v18 = vsel %vm12377_vm12, %v9713_v31, %v9714_v23 }
 0x2b3   :  { %v3195_v61 = vadd.f32 %v3040_v40, %v14603_v14  ;;  %v14604_v40 = vld [vmem:[#allocation52_spill] sm:$0xff]  ;;  %v6820_v32 = vunpack.c.l.b16 %v6596_v13  ;;  %v8197_v14 = vrot.slane %v8196_v19, 4  ;;  %v8088_v13 = vld [vmem:[#allocation2 + $0x2c] sm:$0x1] }
 0x2b5   :  { %11054 = vmatmul.msk.bf16.gmra.mxu1 %vm1510_vm7, %v2807_v53  ;;  %v4184_v59 = vadd.f32 %v4029_v6, %v3195_v61  ;;  %v4724_v10 = vpop.f32.mrf.mxu3  ;;  %v4031_v1 = vpop.f32.mrf.mxu2  ;;  %v6593_v6 = vsel %vm12377_vm12, %v11335_v50, %v6592_v47  ;;  %v8086_v53 = vld [vmem:[#allocation2 + $0x24] sm:$0xf]  ;;  %v8087_v47 = vld [vmem:[#allocation2 + $0x28] sm:$0xf]  ;;  %v8201_v61 = vrot.slane %v8199_v9, 5 }
 0x2b6   :  { %v4881_v21 = vadd.f32 %v4724_v10, %v4183_v62  ;;  %v6161_v54 = vpop.f32.mrf.mxu0  ;;  %v6819_v24 = vunpack.c.l.b16 %v6593_v6  ;;  %v8204_v34 = vshrl.u32 %v8086_v53, 16  ;;  %v8207_v48 = vshll.u32 %v8086_v53, 16 }
 0x2b7   :  { %v8213_v29 = vshll.u32 %v8087_v47, 16  ;;  %v8217_v38 = vshrl.u32 %v8087_v47, 16  ;;  %v8202_v42 = vsel %vm12406_vm15, %v8197_v14, %v8201_v61  ;;  %v6599_v6 = vrot.slane %v6402_v51, 5  ;;  %v9520_v51 = vld [vmem:[#allocation2 + $0x24] sm:$0xe] }
 0x2b8   :  { %v13471_v58 = vadd.f32 %v6158_v30, %v4881_v21  ;;  %v6883_v21 = vpack.c.b16 %v6820_v32, %v6819_v24  ;;  %v8206_v25 = vrot.slane %v8204_v34, 4  ;;  %v8209_v52 = vrot.slane %v8207_v48, 5 }
 0x2b9   :  { %11334 = vmatmul.msk.bf16.gmra.mxu0 %vm1510_vm7, %v5928_v12  ;;  %v8219_v43 = vrot.slane %v8217_v38, 4  ;;  %v8953_v53 = vunpack.c.l.b16 %v8202_v42  ;;  %v11764_v38 = vld [vmem:[#allocation2 + $0x24] sm:$0xff] }
 0x2ba   :  { %v3042_v62 = vpop.f32.mrf.mxu1  ;;  %11294 = vmatmul.msk.bf16.gmra.mxu3 %vm1510_vm7, %v11756_v56  ;;  %11543 = vmatmul.msk.bf16.vlgmr.msra.gmra.mxu2 %vm1510_vm7, %v11763_v3  ;;  %v9938_v56 = vunpack.c.l.b16 %v9712_v26  ;;  %v9939_v3 = vunpack.c.l.b16 %v9715_v18  ;;  %v8210_v24 = vor.u32 %v8209_v52, %v8206_v25  ;;  %v6601_v26 = vrot.slane %v6599_v6, 4 }
 0x2bb   :  { %v3196_v37 = vadd.f32 %v3042_v62, %v14604_v40  ;;  %v14605_v62 = vld [vmem:[#allocation16_spill] sm:$0xff]  ;;  %v6403_v40 = vld [vmem:[#allocation2 + $0x20] sm:$0x1] }
 0x2bc   :  { %v6602_v34 = vrot.slane %v6403_v40, 5  ;;  %v8211_v42 = vrot.slane %v8210_v24, 4 }
 0x2bd   :  { %v4185_v30 = vadd.f32 %v4031_v1, %v3196_v37  ;;  %v4727_v5 = vpop.f32.mrf.mxu3  ;;  %v4034_v50 = vpop.f32.mrf.mxu2  ;;  %v8192_v1 = vsel %vm12406_vm15, %v8187_v17, %v13463_v35  ;;  %v6401_v35 = vld [vmem:[#allocation2 + $0x18] sm:$0xe]  ;;  %v9521_v37 = vld [vmem:[#allocation2 + $0x28] sm:$0xf]  ;;  %v10002_v17 = vpack.c.b16 %v9939_v3, %v9938_v56  ;;  %v8090_v56 = vld [vmem:[#allocation2 + $0x34] sm:$0xf] }
 0x2be   :  { %v4882_v10 = vadd.f32 %v4727_v5, %v4184_v59  ;;  %v6163_v12 = vpop.f32.mrf.mxu0  ;;  %v13488_v59 = vrot.slane %v8213_v29, 5  ;;  %v8952_v23 = vunpack.c.l.b16 %v8192_v1  ;;  %v11336_v61 = vrot.slane %v6401_v35, 9  ;;  %v9522_v1 = vld [vmem:[#allocation2 + $0x2c] sm:$0x1] }
 0x2bf   :  { %v8237_v35 = vshll.u32 %v8090_v56, 16  ;;  %v8241_v40 = vshrl.u32 %v8090_v56, 16 }
 0x2c0   :  { %v13486_v19 = vadd.f32 %v6161_v54, %v4882_v10  ;;  %v8223_v54 = vshll.u32 %v8088_v13, 16  ;;  %v8220_v48 = vor.u32 %v8219_v43, %v13488_v59  ;;  %v9016_v29 = vpack.c.b16 %v8953_v53, %v8952_v23  ;;  %v14606_v13 = vld [vmem:[#allocation18_spill] sm:$0xff] }
 0x2c1   :  { %v9718_v10 = vrot.slane %v9521_v37, 5  ;;  %v6600_v25 = vsel %vm12377_vm12, %v11336_v61, %v6599_v6  ;;  %v6405_v61 = vld [vmem:[#allocation2 + $0x28] sm:$0xf] }
 0x2c2   :  { %v3045_v9 = vpop.f32.mrf.mxu1  ;;  %v8221_v52 = vrot.slane %v8220_v48, 4  ;;  %v6821_v6 = vunpack.c.l.b16 %v6600_v25  ;;  %v6606_v56 = vrot.slane %v6405_v61, 5  ;;  %v9523_v61 = vld [vmem:[#allocation2 + $0x30] sm:$0xe] }
 0x2c3   :  { %v3197_v31 = vadd.f32 %v3045_v9, %v14605_v62  ;;  %v8225_v9 = vrot.slane %v8223_v54, 5  ;;  %v11616_v62 = vrot.slane %v9520_v51, 9  ;;  %v8216_v54 = vsel %vm12406_vm15, %v8211_v42, %v13488_v59  ;;  %v8091_v59 = vld [vmem:[#allocation2 + $0x38] sm:$0x1] }
 0x2c4   :  { %v13512_v51 = vrot.slane %v8237_v35, 5 }
 0x2c5   :  { %11375 = vmatmul.msk.bf16.vlgmr.msra.gmra.mxu1 %vm1510_vm7, %v6883_v21  ;;  %v4186_v47 = vadd.f32 %v4034_v50, %v3197_v31  ;;  %v4729_v32 = vpop.f32.mrf.mxu3  ;;  %v4036_v14 = vpop.f32.mrf.mxu2  ;;  %v8089_v21 = vld [vmem:[#allocation2 + $0x30] sm:$0xf]  ;;  %v9721_v31 = vrot.slane %v9522_v1, 5  ;;  %v8226_v48 = vsel %vm12406_vm15, %v8221_v52, %v8225_v9  ;;  %v8243_v1 = vrot.slane %v8241_v40, 4  ;;  %v6406_v52 = vld [vmem:[#allocation2 + $0x2c] sm:$0x1] }
 0x2c6   :  { %v4883_v5 = vadd.f32 %v4729_v32, %v4185_v30  ;;  %v6166_v18 = vpop.f32.mrf.mxu0  ;;  %v6603_v30 = vsel %vm12377_vm12, %v6601_v26, %v6602_v34  ;;  %v8228_v23 = vshrl.u32 %v8089_v21, 16  ;;  %v8231_v53 = vshll.u32 %v8089_v21, 16  ;;  %v14607_v9 = vld [vmem:[#allocation20_spill] sm:$0xff] }
 0x2c7   :  { %v6609_v40 = vrot.slane %v6406_v52, 5  ;;  %v8092_v52 = vld [vmem:[#allocation2 + $0x3c] sm:$0xf] }
 0x2c8   :  { %v13493_v50 = vadd.f32 %v6163_v12, %v4883_v5  ;;  %v9720_v12 = vrot.slane %v9718_v10, 4  ;;  %v9719_v5 = vsel %vm12377_vm12, %v11616_v62, %v9718_v10  ;;  %v9524_v62 = vld [vmem:[#allocation2 + $0x34] sm:$0xf] }
 0x2c9   :  { %11655 = vmatmul.msk.bf16.vlgmr.msra.gmra.mxu0 %vm1510_vm7, %v10002_v17  ;;  %v6822_v17 = vunpack.c.l.b16 %v6603_v30  ;;  %v6404_v30 = vld [vmem:[#allocation2 + $0x24] sm:$0xe] }
 0x2ca   :  { %v3047_v3 = vpop.f32.mrf.mxu1  ;;  %11583 = vmatmul.msk.bf16.vlgmr.msra.gmra.mxu3 %vm1510_vm7, %v9016_v29  ;;  %11544 = vmatmul.msk.bf16.gmra.mxu2 %vm1510_vm7, %v11764_v38  ;;  %v8230_v29 = vrot.slane %v8228_v23, 4  ;;  %v8233_v38 = vrot.slane %v8231_v53, 5  ;;  %v8247_v23 = vshll.u32 %v8091_v59, 16  ;;  %v11337_v35 = vrot.slane %v6404_v30, 9 }
 0x2cb   :  { %v3198_v43 = vadd.f32 %v3047_v3, %v14606_v13  ;;  %v6884_v21 = vpack.c.b16 %v6822_v17, %v6821_v6  ;;  %v9940_v3 = vunpack.c.l.b16 %v9719_v5  ;;  %v8954_v13 = vunpack.c.l.b16 %v8216_v54 }
 0x2cc   :  { %v11617_v59 = vrot.slane %v9523_v61, 9 }
 0x2cd   :  { %v4187_v37 = vadd.f32 %v4036_v14, %v3198_v43  ;;  %v4732_v24 = vpop.f32.mrf.mxu3  ;;  %v4039_v32 = vpop.f32.mrf.mxu2  ;;  %v9722_v14 = vsel %vm12377_vm12, %v9720_v12, %v9721_v31  ;;  %v8955_v43 = vunpack.c.l.b16 %v8226_v48  ;;  %v8234_v12 = vor.u32 %v8233_v38, %v8230_v29  ;;  %v11765_v48 = vld [vmem:[#allocation2 + $0x30] sm:$0xff] }
 0x2ce   :  { %v4884_v26 = vadd.f32 %v4732_v24, %v4186_v47  ;;  %v6168_v34 = vpop.f32.mrf.mxu0  ;;  %v9941_v25 = vunpack.c.l.b16 %v9722_v14  ;;  %v8244_v31 = vor.u32 %v8243_v1, %v13512_v51  ;;  %v8249_v1 = vrot.slane %v8247_v23, 5 }
 0x2cf   :  { %v9017_v54 = vpack.c.b16 %v8955_v43, %v8954_v13  ;;  %v8235_v29 = vrot.slane %v8234_v12, 4  ;;  %v8093_v13 = vld [vmem:[#allocation2 + $0x40] sm:$0xf]  ;;  %v8252_v23 = vshrl.u32 %v8092_v52, 16 }
 0x2d0   :  { %v13514_v42 = vadd.f32 %v6166_v18, %v4884_v26  ;;  %v6608_v18 = vrot.slane %v6606_v56, 4  ;;  %v10003_v17 = vpack.c.b16 %v9941_v25, %v9940_v3  ;;  %v9725_v26 = vrot.slane %v9524_v62, 5 }
 0x2d1   :  { %v8245_v38 = vrot.slane %v8244_v31, 4  ;;  %v8265_v61 = vshrl.u32 %v8093_v13, 16 }
 0x2d2   :  { %v3050_v47 = vpop.f32.mrf.mxu1  ;;  %v9726_v31 = vsel %vm12377_vm12, %v11617_v59, %v9725_v26 }
 0x2d3   :  { %v3199_v10 = vadd.f32 %v3050_v47, %v14607_v9  ;;  %v9525_v47 = vld [vmem:[#allocation2 + $0x38] sm:$0x1]  ;;  %v14609_v9 = vld [vmem:[#allocation22_spill] sm:$0xff]  ;;  %v8250_v12 = vsel %vm12406_vm15, %v8245_v38, %v8249_v1  ;;  %v8254_v1 = vrot.slane %v8252_v23, 4 }
 0x2d4   :  { %v9728_v25 = vrot.slane %v9525_v47, 5  ;;  %v8957_v47 = vunpack.c.l.b16 %v8250_v12 }
 0x2d5   :  { %11376 = vmatmul.msk.bf16.gmra.mxu1 %vm1510_vm7, %v6884_v21  ;;  %v4188_v53 = vadd.f32 %v4039_v32, %v3199_v10  ;;  %v4734_v6 = vpop.f32.mrf.mxu3  ;;  %v4041_v24 = vpop.f32.mrf.mxu2  ;;  %v6607_v21 = vsel %vm12377_vm12, %v11337_v35, %v6606_v56  ;;  %v6610_v32 = vsel %vm12377_vm12, %v6608_v18, %v6609_v40 }
 0x2d6   :  { %v4885_v5 = vadd.f32 %v4734_v6, %v4187_v37  ;;  %v6171_v14 = vpop.f32.mrf.mxu0  ;;  %v9727_v37 = vrot.slane %v9725_v26, 4  ;;  %v6823_v56 = vunpack.c.l.b16 %v6607_v21  ;;  %v6824_v43 = vunpack.c.l.b16 %v6610_v32 }
 0x2d7   :  { %v8255_v6 = vshll.u32 %v8092_v52, 16 }
 0x2d8   :  { %v13523_v30 = vadd.f32 %v6168_v34, %v4885_v5  ;;  %v8240_v34 = vsel %vm12406_vm15, %v8235_v29, %v13512_v51  ;;  %v9729_v40 = vsel %vm12377_vm12, %v9727_v37, %v9728_v25  ;;  %v6885_v51 = vpack.c.b16 %v6824_v43, %v6823_v56  ;;  %v14611_v25 = vld [vmem:[#allocation24_spill] sm:$0xff] }
 0x2d9   :  { %11656 = vmatmul.msk.bf16.gmra.mxu0 %vm1510_vm7, %v10003_v17  ;;  %v8261_v17 = vshll.u32 %v8093_v13, 16  ;;  %v9942_v29 = vunpack.c.l.b16 %v9726_v31  ;;  %v9943_v38 = vunpack.c.l.b16 %v9729_v40  ;;  %v8257_v59 = vrot.slane %v8255_v6, 5  ;;  %v8094_v13 = vld [vmem:[#allocation2 + $0x44] sm:$0x1]  ;;  %v9526_v40 = vld [vmem:[#allocation2 + $0x3c] sm:$0xe] }
 0x2da   :  { %14608 = vst [vmem:[#allocation34_spill] sm:$0xff] %v13523_v30  ;;  %v3052_v3 = vpop.f32.mrf.mxu1  ;;  %11584 = vmatmul.msk.bf16.gmra.mxu3 %vm1510_vm7, %v9017_v54  ;;  %11545 = vmatmul.msk.bf16.gmra.mxu2 %vm1510_vm7, %v11765_v48  ;;  %v6408_v48 = vld [vmem:[#allocation2 + $0x34] sm:$0xf]  ;;  %v8267_v37 = vrot.slane %v8265_v61, 4  ;;  %v11618_v30 = vrot.slane %v9526_v40, 9 }
 0x2db   :  { %v3200_v10 = vadd.f32 %v3052_v3, %v14609_v9  ;;  %v6613_v32 = vrot.slane %v6408_v48, 5  ;;  %v13540_v3 = vrot.slane %v8261_v17, 5  ;;  %v6407_v9 = vld [vmem:[#allocation2 + $0x30] sm:$0xe]  ;;  %v10004_v43 = vpack.c.b16 %v9943_v38, %v9942_v29  ;;  %v14613_v38 = vld [vmem:[#allocation26_spill] sm:$0xff] }
 0x2dc   :  { %v11338_v31 = vrot.slane %v6407_v9, 9  ;;  %v8258_v48 = vor.u32 %v8257_v59, %v8254_v1 }
 0x2dd   :  { %v4189_v62 = vadd.f32 %v4041_v24, %v3200_v10  ;;  %v4737_v35 = vpop.f32.mrf.mxu3  ;;  %v4044_v18 = vpop.f32.mrf.mxu2  ;;  %v8956_v24 = vunpack.c.l.b16 %v8240_v34  ;;  %v9527_v10 = vld [vmem:[#allocation2 + $0x40] sm:$0xf]  ;;  %v6615_v23 = vrot.slane %v6613_v32, 4 }
 0x2de   :  { %v4886_v5 = vadd.f32 %v4737_v35, %v4188_v53  ;;  %v6173_v54 = vpop.f32.mrf.mxu0  ;;  %v6409_v53 = vld [vmem:[#allocation2 + $0x38] sm:$0x1]  ;;  %v9732_v6 = vrot.slane %v9527_v10, 5  ;;  %v8259_v59 = vrot.slane %v8258_v48, 4  ;;  %v8095_v10 = vld [vmem:[#allocation2 + $0x48] sm:$0xf] }
 0x2df   :  { %v9018_v56 = vpack.c.b16 %v8957_v47, %v8956_v24  ;;  %v6616_v35 = vrot.slane %v6409_v53, 5  ;;  %v6614_v24 = vsel %vm12377_vm12, %v11338_v31, %v6613_v32  ;;  %v8276_v40 = vshrl.u32 %v8095_v10, 16 }
 0x2e0   :  { %v13538_v21 = vadd.f32 %v6171_v14, %v4886_v5  ;;  %v11766_v5 = vld [vmem:[#allocation2 + $0x3c] sm:$0xff]  ;;  %v6825_v9 = vunpack.c.l.b16 %v6614_v24 }
 0x2e1   :  { %v6617_v47 = vsel %vm12377_vm12, %v6615_v23, %v6616_v35  ;;  %v8264_v23 = vsel %vm12406_vm15, %v8259_v59, %v13540_v3  ;;  %v6411_v35 = vld [vmem:[#allocation2 + $0x40] sm:$0xf]  ;;  %v8278_v59 = vrot.slane %v8276_v40, 4  ;;  %v9531_v40 = vld [vmem:[#allocation2 + $0x50] sm:$0x1] }
 0x2e2   :  { %14610 = vst [vmem:[#allocation37_spill] sm:$0xff] %v13538_v21  ;;  %v3055_v26 = vpop.f32.mrf.mxu1  ;;  %v9528_v21 = vld [vmem:[#allocation2 + $0x44] sm:$0x1]  ;;  %v6826_v53 = vunpack.c.l.b16 %v6617_v47 }
 0x2e3   :  { %v3201_v52 = vadd.f32 %v3055_v26, %v14611_v25  ;;  %v8268_v26 = vor.u32 %v8267_v37, %v13540_v3  ;;  %v8271_v25 = vshll.u32 %v8094_v13, 16  ;;  %v9735_v29 = vrot.slane %v9528_v21, 5  ;;  %v8096_v13 = vld [vmem:[#allocation2 + $0x4c] sm:$0xf]  ;;  %v14615_v24 = vld [vmem:[#allocation30_spill] sm:$0xff] }
 0x2e4   :  { %v8289_v48 = vshrl.u32 %v8096_v13, 16  ;;  %v6410_v3 = vld [vmem:[#allocation2 + $0x3c] sm:$0xe] }
 0x2e5   :  { %11377 = vmatmul.msk.bf16.gmra.mxu1 %vm1510_vm7, %v6885_v51  ;;  %v4190_v34 = vadd.f32 %v4044_v18, %v3201_v52  ;;  %v4739_v12 = vpop.f32.mrf.mxu3  ;;  %v4046_v14 = vpop.f32.mrf.mxu2  ;;  %v8273_v37 = vrot.slane %v8271_v25, 5 }
 0x2e6   :  { %v4887_v17 = vadd.f32 %v4739_v12, %v4189_v62  ;;  %v6176_v61 = vpop.f32.mrf.mxu0  ;;  %v9734_v62 = vrot.slane %v9732_v6, 4  ;;  %v9733_v12 = vsel %vm12377_vm12, %v11618_v30, %v9732_v6 }
 0x2e7   :  { %v9944_v25 = vunpack.c.l.b16 %v9733_v12  ;;  %v11339_v12 = vrot.slane %v6410_v3, 9  ;;  %v8098_v3 = vld [vmem:[#allocation2 + $0x54] sm:$0xf] }
 0x2e8   :  { %v13545_v51 = vadd.f32 %v6173_v54, %v4887_v17  ;;  %v8269_v54 = vrot.slane %v8268_v26, 4  ;;  %v9736_v21 = vsel %vm12377_vm12, %v9734_v62, %v9735_v29  ;;  %v8279_v17 = vshll.u32 %v8095_v10, 16 }
 0x2e9   :  { %11657 = vmatmul.msk.bf16.gmra.mxu0 %vm1510_vm7, %v10004_v43  ;;  %v6886_v26 = vpack.c.b16 %v6826_v53, %v6825_v9  ;;  %v9945_v30 = vunpack.c.l.b16 %v9736_v21  ;;  %v8958_v62 = vunpack.c.l.b16 %v8264_v23  ;;  %v8291_v10 = vrot.slane %v8289_v48, 4 }
 0x2ea   :  { %14612 = vst [vmem:[#allocation40_spill] sm:$0xff] %v13545_v51  ;;  %v3057_v18 = vpop.f32.mrf.mxu1  ;;  %11585 = vmatmul.msk.bf16.gmra.mxu3 %vm1510_vm7, %v9018_v56  ;;  %11546 = vmatmul.msk.bf16.gmra.mxu2 %vm1510_vm7, %v11766_v5  ;;  %v8285_v5 = vshll.u32 %v8096_v13, 16  ;;  %v8097_v13 = vld [vmem:[#allocation2 + $0x50] sm:$0x1] }
 0x2eb   :  { %v3202_v1 = vadd.f32 %v3057_v18, %v14613_v38  ;;  %v6412_v38 = vld [vmem:[#allocation2 + $0x44] sm:$0x1]  ;;  %v10005_v9 = vpack.c.b16 %v9945_v30, %v9944_v25  ;;  %v8295_v48 = vshll.u32 %v8097_v13, 16 }
 0x2ed   :  { %v4191_v52 = vadd.f32 %v4046_v14, %v3202_v1  ;;  %v4742_v32 = vpop.f32.mrf.mxu3  ;;  %v4049_v43 = vpop.f32.mrf.mxu2  ;;  %v8274_v14 = vsel %vm12406_vm15, %v8269_v54, %v8273_v37  ;;  %v9530_v1 = vld [vmem:[#allocation2 + $0x4c] sm:$0xf]  ;;  %v8281_v54 = vrot.slane %v8279_v17, 5  ;;  %v8287_v37 = vrot.slane %v8285_v5, 5 }
 0x2ee   :  { %v4888_v56 = vadd.f32 %v4742_v32, %v4190_v34  ;;  %v6178_v31 = vpop.f32.mrf.mxu0  ;;  %v6620_v34 = vrot.slane %v6411_v35, 5  ;;  %v8959_v29 = vunpack.c.l.b16 %v8274_v14  ;;  %v9529_v35 = vld [vmem:[#allocation2 + $0x48] sm:$0xe]  ;;  %v9739_v23 = vrot.slane %v9530_v1, 5 }
 0x2ef   :  { %v8282_v17 = vor.u32 %v8281_v54, %v8278_v59  ;;  %v8292_v5 = vor.u32 %v8291_v10, %v8287_v37  ;;  %v11619_v51 = vrot.slane %v9529_v35, 9  ;;  %v8297_v1 = vrot.slane %v8295_v48, 5 }
 0x2f0   :  { %v13564_v6 = vadd.f32 %v6176_v61, %v4888_v56  ;;  %v6622_v21 = vrot.slane %v6620_v34, 4  ;;  %v6623_v56 = vrot.slane %v6412_v38, 5  ;;  %v6621_v25 = vsel %vm12377_vm12, %v11339_v12, %v6620_v34 }
 0x2f1   :  { %v8293_v38 = vrot.slane %v8292_v5, 4  ;;  %v6827_v54 = vunpack.c.l.b16 %v6621_v25 }
 0x2f2   :  { %14614 = vst [vmem:[#allocation43_spill] sm:$0xff] %v13564_v6  ;;  %v3060_v18 = vpop.f32.mrf.mxu1  ;;  %v11767_v6 = vld [vmem:[#allocation2 + $0x48] sm:$0xff]  ;;  %v6624_v30 = vsel %vm12377_vm12, %v6622_v21, %v6623_v56  ;;  %v8300_v21 = vshrl.u32 %v8098_v3, 16  ;;  %v8303_v56 = vshll.u32 %v8098_v3, 16 }
 0x2f3   :  { %v3203_v47 = vadd.f32 %v3060_v18, %v14615_v24  ;;  %v9019_v24 = vpack.c.b16 %v8959_v29, %v8958_v62  ;;  %v14617_v62 = vld [vmem:[#allocation33_spill] sm:$0xff]  ;;  %v6828_v10 = vunpack.c.l.b16 %v6624_v30  ;;  %v6413_v3 = vld [vmem:[#allocation2 + $0x48] sm:$0xe] }
 0x2f4   :  { %v8302_v30 = vrot.slane %v8300_v21, 4 }
 0x2f5   :  { %11378 = vmatmul.msk.bf16.gmra.mxu1 %vm1510_vm7, %v6886_v26  ;;  %v4192_v53 = vadd.f32 %v4049_v43, %v3203_v47  ;;  %v4744_v61 = vpop.f32.mrf.mxu3  ;;  %v4051_v32 = vpop.f32.mrf.mxu2  ;;  %v9742_v47 = vrot.slane %v9531_v40, 5  ;;  %v6887_v5 = vpack.c.b16 %v6828_v10, %v6827_v54  ;;  %v8100_v10 = vld [vmem:[#allocation2 + $0x5c] sm:$0x1] }
 0x2f6   :  { %v4889_v14 = vadd.f32 %v4744_v61, %v4191_v52  ;;  %v6181_v18 = vpop.f32.mrf.mxu0  ;;  %v9741_v52 = vrot.slane %v9739_v23, 4  ;;  %v9740_v61 = vsel %vm12377_vm12, %v11619_v51, %v9739_v23 }
 0x2f7   :  { %v9946_v48 = vunpack.c.l.b16 %v9740_v61  ;;  %v11340_v61 = vrot.slane %v6413_v3, 9  ;;  %v8101_v3 = vld [vmem:[#allocation2 + $0x60] sm:$0xf] }
 0x2f8   :  { %v13568_v26 = vadd.f32 %v6178_v31, %v4889_v14  ;;  %v8283_v31 = vrot.slane %v8282_v17, 4  ;;  %v9743_v12 = vsel %vm12377_vm12, %v9741_v52, %v9742_v47  ;;  %v6414_v14 = vld [vmem:[#allocation2 + $0x4c] sm:$0xf]  ;;  %v8305_v52 = vrot.slane %v8303_v56, 5 }
 0x2f9   :  { %11658 = vmatmul.msk.bf16.gmra.mxu0 %vm1510_vm7, %v10005_v9  ;;  %v8099_v9 = vld [vmem:[#allocation2 + $0x58] sm:$0xf]  ;;  %v6627_v25 = vrot.slane %v6414_v14, 5 }
 0x2fa   :  { %14616 = vst [vmem:[#allocation46_spill] sm:$0xff] %v13568_v26  ;;  %v3062_v43 = vpop.f32.mrf.mxu1  ;;  %11586 = vmatmul.msk.bf16.gmra.mxu3 %vm1510_vm7, %v9019_v24  ;;  %11547 = vmatmul.msk.bf16.gmra.mxu2 %vm1510_vm7, %v11767_v6  ;;  %v8288_v24 = vsel %vm12406_vm15, %v8283_v31, %v8287_v37  ;;  %v8309_v40 = vshll.u32 %v8099_v9, 16  ;;  %v8313_v17 = vshrl.u32 %v8099_v9, 16  ;;  %v6415_v37 = vld [vmem:[#allocation2 + $0x50] sm:$0x1]  ;;  %v8306_v56 = vor.u32 %v8305_v52, %v8302_v30 }
 0x2fb   :  { %v3204_v29 = vadd.f32 %v3062_v43, %v14617_v62  ;;  %v9947_v43 = vunpack.c.l.b16 %v9743_v12  ;;  %v8960_v62 = vunpack.c.l.b16 %v8288_v24  ;;  %v6629_v12 = vrot.slane %v6627_v25, 4  ;;  %v14621_v30 = vld [vmem:[#allocation39_spill] sm:$0xff] }
 0x2fc   :  { %v8311_v31 = vrot.slane %v8309_v40, 5  ;;  %v6630_v21 = vrot.slane %v6415_v37, 5 }
 0x2fd   :  { %v4193_v59 = vadd.f32 %v4051_v32, %v3204_v29  ;;  %v4747_v34 = vpop.f32.mrf.mxu3  ;;  %v4054_v13 = vpop.f32.mrf.mxu2  ;;  %v8298_v32 = vsel %vm12406_vm15, %v8293_v38, %v8297_v1  ;;  %v9533_v38 = vld [vmem:[#allocation2 + $0x58] sm:$0xf]  ;;  %v10006_v1 = vpack.c.b16 %v9947_v43, %v9946_v48 }
 0x2fe   :  { %v4890_v35 = vadd.f32 %v4747_v34, %v4192_v53  ;;  %v6183_v6 = vpop.f32.mrf.mxu0  ;;  %v14619_v53 = vld [vmem:[#allocation36_spill] sm:$0xff]  ;;  %v8961_v29 = vunpack.c.l.b16 %v8298_v32  ;;  %v8315_v34 = vrot.slane %v8313_v17, 4  ;;  %v8319_v17 = vshll.u32 %v8100_v10, 16 }
 0x2ff   :  { %v11768_v32 = vld [vmem:[#allocation2 + $0x54] sm:$0xff]  ;;  %v6631_v48 = vsel %vm12377_vm12, %v6629_v12, %v6630_v21 }
 0x300   :  { %v13586_v51 = vadd.f32 %v6181_v18, %v4890_v35  ;;  %v9020_v24 = vpack.c.b16 %v8961_v29, %v8960_v62  ;;  %v8316_v40 = vor.u32 %v8315_v34, %v8311_v31  ;;  %v8321_v29 = vrot.slane %v8319_v17, 5  ;;  %v6417_v12 = vld [vmem:[#allocation2 + $0x58] sm:$0xf] }
 0x301   :  { %v6634_v17 = vrot.slane %v6417_v12, 5 }
 0x302   :  { %14618 = vst [vmem:[#allocation49_spill] sm:$0xff] %v13586_v51  ;;  %v3065_v23 = vpop.f32.mrf.mxu1  ;;  %v9534_v51 = vld [vmem:[#allocation2 + $0x5c] sm:$0x1]  ;;  %v8317_v62 = vrot.slane %v8316_v40, 4 }
 0x303   :  { %v3205_v47 = vadd.f32 %v3065_v23, %v14619_v53  ;;  %v9532_v23 = vld [vmem:[#allocation2 + $0x54] sm:$0xe]  ;;  %v9746_v53 = vrot.slane %v9533_v38, 5  ;;  %v6830_v38 = vunpack.c.l.b16 %v6631_v48 }
 0x304   :  { %v11620_v43 = vrot.slane %v9532_v23, 9 }
 0x305   :  { %11379 = vmatmul.msk.bf16.gmra.mxu1 %vm1510_vm7, %v6887_v5  ;;  %v4194_v54 = vadd.f32 %v4054_v13, %v3205_v47  ;;  %v4749_v18 = vpop.f32.mrf.mxu3  ;;  %v4056_v9 = vpop.f32.mrf.mxu2  ;;  %v6628_v5 = vsel %vm12377_vm12, %v11340_v61, %v6627_v25  ;;  %v9748_v47 = vrot.slane %v9746_v53, 4  ;;  %v8102_v25 = vld [vmem:[#allocation2 + $0x64] sm:$0xf] }
 0x306   :  { %v4891_v35 = vadd.f32 %v4749_v18, %v4193_v59  ;;  %v6186_v14 = vpop.f32.mrf.mxu0  ;;  %v8307_v59 = vrot.slane %v8306_v56, 4  ;;  %v6829_v34 = vunpack.c.l.b16 %v6628_v5  ;;  %v9747_v61 = vsel %vm12377_vm12, %v11620_v43, %v9746_v53  ;;  %v14623_v43 = vld [vmem:[#allocation42_spill] sm:$0xff] }
 0x307   :  { %v8337_v23 = vshrl.u32 %v8102_v25, 16  ;;  %v9948_v53 = vunpack.c.l.b16 %v9747_v61 }
 0x308   :  { %v13590_v26 = vadd.f32 %v6183_v6, %v4891_v35  ;;  %v9749_v6 = vrot.slane %v9534_v51, 5  ;;  %v8312_v18 = vsel %vm12406_vm15, %v8307_v59, %v8311_v31  ;;  %v8324_v35 = vshrl.u32 %v8101_v3, 16  ;;  %v6418_v59 = vld [vmem:[#allocation2 + $0x5c] sm:$0x1] }
 0x309   :  { %11659 = vmatmul.msk.bf16.gmra.mxu0 %vm1510_vm7, %v10006_v1  ;;  %v6888_v40 = vpack.c.b16 %v6830_v38, %v6829_v34  ;;  %v8962_v5 = vunpack.c.l.b16 %v8312_v18  ;;  %v6636_v34 = vrot.slane %v6634_v17, 4  ;;  %v6637_v38 = vrot.slane %v6418_v59, 5  ;;  %v8104_v59 = vld [vmem:[#allocation2 + $0x6c] sm:$0xf] }
 0x30a   :  { %14620 = vst [vmem:[#allocation52_spill] sm:$0xff] %v13590_v26  ;;  %v3067_v13 = vpop.f32.mrf.mxu1  ;;  %11587 = vmatmul.msk.bf16.gmra.mxu3 %vm1510_vm7, %v9020_v24  ;;  %11548 = vmatmul.msk.bf16.gmra.mxu2 %vm1510_vm7, %v11768_v32  ;;  %v9750_v51 = vsel %vm12377_vm12, %v9748_v47, %v9749_v6  ;;  %v8327_v24 = vshll.u32 %v8101_v3, 16  ;;  %v8333_v32 = vshll.u32 %v8102_v25, 16  ;;  %v8326_v47 = vrot.slane %v8324_v35, 4  ;;  %v9536_v3 = vld [vmem:[#allocation2 + $0x64] sm:$0xf] }
 0x30b   :  { %v3206_v52 = vadd.f32 %v3067_v13, %v14621_v30  ;;  %v9949_v48 = vunpack.c.l.b16 %v9750_v51  ;;  %v8103_v25 = vld [vmem:[#allocation2 + $0x68] sm:$0x1]  ;;  %v9753_v51 = vrot.slane %v9536_v3, 5 }
 0x30c   :  { %v8329_v6 = vrot.slane %v8327_v24, 5  ;;  %v11769_v24 = vld [vmem:[#allocation2 + $0x60] sm:$0xff] }
 0x30d   :  { %v4195_v37 = vadd.f32 %v4056_v9, %v3206_v52  ;;  %v4752_v1 = vpop.f32.mrf.mxu3  ;;  %v4059_v10 = vpop.f32.mrf.mxu2  ;;  %v8322_v9 = vsel %vm12406_vm15, %v8317_v62, %v8321_v29  ;;  %v8339_v62 = vrot.slane %v8337_v23, 4  ;;  %v10007_v61 = vpack.c.b16 %v9949_v48, %v9948_v53 }
 0x30e   :  { %v4892_v21 = vadd.f32 %v4752_v1, %v4194_v54  ;;  %v6188_v56 = vpop.f32.mrf.mxu0  ;;  %v6416_v54 = vld [vmem:[#allocation2 + $0x54] sm:$0xe]  ;;  %v8963_v52 = vunpack.c.l.b16 %v8322_v9  ;;  %v13611_v1 = vrot.slane %v8333_v32, 5  ;;  %v9537_v32 = vld [vmem:[#allocation2 + $0x68] sm:$0x1]  ;;  %v9755_v48 = vrot.slane %v9753_v51, 4 }
 0x310   :  { %v13608_v13 = vadd.f32 %v6186_v14, %v4892_v21  ;;  %v11341_v14 = vrot.slane %v6416_v54, 9  ;;  %v9535_v21 = vld [vmem:[#allocation2 + $0x60] sm:$0xe]  ;;  %v9021_v35 = vpack.c.b16 %v8963_v52, %v8962_v5  ;;  %v8340_v23 = vor.u32 %v8339_v62, %v13611_v1 }
 0x311   :  { %v11621_v54 = vrot.slane %v9535_v21, 9  ;;  %v9756_v5 = vrot.slane %v9537_v32, 5  ;;  %v6420_v32 = vld [vmem:[#allocation2 + $0x64] sm:$0xf] }
 0x312   :  { %14622 = vst [vmem:[#allocation16_spill] sm:$0xff] %v13608_v13  ;;  %v3070_v31 = vpop.f32.mrf.mxu1  ;;  %v8343_v13 = vshll.u32 %v8103_v25, 16  ;;  %v8341_v62 = vrot.slane %v8340_v23, 4  ;;  %v8351_v25 = vshll.u32 %v8104_v59, 16 }
 0x313   :  { %v3207_v30 = vadd.f32 %v3070_v31, %v14623_v43  ;;  %v8330_v43 = vor.u32 %v8329_v6, %v8326_v47  ;;  %v9757_v21 = vsel %vm12377_vm12, %v9755_v48, %v9756_v5  ;;  %v6641_v5 = vrot.slane %v6420_v32, 5 }
 0x314   :  { %v9951_v23 = vunpack.c.l.b16 %v9757_v21 }
 0x315   :  { %11380 = vmatmul.msk.bf16.gmra.mxu1 %vm1510_vm7, %v6888_v40  ;;  %v4196_v29 = vadd.f32 %v4059_v10, %v3207_v30  ;;  %v4754_v18 = vpop.f32.mrf.mxu3  ;;  %v4061_v12 = vpop.f32.mrf.mxu2  ;;  %v6635_v10 = vsel %vm12377_vm12, %v11341_v14, %v6634_v17  ;;  %v6638_v40 = vsel %vm12377_vm12, %v6636_v34, %v6637_v38  ;;  %v14625_v30 = vld [vmem:[#allocation45_spill] sm:$0xff]  ;;  %v8331_v47 = vrot.slane %v8330_v43, 4  ;;  %v8105_v17 = vld [vmem:[#allocation2 + $0x70] sm:$0xf] }
 0x316   :  { %v4893_v31 = vadd.f32 %v4754_v18, %v4195_v37  ;;  %v6191_v9 = vpop.f32.mrf.mxu0  ;;  %v6831_v6 = vunpack.c.l.b16 %v6635_v10  ;;  %v6832_v3 = vunpack.c.l.b16 %v6638_v40  ;;  %v8345_v14 = vrot.slane %v8343_v13, 5 }
 0x317   :  { %v9754_v34 = vsel %vm12377_vm12, %v11621_v54, %v9753_v51  ;;  %v8348_v38 = vshrl.u32 %v8104_v59, 16  ;;  %v8336_v13 = vsel %vm12406_vm15, %v8331_v47, %v13611_v1  ;;  %v8353_v54 = vrot.slane %v8351_v25, 5  ;;  %v8106_v59 = vld [vmem:[#allocation2 + $0x74] sm:$0x1]  ;;  %v6419_v1 = vld [vmem:[#allocation2 + $0x60] sm:$0xe] }
 0x318   :  { %v13619_v53 = vadd.f32 %v6188_v56, %v4893_v31  ;;  %v8357_v31 = vshll.u32 %v8105_v17, 16  ;;  %v6889_v10 = vpack.c.b16 %v6832_v3, %v6831_v6  ;;  %v9950_v51 = vunpack.c.l.b16 %v9754_v34  ;;  %v6421_v47 = vld [vmem:[#allocation2 + $0x68] sm:$0x1] }
 0x319   :  { %11660 = vmatmul.msk.bf16.gmra.mxu0 %vm1510_vm7, %v10007_v61  ;;  %v8350_v40 = vrot.slane %v8348_v38, 4  ;;  %v8964_v6 = vunpack.c.l.b16 %v8336_v13  ;;  %v11342_v21 = vrot.slane %v6419_v1, 9 }
 0x31a   :  { %14624 = vst [vmem:[#allocation18_spill] sm:$0xff] %v13619_v53  ;;  %v3072_v37 = vpop.f32.mrf.mxu1  ;;  %11588 = vmatmul.msk.bf16.gmra.mxu3 %vm1510_vm7, %v9021_v35  ;;  %11549 = vmatmul.msk.bf16.gmra.mxu2 %vm1510_vm7, %v11769_v24  ;;  %v8361_v35 = vshrl.u32 %v8105_v17, 16  ;;  %v9540_v53 = vld [vmem:[#allocation2 + $0x74] sm:$0x1] }
 0x31b   :  { %v3208_v52 = vadd.f32 %v3072_v37, %v14625_v30  ;;  %v8354_v34 = vor.u32 %v8353_v54, %v8350_v40  ;;  %v14629_v54 = vld [vmem:[#allocation51_spill] sm:$0xff] }
 0x31c   :  { %v8363_v30 = vrot.slane %v8361_v35, 4 }
 0x31d   :  { %v4197_v56 = vadd.f32 %v4061_v12, %v3208_v52  ;;  %v4757_v18 = vpop.f32.mrf.mxu3  ;;  %v4064_v61 = vpop.f32.mrf.mxu2  ;;  %v8346_v12 = vsel %vm12406_vm15, %v8341_v62, %v8345_v14  ;;  %v14627_v52 = vld [vmem:[#allocation48_spill] sm:$0xff]  ;;  %v10008_v62 = vpack.c.b16 %v9951_v23, %v9950_v51  ;;  %v8355_v26 = vrot.slane %v8354_v34, 4 }
 0x31e   :  { %v4894_v24 = vadd.f32 %v4757_v18, %v4196_v29  ;;  %v6193_v43 = vpop.f32.mrf.mxu0  ;;  %v13636_v29 = vrot.slane %v8357_v31, 5  ;;  %v8965_v3 = vunpack.c.l.b16 %v8346_v12  ;;  %v9539_v18 = vld [vmem:[#allocation2 + $0x70] sm:$0xf]  ;;  %v6644_v31 = vrot.slane %v6421_v47, 5  ;;  %v8107_v47 = vld [vmem:[#allocation2 + $0x78] sm:$0xf] }
 0x31f   :  { %v11770_v12 = vld [vmem:[#allocation2 + $0x6c] sm:$0xff]  ;;  %v6642_v51 = vsel %vm12377_vm12, %v11342_v21, %v6641_v5 }
 0x320   :  { %v13634_v37 = vadd.f32 %v6191_v9, %v4894_v24  ;;  %v8367_v9 = vshll.u32 %v8106_v59, 16  ;;  %v6643_v24 = vrot.slane %v6641_v5, 4  ;;  %v8364_v35 = vor.u32 %v8363_v30, %v13636_v29 }
 0x321   :  { %v9022_v13 = vpack.c.b16 %v8965_v3, %v8964_v6  ;;  %v6833_v3 = vunpack.c.l.b16 %v6642_v51  ;;  %v8360_v34 = vsel %vm12406_vm15, %v8355_v26, %v13636_v29  ;;  %v14631_v51 = vld [vmem:[#allocation54_spill] sm:$0xff] }
 0x322   :  { %14626 = vst [vmem:[#allocation20_spill] sm:$0xff] %v13634_v37  ;;  %v3075_v48 = vpop.f32.mrf.mxu1  ;;  %v9538_v37 = vld [vmem:[#allocation2 + $0x6c] sm:$0xe]  ;;  %v6645_v23 = vsel %vm12377_vm12, %v6643_v24, %v6644_v31  ;;  %v8365_v40 = vrot.slane %v8364_v35, 4  ;;  %v8372_v24 = vshrl.u32 %v8107_v47, 16  ;;  %v8375_v31 = vshll.u32 %v8107_v47, 16 }
 0x323   :  { %v3209_v17 = vadd.f32 %v3075_v48, %v14627_v52  ;;  %v9760_v52 = vrot.slane %v9539_v18, 5  ;;  %v11622_v30 = vrot.slane %v9538_v37, 9  ;;  %v6834_v1 = vunpack.c.l.b16 %v6645_v23  ;;  %v8108_v18 = vld [vmem:[#allocation2 + $0x7c] sm:$0xf] }
 0x324   :  { %v8381_v35 = vshll.u32 %v8108_v18, 16  ;;  %v9542_v47 = vld [vmem:[#allocation2 + $0x7c] sm:$0xf] }
 0x325   :  { %11381 = vmatmul.msk.bf16.gmra.mxu1 %vm1510_vm7, %v6889_v10  ;;  %v4198_v14 = vadd.f32 %v4064_v61, %v3209_v17  ;;  %v4759_v38 = vpop.f32.mrf.mxu3  ;;  %v4066_v25 = vpop.f32.mrf.mxu2  ;;  %v9763_v17 = vrot.slane %v9540_v53, 5  ;;  %v9761_v37 = vsel %vm12377_vm12, %v11622_v30, %v9760_v52  ;;  %v8377_v30 = vrot.slane %v8375_v31, 5 }
 0x326   :  { %v4895_v32 = vadd.f32 %v4759_v38, %v4197_v56  ;;  %v6196_v48 = vpop.f32.mrf.mxu0  ;;  %v8369_v56 = vrot.slane %v8367_v9, 5  ;;  %v9952_v29 = vunpack.c.l.b16 %v9761_v37  ;;  %v9767_v31 = vrot.slane %v9542_v47, 5 }
 0x328   :  { %v13641_v10 = vadd.f32 %v6193_v43, %v4895_v32  ;;  %v9762_v43 = vrot.slane %v9760_v52, 4  ;;  %v8370_v21 = vsel %vm12406_vm15, %v8365_v40, %v8369_v56  ;;  %v8385_v32 = vshrl.u32 %v8108_v18, 16  ;;  %v6422_v52 = vld [vmem:[#allocation2 + $0x6c] sm:$0xe] }
 0x329   :  { %11661 = vmatmul.msk.bf16.gmra.mxu0 %vm1510_vm7, %v10008_v62  ;;  %v8966_v40 = vunpack.c.l.b16 %v8360_v34  ;;  %v8967_v56 = vunpack.c.l.b16 %v8370_v21 }
 0x32a   :  { %14628 = vst [vmem:[#allocation22_spill] sm:$0xff] %v13641_v10  ;;  %v3077_v61 = vpop.f32.mrf.mxu1  ;;  %11589 = vmatmul.msk.bf16.gmra.mxu3 %vm1510_vm7, %v9022_v13  ;;  %11550 = vmatmul.msk.bf16.gmra.mxu2 %vm1510_vm7, %v11770_v12  ;;  %v9764_v53 = vsel %vm12377_vm12, %v9762_v43, %v9763_v17  ;;  %v6890_v13 = vpack.c.b16 %v6834_v1, %v6833_v3  ;;  %v13663_v43 = vrot.slane %v8381_v35, 5  ;;  %v8387_v17 = vrot.slane %v8385_v32, 4  ;;  %v8109_v3 = vld [vmem:[#allocation2 + $0x80] sm:$0x1] }
 0x32b   :  { %v3210_v59 = vadd.f32 %v3077_v61, %v14629_v54  ;;  %v6424_v54 = vld [vmem:[#allocation2 + $0x74] sm:$0x1]  ;;  %v8117_v10 = vld [vmem:[#allocation2 + $0xa0] sm:$0xf] }
 0x32c   :  { %v8388_v32 = vor.u32 %v8387_v17, %v13663_v43  ;;  %v8111_v17 = vld [vmem:[#allocation2 + $0x88] sm:$0xf] }
 0x32d   :  { %v4199_v6 = vadd.f32 %v4066_v25, %v3210_v59  ;;  %v4762_v5 = vpop.f32.mrf.mxu3  ;;  %v4069_v62 = vpop.f32.mrf.mxu2  ;;  %v6423_v25 = vld [vmem:[#allocation2 + $0x70] sm:$0xf]  ;;  %v8374_v59 = vrot.slane %v8372_v24, 4  ;;  %v9541_v24 = vld [vmem:[#allocation2 + $0x78] sm:$0xe] }
 0x32e   :  { %v4896_v9 = vadd.f32 %v4762_v5, %v4198_v14  ;;  %v6198_v38 = vpop.f32.mrf.mxu0  ;;  %v9953_v14 = vunpack.c.l.b16 %v9764_v53  ;;  %v6648_v61 = vrot.slane %v6423_v25, 5  ;;  %v6651_v53 = vrot.slane %v6424_v54, 5 }
 0x32f   :  { %v9023_v25 = vpack.c.b16 %v8967_v56, %v8966_v40  ;;  %v8378_v35 = vor.u32 %v8377_v30, %v8374_v59  ;;  %v9769_v56 = vrot.slane %v9767_v31, 4  ;;  %v8389_v59 = vrot.slane %v8388_v32, 4 }
 0x330   :  { %v13660_v12 = vadd.f32 %v6196_v48, %v4896_v9  ;;  %v10009_v18 = vpack.c.b16 %v9953_v14, %v9952_v29  ;;  %v11343_v9 = vrot.slane %v6422_v52, 9  ;;  %v6650_v37 = vrot.slane %v6648_v61, 4 }
 0x331   :  { %v11623_v14 = vrot.slane %v9541_v24, 9  ;;  %v8379_v54 = vrot.slane %v8378_v35, 4  ;;  %v8405_v24 = vshll.u32 %v8111_v17, 16  ;;  %v8409_v35 = vshrl.u32 %v8111_v17, 16 }
 0x332   :  { %14630 = vst [vmem:[#allocation24_spill] sm:$0xff] %v13660_v12  ;;  %v3080_v26 = vpop.f32.mrf.mxu1  ;;  %v9543_v12 = vld [vmem:[#allocation2 + $0x80] sm:$0x1]  ;;  %v6649_v29 = vsel %vm12377_vm12, %v11343_v9, %v6648_v61 }
 0x333   :  { %v3211_v23 = vadd.f32 %v3080_v26, %v14631_v51  ;;  %v11771_v26 = vld [vmem:[#allocation2 + $0x78] sm:$0xff]  ;;  %v8391_v51 = vshll.u32 %v8109_v3, 16  ;;  %v9770_v52 = vrot.slane %v9543_v12, 5  ;;  %v6835_v3 = vunpack.c.l.b16 %v6649_v29 }
 0x334   :  { %v6425_v29 = vld [vmem:[#allocation2 + $0x78] sm:$0xe] }
 0x335   :  { %11382 = vmatmul.msk.bf16.gmra.mxu1 %vm1510_vm7, %v6890_v13  ;;  %v4200_v48 = vadd.f32 %v4069_v62, %v3211_v23  ;;  %v4764_v1 = vpop.f32.mrf.mxu3  ;;  %v4071_v5 = vpop.f32.mrf.mxu2  ;;  %v14633_v23 = vld [vmem:[#allocation55_spill] sm:$0xff]  ;;  %v8393_v30 = vrot.slane %v8391_v51, 5  ;;  %v9771_v12 = vsel %vm12377_vm12, %v9769_v56, %v9770_v52 }
 0x336   :  { %v4897_v34 = vadd.f32 %v4764_v1, %v4199_v6  ;;  %v6201_v21 = vpop.f32.mrf.mxu0  ;;  %v6652_v6 = vsel %vm12377_vm12, %v6650_v37, %v6651_v53  ;;  %v6426_v1 = vld [vmem:[#allocation2 + $0x7c] sm:$0xf]  ;;  %v9768_v37 = vsel %vm12377_vm12, %v11623_v14, %v9767_v31  ;;  %v6427_v31 = vld [vmem:[#allocation2 + $0x80] sm:$0x1]  ;;  %v9545_v52 = vld [vmem:[#allocation2 + $0x88] sm:$0xf] }
 0x337   :  { %v6836_v61 = vunpack.c.l.b16 %v6652_v6  ;;  %v8394_v32 = vsel %vm12406_vm15, %v8389_v59, %v8393_v30  ;;  %v6655_v51 = vrot.slane %v6426_v1, 5  ;;  %v9954_v14 = vunpack.c.l.b16 %v9768_v37  ;;  %v8112_v30 = vld [vmem:[#allocation2 + $0x8c] sm:$0x1] }
 0x338   :  { %v13667_v13 = vadd.f32 %v6198_v38, %v4897_v34  ;;  %v8110_v38 = vld [vmem:[#allocation2 + $0x84] sm:$0xf]  ;;  %v8969_v17 = vunpack.c.l.b16 %v8394_v32  ;;  %v6658_v59 = vrot.slane %v6427_v31, 5  ;;  %v8415_v32 = vshll.u32 %v8112_v30, 16 }
 0x339   :  { %11662 = vmatmul.msk.bf16.gmra.mxu0 %vm1510_vm7, %v10009_v18  ;;  %v8396_v53 = vshrl.u32 %v8110_v38, 16  ;;  %v8399_v34 = vshll.u32 %v8110_v38, 16 }
 0x33a   :  { %14632 = vst [vmem:[#allocation26_spill] sm:$0xff] %v13667_v13  ;;  %v3082_v62 = vpop.f32.mrf.mxu1  ;;  %11590 = vmatmul.msk.bf16.gmra.mxu3 %vm1510_vm7, %v9023_v25  ;;  %11551 = vmatmul.msk.bf16.gmra.mxu2 %vm1510_vm7, %v11771_v26  ;;  %v6657_v13 = vrot.slane %v6655_v51, 4 }
 0x33b   :  { %v3212_v40 = vadd.f32 %v3082_v62, %v14633_v23  ;;  %v6891_v62 = vpack.c.b16 %v6836_v61, %v6835_v3  ;;  %v9955_v23 = vunpack.c.l.b16 %v9771_v12  ;;  %v8401_v56 = vrot.slane %v8399_v34, 5  ;;  %v9544_v3 = vld [vmem:[#allocation2 + $0x84] sm:$0xe]  ;;  %v9546_v34 = vld [vmem:[#allocation2 + $0x8c] sm:$0x1] }
 0x33c   :  { %v11624_v31 = vrot.slane %v9544_v3, 9 }
 0x33d   :  { %v4201_v47 = vadd.f32 %v4071_v5, %v3212_v40  ;;  %v4767_v18 = vpop.f32.mrf.mxu3  ;;  %v13677_v9 = vpop.f32.mrf.mxu2  ;;  %v8384_v5 = vsel %vm12406_vm15, %v8379_v54, %v13663_v43  ;;  %v8398_v40 = vrot.slane %v8396_v53, 4  ;;  %v8411_v43 = vrot.slane %v8409_v35, 4 }
 0x33e   :  { %v4898_v25 = vadd.f32 %v4767_v18, %v4200_v48  ;;  %v6203_v26 = vpop.f32.mrf.mxu0  ;;  %v8968_v38 = vunpack.c.l.b16 %v8384_v5  ;;  %v13690_v18 = vrot.slane %v8405_v24, 5  ;;  %v11344_v54 = vrot.slane %v6425_v29, 9  ;;  %v11772_v24 = vld [vmem:[#allocation2 + $0x84] sm:$0xff] }
 0x33f   :  { %v10010_v1 = vpack.c.b16 %v9955_v23, %v9954_v14  ;;  %v8402_v53 = vor.u32 %v8401_v56, %v8398_v40  ;;  %v8113_v40 = vld [vmem:[#allocation2 + $0x90] sm:$0xf] }
 0x340   :  { %v13688_v6 = vadd.f32 %v6201_v21, %v4898_v25  ;;  %v9774_v21 = vrot.slane %v9545_v52, 5  ;;  %v9024_v5 = vpack.c.b16 %v8969_v17, %v8968_v38  ;;  %v8412_v35 = vor.u32 %v8411_v43, %v13690_v18  ;;  %v8114_v17 = vld [vmem:[#allocation2 + $0x94] sm:$0xf] }
 0x341   :  { %v6656_v29 = vsel %vm12377_vm12, %v11344_v54, %v6655_v51  ;;  %v9777_v52 = vrot.slane %v9546_v34, 5  ;;  %v8403_v38 = vrot.slane %v8402_v53, 4  ;;  %v8417_v54 = vrot.slane %v8415_v32, 5 }
 0x342   :  { %14634 = vst [vmem:[#allocation30_spill] sm:$0xff] %v13688_v6  ;;  %v7032_v48 = vpop.f32.mrf.mxu1  ;;  %v9776_v23 = vrot.slane %v9774_v21, 4  ;;  %v6837_v51 = vunpack.c.l.b16 %v6656_v29  ;;  %v8429_v3 = vshll.u32 %v8114_v17, 16  ;;  %v9547_v6 = vld [vmem:[#allocation2 + $0x90] sm:$0xe] }
 0x343   :  { %v7256_v14 = vadd.f32 %v7032_v48, %v12756_v36  ;;  %v9775_v36 = vsel %vm12377_vm12, %v11624_v31, %v9774_v21  ;;  %v8420_v48 = vshrl.u32 %v8113_v40, 16  ;;  %v8408_v21 = vsel %vm12406_vm15, %v8403_v38, %v13690_v18 }
 0x344   :  { %v9778_v30 = vsel %vm12377_vm12, %v9776_v23, %v9777_v52  ;;  %v9956_v32 = vunpack.c.l.b16 %v9775_v36  ;;  %v13720_v23 = vld [vmem:[#allocation9 + $0x1] ss:$0 sm:$0xff]  ;;  %v8970_v38 = vunpack.c.l.b16 %v8408_v21  ;;  %v8115_v36 = vld [vmem:[#allocation2 + $0x98] sm:$0x1] }
 0x345   :  { %11383 = vmatmul.msk.bf16.gmra.mxu1 %vm1510_vm7, %v6891_v62  ;;  %v4769_v61 = vpop.f32.mrf.mxu3  ;;  %v13693_v37 = vpop.f32.mrf.mxu2  ;;  %v6659_v62 = vsel %vm12377_vm12, %v6657_v13, %v6658_v59  ;;  %v8413_v13 = vrot.slane %v8412_v35, 4  ;;  %v8423_v59 = vshll.u32 %v8113_v40, 16  ;;  %v6429_v35 = vld [vmem:[#allocation2 + $0x88] sm:$0xf]  ;;  %v9957_v29 = vunpack.c.l.b16 %v9778_v30 }
 0x346   :  { %v4899_v25 = vadd.f32 %v4769_v61, %v4201_v47  ;;  %v10151_v12 = vpop.f32.mrf.mxu0  ;;  %v6838_v43 = vunpack.c.l.b16 %v6659_v62  ;;  %v8433_v61 = vshrl.u32 %v8114_v17, 16  ;;  %v8422_v62 = vrot.slane %v8420_v48, 4  ;;  %v9548_v48 = vld [vmem:[#allocation2 + $0x94] sm:$0xf] }
 0x347   :  { %v8425_v31 = vrot.slane %v8423_v59, 5  ;;  %v13723_v40 = vrot.slane %v8429_v3, 5  ;;  %v10011_v30 = vpack.c.b16 %v9957_v29, %v9956_v32 }
 0x348   :  { %v13701_v56 = vadd.f32 %v6203_v26, %v4899_v25  ;;  %v7955_v26 = vadd.f32 %v13677_v9, %v7256_v14  ;;  %v13713_v25 = vld [vmem:[#allocation9] ss:$0 sm:$0xff]  ;;  %v8418_v9 = vsel %vm12406_vm15, %v8413_v13, %v8417_v54  ;;  %v8435_v17 = vrot.slane %v8433_v61, 4  ;;  %v6428_v13 = vld [vmem:[#allocation2 + $0x84] sm:$0xe] }
 0x349   :  { %11663 = vmatmul.msk.bf16.gmra.mxu0 %vm1510_vm7, %v10010_v1  ;;  %v6430_v54 = vld [vmem:[#allocation2 + $0x8c] sm:$0x1] }
 0x34a   :  { %14635 = vst [vmem:[#allocation33_spill] sm:$0xff] %v13701_v56  ;;  %v7034_v47 = vpop.f32.mrf.mxu1  ;;  %11591 = vmatmul.msk.bf16.gmra.mxu3 %vm1510_vm7, %v9024_v5  ;;  %11552 = vmatmul.msk.bf16.gmra.mxu2 %vm1510_vm7, %v11772_v24  ;;  %v6892_v24 = vpack.c.b16 %v6838_v43, %v6837_v51  ;;  %v6662_v43 = vrot.slane %v6429_v35, 5  ;;  %v6665_v21 = vrot.slane %v6430_v54, 5  ;;  %v11773_v56 = vld [vmem:[#allocation2 + $0x90] sm:$0xff] }
 0x34b   :  { %v7257_v52 = vadd.f32 %v7034_v47, %v12767_v15  ;;  %v8426_v15 = vor.u32 %v8425_v31, %v8422_v62  ;;  %v8436_v47 = vor.u32 %v8435_v17, %v13723_v40  ;;  %v14636_v62 = vld [vmem:[#allocation56_spill] sm:$0xff]  ;;  %v8116_v17 = vld [vmem:[#allocation2 + $0x9c] sm:$0xf] }
 0x34d   :  { %v9165_v1 = vpop.f32.mrf.mxu3  ;;  %v13711_v53 = vpop.f32.mrf.mxu2  ;;  %v7956_v59 = vadd.f32 %v13693_v37, %v7257_v52  ;;  %v9549_v37 = vld [vmem:[#allocation2 + $0x98] sm:$0x1]  ;;  %v8427_v52 = vrot.slane %v8426_v15, 4  ;;  %v8453_v15 = vshll.u32 %v8117_v10, 16 }
 0x34e   :  { %v9389_v34 = vadd.f32 %v9165_v1, %v7955_v26  ;;  %v10153_v5 = vpop.f32.mrf.mxu0  ;;  %v8971_v26 = vunpack.c.l.b16 %v8418_v9  ;;  %v11345_v1 = vrot.slane %v6428_v13, 9  ;;  %v8439_v9 = vshll.u32 %v8115_v36, 16 }
 0x350   :  { %v10375_v14 = vadd.f32 %v10151_v12, %v9389_v34  ;;  %v6664_v34 = vrot.slane %v6662_v43, 4  ;;  %v9025_v29 = vpack.c.b16 %v8971_v26, %v8970_v38  ;;  %v6663_v54 = vsel %vm12377_vm12, %v11345_v1, %v6662_v43 }
 0x351   :  { %v8437_v26 = vrot.slane %v8436_v47, 4  ;;  %v8441_v36 = vrot.slane %v8439_v9, 5 }
 0x352   :  { %v7037_v51 = vpop.f32.mrf.mxu1  ;;  %v10569_v18 = vmul.f32 %v13713_v25, %v10375_v14  ;;  %v6666_v38 = vsel %vm12377_vm12, %v6664_v34, %v6665_v21  ;;  %v6839_v34 = vunpack.c.l.b16 %v6663_v54 }
 0x353   :  { %v7258_v31 = vadd.f32 %v7037_v51, %v14636_v62  ;;  %v6840_v47 = vunpack.c.l.b16 %v6666_v38 }
 0x354   :  { %v10635_v12 = vadd.f32 %v13720_v23, %v10569_v18  ;;  %v9781_v18 = vrot.slane %v9548_v48, 5 }
 0x355   :  { %11384 = vmatmul.msk.bf16.gmra.mxu1 %vm1510_vm7, %v6892_v24  ;;  %v9167_v3 = vpop.f32.mrf.mxu3  ;;  %v13730_v61 = vpop.f32.mrf.mxu2  ;;  %v7957_v1 = vadd.f32 %v13711_v53, %v7258_v31  ;;  %v13754_v31 = vrot.slane %v8453_v15, 5  ;;  %v6893_v38 = vpack.c.b16 %v6840_v47, %v6839_v34 }
 0x356   :  { %v10699_v35 = vmax.f32 %v10635_v12, 0.0  ;;  %v9390_v14 = vadd.f32 %v9167_v3, %v7956_v59  ;;  %v10156_v32 = vpop.f32.mrf.mxu0  ;;  %v9783_v51 = vrot.slane %v9781_v18, 4  ;;  %v9784_v12 = vrot.slane %v9549_v37, 5  ;;  %v6432_v37 = vld [vmem:[#allocation2 + $0x94] sm:$0xf] }
 0x357   :  { %v8444_v59 = vshrl.u32 %v8116_v17, 16  ;;  %v8457_v3 = vshrl.u32 %v8117_v10, 16 }
 0x358   :  { %10763 = vst [vmem:[#allocation10] sm:$0xff] %v10699_v35  ;;  %v10376_v24 = vadd.f32 %v10153_v5, %v9390_v14  ;;  %v11625_v5 = vrot.slane %v9547_v6, 9  ;;  %v8442_v6 = vsel %vm12406_vm15, %v8437_v26, %v8441_v36  ;;  %v9785_v53 = vsel %vm12377_vm12, %v9783_v51, %v9784_v12 }
 0x359   :  { %11664 = vmatmul.msk.bf16.gmra.mxu0 %vm1510_vm7, %v10011_v30  ;;  %v8447_v30 = vshll.u32 %v8116_v17, 16  ;;  %v8459_v17 = vrot.slane %v8457_v3, 4  ;;  %v8973_v12 = vunpack.c.l.b16 %v8442_v6 }
 0x35a   :  { %v7039_v13 = vpop.f32.mrf.mxu1  ;;  %v10570_v48 = vmul.f32 %v13713_v25, %v10376_v24  ;;  %11592 = vmatmul.msk.bf16.gmra.mxu3 %vm1510_vm7, %v9025_v29  ;;  %11553 = vmatmul.msk.bf16.gmra.mxu2 %vm1510_vm7, %v11773_v56  ;;  %v8432_v56 = vsel %vm12406_vm15, %v8427_v52, %v13723_v40  ;;  %v9782_v10 = vsel %vm12377_vm12, %v11625_v5, %v9781_v18  ;;  %v8446_v24 = vrot.slane %v8444_v59, 4  ;;  %v14637_v52 = vld [vmem:[#allocation57_spill] sm:$0xff]  ;;  %v8118_v18 = vld [vmem:[#allocation2 + $0xa4] sm:$0x1]  ;;  %v6433_v59 = vld [vmem:[#allocation2 + $0x98] sm:$0x1] }
 0x35b   :  { %v8449_v62 = vrot.slane %v8447_v30, 5  ;;  %v7259_v54 = vadd.f32 %v7039_v13, %v14637_v52  ;;  %v9958_v36 = vunpack.c.l.b16 %v9782_v10  ;;  %v8972_v51 = vunpack.c.l.b16 %v8432_v56  ;;  %v9551_v30 = vld [vmem:[#allocation2 + $0xa0] sm:$0xf]  ;;  %v9552_v52 = vld [vmem:[#allocation2 + $0xa4] sm:$0x1] }
 0x35c   :  { %v10636_v43 = vadd.f32 %v13720_v23, %v10570_v48  ;;  %v9959_v48 = vunpack.c.l.b16 %v9785_v53  ;;  %v8460_v3 = vor.u32 %v8459_v17, %v13754_v31  ;;  %v8463_v47 = vshll.u32 %v8118_v18, 16  ;;  %v11774_v17 = vld [vmem:[#allocation2 + $0x9c] sm:$0xff] }
 0x35d   :  { %v9170_v21 = vpop.f32.mrf.mxu3  ;;  %v13743_v9 = vpop.f32.mrf.mxu2  ;;  %v8450_v15 = vor.u32 %v8449_v62, %v8446_v24  ;;  %v7958_v13 = vadd.f32 %v13730_v61, %v7259_v54  ;;  %v6672_v56 = vrot.slane %v6433_v59, 5  ;;  %v9788_v6 = vrot.slane %v9551_v30, 5  ;;  %v8119_v54 = vld [vmem:[#allocation2 + $0xa8] sm:$0xf]  ;;  %v8120_v59 = vld [vmem:[#allocation2 + $0xac] sm:$0xf] }
 0x35e   :  { %v10700_v35 = vmax.f32 %v10636_v43, 0.0  ;;  %v9391_v14 = vadd.f32 %v9170_v21, %v7957_v1  ;;  %v10158_v29 = vpop.f32.mrf.mxu0  ;;  %v6431_v43 = vld [vmem:[#allocation2 + $0x90] sm:$0xe]  ;;  %v6669_v1 = vrot.slane %v6432_v37, 5  ;;  %v9026_v62 = vpack.c.b16 %v8973_v12, %v8972_v51 }
 0x35f   :  { %v11346_v34 = vrot.slane %v6431_v43, 9  ;;  %v8461_v61 = vrot.slane %v8460_v3, 4  ;;  %v14638_v43 = vld [vmem:[#allocation58_spill] sm:$0xff] }
 0x360   :  { %10764 = vst [vmem:[#allocation10 + $0x8] sm:$0xff] %v10700_v35  ;;  %v10377_v40 = vadd.f32 %v10156_v32, %v9391_v14  ;;  %v10012_v35 = vpack.c.b16 %v9959_v48, %v9958_v36  ;;  %v6671_v10 = vrot.slane %v6669_v1, 4  ;;  %v8465_v48 = vrot.slane %v8463_v47, 5 }
 0x361   :  { %v6670_v36 = vsel %vm12377_vm12, %v11346_v34, %v6669_v1  ;;  %v8477_v1 = vshll.u32 %v8120_v59, 16 }
 0x362   :  { %v7042_v26 = vpop.f32.mrf.mxu1  ;;  %v10571_v5 = vmul.f32 %v13713_v25, %v10377_v40  ;;  %v9550_v40 = vld [vmem:[#allocation2 + $0x9c] sm:$0xe]  ;;  %v6673_v51 = vsel %vm12377_vm12, %v6671_v10, %v6672_v56  ;;  %v6435_v10 = vld [vmem:[#allocation2 + $0xa0] sm:$0xf] }
 0x363   :  { %v7260_v18 = vadd.f32 %v7042_v26, %v14638_v43  ;;  %v11626_v12 = vrot.slane %v9550_v40, 9  ;;  %v8471_v26 = vshll.u32 %v8119_v54, 16 }
 0x364   :  { %v10637_v32 = vadd.f32 %v13720_v23, %v10571_v5  ;;  %v8451_v5 = vrot.slane %v8450_v15, 4  ;;  %v9791_v15 = vrot.slane %v9552_v52, 5 }
 0x365   :  { %11385 = vmatmul.msk.bf16.gmra.mxu1 %vm1510_vm7, %v6893_v38  ;;  %v9172_v21 = vpop.f32.mrf.mxu3  ;;  %v13762_v14 = vpop.f32.mrf.mxu2  ;;  %v7959_v47 = vadd.f32 %v13743_v9, %v7260_v18  ;;  %v8473_v43 = vrot.slane %v8471_v26, 5  ;;  %v6676_v18 = vrot.slane %v6435_v10, 5 }
 0x366   :  { %v10701_v53 = vmax.f32 %v10637_v32, 0.0  ;;  %v9392_v37 = vadd.f32 %v9172_v21, %v7958_v13  ;;  %v10161_v24 = vpop.f32.mrf.mxu0  ;;  %v9790_v32 = vrot.slane %v9788_v6, 4  ;;  %v8481_v13 = vshrl.u32 %v8120_v59, 16 }
 0x367   :  { %v6841_v21 = vunpack.c.l.b16 %v6670_v36  ;;  %v8121_v36 = vld [vmem:[#allocation2 + $0xb0] sm:$0x1]  ;;  %v13786_v59 = vrot.slane %v8477_v1, 5 }
 0x368   :  { %10765 = vst [vmem:[#allocation10 + $0x10] sm:$0xff] %v10701_v53  ;;  %v10378_v38 = vadd.f32 %v10158_v29, %v9392_v37  ;;  %v8468_v29 = vshrl.u32 %v8119_v54, 16  ;;  %v8456_v37 = vsel %vm12406_vm15, %v8451_v5, %v13754_v31  ;;  %v9792_v40 = vsel %vm12377_vm12, %v9790_v32, %v9791_v15 }
 0x369   :  { %11665 = vmatmul.msk.bf16.gmra.mxu0 %vm1510_vm7, %v10012_v35  ;;  %v6842_v35 = vunpack.c.l.b16 %v6673_v51  ;;  %v8483_v51 = vrot.slane %v8481_v13, 4  ;;  %v8487_v10 = vshll.u32 %v8121_v36, 16  ;;  %v11775_v36 = vld [vmem:[#allocation2 + $0xa8] sm:$0xff] }
 0x36a   :  { %v7044_v30 = vpop.f32.mrf.mxu1  ;;  %v10572_v3 = vmul.f32 %v13713_v25, %v10378_v38  ;;  %11593 = vmatmul.msk.bf16.gmra.mxu3 %vm1510_vm7, %v9026_v62  ;;  %11554 = vmatmul.msk.bf16.gmra.mxu2 %vm1510_vm7, %v11774_v17  ;;  %v8466_v62 = vsel %vm12406_vm15, %v8461_v61, %v8465_v48  ;;  %v9789_v17 = vsel %vm12377_vm12, %v11626_v12, %v9788_v6  ;;  %v8470_v38 = vrot.slane %v8468_v29, 4  ;;  %v6434_v48 = vld [vmem:[#allocation2 + $0x9c] sm:$0xe]  ;;  %v6436_v6 = vld [vmem:[#allocation2 + $0xa4] sm:$0x1] }
 0x36b   :  { %v7261_v5 = vadd.f32 %v7044_v30, %v12837_v0  ;;  %v6894_v61 = vpack.c.b16 %v6842_v35, %v6841_v21  ;;  %v8975_v32 = vunpack.c.l.b16 %v8466_v62  ;;  %v9960_v15 = vunpack.c.l.b16 %v9789_v17  ;;  %v9553_v21 = vld [vmem:[#allocation2 + $0xa8] sm:$0xe] }
 0x36c   :  { %v10638_v34 = vadd.f32 %v13720_v23, %v10572_v3  ;;  %v8974_v3 = vunpack.c.l.b16 %v8456_v37  ;;  %v8474_v26 = vor.u32 %v8473_v43, %v8470_v38  ;;  %v11347_v1 = vrot.slane %v6434_v48, 9 }
 0x36d   :  { %v9175_v56 = vpop.f32.mrf.mxu3  ;;  %v13775_v53 = vpop.f32.mrf.mxu2  ;;  %v6679_v13 = vrot.slane %v6436_v6, 5  ;;  %v7960_v30 = vadd.f32 %v13762_v14, %v7261_v5 }
 0x36e   :  { %v10702_v9 = vmax.f32 %v10638_v34, 0.0  ;;  %v9393_v52 = vadd.f32 %v9175_v56, %v7959_v47  ;;  %v10163_v54 = vpop.f32.mrf.mxu0  ;;  %v9961_v34 = vunpack.c.l.b16 %v9792_v40  ;;  %v9554_v47 = vld [vmem:[#allocation2 + $0xac] sm:$0xf]  ;;  %v6678_v56 = vrot.slane %v6676_v18, 4 }
 0x36f   :  { %v9795_v35 = vrot.slane %v9554_v47, 5  ;;  %v9027_v62 = vpack.c.b16 %v8975_v32, %v8974_v3  ;;  %v6677_v48 = vsel %vm12377_vm12, %v11347_v1, %v6676_v18  ;;  %v8122_v18 = vld [vmem:[#allocation2 + $0xb4] sm:$0xf] }
 0x370   :  { %10766 = vst [vmem:[#allocation10 + $0x18] sm:$0xff] %v10702_v9  ;;  %v10379_v31 = vadd.f32 %v10161_v24, %v9393_v52  ;;  %v8484_v24 = vor.u32 %v8483_v51, %v13786_v59  ;;  %v10013_v17 = vpack.c.b16 %v9961_v34, %v9960_v15  ;;  %v9555_v9 = vld [vmem:[#allocation2 + $0xb0] sm:$0x1]  ;;  %v8489_v51 = vrot.slane %v8487_v10, 5 }
 0x371   :  { %v6680_v14 = vsel %vm12377_vm12, %v6678_v56, %v6679_v13  ;;  %v9797_v32 = vrot.slane %v9795_v35, 4  ;;  %v9798_v15 = vrot.slane %v9555_v9, 5 }
 0x372   :  { %v7047_v12 = vpop.f32.mrf.mxu1  ;;  %v10573_v29 = vmul.f32 %v13713_v25, %v10379_v31  ;;  %v8475_v31 = vrot.slane %v8474_v26, 4  ;;  %v8485_v5 = vrot.slane %v8484_v24, 4  ;;  %v6843_v26 = vunpack.c.l.b16 %v6677_v48  ;;  %v6438_v24 = vld [vmem:[#allocation2 + $0xac] sm:$0xf] }
 0x373   :  { %v7262_v3 = vadd.f32 %v7047_v12, %v12854_v44  ;;  %v6844_v10 = vunpack.c.l.b16 %v6680_v14  ;;  %v9799_v13 = vsel %vm12377_vm12, %v9797_v32, %v9798_v15  ;;  %v14639_v48 = vld [vmem:[#allocation59_spill] sm:$0xff] }
 0x374   :  { %v10639_v0 = vadd.f32 %v13720_v23, %v10573_v29  ;;  %v8123_v29 = vld [vmem:[#allocation2 + $0xb8] sm:$0xf]  ;;  %v8490_v56 = vsel %vm12406_vm15, %v8485_v5, %v8489_v51 }
 0x375   :  { %11386 = vmatmul.msk.bf16.gmra.mxu1 %vm1510_vm7, %v6894_v61  ;;  %v9177_v37 = vpop.f32.mrf.mxu3  ;;  %v13794_v40 = vpop.f32.mrf.mxu2  ;;  %v11627_v61 = vrot.slane %v9553_v21, 9  ;;  %v7961_v1 = vadd.f32 %v13775_v53, %v7262_v3  ;;  %v8492_v21 = vshrl.u32 %v8122_v18, 16  ;;  %v8977_v5 = vunpack.c.l.b16 %v8490_v56  ;;  %v9557_v3 = vld [vmem:[#allocation2 + $0xb8] sm:$0xf]  ;;  %v9556_v56 = vld [vmem:[#allocation2 + $0xb4] sm:$0xe] }
 0x376   :  { %v10703_v52 = vmax.f32 %v10639_v0, 0.0  ;;  %v9394_v38 = vadd.f32 %v9177_v37, %v7960_v30  ;;  %v10166_v43 = vpop.f32.mrf.mxu0  ;;  %v8495_v37 = vshll.u32 %v8122_v18, 16 }
 0x377   :  { %v9796_v44 = vsel %vm12377_vm12, %v11627_v61, %v9795_v35  ;;  %v9963_v61 = vunpack.c.l.b16 %v9799_v13  ;;  %v8494_v15 = vrot.slane %v8492_v21, 4  ;;  %v9558_v13 = vld [vmem:[#allocation2 + $0xbc] sm:$0x1] }
 0x378   :  { %10767 = vst [vmem:[#allocation10 + $0x20] sm:$0xff] %v10703_v52  ;;  %v10380_v6 = vadd.f32 %v10163_v54, %v9394_v38  ;;  %v8480_v54 = vsel %vm12406_vm15, %v8475_v31, %v13786_v59  ;;  %v8501_v59 = vshll.u32 %v8123_v29, 16  ;;  %v6895_v52 = vpack.c.b16 %v6844_v10, %v6843_v26 }
 0x379   :  { %11666 = vmatmul.msk.bf16.gmra.mxu0 %vm1510_vm7, %v10013_v17  ;;  %v8976_v38 = vunpack.c.l.b16 %v8480_v54  ;;  %v9962_v53 = vunpack.c.l.b16 %v9796_v44  ;;  %v6683_v31 = vrot.slane %v6438_v24, 5 }
 0x37a   :  { %v7049_v34 = vpop.f32.mrf.mxu1  ;;  %v10574_v47 = vmul.f32 %v13713_v25, %v10380_v6  ;;  %11594 = vmatmul.msk.bf16.gmra.mxu3 %vm1510_vm7, %v9027_v62  ;;  %11555 = vmatmul.msk.bf16.gmra.mxu2 %vm1510_vm7, %v11775_v36  ;;  %v8505_v62 = vshrl.u32 %v8123_v29, 16  ;;  %v6437_v36 = vld [vmem:[#allocation2 + $0xa8] sm:$0xe]  ;;  %v6439_v6 = vld [vmem:[#allocation2 + $0xb0] sm:$0x1]  ;;  %v13819_v18 = vrot.slane %v8501_v59, 5 }
 0x37b   :  { %v7263_v14 = vadd.f32 %v7049_v34, %v14639_v48  ;;  %v11348_v10 = vrot.slane %v6437_v36, 9  ;;  %v6685_v54 = vrot.slane %v6683_v31, 4  ;;  %v6686_v44 = vrot.slane %v6439_v6, 5 }
 0x37c   :  { %v10640_v12 = vadd.f32 %v13720_v23, %v10574_v47  ;;  %v8497_v47 = vrot.slane %v8495_v37, 5  ;;  %v8507_v29 = vrot.slane %v8505_v62, 4  ;;  %v10014_v21 = vpack.c.b16 %v9963_v61, %v9962_v53  ;;  %v8125_v61 = vld [vmem:[#allocation2 + $0xc0] sm:$0xf] }
 0x37d   :  { %v9180_v0 = vpop.f32.mrf.mxu3  ;;  %v13816_v30 = vpop.f32.mrf.mxu2  ;;  %v7962_v34 = vadd.f32 %v13794_v40, %v7263_v14  ;;  %v6684_v48 = vsel %vm12377_vm12, %v11348_v10, %v6683_v31  ;;  %v11628_v14 = vrot.slane %v9556_v56, 9 }
 0x37e   :  { %v10704_v17 = vmax.f32 %v10640_v12, 0.0  ;;  %v9395_v35 = vadd.f32 %v9180_v0, %v7961_v1  ;;  %v10168_v9 = vpop.f32.mrf.mxu0  ;;  %v8124_v12 = vld [vmem:[#allocation2 + $0xbc] sm:$0x1]  ;;  %v9802_v1 = vrot.slane %v9557_v3, 5  ;;  %v9028_v0 = vpack.c.b16 %v8977_v5, %v8976_v38 }
 0x37f   :  { %v8498_v59 = vor.u32 %v8497_v47, %v8494_v15  ;;  %v8508_v62 = vor.u32 %v8507_v29, %v13819_v18  ;;  %v8511_v40 = vshll.u32 %v8124_v12, 16  ;;  %v9805_v38 = vrot.slane %v9558_v13, 5  ;;  %v8126_v29 = vld [vmem:[#allocation2 + $0xc4] sm:$0xf] }
 0x380   :  { %10768 = vst [vmem:[#allocation10 + $0x28] sm:$0xff] %v10704_v17  ;;  %v10381_v51 = vadd.f32 %v10166_v43, %v9395_v35  ;;  %v9804_v6 = vrot.slane %v9802_v1, 4  ;;  %v8529_v56 = vshrl.u32 %v8126_v29, 16 }
 0x381   :  { %v8499_v15 = vrot.slane %v8498_v59, 4  ;;  %v8509_v47 = vrot.slane %v8508_v62, 4 }
 0x382   :  { %v7052_v32 = vpop.f32.mrf.mxu1  ;;  %v10575_v26 = vmul.f32 %v13713_v25, %v10381_v51  ;;  %v11776_v51 = vld [vmem:[#allocation2 + $0xb4] sm:$0xff] }
 0x383   :  { %v7264_v5 = vadd.f32 %v7052_v32, %v12909_v8  ;;  %v9806_v8 = vsel %vm12377_vm12, %v9804_v6, %v9805_v38  ;;  %v8516_v32 = vshrl.u32 %v8125_v61, 16  ;;  %v8531_v38 = vrot.slane %v8529_v56, 4 }
 0x384   :  { %v10641_v43 = vadd.f32 %v13720_v23, %v10575_v26  ;;  %v6845_v26 = vunpack.c.l.b16 %v6684_v48  ;;  %v9965_v48 = vunpack.c.l.b16 %v9806_v8 }
 0x385   :  { %11387 = vmatmul.msk.bf16.gmra.mxu1 %vm1510_vm7, %v6895_v52  ;;  %v9182_v24 = vpop.f32.mrf.mxu3  ;;  %v13825_v37 = vpop.f32.mrf.mxu2  ;;  %v6687_v52 = vsel %vm12377_vm12, %v6685_v54, %v6686_v44  ;;  %v8513_v54 = vrot.slane %v8511_v40, 5  ;;  %v8519_v44 = vshll.u32 %v8125_v61, 16 }
 0x386   :  { %v10705_v17 = vmax.f32 %v10641_v43, 0.0  ;;  %v9396_v35 = vadd.f32 %v9182_v24, %v7962_v34  ;;  %v10171_v36 = vpop.f32.mrf.mxu0  ;;  %v6846_v10 = vunpack.c.l.b16 %v6687_v52  ;;  %v7963_v43 = vadd.f32 %v13816_v30, %v7264_v5 }
 0x387   :  { %v8525_v34 = vshll.u32 %v8126_v29, 16  ;;  %v8518_v30 = vrot.slane %v8516_v32, 4  ;;  %v8521_v40 = vrot.slane %v8519_v44, 5  ;;  %v6440_v29 = vld [vmem:[#allocation2 + $0xb4] sm:$0xe] }
 0x388   :  { %10769 = vst [vmem:[#allocation10 + $0x30] sm:$0xff] %v10705_v17  ;;  %v10382_v53 = vadd.f32 %v10168_v9, %v9396_v35  ;;  %v9803_v9 = vsel %vm12377_vm12, %v11628_v14, %v9802_v1  ;;  %v6896_v62 = vpack.c.b16 %v6846_v10, %v6845_v26  ;;  %v8514_v17 = vsel %vm12406_vm15, %v8509_v47, %v8513_v54  ;;  %v6441_v35 = vld [vmem:[#allocation2 + $0xb8] sm:$0xf]  ;;  %v6442_v47 = vld [vmem:[#allocation2 + $0xbc] sm:$0x1] }
 0x389   :  { %11667 = vmatmul.msk.bf16.gmra.mxu0 %vm1510_vm7, %v10014_v21  ;;  %v13851_v6 = vrot.slane %v8525_v34, 5  ;;  %v9560_v10 = vld [vmem:[#allocation2 + $0xc4] sm:$0xf]  ;;  %v11349_v32 = vrot.slane %v6440_v29, 9 }
 0x38a   :  { %v7054_v3 = vpop.f32.mrf.mxu1  ;;  %v10576_v31 = vmul.f32 %v13713_v25, %v10382_v53  ;;  %11595 = vmatmul.msk.bf16.gmra.mxu3 %vm1510_vm7, %v9028_v0  ;;  %11556 = vmatmul.msk.bf16.gmra.mxu2 %vm1510_vm7, %v11776_v51  ;;  %v8504_v0 = vsel %vm12406_vm15, %v8499_v15, %v13819_v18  ;;  %v9964_v51 = vunpack.c.l.b16 %v9803_v9  ;;  %v6690_v53 = vrot.slane %v6441_v35, 5 }
 0x38b   :  { %v7265_v14 = vadd.f32 %v7054_v3, %v12923_v55  ;;  %v8978_v61 = vunpack.c.l.b16 %v8504_v0  ;;  %v8979_v15 = vunpack.c.l.b16 %v8514_v17  ;;  %v8522_v55 = vor.u32 %v8521_v40, %v8518_v30  ;;  %v9559_v17 = vld [vmem:[#allocation2 + $0xc0] sm:$0xe]  ;;  %v8129_v30 = vld [vmem:[#allocation2 + $0xd0] sm:$0xf] }
 0x38c   :  { %v10642_v12 = vadd.f32 %v13720_v23, %v10576_v31  ;;  %v8127_v31 = vld [vmem:[#allocation2 + $0xc8] sm:$0x1]  ;;  %v10015_v26 = vpack.c.b16 %v9965_v48, %v9964_v51  ;;  %v8532_v3 = vor.u32 %v8531_v38, %v13851_v6  ;;  %v6692_v44 = vrot.slane %v6690_v53, 4  ;;  %v8128_v48 = vld [vmem:[#allocation2 + $0xcc] sm:$0xf] }
 0x38d   :  { %v9185_v13 = vpop.f32.mrf.mxu3  ;;  %v13843_v24 = vpop.f32.mrf.mxu2  ;;  %v9029_v0 = vpack.c.b16 %v8979_v15, %v8978_v61  ;;  %v8523_v51 = vrot.slane %v8522_v55, 4  ;;  %v8540_v15 = vshrl.u32 %v8128_v48, 16  ;;  %v8543_v29 = vshll.u32 %v8128_v48, 16  ;;  %v8130_v48 = vld [vmem:[#allocation2 + $0xd4] sm:$0x1] }
 0x38e   :  { %v10706_v21 = vmax.f32 %v10642_v12, 0.0  ;;  %v9397_v1 = vadd.f32 %v9185_v13, %v7963_v43  ;;  %v10173_v59 = vpop.f32.mrf.mxu0  ;;  %v6693_v12 = vrot.slane %v6442_v47, 5  ;;  %v8535_v43 = vshll.u32 %v8127_v31, 16 }
 0x38f   :  { %v8533_v38 = vrot.slane %v8532_v3, 4  ;;  %v8549_v47 = vshll.u32 %v8129_v30, 16  ;;  %v8553_v31 = vshrl.u32 %v8129_v30, 16  ;;  %v8528_v3 = vsel %vm12406_vm15, %v8523_v51, %v13851_v6 }
 0x390   :  { %10770 = vst [vmem:[#allocation10 + $0x38] sm:$0xff] %v10706_v21  ;;  %v10383_v52 = vadd.f32 %v10171_v36, %v9397_v1  ;;  %v7964_v36 = vadd.f32 %v13825_v37, %v7265_v14  ;;  %v11777_v21 = vld [vmem:[#allocation2 + $0xc0] sm:$0xff]  ;;  %v9809_v1 = vrot.slane %v9560_v10, 5  ;;  %v9561_v37 = vld [vmem:[#allocation2 + $0xc8] sm:$0x1]  ;;  %v6694_v14 = vsel %vm12377_vm12, %v6692_v44, %v6693_v12 }
 0x392   :  { %v7057_v18 = vpop.f32.mrf.mxu1  ;;  %v10577_v5 = vmul.f32 %v13713_v25, %v10383_v52  ;;  %v6691_v52 = vsel %vm12377_vm12, %v11349_v32, %v6690_v53  ;;  %v6444_v32 = vld [vmem:[#allocation2 + $0xc4] sm:$0xf] }
 0x393   :  { %v7266_v35 = vadd.f32 %v7057_v18, %v12956_v39  ;;  %v11629_v39 = vrot.slane %v9559_v17, 9  ;;  %v9812_v18 = vrot.slane %v9561_v37, 5  ;;  %v6847_v10 = vunpack.c.l.b16 %v6691_v52 }
 0x394   :  { %v10643_v54 = vadd.f32 %v13720_v23, %v10577_v5  ;;  %v8537_v5 = vrot.slane %v8535_v43, 5  ;;  %v8555_v17 = vrot.slane %v8553_v31, 4  ;;  %v6697_v51 = vrot.slane %v6444_v32, 5 }
 0x395   :  { %11388 = vmatmul.msk.bf16.gmra.mxu1 %vm1510_vm7, %v6896_v62  ;;  %v9187_v9 = vpop.f32.mrf.mxu3  ;;  %v13858_v8 = vpop.f32.mrf.mxu2 }
 0x396   :  { %v10707_v34 = vmax.f32 %v10643_v54, 0.0  ;;  %v9398_v56 = vadd.f32 %v9187_v9, %v7964_v36  ;;  %v10176_v13 = vpop.f32.mrf.mxu0  ;;  %v6848_v54 = vunpack.c.l.b16 %v6694_v14  ;;  %v8538_v9 = vsel %vm12406_vm15, %v8533_v38, %v8537_v5 }
 0x397   :  { %v8980_v5 = vunpack.c.l.b16 %v8528_v3 }
 0x398   :  { %10771 = vst [vmem:[#allocation10 + $0x40] sm:$0xff] %v10707_v34  ;;  %v10384_v62 = vadd.f32 %v10173_v59, %v9398_v56  ;;  %v9811_v59 = vrot.slane %v9809_v1, 4  ;;  %v9810_v34 = vsel %vm12377_vm12, %v11629_v39, %v9809_v1  ;;  %v8542_v56 = vrot.slane %v8540_v15, 4  ;;  %v6445_v1 = vld [vmem:[#allocation2 + $0xc8] sm:$0x1] }
 0x399   :  { %11668 = vmatmul.msk.bf16.gmra.mxu0 %vm1510_vm7, %v10015_v26  ;;  %v7965_v26 = vadd.f32 %v13843_v24, %v7266_v35  ;;  %v6443_v35 = vld [vmem:[#allocation2 + $0xc0] sm:$0xe]  ;;  %v9966_v52 = vunpack.c.l.b16 %v9810_v34  ;;  %v9563_v39 = vld [vmem:[#allocation2 + $0xd0] sm:$0xf] }
 0x39a   :  { %v7059_v40 = vpop.f32.mrf.mxu1  ;;  %v10578_v61 = vmul.f32 %v13713_v25, %v10384_v62  ;;  %11596 = vmatmul.msk.bf16.gmra.mxu3 %vm1510_vm7, %v9029_v0  ;;  %11557 = vmatmul.msk.bf16.gmra.mxu2 %vm1510_vm7, %v11777_v21  ;;  %v9813_v24 = vsel %vm12377_vm12, %v9811_v59, %v9812_v18  ;;  %v8545_v0 = vrot.slane %v8543_v29, 5  ;;  %v13882_v21 = vrot.slane %v8549_v47, 5  ;;  %v8131_v34 = vld [vmem:[#allocation2 + $0xf0] sm:$0xf] }
 0x39b   :  { %v7267_v37 = vadd.f32 %v7059_v40, %v12982_v46  ;;  %v6897_v62 = vpack.c.b16 %v6848_v54, %v6847_v10  ;;  %v9967_v14 = vunpack.c.l.b16 %v9813_v24  ;;  %v11350_v59 = vrot.slane %v6443_v35, 9  ;;  %v9562_v10 = vld [vmem:[#allocation2 + $0xcc] sm:$0xe] }
 0x39c   :  { %v10644_v53 = vadd.f32 %v13720_v23, %v10578_v61  ;;  %v8981_v61 = vunpack.c.l.b16 %v8538_v9  ;;  %v8546_v18 = vor.u32 %v8545_v0, %v8542_v56  ;;  %v8556_v15 = vor.u32 %v8555_v17, %v13882_v21  ;;  %v8132_v17 = vld [vmem:[#allocation2 + $0xf4] sm:$0xf] }
 0x39d   :  { %v9190_v36 = vpop.f32.mrf.mxu3  ;;  %v13871_v55 = vpop.f32.mrf.mxu2  ;;  %v7966_v40 = vadd.f32 %v13858_v8, %v7267_v37  ;;  %v6699_v29 = vrot.slane %v6697_v51, 4  ;;  %v6700_v47 = vrot.slane %v6445_v1, 5  ;;  %v9816_v54 = vrot.slane %v9563_v39, 5 }
 0x39e   :  { %v10708_v44 = vmax.f32 %v10644_v53, 0.0  ;;  %v9399_v12 = vadd.f32 %v9190_v36, %v7965_v26  ;;  %v10178_v43 = vpop.f32.mrf.mxu0  ;;  %v10016_v53 = vpack.c.b16 %v9967_v14, %v9966_v52  ;;  %v9030_v32 = vpack.c.b16 %v8981_v61, %v8980_v5 }
 0x39f   :  { %v6698_v8 = vsel %vm12377_vm12, %v11350_v59, %v6697_v51  ;;  %v8547_v24 = vrot.slane %v8546_v18, 4  ;;  %v8557_v56 = vrot.slane %v8556_v15, 4  ;;  %v11630_v35 = vrot.slane %v9562_v10, 9  ;;  %v6447_v15 = vld [vmem:[#allocation2 + $0xe8] sm:$0xf] }
 0x3a0   :  { %10772 = vst [vmem:[#allocation10 + $0x48] sm:$0xff] %v10708_v44  ;;  %v10385_v6 = vadd.f32 %v10176_v13, %v9399_v12  ;;  %v8559_v13 = vshll.u32 %v8130_v48, 16  ;;  %v11778_v44 = vld [vmem:[#allocation2 + $0xcc] sm:$0xff]  ;;  %v9564_v12 = vld [vmem:[#allocation2 + $0xd4] sm:$0x1]  ;;  %v9818_v52 = vrot.slane %v9816_v54, 4 }
 0x3a1   :  { %v9819_v14 = vrot.slane %v9564_v12, 5  ;;  %v8564_v1 = vshrl.u32 %v8131_v34, 16  ;;  %v8577_v5 = vshrl.u32 %v8132_v17, 16 }
 0x3a2   :  { %v7062_v30 = vpop.f32.mrf.mxu1  ;;  %v10579_v38 = vmul.f32 %v13713_v25, %v10385_v6  ;;  %v8561_v0 = vrot.slane %v8559_v13, 5 }
 0x3a3   :  { %v7268_v37 = vadd.f32 %v7062_v30, %v12988_v33  ;;  %v6849_v33 = vunpack.c.l.b16 %v6698_v8  ;;  %v8552_v30 = vsel %vm12406_vm15, %v8547_v24, %v13882_v21  ;;  %v6446_v8 = vld [vmem:[#allocation2 + $0xe4] sm:$0xe] }
 0x3a4   :  { %v10645_v46 = vadd.f32 %v13720_v23, %v10579_v38  ;;  %v8567_v38 = vshll.u32 %v8131_v34, 16  ;;  %v8562_v18 = vsel %vm12406_vm15, %v8557_v56, %v8561_v0  ;;  %v8982_v56 = vunpack.c.l.b16 %v8552_v30 }
 0x3a5   :  { %11389 = vmatmul.msk.bf16.gmra.mxu1 %vm1510_vm7, %v6897_v62  ;;  %v9192_v31 = vpop.f32.mrf.mxu3  ;;  %v13890_v26 = vpop.f32.mrf.mxu2  ;;  %v6701_v62 = vsel %vm12377_vm12, %v6699_v29, %v6700_v47  ;;  %v7967_v39 = vadd.f32 %v13871_v55, %v7268_v37  ;;  %v9820_v29 = vsel %vm12377_vm12, %v9818_v52, %v9819_v14  ;;  %v8566_v47 = vrot.slane %v8564_v1, 4  ;;  %v9566_v37 = vld [vmem:[#allocation2 + $0xf4] sm:$0xf] }
 0x3a6   :  { %v10709_v36 = vmax.f32 %v10645_v46, 0.0  ;;  %v9400_v3 = vadd.f32 %v9192_v31, %v7966_v40  ;;  %v10181_v9 = vpop.f32.mrf.mxu0  ;;  %v6850_v59 = vunpack.c.l.b16 %v6701_v62  ;;  %v9817_v40 = vsel %vm12377_vm12, %v11630_v35, %v9816_v54  ;;  %v6448_v54 = vld [vmem:[#allocation2 + $0xec] sm:$0x1] }
 0x3a7   :  { %v8569_v21 = vrot.slane %v8567_v38, 5  ;;  %v8983_v0 = vunpack.c.l.b16 %v8562_v18  ;;  %v11351_v14 = vrot.slane %v6446_v8, 9  ;;  %v6707_v38 = vrot.slane %v6448_v54, 5  ;;  %v8135_v8 = vld [vmem:[#allocation2 + $0x100] sm:$0xf] }
 0x3a8   :  { %10773 = vst [vmem:[#allocation10 + $0x50] sm:$0xff] %v10709_v36  ;;  %v10386_v6 = vadd.f32 %v10178_v43, %v9400_v3  ;;  %v8573_v43 = vshll.u32 %v8132_v17, 16  ;;  %v8579_v36 = vrot.slane %v8577_v5, 4  ;;  %v6704_v3 = vrot.slane %v6447_v15, 5 }
 0x3a9   :  { %11669 = vmatmul.msk.bf16.gmra.mxu0 %vm1510_vm7, %v10016_v53  ;;  %v6898_v34 = vpack.c.b16 %v6850_v59, %v6849_v33  ;;  %v9968_v17 = vunpack.c.l.b16 %v9817_v40  ;;  %v8570_v35 = vor.u32 %v8569_v21, %v8566_v47  ;;  %v9031_v33 = vpack.c.b16 %v8983_v0, %v8982_v56 }
 0x3aa   :  { %v7064_v48 = vpop.f32.mrf.mxu1  ;;  %v10580_v51 = vmul.f32 %v13713_v25, %v10386_v6  ;;  %11597 = vmatmul.msk.bf16.gmra.mxu3 %vm1510_vm7, %v9030_v32  ;;  %11558 = vmatmul.msk.bf16.gmra.mxu2 %vm1510_vm7, %v11778_v44  ;;  %v13914_v55 = vrot.slane %v8573_v43, 5  ;;  %v8133_v32 = vld [vmem:[#allocation2 + $0xf8] sm:$0x1]  ;;  %v9969_v6 = vunpack.c.l.b16 %v9820_v29  ;;  %v6706_v1 = vrot.slane %v6704_v3, 4 }
 0x3ab   :  { %v7269_v12 = vadd.f32 %v7064_v48, %v12995_v20  ;;  %v9823_v43 = vrot.slane %v9566_v37, 5  ;;  %v8571_v40 = vrot.slane %v8570_v35, 4  ;;  %v6705_v47 = vsel %vm12377_vm12, %v11351_v14, %v6704_v3  ;;  %v8134_v3 = vld [vmem:[#allocation2 + $0xfc] sm:$0xf] }
 0x3ac   :  { %v10646_v61 = vadd.f32 %v13720_v23, %v10580_v51  ;;  %v8580_v52 = vor.u32 %v8579_v36, %v13914_v55  ;;  %v9565_v51 = vld [vmem:[#allocation2 + $0xf0] sm:$0xe]  ;;  %v10017_v30 = vpack.c.b16 %v9969_v6, %v9968_v17  ;;  %v6851_v54 = vunpack.c.l.b16 %v6705_v47  ;;  %v6450_v6 = vld [vmem:[#allocation2 + $0xf4] sm:$0xf] }
 0x3ad   :  { %v9195_v13 = vpop.f32.mrf.mxu3  ;;  %v13908_v46 = vpop.f32.mrf.mxu2  ;;  %v7968_v48 = vadd.f32 %v13890_v26, %v7269_v12  ;;  %v6708_v26 = vsel %vm12377_vm12, %v6706_v1, %v6707_v38  ;;  %v8588_v35 = vshrl.u32 %v8134_v3, 16  ;;  %v8601_v14 = vshrl.u32 %v8135_v8, 16 }
 0x3ae   :  { %v10710_v31 = vmax.f32 %v10646_v61, 0.0  ;;  %v9401_v53 = vadd.f32 %v9195_v13, %v7967_v39  ;;  %v10183_v10 = vpop.f32.mrf.mxu0  ;;  %v9567_v39 = vld [vmem:[#allocation2 + $0xf8] sm:$0x1]  ;;  %v11779_v13 = vld [vmem:[#allocation2 + $0xf0] sm:$0xff]  ;;  %v8581_v29 = vrot.slane %v8580_v52, 4  ;;  %v6852_v56 = vunpack.c.l.b16 %v6708_v26 }
 0x3af   :  { %v8591_v52 = vshll.u32 %v8134_v3, 16  ;;  %v8603_v47 = vrot.slane %v8601_v14, 4  ;;  %v13949_v26 = vld [vmem:[#allocation9] ss:$0 sm:$0xff]  ;;  %v9570_v3 = vld [vmem:[#allocation2 + $0x104] sm:$0x1] }
 0x3b0   :  { %10774 = vst [vmem:[#allocation10 + $0x58] sm:$0xff] %v10710_v31  ;;  %v10387_v44 = vadd.f32 %v10181_v9, %v9401_v53  ;;  %v8583_v9 = vshll.u32 %v8133_v32, 16  ;;  %v11631_v31 = vrot.slane %v9565_v51, 9  ;;  %v9825_v32 = vrot.slane %v9823_v43, 4 }
 0x3b1   :  { %v6711_v51 = vrot.slane %v6450_v6, 5  ;;  %v11780_v6 = vld [vmem:[#allocation2 + $0xfc] sm:$0xff]  ;;  %v9833_v14 = vrot.slane %v9570_v3, 5 }
 0x3b2   :  { %v7067_v24 = vpop.f32.mrf.mxu1  ;;  %v10581_v62 = vmul.f32 %v13713_v25, %v10387_v44  ;;  %v8585_v21 = vrot.slane %v8583_v9, 5  ;;  %v9826_v44 = vrot.slane %v9567_v39, 5  ;;  %v6451_v39 = vld [vmem:[#allocation2 + $0xf8] sm:$0x1] }
 0x3b3   :  { %v7270_v36 = vadd.f32 %v7067_v24, %v13010_v11 }
 0x3b4   :  { %v10647_v20 = vadd.f32 %v13720_v23, %v10581_v62  ;;  %v8586_v11 = vsel %vm12406_vm15, %v8581_v29, %v8585_v21  ;;  %v9827_v17 = vsel %vm12377_vm12, %v9825_v32, %v9826_v44 }
 0x3b5   :  { %11390 = vmatmul.msk.bf16.gmra.mxu1 %vm1510_vm7, %v6898_v34  ;;  %v9197_v5 = vpop.f32.mrf.mxu3  ;;  %v13922_v61 = vpop.f32.mrf.mxu2  ;;  %v7969_v0 = vadd.f32 %v13908_v46, %v7270_v36  ;;  %v8985_v46 = vunpack.c.l.b16 %v8586_v11  ;;  %v6714_v36 = vrot.slane %v6451_v39, 5 }
 0x3b6   :  { %v10711_v59 = vmax.f32 %v10647_v20, 0.0  ;;  %v9402_v18 = vadd.f32 %v9197_v5, %v7968_v48  ;;  %v10186_v15 = vpop.f32.mrf.mxu0  ;;  %v6449_v48 = vld [vmem:[#allocation2 + $0xf0] sm:$0xe] }
 0x3b8   :  { %10775 = vst [vmem:[#allocation10 + $0x60] sm:$0xff] %v10711_v59  ;;  %v10388_v53 = vadd.f32 %v10183_v10, %v9402_v18  ;;  %v8576_v10 = vsel %vm12406_vm15, %v8571_v40, %v13914_v55  ;;  %v8597_v55 = vshll.u32 %v8135_v8, 16  ;;  %v9569_v59 = vld [vmem:[#allocation2 + $0x100] sm:$0xf]  ;;  %v8593_v40 = vrot.slane %v8591_v52, 5 }
 0x3b9   :  { %11670 = vmatmul.msk.bf16.gmra.mxu0 %vm1510_vm7, %v10017_v30  ;;  %v8984_v20 = vunpack.c.l.b16 %v8576_v10  ;;  %v9971_v30 = vunpack.c.l.b16 %v9827_v17  ;;  %v9830_v32 = vrot.slane %v9569_v59, 5 }
 0x3ba   :  { %v7069_v12 = vpop.f32.mrf.mxu1  ;;  %v10582_v34 = vmul.f32 %v13713_v25, %v10388_v53  ;;  %11598 = vmatmul.msk.bf16.gmra.mxu3 %vm1510_vm7, %v9031_v33  ;;  %11559 = vmatmul.msk.bf16.gmra.mxu2 %vm1510_vm7, %v11779_v13  ;;  %v9824_v25 = vsel %vm12377_vm12, %v11631_v31, %v9823_v43  ;;  %v8590_v13 = vrot.slane %v8588_v35, 4  ;;  %v13947_v29 = vrot.slane %v8597_v55, 5 }
 0x3bb   :  { %v7271_v5 = vadd.f32 %v7069_v12, %v13021_v45  ;;  %v9970_v33 = vunpack.c.l.b16 %v9824_v25  ;;  %v11352_v31 = vrot.slane %v6449_v48, 9  ;;  %v6713_v53 = vrot.slane %v6711_v51, 4  ;;  %v13952_v45 = vld [vmem:[#allocation9 + $0x1] ss:$0 sm:$0xff] }
 0x3bc   :  { %v10648_v24 = vadd.f32 %v13720_v23, %v10582_v34  ;;  %v6899_v23 = vpack.c.b16 %v6852_v56, %v6851_v54  ;;  %v9568_v34 = vld [vmem:[#allocation2 + $0xfc] sm:$0xe]  ;;  %v9032_v54 = vpack.c.b16 %v8985_v46, %v8984_v20  ;;  %v8594_v11 = vor.u32 %v8593_v40, %v8590_v13 }
 0x3bd   :  { %v9200_v37 = vpop.f32.mrf.mxu3  ;;  %v13944_v62 = vpop.f32.mrf.mxu2  ;;  %v7970_v12 = vadd.f32 %v13922_v61, %v7271_v5  ;;  %v10018_v56 = vpack.c.b16 %v9971_v30, %v9970_v33  ;;  %v6715_v35 = vsel %vm12377_vm12, %v6713_v53, %v6714_v36  ;;  %v11632_v52 = vrot.slane %v9568_v34, 9  ;;  %v6453_v34 = vld [vmem:[#allocation2 + $0x100] sm:$0xf] }
 0x3be   :  { %v10712_v1 = vmax.f32 %v10648_v24, 0.0  ;;  %v9403_v38 = vadd.f32 %v9200_v37, %v7969_v0  ;;  %v10188_v9 = vpop.f32.mrf.mxu0  ;;  %v8604_v24 = vor.u32 %v8603_v47, %v13947_v29  ;;  %v6712_v37 = vsel %vm12377_vm12, %v11352_v31, %v6711_v51 }
 0x3bf   :  { %v9832_v55 = vrot.slane %v9830_v32, 4  ;;  %v8595_v46 = vrot.slane %v8594_v11, 4  ;;  %v6853_v5 = vunpack.c.l.b16 %v6712_v37  ;;  %v6854_v33 = vunpack.c.l.b16 %v6715_v35  ;;  %v6452_v35 = vld [vmem:[#allocation2 + $0xfc] sm:$0xe] }
 0x3c0   :  { %10776 = vst [vmem:[#allocation10 + $0x68] sm:$0xff] %v10712_v1  ;;  %v10389_v43 = vadd.f32 %v10186_v15, %v9403_v38  ;;  %v8136_v15 = vld [vmem:[#allocation2 + $0x104] sm:$0x1]  ;;  %v8605_v48 = vrot.slane %v8604_v24, 4 }
 0x3c1   :  { %v8607_v61 = vshll.u32 %v8136_v15, 16  ;;  %v8600_v53 = vsel %vm12406_vm15, %v8595_v46, %v13947_v29 }
 0x3c2   :  { %v7072_v18 = vpop.f32.mrf.mxu1  ;;  %v10583_v21 = vmul.f32 %v13949_v26, %v10389_v43  ;;  %v8138_v43 = vld [vmem:[#allocation2 + $0x10c] sm:$0xf]  ;;  %v8986_v37 = vunpack.c.l.b16 %v8600_v53  ;;  %v8141_v53 = vld [vmem:[#allocation2 + $0x118] sm:$0xf] }
 0x3c3   :  { %v7272_v38 = vadd.f32 %v7072_v18, %v13041_v2  ;;  %v8609_v30 = vrot.slane %v8607_v61, 5  ;;  %v9834_v2 = vsel %vm12377_vm12, %v9832_v55, %v9833_v14  ;;  %v8621_v40 = vshll.u32 %v8138_v43, 16  ;;  %v8139_v55 = vld [vmem:[#allocation2 + $0x110] sm:$0x1] }
 0x3c4   :  { %v10649_v44 = vadd.f32 %v13952_v45, %v10583_v21  ;;  %v8625_v47 = vshrl.u32 %v8138_v43, 16 }
 0x3c5   :  { %11391 = vmatmul.msk.bf16.gmra.mxu1 %vm1510_vm7, %v6899_v23  ;;  %v9202_v8 = vpop.f32.mrf.mxu3  ;;  %v13957_v10 = vpop.f32.mrf.mxu2  ;;  %v8137_v23 = vld [vmem:[#allocation2 + $0x108] sm:$0xf]  ;;  %v7971_v13 = vadd.f32 %v13944_v62, %v7272_v38  ;;  %v13983_v24 = vrot.slane %v8621_v40, 5 }
 0x3c6   :  { %v10713_v0 = vmax.f32 %v10649_v44, 0.0  ;;  %v9404_v25 = vadd.f32 %v9202_v8, %v7970_v12  ;;  %v10191_v17 = vpop.f32.mrf.mxu0  ;;  %v8612_v39 = vshrl.u32 %v8137_v23, 16  ;;  %v8615_v59 = vshll.u32 %v8137_v23, 16 }
 0x3c7   :  { %v6900_v44 = vpack.c.b16 %v6854_v33, %v6853_v5  ;;  %v8610_v12 = vsel %vm12406_vm15, %v8605_v48, %v8609_v30  ;;  %v9973_v8 = vunpack.c.l.b16 %v9834_v2  ;;  %v11353_v48 = vrot.slane %v6452_v35, 9 }
 0x3c8   :  { %10777 = vst [vmem:[#allocation10 + $0x70] sm:$0xff] %v10713_v0  ;;  %v10390_v1 = vadd.f32 %v10188_v9, %v9404_v25  ;;  %v9831_v9 = vsel %vm12377_vm12, %v11632_v52, %v9830_v32  ;;  %v8614_v62 = vrot.slane %v8612_v39, 4  ;;  %v8627_v0 = vrot.slane %v8625_v47, 4  ;;  %v6454_v52 = vld [vmem:[#allocation2 + $0x104] sm:$0x1]  ;;  %v11781_v39 = vld [vmem:[#allocation2 + $0x108] sm:$0xff] }
 0x3c9   :  { %11671 = vmatmul.msk.bf16.gmra.mxu0 %vm1510_vm7, %v10018_v56  ;;  %v9972_v3 = vunpack.c.l.b16 %v9831_v9  ;;  %v6718_v25 = vrot.slane %v6453_v34, 5  ;;  %v8987_v61 = vunpack.c.l.b16 %v8610_v12  ;;  %v8631_v5 = vshll.u32 %v8139_v55, 16  ;;  %v6456_v55 = vld [vmem:[#allocation2 + $0x10c] sm:$0xf] }
 0x3ca   :  { %v7074_v20 = vpop.f32.mrf.mxu1  ;;  %v10584_v51 = vmul.f32 %v13949_v26, %v10390_v1  ;;  %11599 = vmatmul.msk.bf16.gmra.mxu3 %vm1510_vm7, %v9032_v54  ;;  %11560 = vmatmul.msk.bf16.gmra.mxu2 %vm1510_vm7, %v11780_v6  ;;  %v8617_v54 = vrot.slane %v8615_v59, 5  ;;  %v9572_v1 = vld [vmem:[#allocation2 + $0x10c] sm:$0xf]  ;;  %v8628_v23 = vor.u32 %v8627_v0, %v13983_v24 }
 0x3cb   :  { %v7273_v11 = vadd.f32 %v7074_v20, %v13051_v57  ;;  %v10019_v14 = vpack.c.b16 %v9973_v8, %v9972_v3  ;;  %v6720_v43 = vrot.slane %v6718_v25, 4  ;;  %v9033_v2 = vpack.c.b16 %v8987_v61, %v8986_v37 }
 0x3cc   :  { %v10650_v18 = vadd.f32 %v13952_v45, %v10584_v51  ;;  %v8618_v57 = vor.u32 %v8617_v54, %v8614_v62  ;;  %v6721_v51 = vrot.slane %v6454_v52, 5  ;;  %v9837_v59 = vrot.slane %v9572_v1, 5 }
 0x3cd   :  { %v9205_v21 = vpop.f32.mrf.mxu3  ;;  %v13975_v31 = vpop.f32.mrf.mxu2  ;;  %v8629_v12 = vrot.slane %v8628_v23, 4  ;;  %v8633_v34 = vrot.slane %v8631_v5, 5  ;;  %v6455_v5 = vld [vmem:[#allocation2 + $0x108] sm:$0xe] }
 0x3ce   :  { %v10714_v36 = vmax.f32 %v10650_v18, 0.0  ;;  %v9405_v15 = vadd.f32 %v9205_v21, %v7971_v13  ;;  %v10193_v32 = vpop.f32.mrf.mxu0  ;;  %v9571_v18 = vld [vmem:[#allocation2 + $0x108] sm:$0xe]  ;;  %v8619_v47 = vrot.slane %v8618_v57, 4  ;;  %v8140_v21 = vld [vmem:[#allocation2 + $0x114] sm:$0xf] }
 0x3cf   :  { %v8636_v62 = vshrl.u32 %v8140_v21, 16  ;;  %v8639_v54 = vshll.u32 %v8140_v21, 16  ;;  %v8634_v52 = vsel %vm12406_vm15, %v8629_v12, %v8633_v34  ;;  %v11354_v21 = vrot.slane %v6455_v5, 9 }
 0x3d0   :  { %10778 = vst [vmem:[#allocation10 + $0x78] sm:$0xff] %v10714_v36  ;;  %v10391_v56 = vadd.f32 %v10191_v17, %v9405_v15  ;;  %v7972_v17 = vadd.f32 %v13957_v10, %v7273_v11  ;;  %v9573_v10 = vld [vmem:[#allocation2 + $0x110] sm:$0x1]  ;;  %v6719_v15 = vsel %vm12377_vm12, %v11353_v48, %v6718_v25  ;;  %v8649_v11 = vshrl.u32 %v8141_v53, 16 }
 0x3d1   :  { %v9840_v8 = vrot.slane %v9573_v10, 5  ;;  %v6855_v25 = vunpack.c.l.b16 %v6719_v15  ;;  %v8624_v35 = vsel %vm12406_vm15, %v8619_v47, %v13983_v24  ;;  %v8638_v57 = vrot.slane %v8636_v62, 4  ;;  %v9575_v47 = vld [vmem:[#allocation2 + $0x118] sm:$0xf] }
 0x3d2   :  { %v7077_v29 = vpop.f32.mrf.mxu1  ;;  %v10585_v6 = vmul.f32 %v13949_v26, %v10391_v56  ;;  %v8645_v56 = vshll.u32 %v8141_v53, 16  ;;  %v8641_v23 = vrot.slane %v8639_v54, 5  ;;  %v8651_v48 = vrot.slane %v8649_v11, 4 }
 0x3d3   :  { %v7274_v40 = vadd.f32 %v7077_v29, %v13066_v60  ;;  %v11633_v60 = vrot.slane %v9571_v18, 9 }
 0x3d4   :  { %v10651_v38 = vadd.f32 %v13952_v45, %v10585_v6  ;;  %v8642_v53 = vor.u32 %v8641_v23, %v8638_v57 }
 0x3d5   :  { %11392 = vmatmul.msk.bf16.gmra.mxu1 %vm1510_vm7, %v6900_v44  ;;  %v9207_v20 = vpop.f32.mrf.mxu3  ;;  %v13990_v46 = vpop.f32.mrf.mxu2  ;;  %v6722_v44 = vsel %vm12377_vm12, %v6720_v43, %v6721_v51  ;;  %v7973_v29 = vadd.f32 %v13975_v31, %v7274_v40  ;;  %v8989_v40 = vunpack.c.l.b16 %v8634_v52  ;;  %v8144_v52 = vld [vmem:[#allocation2 + $0x124] sm:$0xf] }
 0x3d6   :  { %v10715_v33 = vmax.f32 %v10651_v38, 0.0  ;;  %v9406_v30 = vadd.f32 %v9207_v20, %v7972_v17  ;;  %v10196_v9 = vpop.f32.mrf.mxu0  ;;  %v6856_v6 = vunpack.c.l.b16 %v6722_v44  ;;  %v9838_v17 = vsel %vm12377_vm12, %v11633_v60, %v9837_v59 }
 0x3d7   :  { %v14014_v20 = vrot.slane %v8645_v56, 5 }
 0x3d8   :  { %10779 = vst [vmem:[#allocation10 + $0x80] sm:$0xff] %v10715_v33  ;;  %v10392_v13 = vadd.f32 %v10193_v32, %v9406_v30  ;;  %v9839_v32 = vrot.slane %v9837_v59, 4  ;;  %v6901_v51 = vpack.c.b16 %v6856_v6, %v6855_v25  ;;  %v6725_v33 = vrot.slane %v6456_v55, 5  ;;  %v8142_v30 = vld [vmem:[#allocation2 + $0x11c] sm:$0x1] }
 0x3d9   :  { %11672 = vmatmul.msk.bf16.gmra.mxu0 %vm1510_vm7, %v10019_v14  ;;  %v6457_v59 = vld [vmem:[#allocation2 + $0x110] sm:$0x1]  ;;  %v8652_v15 = vor.u32 %v8651_v48, %v14014_v20  ;;  %v8143_v25 = vld [vmem:[#allocation2 + $0x120] sm:$0xf]  ;;  %v8643_v6 = vrot.slane %v8642_v53, 4 }
 0x3da   :  { %v7079_v36 = vpop.f32.mrf.mxu1  ;;  %v10586_v3 = vmul.f32 %v13949_v26, %v10392_v13  ;;  %11600 = vmatmul.msk.bf16.gmra.mxu3 %vm1510_vm7, %v9033_v2  ;;  %11561 = vmatmul.msk.bf16.gmra.mxu2 %vm1510_vm7, %v11781_v39  ;;  %v9841_v31 = vsel %vm12377_vm12, %v9839_v32, %v9840_v8  ;;  %v9974_v39 = vunpack.c.l.b16 %v9838_v17  ;;  %v8988_v13 = vunpack.c.l.b16 %v8624_v35  ;;  %v9574_v32 = vld [vmem:[#allocation2 + $0x114] sm:$0xe] }
 0x3db   :  { %v7275_v43 = vadd.f32 %v7079_v36, %v13075_v63  ;;  %v9975_v18 = vunpack.c.l.b16 %v9841_v31  ;;  %v6727_v44 = vrot.slane %v6725_v33, 4  ;;  %v6728_v12 = vrot.slane %v6457_v59, 5 }
 0x3dc   :  { %v10652_v0 = vadd.f32 %v13952_v45, %v10586_v3  ;;  %v9844_v8 = vrot.slane %v9575_v47, 5  ;;  %v9034_v11 = vpack.c.b16 %v8989_v40, %v8988_v13  ;;  %v11634_v17 = vrot.slane %v9574_v32, 9  ;;  %v6458_v32 = vld [vmem:[#allocation2 + $0x114] sm:$0xe] }
 0x3dd   :  { %v9210_v37 = vpop.f32.mrf.mxu3  ;;  %v14003_v61 = vpop.f32.mrf.mxu2  ;;  %v7974_v36 = vadd.f32 %v13990_v46, %v7275_v43  ;;  %v10020_v3 = vpack.c.b16 %v9975_v18, %v9974_v39  ;;  %v6726_v46 = vsel %vm12377_vm12, %v11354_v21, %v6725_v33  ;;  %v8660_v48 = vshrl.u32 %v8143_v25, 16  ;;  %v6459_v18 = vld [vmem:[#allocation2 + $0x118] sm:$0xf] }
 0x3de   :  { %v10716_v14 = vmax.f32 %v10652_v0, 0.0  ;;  %v9407_v1 = vadd.f32 %v9210_v37, %v7973_v29  ;;  %v10198_v38 = vpop.f32.mrf.mxu0  ;;  %v11782_v0 = vld [vmem:[#allocation2 + $0x114] sm:$0xff]  ;;  %v9576_v29 = vld [vmem:[#allocation2 + $0x11c] sm:$0x1]  ;;  %v8653_v37 = vrot.slane %v8652_v15, 4  ;;  %v9846_v57 = vrot.slane %v9844_v8, 4 }
 0x3df   :  { %v9847_v23 = vrot.slane %v9576_v29, 5  ;;  %v8648_v5 = vsel %vm12406_vm15, %v8643_v6, %v14014_v20  ;;  %v9845_v13 = vsel %vm12377_vm12, %v11634_v17, %v9844_v8  ;;  %v8662_v47 = vrot.slane %v8660_v48, 4  ;;  %v6460_v8 = vld [vmem:[#allocation2 + $0x11c] sm:$0x1]  ;;  %v9577_v17 = vld [vmem:[#allocation2 + $0x120] sm:$0xe] }
 0x3e0   :  { %10780 = vst [vmem:[#allocation10 + $0x88] sm:$0xff] %v10716_v14  ;;  %v10393_v24 = vadd.f32 %v10196_v9, %v9407_v1  ;;  %v8655_v9 = vshll.u32 %v8142_v30, 16  ;;  %v6729_v1 = vsel %vm12377_vm12, %v6727_v44, %v6728_v12  ;;  %v14640_v12 = vld [vmem:[#allocation27_spill] sm:$0xff] }
 0x3e1   :  { %v9848_v40 = vsel %vm12377_vm12, %v9846_v57, %v9847_v23 }
 0x3e2   :  { %v7082_v2 = vpop.f32.mrf.mxu1  ;;  %v10587_v10 = vmul.f32 %v13949_v26, %v10393_v24  ;;  %v8657_v35 = vrot.slane %v8655_v9, 5  ;;  %v8663_v24 = vshll.u32 %v8143_v25, 16  ;;  %v9977_v29 = vunpack.c.l.b16 %v9848_v40  ;;  %v9578_v25 = vld [vmem:[#allocation2 + $0x124] sm:$0xf] }
 0x3e3   :  { %v7276_v14 = vadd.f32 %v7082_v2, %v13095_v27  ;;  %v6857_v27 = vunpack.c.l.b16 %v6726_v46  ;;  %v6858_v2 = vunpack.c.l.b16 %v6729_v1 }
 0x3e4   :  { %v10653_v63 = vadd.f32 %v13952_v45, %v10587_v10  ;;  %v8658_v39 = vsel %vm12406_vm15, %v8653_v37, %v8657_v35  ;;  %v8665_v20 = vrot.slane %v8663_v24, 5  ;;  %v11355_v35 = vrot.slane %v6458_v32, 9 }
 0x3e5   :  { %11393 = vmatmul.msk.bf16.gmra.mxu1 %vm1510_vm7, %v6901_v51  ;;  %v9212_v34 = vpop.f32.mrf.mxu3  ;;  %v14022_v60 = vpop.f32.mrf.mxu2  ;;  %v8673_v51 = vshrl.u32 %v8144_v52, 16  ;;  %v7975_v30 = vadd.f32 %v14003_v61, %v7276_v14 }
 0x3e6   :  { %v10717_v62 = vmax.f32 %v10653_v63, 0.0  ;;  %v9408_v54 = vadd.f32 %v9212_v34, %v7974_v36  ;;  %v10201_v56 = vpop.f32.mrf.mxu0  ;;  %v6732_v63 = vrot.slane %v6459_v18, 5  ;;  %v8145_v36 = vld [vmem:[#allocation2 + $0x128] sm:$0x1]  ;;  %v8666_v6 = vor.u32 %v8665_v20, %v8662_v47 }
 0x3e7   :  { %v8675_v9 = vrot.slane %v8673_v51, 4  ;;  %v11635_v18 = vrot.slane %v9577_v17, 9 }
 0x3e8   :  { %10781 = vst [vmem:[#allocation10 + $0x90] sm:$0xff] %v10717_v62  ;;  %v10394_v55 = vadd.f32 %v10198_v38, %v9408_v54  ;;  %v8669_v38 = vshll.u32 %v8144_v52, 16  ;;  %v8990_v54 = vunpack.c.l.b16 %v8648_v5  ;;  %v6734_v52 = vrot.slane %v6732_v63, 4  ;;  %v11783_v5 = vld [vmem:[#allocation2 + $0x120] sm:$0xff] }
 0x3e9   :  { %11673 = vmatmul.msk.bf16.gmra.mxu0 %vm1510_vm7, %v10020_v3  ;;  %v6902_v3 = vpack.c.b16 %v6858_v2, %v6857_v27  ;;  %v6733_v2 = vsel %vm12377_vm12, %v11355_v35, %v6732_v63  ;;  %v8147_v63 = vld [vmem:[#allocation2 + $0x130] sm:$0xf] }
 0x3ea   :  { %v7084_v31 = vpop.f32.mrf.mxu1  ;;  %v10588_v43 = vmul.f32 %v13949_v26, %v10394_v55  ;;  %11601 = vmatmul.msk.bf16.gmra.mxu3 %vm1510_vm7, %v9034_v11  ;;  %11562 = vmatmul.msk.bf16.gmra.mxu2 %vm1510_vm7, %v11782_v0  ;;  %v14046_v61 = vrot.slane %v8669_v38, 5  ;;  %v8991_v11 = vunpack.c.l.b16 %v8658_v39  ;;  %v9976_v0 = vunpack.c.l.b16 %v9845_v13  ;;  %v14641_v13 = vld [vmem:[#allocation29_spill] sm:$0xff] }
 0x3eb   :  { %v7277_v34 = vadd.f32 %v7084_v31, %v14640_v12  ;;  %v6735_v55 = vrot.slane %v6460_v8, 5  ;;  %v9851_v31 = vrot.slane %v9578_v25, 5  ;;  %v8697_v25 = vshrl.u32 %v8147_v63, 16 }
 0x3ec   :  { %v10654_v33 = vadd.f32 %v13952_v45, %v10588_v43  ;;  %v8676_v37 = vor.u32 %v8675_v9, %v14046_v61  ;;  %v9035_v23 = vpack.c.b16 %v8991_v11, %v8990_v54  ;;  %v10021_v48 = vpack.c.b16 %v9977_v29, %v9976_v0  ;;  %v9579_v43 = vld [vmem:[#allocation2 + $0x128] sm:$0x1]  ;;  %v8146_v9 = vld [vmem:[#allocation2 + $0x12c] sm:$0xf] }
 0x3ed   :  { %v9215_v59 = vpop.f32.mrf.mxu3  ;;  %v14040_v10 = vpop.f32.mrf.mxu2  ;;  %v7976_v1 = vadd.f32 %v14022_v60, %v7277_v34  ;;  %v6736_v60 = vsel %vm12377_vm12, %v6734_v52, %v6735_v55  ;;  %v9853_v47 = vrot.slane %v9851_v31, 4  ;;  %v9854_v20 = vrot.slane %v9579_v43, 5  ;;  %v6461_v55 = vld [vmem:[#allocation2 + $0x120] sm:$0xe] }
 0x3ee   :  { %v10718_v21 = vmax.f32 %v10654_v33, 0.0  ;;  %v9409_v53 = vadd.f32 %v9215_v59, %v7975_v30  ;;  %v10203_v15 = vpop.f32.mrf.mxu0  ;;  %v8667_v33 = vrot.slane %v8666_v6, 4  ;;  %v8677_v30 = vrot.slane %v8676_v37, 4 }
 0x3ef   :  { %v9852_v32 = vsel %vm12377_vm12, %v11635_v18, %v9851_v31  ;;  %v9855_v8 = vsel %vm12377_vm12, %v9853_v47, %v9854_v20  ;;  %v8684_v0 = vshrl.u32 %v8146_v9, 16  ;;  %v8687_v29 = vshll.u32 %v8146_v9, 16  ;;  %v8148_v18 = vld [vmem:[#allocation2 + $0x134] sm:$0x1] }
 0x3f0   :  { %10782 = vst [vmem:[#allocation10 + $0x98] sm:$0xff] %v10718_v21  ;;  %v10395_v44 = vadd.f32 %v10201_v56, %v9409_v53  ;;  %v8679_v56 = vshll.u32 %v8145_v36, 16  ;;  %v6859_v36 = vunpack.c.l.b16 %v6733_v2  ;;  %v9978_v31 = vunpack.c.l.b16 %v9852_v32  ;;  %v9582_v47 = vld [vmem:[#allocation2 + $0x134] sm:$0x1] }
 0x3f1   :  { %v11356_v2 = vrot.slane %v6461_v55, 9 }
 0x3f2   :  { %v7087_v62 = vpop.f32.mrf.mxu1  ;;  %v10589_v46 = vmul.f32 %v13949_v26, %v10395_v44  ;;  %v8681_v39 = vrot.slane %v8679_v56, 5  ;;  %v6860_v44 = vunpack.c.l.b16 %v6736_v60 }
 0x3f3   :  { %v7278_v40 = vadd.f32 %v7087_v62, %v14641_v13  ;;  %v6462_v62 = vld [vmem:[#allocation2 + $0x124] sm:$0xf] }
 0x3f4   :  { %v10655_v14 = vadd.f32 %v13952_v45, %v10589_v46  ;;  %v8682_v12 = vsel %vm12406_vm15, %v8677_v30, %v8681_v39  ;;  %v6903_v35 = vpack.c.b16 %v6860_v44, %v6859_v36  ;;  %v6739_v56 = vrot.slane %v6462_v62, 5 }
 0x3f5   :  { %11394 = vmatmul.msk.bf16.gmra.mxu1 %vm1510_vm7, %v6902_v3  ;;  %v9217_v57 = vpop.f32.mrf.mxu3  ;;  %v14054_v24 = vpop.f32.mrf.mxu2  ;;  %v7977_v3 = vadd.f32 %v14040_v10, %v7278_v40  ;;  %v8993_v10 = vunpack.c.l.b16 %v8682_v12  ;;  %v9580_v40 = vld [vmem:[#allocation2 + $0x12c] sm:$0xe] }
 0x3f6   :  { %v10719_v38 = vmax.f32 %v10655_v14, 0.0  ;;  %v9410_v51 = vadd.f32 %v9217_v57, %v7976_v1  ;;  %v10206_v27 = vpop.f32.mrf.mxu0  ;;  %v14642_v1 = vld [vmem:[#allocation32_spill] sm:$0xff]  ;;  %v9979_v57 = vunpack.c.l.b16 %v9855_v8  ;;  %v6741_v60 = vrot.slane %v6739_v56, 4 }
 0x3f7   :  { %v11636_v8 = vrot.slane %v9580_v40, 9 }
 0x3f8   :  { %10783 = vst [vmem:[#allocation10 + $0xa0] sm:$0xff] %v10719_v38  ;;  %v10396_v59 = vadd.f32 %v10203_v15, %v9410_v51  ;;  %v8672_v15 = vsel %vm12406_vm15, %v8667_v33, %v14046_v61  ;;  %v8693_v61 = vshll.u32 %v8147_v63, 16  ;;  %v8686_v38 = vrot.slane %v8684_v0, 4 }
 0x3f9   :  { %11674 = vmatmul.msk.bf16.gmra.mxu0 %vm1510_vm7, %v10021_v48  ;;  %v8992_v52 = vunpack.c.l.b16 %v8672_v15  ;;  %v9581_v48 = vld [vmem:[#allocation2 + $0x130] sm:$0xf]  ;;  %v8689_v51 = vrot.slane %v8687_v29, 5  ;;  %v8699_v33 = vrot.slane %v8697_v25, 4  ;;  %v8149_v25 = vld [vmem:[#allocation2 + $0x138] sm:$0xf] }
 0x3fa   :  { %v7089_v21 = vpop.f32.mrf.mxu1  ;;  %v10590_v53 = vmul.f32 %v13949_v26, %v10396_v59  ;;  %11602 = vmatmul.msk.bf16.gmra.mxu3 %vm1510_vm7, %v9035_v23  ;;  %11563 = vmatmul.msk.bf16.gmra.mxu2 %vm1510_vm7, %v11783_v5  ;;  %v6463_v23 = vld [vmem:[#allocation2 + $0x128] sm:$0x1]  ;;  %v14079_v5 = vrot.slane %v8693_v61, 5  ;;  %v9858_v59 = vrot.slane %v9581_v48, 5  ;;  %v14643_v29 = vld [vmem:[#allocation35_spill] sm:$0xff] }
 0x3fb   :  { %v7279_v17 = vadd.f32 %v7089_v21, %v14642_v1  ;;  %v6742_v39 = vrot.slane %v6463_v23, 5  ;;  %v9036_v21 = vpack.c.b16 %v8993_v10, %v8992_v52  ;;  %v8690_v63 = vor.u32 %v8689_v51, %v8686_v38  ;;  %v8150_v52 = vld [vmem:[#allocation2 + $0x13c] sm:$0xf] }
 0x3fc   :  { %v10656_v34 = vadd.f32 %v13952_v45, %v10590_v53  ;;  %v10022_v53 = vpack.c.b16 %v9979_v57, %v9978_v31  ;;  %v8700_v36 = vor.u32 %v8699_v33, %v14079_v5  ;;  %v9860_v62 = vrot.slane %v9858_v59, 4 }
 0x3fd   :  { %v9220_v54 = vpop.f32.mrf.mxu3  ;;  %v14076_v11 = vpop.f32.mrf.mxu2  ;;  %v7978_v13 = vadd.f32 %v14054_v24, %v7279_v17  ;;  %v8703_v24 = vshll.u32 %v8148_v18, 16  ;;  %v6743_v32 = vsel %vm12377_vm12, %v6741_v60, %v6742_v39  ;;  %v8708_v17 = vshrl.u32 %v8149_v25, 16 }
 0x3fe   :  { %v10720_v46 = vmax.f32 %v10656_v34, 0.0  ;;  %v9411_v6 = vadd.f32 %v9220_v54, %v7977_v3  ;;  %v10208_v37 = vpop.f32.mrf.mxu0  ;;  %v11784_v34 = vld [vmem:[#allocation2 + $0x12c] sm:$0xff]  ;;  %v6740_v3 = vsel %vm12377_vm12, %v11356_v2, %v6739_v56  ;;  %v9861_v54 = vrot.slane %v9582_v47, 5 }
 0x3ff   :  { %v6861_v55 = vunpack.c.l.b16 %v6740_v3  ;;  %v6862_v56 = vunpack.c.l.b16 %v6743_v32  ;;  %v8711_v31 = vshll.u32 %v8149_v25, 16  ;;  %v8717_v48 = vshll.u32 %v8150_v52, 16  ;;  %v6464_v3 = vld [vmem:[#allocation2 + $0x12c] sm:$0xe]  ;;  %v8151_v32 = vld [vmem:[#allocation2 + $0x140] sm:$0x1] }
 0x400   :  { %10784 = vst [vmem:[#allocation10 + $0xa8] sm:$0xff] %v10720_v46  ;;  %v10397_v14 = vadd.f32 %v10206_v27, %v9411_v6  ;;  %v8691_v6 = vrot.slane %v8690_v63, 4  ;;  %v9862_v1 = vsel %vm12377_vm12, %v9860_v62, %v9861_v54  ;;  %v9584_v62 = vld [vmem:[#allocation2 + $0x13c] sm:$0xf] }
 0x401   :  { %v6904_v39 = vpack.c.b16 %v6862_v56, %v6861_v55  ;;  %v8713_v40 = vrot.slane %v8711_v31, 5 }
 0x402   :  { %v7092_v43 = vpop.f32.mrf.mxu1  ;;  %v10591_v30 = vmul.f32 %v13949_v26, %v10397_v14  ;;  %v8705_v14 = vrot.slane %v8703_v24, 5  ;;  %v8696_v33 = vsel %vm12406_vm15, %v8691_v6, %v14079_v5  ;;  %v6466_v24 = vld [vmem:[#allocation2 + $0x134] sm:$0x1] }
 0x403   :  { %v7280_v61 = vadd.f32 %v7092_v43, %v14643_v29  ;;  %v8721_v43 = vshrl.u32 %v8150_v52, 16  ;;  %v8727_v52 = vshll.u32 %v8151_v32, 16 }
 0x404   :  { %v10657_v27 = vadd.f32 %v13952_v45, %v10591_v30 }
 0x405   :  { %11395 = vmatmul.msk.bf16.gmra.mxu1 %vm1510_vm7, %v6903_v35  ;;  %v9222_v20 = vpop.f32.mrf.mxu3  ;;  %v14085_v9 = vpop.f32.mrf.mxu2  ;;  %v8701_v35 = vrot.slane %v8700_v36, 4  ;;  %v7979_v23 = vadd.f32 %v14076_v11, %v7280_v61  ;;  %v8710_v11 = vrot.slane %v8708_v17, 4  ;;  %v8723_v63 = vrot.slane %v8721_v43, 4  ;;  %v9583_v17 = vld [vmem:[#allocation2 + $0x138] sm:$0xe] }
 0x406   :  { %v10721_v44 = vmax.f32 %v10657_v27, 0.0  ;;  %v9412_v15 = vadd.f32 %v9222_v20, %v7978_v13  ;;  %v10211_v12 = vpop.f32.mrf.mxu0  ;;  %v9981_v13 = vunpack.c.l.b16 %v9862_v1  ;;  %v14644_v20 = vld [vmem:[#allocation38_spill] sm:$0xff]  ;;  %v9865_v1 = vrot.slane %v9584_v62, 5 }
 0x407   :  { %v8706_v18 = vsel %vm12406_vm15, %v8701_v35, %v8705_v14  ;;  %v6749_v35 = vrot.slane %v6466_v24, 5  ;;  %v8152_v43 = vld [vmem:[#allocation2 + $0x144] sm:$0xf]  ;;  %v6468_v24 = vld [vmem:[#allocation2 + $0x13c] sm:$0xf] }
 0x408   :  { %10785 = vst [vmem:[#allocation10 + $0xb0] sm:$0xff] %v10721_v44  ;;  %v10398_v0 = vadd.f32 %v10208_v37, %v9412_v15  ;;  %v9859_v37 = vsel %vm12377_vm12, %v11636_v8, %v9858_v59  ;;  %v6465_v59 = vld [vmem:[#allocation2 + $0x130] sm:$0xf]  ;;  %v8994_v15 = vunpack.c.l.b16 %v8696_v33 }
 0x409   :  { %11675 = vmatmul.msk.bf16.gmra.mxu0 %vm1510_vm7, %v10022_v53  ;;  %v9980_v27 = vunpack.c.l.b16 %v9859_v37  ;;  %v14111_v53 = vrot.slane %v8717_v48, 5  ;;  %v6746_v36 = vrot.slane %v6465_v59, 5  ;;  %v11785_v37 = vld [vmem:[#allocation2 + $0x138] sm:$0xff] }
 0x40a   :  { %v7094_v46 = vpop.f32.mrf.mxu1  ;;  %v10592_v10 = vmul.f32 %v13949_v26, %v10398_v0  ;;  %11603 = vmatmul.msk.bf16.gmra.mxu3 %vm1510_vm7, %v9036_v21  ;;  %11564 = vmatmul.msk.bf16.gmra.mxu2 %vm1510_vm7, %v11784_v34  ;;  %v8995_v34 = vunpack.c.l.b16 %v8706_v18  ;;  %v8714_v0 = vor.u32 %v8713_v40, %v8710_v11  ;;  %v8729_v18 = vrot.slane %v8727_v52, 5  ;;  %v6467_v52 = vld [vmem:[#allocation2 + $0x138] sm:$0xe] }
 0x40b   :  { %v7281_v21 = vadd.f32 %v7094_v46, %v14644_v20  ;;  %v10023_v8 = vpack.c.b16 %v9981_v13, %v9980_v27  ;;  %v8724_v29 = vor.u32 %v8723_v63, %v14111_v53  ;;  %v11357_v46 = vrot.slane %v6464_v3, 9 }
 0x40c   :  { %v10658_v57 = vadd.f32 %v13952_v45, %v10592_v10  ;;  %v6748_v6 = vrot.slane %v6746_v36, 4  ;;  %v9037_v14 = vpack.c.b16 %v8995_v34, %v8994_v15  ;;  %v8715_v48 = vrot.slane %v8714_v0, 4 }
 0x40d   :  { %v9225_v38 = vpop.f32.mrf.mxu3  ;;  %v14103_v51 = vpop.f32.mrf.mxu2  ;;  %v9867_v27 = vrot.slane %v9865_v1, 4  ;;  %v8732_v11 = vshrl.u32 %v8152_v43, 16  ;;  %v8735_v40 = vshll.u32 %v8152_v43, 16 }
 0x40e   :  { %v10722_v30 = vmax.f32 %v10658_v57, 0.0  ;;  %v9413_v2 = vadd.f32 %v9225_v38, %v7979_v23  ;;  %v10213_v60 = vpop.f32.mrf.mxu0  ;;  %v14645_v57 = vld [vmem:[#allocation41_spill] sm:$0xff]  ;;  %v8153_v38 = vld [vmem:[#allocation2 + $0x148] sm:$0xf]  ;;  %v8720_v34 = vsel %vm12406_vm15, %v8715_v48, %v14111_v53  ;;  %v11358_v48 = vrot.slane %v6467_v52, 9 }
 0x40f   :  { %v8745_v20 = vshrl.u32 %v8153_v38, 16  ;;  %v8737_v0 = vrot.slane %v8735_v40, 5 }
 0x410   :  { %10786 = vst [vmem:[#allocation10 + $0xb8] sm:$0xff] %v10722_v30  ;;  %v10399_v47 = vadd.f32 %v10211_v12, %v9413_v2  ;;  %v7980_v12 = vadd.f32 %v14085_v9, %v7281_v21  ;;  %v9585_v9 = vld [vmem:[#allocation2 + $0x140] sm:$0x1]  ;;  %v6747_v30 = vsel %vm12377_vm12, %v11357_v46, %v6746_v36  ;;  %v6750_v2 = vsel %vm12377_vm12, %v6748_v6, %v6749_v35  ;;  %v14646_v46 = vld [vmem:[#allocation44_spill] sm:$0xff] }
 0x411   :  { %v9868_v13 = vrot.slane %v9585_v9, 5  ;;  %v6864_v36 = vunpack.c.l.b16 %v6750_v2 }
 0x412   :  { %v7097_v5 = vpop.f32.mrf.mxu1  ;;  %v10593_v44 = vmul.f32 %v13949_v26, %v10399_v47  ;;  %v8741_v47 = vshll.u32 %v8153_v38, 16 }
 0x413   :  { %v7282_v23 = vadd.f32 %v7097_v5, %v14645_v57  ;;  %v6863_v5 = vunpack.c.l.b16 %v6747_v30 }
 0x414   :  { %v10659_v54 = vadd.f32 %v13952_v45, %v10593_v44 }
 0x415   :  { %11396 = vmatmul.msk.bf16.gmra.mxu1 %vm1510_vm7, %v6904_v39  ;;  %v9227_v61 = vpop.f32.mrf.mxu3  ;;  %v14118_v25 = vpop.f32.mrf.mxu2  ;;  %v8725_v39 = vrot.slane %v8724_v29, 4  ;;  %v7981_v63 = vadd.f32 %v14103_v51, %v7282_v23  ;;  %v9869_v51 = vsel %vm12377_vm12, %v9867_v27, %v9868_v13  ;;  %v14142_v29 = vrot.slane %v8741_v47, 5  ;;  %v9587_v23 = vld [vmem:[#allocation2 + $0x148] sm:$0xf]  ;;  %v9586_v27 = vld [vmem:[#allocation2 + $0x144] sm:$0xe] }
 0x416   :  { %v10723_v10 = vmax.f32 %v10659_v54, 0.0  ;;  %v9414_v55 = vadd.f32 %v9227_v61, %v7980_v12  ;;  %v10216_v56 = vpop.f32.mrf.mxu0  ;;  %v8734_v12 = vrot.slane %v8732_v11, 4  ;;  %v8747_v61 = vrot.slane %v8745_v20, 4 }
 0x417   :  { %v8730_v3 = vsel %vm12406_vm15, %v8725_v39, %v8729_v18  ;;  %v6905_v35 = vpack.c.b16 %v6864_v36, %v6863_v5  ;;  %v9872_v13 = vrot.slane %v9587_v23, 5  ;;  %v8155_v5 = vld [vmem:[#allocation2 + $0x150] sm:$0xf] }
 0x418   :  { %10787 = vst [vmem:[#allocation10 + $0xc0] sm:$0xff] %v10723_v10  ;;  %v10400_v31 = vadd.f32 %v10213_v60, %v9414_v55  ;;  %v11637_v60 = vrot.slane %v9583_v17, 9  ;;  %v6753_v10 = vrot.slane %v6468_v24, 5  ;;  %v8154_v55 = vld [vmem:[#allocation2 + $0x14c] sm:$0x1]  ;;  %v9983_v17 = vunpack.c.l.b16 %v9869_v51 }
 0x419   :  { %11676 = vmatmul.msk.bf16.gmra.mxu0 %vm1510_vm7, %v10023_v8  ;;  %v8997_v57 = vunpack.c.l.b16 %v8730_v3  ;;  %v8738_v43 = vor.u32 %v8737_v0, %v8734_v12  ;;  %v8748_v38 = vor.u32 %v8747_v61, %v14142_v29  ;;  %v8156_v3 = vld [vmem:[#allocation2 + $0x154] sm:$0xf]  ;;  %v11638_v51 = vrot.slane %v9586_v27, 9  ;;  %v6472_v27 = vld [vmem:[#allocation2 + $0x14c] sm:$0x1] }
 0x41a   :  { %v7099_v33 = vpop.f32.mrf.mxu1  ;;  %v10594_v59 = vmul.f32 %v13949_v26, %v10400_v31  ;;  %11604 = vmatmul.msk.bf16.gmra.mxu3 %vm1510_vm7, %v9037_v14  ;;  %11565 = vmatmul.msk.bf16.gmra.mxu2 %vm1510_vm7, %v11785_v37  ;;  %v9866_v54 = vsel %vm12377_vm12, %v11637_v60, %v9865_v1  ;;  %v6469_v1 = vld [vmem:[#allocation2 + $0x140] sm:$0x1]  ;;  %v8996_v31 = vunpack.c.l.b16 %v8720_v34  ;;  %v6755_v2 = vrot.slane %v6753_v10, 4 }
 0x41b   :  { %v7283_v6 = vadd.f32 %v7099_v33, %v14646_v46  ;;  %v9982_v37 = vunpack.c.l.b16 %v9866_v54  ;;  %v6756_v39 = vrot.slane %v6469_v1, 5  ;;  %v8739_v36 = vrot.slane %v8738_v43, 4 }
 0x41c   :  { %v10660_v21 = vadd.f32 %v13952_v45, %v10594_v59  ;;  %v9038_v20 = vpack.c.b16 %v8997_v57, %v8996_v31  ;;  %v9874_v0 = vrot.slane %v9872_v13, 4  ;;  %v8759_v46 = vshll.u32 %v8155_v5, 16 }
 0x41d   :  { %v9230_v44 = vpop.f32.mrf.mxu3  ;;  %v14131_v15 = vpop.f32.mrf.mxu2  ;;  %v7982_v30 = vadd.f32 %v14118_v25, %v7283_v6  ;;  %v10024_v59 = vpack.c.b16 %v9983_v17, %v9982_v37  ;;  %v6754_v25 = vsel %vm12377_vm12, %v11358_v48, %v6753_v10  ;;  %v6757_v54 = vsel %vm12377_vm12, %v6755_v2, %v6756_v39  ;;  %v14648_v2 = vld [vmem:[#allocation50_spill] sm:$0xff] }
 0x41e   :  { %v10724_v32 = vmax.f32 %v10660_v21, 0.0  ;;  %v9415_v8 = vadd.f32 %v9230_v44, %v7981_v63  ;;  %v10218_v62 = vpop.f32.mrf.mxu0  ;;  %v11786_v21 = vld [vmem:[#allocation2 + $0x144] sm:$0xff]  ;;  %v9588_v63 = vld [vmem:[#allocation2 + $0x14c] sm:$0x1]  ;;  %v8749_v44 = vrot.slane %v8748_v38, 4  ;;  %v6865_v52 = vunpack.c.l.b16 %v6754_v25 }
 0x41f   :  { %v9875_v61 = vrot.slane %v9588_v63, 5  ;;  %v8744_v10 = vsel %vm12406_vm15, %v8739_v36, %v14142_v29  ;;  %v6866_v37 = vunpack.c.l.b16 %v6757_v54  ;;  %v9873_v31 = vsel %vm12377_vm12, %v11638_v51, %v9872_v13  ;;  %v9590_v63 = vld [vmem:[#allocation2 + $0x154] sm:$0xf]  ;;  %v9589_v51 = vld [vmem:[#allocation2 + $0x150] sm:$0xe] }
 0x420   :  { %10788 = vst [vmem:[#allocation10 + $0xc8] sm:$0xff] %v10724_v32  ;;  %v10401_v53 = vadd.f32 %v10216_v56, %v9415_v8  ;;  %v8751_v56 = vshll.u32 %v8154_v55, 16  ;;  %v14647_v32 = vld [vmem:[#allocation47_spill] sm:$0xff]  ;;  %v8761_v29 = vrot.slane %v8759_v46, 5 }
 0x421   :  { %v9876_v57 = vsel %vm12377_vm12, %v9874_v0, %v9875_v61 }
 0x422   :  { %v7102_v14 = vpop.f32.mrf.mxu1  ;;  %v10595_v9 = vmul.f32 %v13949_v26, %v10401_v53  ;;  %v8753_v34 = vrot.slane %v8751_v56, 5  ;;  %v8756_v53 = vshrl.u32 %v8155_v5, 16  ;;  %v14177_v5 = vld [vmem:[#allocation9] ss:$0 sm:$0xff] }
 0x423   :  { %v7284_v8 = vadd.f32 %v7102_v14, %v14647_v32  ;;  %v14181_v32 = vld [vmem:[#allocation9 + $0x1] ss:$0 sm:$0xff] }
 0x424   :  { %v10661_v33 = vadd.f32 %v13952_v45, %v10595_v9  ;;  %v8754_v17 = vsel %vm12406_vm15, %v8749_v44, %v8753_v34  ;;  %v8758_v23 = vrot.slane %v8756_v53, 4 }
 0x425   :  { %11397 = vmatmul.msk.bf16.gmra.mxu1 %vm1510_vm7, %v6905_v35  ;;  %v9232_v18 = vpop.f32.mrf.mxu3  ;;  %v14150_v60 = vpop.f32.mrf.mxu2  ;;  %v8769_v35 = vshrl.u32 %v8156_v3, 16  ;;  %v7983_v14 = vadd.f32 %v14131_v15, %v7284_v8 }
 0x426   :  { %v10725_v11 = vmax.f32 %v10661_v33, 0.0  ;;  %v9416_v40 = vadd.f32 %v9232_v18, %v7982_v30  ;;  %v10221_v47 = vpop.f32.mrf.mxu0  ;;  %v8157_v33 = vld [vmem:[#allocation2 + $0x158] sm:$0x1]  ;;  %v6906_v18 = vpack.c.b16 %v6866_v37, %v6865_v52  ;;  %v8762_v36 = vor.u32 %v8761_v29, %v8758_v23 }
 0x427   :  { %v8771_v38 = vrot.slane %v8769_v35, 4 }
 0x428   :  { %10789 = vst [vmem:[#allocation10 + $0xd0] sm:$0xff] %v10725_v11  ;;  %v10402_v24 = vadd.f32 %v10218_v62, %v9416_v40  ;;  %v8765_v62 = vshll.u32 %v8156_v3, 16  ;;  %v8998_v11 = vunpack.c.l.b16 %v8744_v10  ;;  %v8999_v40 = vunpack.c.l.b16 %v8754_v17  ;;  %v11787_v10 = vld [vmem:[#allocation2 + $0x150] sm:$0xff] }
 0x429   :  { %11677 = vmatmul.msk.bf16.gmra.mxu0 %vm1510_vm7, %v10024_v59  ;;  %v6470_v59 = vld [vmem:[#allocation2 + $0x144] sm:$0xe]  ;;  %v6763_v3 = vrot.slane %v6472_v27, 5 }
 0x42a   :  { %v7104_v12 = vpop.f32.mrf.mxu1  ;;  %v10596_v6 = vmul.f32 %v13949_v26, %v10402_v24  ;;  %11605 = vmatmul.msk.bf16.gmra.mxu3 %vm1510_vm7, %v9038_v20  ;;  %11566 = vmatmul.msk.bf16.gmra.mxu2 %vm1510_vm7, %v11786_v21  ;;  %v6471_v26 = vld [vmem:[#allocation2 + $0x148] sm:$0xf]  ;;  %v14174_v15 = vrot.slane %v8765_v62, 5  ;;  %v9984_v20 = vunpack.c.l.b16 %v9873_v31  ;;  %v9985_v21 = vunpack.c.l.b16 %v9876_v57  ;;  %v14649_v31 = vld [vmem:[#allocation53_spill] sm:$0xff] }
 0x42b   :  { %v6760_v56 = vrot.slane %v6471_v26, 5  ;;  %v7285_v39 = vadd.f32 %v7104_v12, %v14648_v2  ;;  %v11359_v34 = vrot.slane %v6470_v59, 9  ;;  %v8775_v24 = vshll.u32 %v8157_v33, 16 }
 0x42c   :  { %v10662_v55 = vadd.f32 %v13952_v45, %v10596_v6  ;;  %v8772_v44 = vor.u32 %v8771_v38, %v14174_v15  ;;  %v9879_v12 = vrot.slane %v9590_v63, 5  ;;  %v9039_v61 = vpack.c.b16 %v8999_v40, %v8998_v11  ;;  %v9591_v6 = vld [vmem:[#allocation2 + $0x158] sm:$0x1]  ;;  %v8158_v38 = vld [vmem:[#allocation2 + $0x15c] sm:$0xf] }
 0x42d   :  { %v9235_v1 = vpop.f32.mrf.mxu3  ;;  %v14168_v9 = vpop.f32.mrf.mxu2  ;;  %v7984_v54 = vadd.f32 %v14150_v60, %v7285_v39  ;;  %v10025_v53 = vpack.c.b16 %v9985_v21, %v9984_v20  ;;  %v6761_v37 = vsel %vm12377_vm12, %v11359_v34, %v6760_v56  ;;  %v8777_v17 = vrot.slane %v8775_v24, 5 }
 0x42e   :  { %v10726_v48 = vmax.f32 %v10662_v55, 0.0  ;;  %v9417_v45 = vadd.f32 %v9235_v1, %v7983_v14  ;;  %v10223_v43 = vpop.f32.mrf.mxu0  ;;  %v8763_v55 = vrot.slane %v8762_v36, 4  ;;  %v8773_v14 = vrot.slane %v8772_v44, 4 }
 0x42f   :  { %v11639_v26 = vrot.slane %v9589_v51, 9  ;;  %v9881_v23 = vrot.slane %v9879_v12, 4  ;;  %v9882_v29 = vrot.slane %v9591_v6, 5  ;;  %v6867_v33 = vunpack.c.l.b16 %v6761_v37 }
 0x430   :  { %10790 = vst [vmem:[#allocation10 + $0xd8] sm:$0xff] %v10726_v48  ;;  %v10403_v30 = vadd.f32 %v10221_v47, %v9417_v45  ;;  %v6762_v47 = vrot.slane %v6760_v56, 4  ;;  %v8159_v56 = vld [vmem:[#allocation2 + $0x160] sm:$0xf]  ;;  %v8778_v2 = vsel %vm12406_vm15, %v8773_v14, %v8777_v17  ;;  %v8780_v20 = vshrl.u32 %v8158_v38, 16 }
 0x431   :  { %v9880_v59 = vsel %vm12377_vm12, %v11639_v26, %v9879_v12  ;;  %v9883_v27 = vsel %vm12377_vm12, %v9881_v23, %v9882_v29  ;;  %v8783_v21 = vshll.u32 %v8158_v38, 16  ;;  %v8793_v63 = vshrl.u32 %v8159_v56, 16  ;;  %v8160_v26 = vld [vmem:[#allocation2 + $0x164] sm:$0x1] }
 0x432   :  { %v7107_v13 = vpop.f32.mrf.mxu1  ;;  %v10597_v25 = vmul.f32 %v14177_v5, %v10403_v30  ;;  %v6764_v60 = vsel %vm12377_vm12, %v6762_v47, %v6763_v3  ;;  %v6473_v3 = vld [vmem:[#allocation2 + $0x150] sm:$0xe]  ;;  %v9986_v12 = vunpack.c.l.b16 %v9880_v59  ;;  %v9594_v23 = vld [vmem:[#allocation2 + $0x164] sm:$0x1] }
 0x433   :  { %v7286_v57 = vadd.f32 %v7107_v13, %v14649_v31  ;;  %v6868_v30 = vunpack.c.l.b16 %v6764_v60  ;;  %v6474_v13 = vld [vmem:[#allocation2 + $0x154] sm:$0xf]  ;;  %v11360_v37 = vrot.slane %v6473_v3, 9 }
 0x434   :  { %v10663_v8 = vadd.f32 %v14181_v32, %v10597_v25  ;;  %v6767_v24 = vrot.slane %v6474_v13, 5 }
 0x435   :  { %11398 = vmatmul.msk.bf16.gmra.mxu1 %vm1510_vm7, %v6906_v18  ;;  %v9237_v0 = vpop.f32.mrf.mxu3  ;;  %v14186_v46 = vpop.f32.mrf.mxu2  ;;  %v7985_v18 = vadd.f32 %v14168_v9, %v7286_v57  ;;  %v6907_v34 = vpack.c.b16 %v6868_v30, %v6867_v33  ;;  %v9001_v9 = vunpack.c.l.b16 %v8778_v2  ;;  %v9592_v57 = vld [vmem:[#allocation2 + $0x15c] sm:$0xe] }
 0x436   :  { %v10727_v62 = vmax.f32 %v10663_v8, 0.0  ;;  %v9418_v35 = vadd.f32 %v9237_v0, %v7984_v54  ;;  %v10226_v52 = vpop.f32.mrf.mxu0  ;;  %v14650_v54 = vld [vmem:[#allocation14_spill] sm:$0xff]  ;;  %v9987_v0 = vunpack.c.l.b16 %v9883_v27  ;;  %v6769_v60 = vrot.slane %v6767_v24, 4 }
 0x437   :  { %v11640_v27 = vrot.slane %v9592_v57, 9 }
 0x438   :  { %10791 = vst [vmem:[#allocation10 + $0xe0] sm:$0xff] %v10727_v62  ;;  %v10404_v1 = vadd.f32 %v10223_v43, %v9418_v35  ;;  %v8768_v43 = vsel %vm12406_vm15, %v8763_v55, %v14174_v15  ;;  %v8789_v15 = vshll.u32 %v8159_v56, 16  ;;  %v8782_v62 = vrot.slane %v8780_v20, 4 }
 0x439   :  { %11678 = vmatmul.msk.bf16.gmra.mxu0 %vm1510_vm7, %v10025_v53  ;;  %v9000_v47 = vunpack.c.l.b16 %v8768_v43  ;;  %v9593_v53 = vld [vmem:[#allocation2 + $0x160] sm:$0xf]  ;;  %v8785_v35 = vrot.slane %v8783_v21, 5  ;;  %v8795_v55 = vrot.slane %v8793_v63, 4  ;;  %v14651_v21 = vld [vmem:[#allocation15_spill] sm:$0xff] }
 0x43a   :  { %v7109_v48 = vpop.f32.mrf.mxu1  ;;  %v10598_v45 = vmul.f32 %v14177_v5, %v10404_v1  ;;  %11606 = vmatmul.msk.bf16.gmra.mxu3 %vm1510_vm7, %v9039_v61  ;;  %11567 = vmatmul.msk.bf16.gmra.mxu2 %vm1510_vm7, %v11787_v10  ;;  %v6475_v61 = vld [vmem:[#allocation2 + $0x158] sm:$0x1]  ;;  %v14211_v10 = vrot.slane %v8789_v15, 5  ;;  %v9886_v1 = vrot.slane %v9593_v53, 5  ;;  %v8161_v63 = vld [vmem:[#allocation2 + $0x168] sm:$0xf] }
 0x43b   :  { %v7287_v51 = vadd.f32 %v7109_v48, %v14650_v54  ;;  %v6770_v17 = vrot.slane %v6475_v61, 5  ;;  %v9040_v48 = vpack.c.b16 %v9001_v9, %v9000_v47  ;;  %v8786_v56 = vor.u32 %v8785_v35, %v8782_v62  ;;  %v8162_v47 = vld [vmem:[#allocation2 + $0x16c] sm:$0xf] }
 0x43c   :  { %v10664_v39 = vadd.f32 %v14181_v32, %v10598_v45  ;;  %v10026_v45 = vpack.c.b16 %v9987_v0, %v9986_v12  ;;  %v8796_v33 = vor.u32 %v8795_v55, %v14211_v10  ;;  %v9888_v13 = vrot.slane %v9886_v1, 4 }
 0x43d   :  { %v9240_v11 = vpop.f32.mrf.mxu3  ;;  %v14208_v40 = vpop.f32.mrf.mxu2  ;;  %v7986_v31 = vadd.f32 %v14186_v46, %v7287_v51  ;;  %v8799_v46 = vshll.u32 %v8160_v26, 16  ;;  %v6771_v59 = vsel %vm12377_vm12, %v6769_v60, %v6770_v17  ;;  %v8804_v51 = vshrl.u32 %v8161_v63, 16 }
 0x43e   :  { %v10728_v25 = vmax.f32 %v10664_v39, 0.0  ;;  %v9419_v36 = vadd.f32 %v9240_v11, %v7985_v18  ;;  %v10228_v44 = vpop.f32.mrf.mxu0  ;;  %v11788_v39 = vld [vmem:[#allocation2 + $0x15c] sm:$0xff]  ;;  %v6768_v18 = vsel %vm12377_vm12, %v11360_v37, %v6767_v24  ;;  %v9889_v11 = vrot.slane %v9594_v23, 5 }
 0x43f   :  { %v6869_v3 = vunpack.c.l.b16 %v6768_v18  ;;  %v6870_v24 = vunpack.c.l.b16 %v6771_v59  ;;  %v8807_v12 = vshll.u32 %v8161_v63, 16  ;;  %v8813_v53 = vshll.u32 %v8162_v47, 16  ;;  %v6476_v18 = vld [vmem:[#allocation2 + $0x15c] sm:$0xe]  ;;  %v8163_v59 = vld [vmem:[#allocation2 + $0x170] sm:$0x1] }
 0x440   :  { %10792 = vst [vmem:[#allocation10 + $0xe8] sm:$0xff] %v10728_v25  ;;  %v10405_v8 = vadd.f32 %v10226_v52, %v9419_v36  ;;  %v8787_v36 = vrot.slane %v8786_v56, 4  ;;  %v9890_v54 = vsel %vm12377_vm12, %v9888_v13, %v9889_v11  ;;  %v9596_v13 = vld [vmem:[#allocation2 + $0x16c] sm:$0xf] }
 0x441   :  { %v6908_v17 = vpack.c.b16 %v6870_v24, %v6869_v3  ;;  %v8809_v57 = vrot.slane %v8807_v12, 5 }
 0x442   :  { %v7112_v6 = vpop.f32.mrf.mxu1  ;;  %v10599_v14 = vmul.f32 %v14177_v5, %v10405_v8  ;;  %v8801_v8 = vrot.slane %v8799_v46, 5  ;;  %v8792_v55 = vsel %vm12406_vm15, %v8787_v36, %v14211_v10  ;;  %v6478_v46 = vld [vmem:[#allocation2 + $0x164] sm:$0x1] }
 0x443   :  { %v7288_v15 = vadd.f32 %v7112_v6, %v14651_v21  ;;  %v8817_v6 = vshrl.u32 %v8162_v47, 16  ;;  %v8823_v47 = vshll.u32 %v8163_v59, 16 }
 0x444   :  { %v10665_v52 = vadd.f32 %v14181_v32, %v10599_v14 }
 0x445   :  { %11399 = vmatmul.msk.bf16.gmra.mxu1 %vm1510_vm7, %v6907_v34  ;;  %v9242_v29 = vpop.f32.mrf.mxu3  ;;  %v14217_v38 = vpop.f32.mrf.mxu2  ;;  %v8797_v34 = vrot.slane %v8796_v33, 4  ;;  %v7987_v61 = vadd.f32 %v14208_v40, %v7288_v15  ;;  %v8806_v40 = vrot.slane %v8804_v51, 4  ;;  %v8819_v56 = vrot.slane %v8817_v6, 4  ;;  %v9595_v51 = vld [vmem:[#allocation2 + $0x168] sm:$0xe] }
 0x446   :  { %v10729_v30 = vmax.f32 %v10665_v52, 0.0  ;;  %v9420_v43 = vadd.f32 %v9242_v29, %v7986_v31  ;;  %v10231_v2 = vpop.f32.mrf.mxu0  ;;  %v9989_v31 = vunpack.c.l.b16 %v9890_v54  ;;  %v14652_v29 = vld [vmem:[#allocation17_spill] sm:$0xff]  ;;  %v9893_v54 = vrot.slane %v9596_v13, 5  ;;  %v8164_v6 = vld [vmem:[#allocation2 + $0x174] sm:$0xf] }
 0x447   :  { %v8802_v26 = vsel %vm12406_vm15, %v8797_v34, %v8801_v8  ;;  %v6777_v34 = vrot.slane %v6478_v46, 5  ;;  %v6480_v46 = vld [vmem:[#allocation2 + $0x16c] sm:$0xf] }
 0x448   :  { %10793 = vst [vmem:[#allocation10 + $0xf0] sm:$0xff] %v10729_v30  ;;  %v10406_v20 = vadd.f32 %v10228_v44, %v9420_v43  ;;  %v9887_v44 = vsel %vm12377_vm12, %v11640_v27, %v9886_v1  ;;  %v6477_v1 = vld [vmem:[#allocation2 + $0x160] sm:$0xf]  ;;  %v9002_v43 = vunpack.c.l.b16 %v8792_v55 }
 0x449   :  { %11679 = vmatmul.msk.bf16.gmra.mxu0 %vm1510_vm7, %v10026_v45  ;;  %v9988_v52 = vunpack.c.l.b16 %v9887_v44  ;;  %v14243_v45 = vrot.slane %v8813_v53, 5  ;;  %v6774_v33 = vrot.slane %v6477_v1, 5  ;;  %v11789_v44 = vld [vmem:[#allocation2 + $0x168] sm:$0xff] }
 0x44a   :  { %v7114_v25 = vpop.f32.mrf.mxu1  ;;  %v10600_v9 = vmul.f32 %v14177_v5, %v10406_v20  ;;  %11607 = vmatmul.msk.bf16.gmra.mxu3 %vm1510_vm7, %v9040_v48  ;;  %11568 = vmatmul.msk.bf16.gmra.mxu2 %vm1510_vm7, %v11788_v39  ;;  %v9003_v39 = vunpack.c.l.b16 %v8802_v26  ;;  %v8810_v20 = vor.u32 %v8809_v57, %v8806_v40  ;;  %v8825_v26 = vrot.slane %v8823_v47, 5  ;;  %v6479_v47 = vld [vmem:[#allocation2 + $0x168] sm:$0xe] }
 0x44b   :  { %v7289_v48 = vadd.f32 %v7114_v25, %v14652_v29  ;;  %v10027_v27 = vpack.c.b16 %v9989_v31, %v9988_v52  ;;  %v8820_v21 = vor.u32 %v8819_v56, %v14243_v45  ;;  %v11361_v25 = vrot.slane %v6476_v18, 9 }
 0x44c   :  { %v10666_v0 = vadd.f32 %v14181_v32, %v10600_v9  ;;  %v6776_v36 = vrot.slane %v6774_v33, 4  ;;  %v9041_v8 = vpack.c.b16 %v9003_v39, %v9002_v43  ;;  %v8811_v53 = vrot.slane %v8810_v20, 4 }
 0x44d   :  { %v9245_v62 = vpop.f32.mrf.mxu3  ;;  %v14235_v35 = vpop.f32.mrf.mxu2  ;;  %v9895_v52 = vrot.slane %v9893_v54, 4  ;;  %v8828_v40 = vshrl.u32 %v8164_v6, 16  ;;  %v8831_v57 = vshll.u32 %v8164_v6, 16 }
 0x44e   :  { %v10730_v14 = vmax.f32 %v10666_v0, 0.0  ;;  %v9421_v37 = vadd.f32 %v9245_v62, %v7987_v61  ;;  %v10233_v60 = vpop.f32.mrf.mxu0  ;;  %v14653_v0 = vld [vmem:[#allocation19_spill] sm:$0xff]  ;;  %v8165_v62 = vld [vmem:[#allocation2 + $0x178] sm:$0xf]  ;;  %v8816_v39 = vsel %vm12406_vm15, %v8811_v53, %v14243_v45  ;;  %v11362_v53 = vrot.slane %v6479_v47, 9 }
 0x44f   :  { %v8841_v29 = vshrl.u32 %v8165_v62, 16  ;;  %v8833_v20 = vrot.slane %v8831_v57, 5 }
 0x450   :  { %10794 = vst [vmem:[#allocation10 + $0xf8] sm:$0xff] %v10730_v14  ;;  %v10407_v23 = vadd.f32 %v10231_v2, %v9421_v37  ;;  %v7988_v2 = vadd.f32 %v14217_v38, %v7289_v48  ;;  %v9597_v38 = vld [vmem:[#allocation2 + $0x170] sm:$0x1]  ;;  %v6775_v14 = vsel %vm12377_vm12, %v11361_v25, %v6774_v33  ;;  %v6778_v37 = vsel %vm12377_vm12, %v6776_v36, %v6777_v34  ;;  %v14654_v25 = vld [vmem:[#allocation21_spill] sm:$0xff] }
 0x451   :  { %v9896_v31 = vrot.slane %v9597_v38, 5  ;;  %v6872_v33 = vunpack.c.l.b16 %v6778_v37 }
 0x452   :  { %v7117_v10 = vpop.f32.mrf.mxu1  ;;  %v10601_v30 = vmul.f32 %v14177_v5, %v10407_v23  ;;  %v8837_v23 = vshll.u32 %v8165_v62, 16 }
 0x453   :  { %v7290_v61 = vadd.f32 %v7117_v10, %v14653_v0  ;;  %v6871_v10 = vunpack.c.l.b16 %v6775_v14 }
 0x454   :  { %v10667_v11 = vadd.f32 %v14181_v32, %v10601_v30 }
 0x455   :  { %11400 = vmatmul.msk.bf16.gmra.mxu1 %vm1510_vm7, %v6908_v17  ;;  %v9247_v15 = vpop.f32.mrf.mxu3  ;;  %v14250_v63 = vpop.f32.mrf.mxu2  ;;  %v8821_v17 = vrot.slane %v8820_v21, 4  ;;  %v7989_v56 = vadd.f32 %v14235_v35, %v7290_v61  ;;  %v9897_v35 = vsel %vm12377_vm12, %v9895_v52, %v9896_v31  ;;  %v14274_v21 = vrot.slane %v8837_v23, 5  ;;  %v9599_v61 = vld [vmem:[#allocation2 + $0x178] sm:$0xf]  ;;  %v9598_v52 = vld [vmem:[#allocation2 + $0x174] sm:$0xe] }
 0x456   :  { %v10731_v9 = vmax.f32 %v10667_v11, 0.0  ;;  %v9422_v3 = vadd.f32 %v9247_v15, %v7988_v2  ;;  %v10236_v24 = vpop.f32.mrf.mxu0  ;;  %v8830_v2 = vrot.slane %v8828_v40, 4  ;;  %v8843_v15 = vrot.slane %v8841_v29, 4 }
 0x457   :  { %v8826_v18 = vsel %vm12406_vm15, %v8821_v17, %v8825_v26  ;;  %v6909_v34 = vpack.c.b16 %v6872_v33, %v6871_v10  ;;  %v9900_v31 = vrot.slane %v9599_v61, 5  ;;  %v8167_v10 = vld [vmem:[#allocation2 + $0x180] sm:$0xf] }
 0x458   :  { %10795 = vst [vmem:[#allocation10 + $0x100] sm:$0xff] %v10731_v9  ;;  %v10408_v12 = vadd.f32 %v10233_v60, %v9422_v3  ;;  %v11641_v60 = vrot.slane %v9595_v51, 9  ;;  %v6781_v9 = vrot.slane %v6480_v46, 5  ;;  %v8166_v3 = vld [vmem:[#allocation2 + $0x17c] sm:$0x1]  ;;  %v9991_v51 = vunpack.c.l.b16 %v9897_v35 }
 0x459   :  { %11680 = vmatmul.msk.bf16.gmra.mxu0 %vm1510_vm7, %v10027_v27  ;;  %v9005_v0 = vunpack.c.l.b16 %v8826_v18  ;;  %v8834_v6 = vor.u32 %v8833_v20, %v8830_v2  ;;  %v8844_v62 = vor.u32 %v8843_v15, %v14274_v21  ;;  %v8168_v18 = vld [vmem:[#allocation2 + $0x184] sm:$0xf]  ;;  %v11642_v35 = vrot.slane %v9598_v52, 9 }
 0x45a   :  { %v7119_v55 = vpop.f32.mrf.mxu1  ;;  %v10602_v1 = vmul.f32 %v14177_v5, %v10408_v12  ;;  %11608 = vmatmul.msk.bf16.gmra.mxu3 %vm1510_vm7, %v9041_v8  ;;  %11569 = vmatmul.msk.bf16.gmra.mxu2 %vm1510_vm7, %v11789_v44  ;;  %v9894_v11 = vsel %vm12377_vm12, %v11641_v60, %v9893_v54  ;;  %v6481_v54 = vld [vmem:[#allocation2 + $0x170] sm:$0x1]  ;;  %v9004_v12 = vunpack.c.l.b16 %v8816_v39  ;;  %v6783_v37 = vrot.slane %v6781_v9, 4 }
 0x45b   :  { %v7291_v36 = vadd.f32 %v7119_v55, %v14654_v25  ;;  %v9990_v44 = vunpack.c.l.b16 %v9894_v11  ;;  %v6784_v17 = vrot.slane %v6481_v54, 5  ;;  %v8835_v33 = vrot.slane %v8834_v6, 4  ;;  %v6483_v54 = vld [vmem:[#allocation2 + $0x178] sm:$0xf] }
 0x45c   :  { %v10668_v48 = vadd.f32 %v14181_v32, %v10602_v1  ;;  %v9042_v29 = vpack.c.b16 %v9005_v0, %v9004_v12  ;;  %v9902_v20 = vrot.slane %v9900_v31, 4  ;;  %v8855_v25 = vshll.u32 %v8167_v10, 16 }
 0x45d   :  { %v9250_v30 = vpop.f32.mrf.mxu3  ;;  %v14263_v43 = vpop.f32.mrf.mxu2  ;;  %v7990_v14 = vadd.f32 %v14250_v63, %v7291_v36  ;;  %v10028_v1 = vpack.c.b16 %v9991_v51, %v9990_v44  ;;  %v6782_v63 = vsel %vm12377_vm12, %v11362_v53, %v6781_v9  ;;  %v6785_v11 = vsel %vm12377_vm12, %v6783_v37, %v6784_v17  ;;  %v8169_v37 = vld [vmem:[#allocation2 + $0x188] sm:$0x1] }
 0x45e   :  { %v10732_v59 = vmax.f32 %v10668_v48, 0.0  ;;  %v9423_v27 = vadd.f32 %v9250_v30, %v7989_v56  ;;  %v10238_v13 = vpop.f32.mrf.mxu0  ;;  %v11790_v48 = vld [vmem:[#allocation2 + $0x174] sm:$0xff]  ;;  %v9600_v56 = vld [vmem:[#allocation2 + $0x17c] sm:$0x1]  ;;  %v8845_v30 = vrot.slane %v8844_v62, 4  ;;  %v6873_v47 = vunpack.c.l.b16 %v6782_v63 }
 0x45f   :  { %v9903_v15 = vrot.slane %v9600_v56, 5  ;;  %v8840_v9 = vsel %vm12406_vm15, %v8835_v33, %v14274_v21  ;;  %v6874_v44 = vunpack.c.l.b16 %v6785_v11  ;;  %v9901_v0 = vsel %vm12377_vm12, %v11642_v35, %v9900_v31  ;;  %v6484_v31 = vld [vmem:[#allocation2 + $0x17c] sm:$0x1]  ;;  %v9602_v63 = vld [vmem:[#allocation2 + $0x184] sm:$0xf] }
 0x460   :  { %10796 = vst [vmem:[#allocation10 + $0x108] sm:$0xff] %v10732_v59  ;;  %v10409_v45 = vadd.f32 %v10236_v24, %v9423_v27  ;;  %v8847_v24 = vshll.u32 %v8166_v3, 16  ;;  %v14655_v59 = vld [vmem:[#allocation23_spill] sm:$0xff]  ;;  %v8857_v21 = vrot.slane %v8855_v25, 5  ;;  %v9992_v56 = vunpack.c.l.b16 %v9901_v0  ;;  %v9601_v35 = vld [vmem:[#allocation2 + $0x180] sm:$0xe] }
 0x461   :  { %v9904_v61 = vsel %vm12377_vm12, %v9902_v20, %v9903_v15  ;;  %v6910_v52 = vpack.c.b16 %v6874_v44, %v6873_v47  ;;  %v14657_v0 = vld [vmem:[#allocation28_spill] sm:$0xff] }
 0x462   :  { %v7122_v8 = vpop.f32.mrf.mxu1  ;;  %v10603_v38 = vmul.f32 %v14177_v5, %v10409_v45  ;;  %v8849_v39 = vrot.slane %v8847_v24, 5  ;;  %v8852_v45 = vshrl.u32 %v8167_v10, 16  ;;  %v9993_v10 = vunpack.c.l.b16 %v9904_v61 }
 0x463   :  { %v7292_v27 = vadd.f32 %v7122_v8, %v14655_v59  ;;  %v6791_v59 = vrot.slane %v6484_v31, 5 }
 0x464   :  { %v10669_v55 = vadd.f32 %v14181_v32, %v10603_v38  ;;  %v8850_v51 = vsel %vm12406_vm15, %v8845_v30, %v8849_v39  ;;  %v8854_v53 = vrot.slane %v8852_v45, 4  ;;  %v10029_v45 = vpack.c.b16 %v9993_v10, %v9992_v56 }
 0x465   :  { %11401 = vmatmul.msk.bf16.gmra.mxu1 %vm1510_vm7, %v6909_v34  ;;  %v9252_v26 = vpop.f32.mrf.mxu3  ;;  %v14282_v60 = vpop.f32.mrf.mxu2  ;;  %v8865_v34 = vshrl.u32 %v8168_v18, 16  ;;  %v7991_v8 = vadd.f32 %v14263_v43, %v7292_v27 }
 0x466   :  { %v10733_v40 = vmax.f32 %v10669_v55, 0.0  ;;  %v9424_v57 = vadd.f32 %v9252_v26, %v7990_v14  ;;  %v10241_v23 = vpop.f32.mrf.mxu0  ;;  %v6788_v14 = vrot.slane %v6483_v54, 5  ;;  %v14656_v26 = vld [vmem:[#allocation25_spill] sm:$0xff]  ;;  %v8858_v30 = vor.u32 %v8857_v21, %v8854_v53 }
 0x467   :  { %v8867_v55 = vrot.slane %v8865_v34, 4  ;;  %v11643_v54 = vrot.slane %v9601_v35, 9 }
 0x468   :  { %10797 = vst [vmem:[#allocation10 + $0x110] sm:$0xff] %v10733_v40  ;;  %v10410_v46 = vadd.f32 %v10238_v13, %v9424_v57  ;;  %v8861_v13 = vshll.u32 %v8168_v18, 16  ;;  %v6482_v40 = vld [vmem:[#allocation2 + $0x174] sm:$0xe] }
 0x469   :  { %11681 = vmatmul.msk.bf16.gmra.mxu0 %vm1510_vm7, %v10028_v1  ;;  %v11363_v18 = vrot.slane %v6482_v40, 9 }
 0x46a   :  { %v7124_v2 = vpop.f32.mrf.mxu1  ;;  %v10604_v36 = vmul.f32 %v14177_v5, %v10410_v46  ;;  %11609 = vmatmul.msk.bf16.gmra.mxu3 %vm1510_vm7, %v9042_v29  ;;  %11570 = vmatmul.msk.bf16.gmra.mxu2 %vm1510_vm7, %v11790_v48  ;;  %v14306_v43 = vrot.slane %v8861_v13, 5  ;;  %v9006_v29 = vunpack.c.l.b16 %v8840_v9  ;;  %v9007_v48 = vunpack.c.l.b16 %v8850_v51  ;;  %v11791_v9 = vld [vmem:[#allocation2 + $0x180] sm:$0xff] }
 0x46b   :  { %v7293_v1 = vadd.f32 %v7124_v2, %v14656_v26  ;;  %v6790_v46 = vrot.slane %v6788_v14, 4  ;;  %v9907_v2 = vrot.slane %v9602_v63, 5  ;;  %v6789_v44 = vsel %vm12377_vm12, %v11363_v18, %v6788_v14  ;;  %v8171_v14 = vld [vmem:[#allocation2 + $0x190] sm:$0xf] }
 0x46c   :  { %v10670_v3 = vadd.f32 %v14181_v32, %v10604_v36  ;;  %v8868_v39 = vor.u32 %v8867_v55, %v14306_v43  ;;  %v9043_v15 = vpack.c.b16 %v9007_v48, %v9006_v29  ;;  %v9603_v36 = vld [vmem:[#allocation2 + $0x188] sm:$0x1]  ;;  %v8170_v55 = vld [vmem:[#allocation2 + $0x18c] sm:$0xf]  ;;  %v8889_v63 = vshrl.u32 %v8171_v14, 16 }
 0x46d   :  { %v9255_v38 = vpop.f32.mrf.mxu3  ;;  %v14300_v12 = vpop.f32.mrf.mxu2  ;;  %v7992_v11 = vadd.f32 %v14282_v60, %v7293_v1  ;;  %v6792_v60 = vsel %vm12377_vm12, %v6790_v46, %v6791_v59  ;;  %v9909_v53 = vrot.slane %v9907_v2, 4  ;;  %v9910_v21 = vrot.slane %v9603_v36, 5  ;;  %v6485_v59 = vld [vmem:[#allocation2 + $0x180] sm:$0xe] }
 0x46e   :  { %v10734_v6 = vmax.f32 %v10670_v3, 0.0  ;;  %v9425_v62 = vadd.f32 %v9255_v38, %v7991_v8  ;;  %v10243_v24 = vpop.f32.mrf.mxu0  ;;  %v8859_v3 = vrot.slane %v8858_v30, 4  ;;  %v8869_v8 = vrot.slane %v8868_v39, 4 }
 0x46f   :  { %v9908_v40 = vsel %vm12377_vm12, %v11643_v54, %v9907_v2  ;;  %v9911_v31 = vsel %vm12377_vm12, %v9909_v53, %v9910_v21  ;;  %v8876_v56 = vshrl.u32 %v8170_v55, 16  ;;  %v8879_v10 = vshll.u32 %v8170_v55, 16  ;;  %v8172_v54 = vld [vmem:[#allocation2 + $0x194] sm:$0x1] }
 0x470   :  { %10798 = vst [vmem:[#allocation10 + $0x118] sm:$0xff] %v10734_v6  ;;  %v10411_v17 = vadd.f32 %v10241_v23, %v9425_v62  ;;  %v8871_v23 = vshll.u32 %v8169_v37, 16  ;;  %v6875_v37 = vunpack.c.l.b16 %v6789_v44  ;;  %v9994_v2 = vunpack.c.l.b16 %v9908_v40  ;;  %v9606_v53 = vld [vmem:[#allocation2 + $0x194] sm:$0x1] }
 0x471   :  { %v11364_v44 = vrot.slane %v6485_v59, 9 }
 0x472   :  { %v7127_v57 = vpop.f32.mrf.mxu1  ;;  %v10605_v33 = vmul.f32 %v14177_v5, %v10411_v17  ;;  %v8873_v51 = vrot.slane %v8871_v23, 5  ;;  %v6876_v17 = vunpack.c.l.b16 %v6792_v60 }
 0x473   :  { %v7294_v61 = vadd.f32 %v7127_v57, %v14657_v0  ;;  %v6486_v57 = vld [vmem:[#allocation2 + $0x184] sm:$0xf] }
 0x474   :  { %v10671_v27 = vadd.f32 %v14181_v32, %v10605_v33  ;;  %v8874_v26 = vsel %vm12406_vm15, %v8869_v8, %v8873_v51  ;;  %v6911_v18 = vpack.c.b16 %v6876_v17, %v6875_v37  ;;  %v6795_v23 = vrot.slane %v6486_v57, 5 }
 0x475   :  { %11402 = vmatmul.msk.bf16.gmra.mxu1 %vm1510_vm7, %v6910_v52  ;;  %v9257_v20 = vpop.f32.mrf.mxu3  ;;  %v14314_v25 = vpop.f32.mrf.mxu2  ;;  %v7993_v52 = vadd.f32 %v14300_v12, %v7294_v61  ;;  %v9009_v12 = vunpack.c.l.b16 %v8874_v26  ;;  %v9604_v61 = vld [vmem:[#allocation2 + $0x18c] sm:$0xe] }
 0x476   :  { %v10735_v13 = vmax.f32 %v10671_v27, 0.0  ;;  %v9426_v34 = vadd.f32 %v9257_v20, %v7992_v11  ;;  %v10246_v47 = vpop.f32.mrf.mxu0  ;;  %v14658_v11 = vld [vmem:[#allocation31_spill] sm:$0xff]  ;;  %v9995_v20 = vunpack.c.l.b16 %v9911_v31  ;;  %v6797_v60 = vrot.slane %v6795_v23, 4 }
 0x477   :  { %v11644_v31 = vrot.slane %v9604_v61, 9 }
 0x478   :  { %10799 = vst [vmem:[#allocation10 + $0x120] sm:$0xff] %v10735_v13  ;;  %v10412_v38 = vadd.f32 %v10243_v24, %v9426_v34  ;;  %v8864_v24 = vsel %vm12406_vm15, %v8859_v3, %v14306_v43  ;;  %v8885_v43 = vshll.u32 %v8171_v14, 16  ;;  %v8878_v13 = vrot.slane %v8876_v56, 4 }
 0x479   :  { %11682 = vmatmul.msk.bf16.gmra.mxu0 %vm1510_vm7, %v10029_v45  ;;  %v9008_v46 = vunpack.c.l.b16 %v8864_v24  ;;  %v9605_v45 = vld [vmem:[#allocation2 + $0x190] sm:$0xf]  ;;  %v8881_v34 = vrot.slane %v8879_v10, 5  ;;  %v8891_v3 = vrot.slane %v8889_v63, 4 }
 0x47a   :  { %v7129_v6 = vpop.f32.mrf.mxu1  ;;  %v10606_v62 = vmul.f32 %v14177_v5, %v10412_v38  ;;  %11610 = vmatmul.msk.bf16.gmra.mxu3 %vm1510_vm7, %v9043_v15  ;;  %11571 = vmatmul.msk.bf16.gmra.mxu2 %vm1510_vm7, %v11791_v9  ;;  %v6487_v15 = vld [vmem:[#allocation2 + $0x188] sm:$0x1]  ;;  %v14339_v9 = vrot.slane %v8885_v43, 5  ;;  %v9914_v38 = vrot.slane %v9605_v45, 5  ;;  %v8173_v43 = vld [vmem:[#allocation2 + $0x198] sm:$0xf] }
 0x47b   :  { %v7295_v35 = vadd.f32 %v7129_v6, %v14658_v11  ;;  %v6798_v51 = vrot.slane %v6487_v15, 5  ;;  %v9044_v6 = vpack.c.b16 %v9009_v12, %v9008_v46  ;;  %v8882_v14 = vor.u32 %v8881_v34, %v8878_v13 }
 0x47c   :  { %v10672_v1 = vadd.f32 %v14181_v32, %v10606_v62  ;;  %v10030_v62 = vpack.c.b16 %v9995_v20, %v9994_v2  ;;  %v8892_v37 = vor.u32 %v8891_v3, %v14339_v9  ;;  %v9916_v57 = vrot.slane %v9914_v38, 4 }
 0x47d   :  { %v9260_v29 = vpop.f32.mrf.mxu3  ;;  %v14336_v48 = vpop.f32.mrf.mxu2  ;;  %v7994_v0 = vadd.f32 %v14314_v25, %v7295_v35  ;;  %v8895_v25 = vshll.u32 %v8172_v54, 16  ;;  %v6799_v40 = vsel %vm12377_vm12, %v6797_v60, %v6798_v51  ;;  %v8903_v11 = vshll.u32 %v8173_v43, 16  ;;  %v6489_v51 = vld [vmem:[#allocation2 + $0x190] sm:$0xf] }
 0x47e   :  { %v10736_v33 = vmax.f32 %v10672_v1, 0.0  ;;  %v9427_v30 = vadd.f32 %v9260_v29, %v7993_v52  ;;  %v10248_v39 = vpop.f32.mrf.mxu0  ;;  %v11792_v1 = vld [vmem:[#allocation2 + $0x18c] sm:$0xff]  ;;  %v6796_v52 = vsel %vm12377_vm12, %v11364_v44, %v6795_v23  ;;  %v9917_v29 = vrot.slane %v9606_v53, 5 }
 0x47f   :  { %v6877_v12 = vunpack.c.l.b16 %v6796_v52  ;;  %v6878_v59 = vunpack.c.l.b16 %v6799_v40  ;;  %v8897_v23 = vrot.slane %v8895_v25, 5  ;;  %v9608_v25 = vld [vmem:[#allocation2 + $0x19c] sm:$0xf] }
 0x480   :  { %10800 = vst [vmem:[#allocation10 + $0x128] sm:$0xff] %v10736_v33  ;;  %v10413_v27 = vadd.f32 %v10246_v47, %v9427_v30  ;;  %v8883_v33 = vrot.slane %v8882_v14, 4  ;;  %v8893_v30 = vrot.slane %v8892_v37, 4 }
 0x481   :  { %v6912_v44 = vpack.c.b16 %v6878_v59, %v6877_v12  ;;  %v11793_v12 = vld [vmem:[#allocation2 + $0x198] sm:$0xff]  ;;  %v9921_v59 = vrot.slane %v9608_v25, 5 }
 0x482   :  { %v7132_v36 = vpop.f32.mrf.mxu1  ;;  %v10607_v8 = vmul.f32 %v14177_v5, %v10413_v27  ;;  %v8900_v27 = vshrl.u32 %v8173_v43, 16  ;;  %v8888_v13 = vsel %vm12406_vm15, %v8883_v33, %v14339_v9  ;;  %v8898_v60 = vsel %vm12406_vm15, %v8893_v30, %v8897_v23  ;;  %v9607_v23 = vld [vmem:[#allocation2 + $0x198] sm:$0xe] }
 0x483   :  { %v7296_v10 = vadd.f32 %v7132_v36, %v13412_v49  ;;  %v9918_v49 = vsel %vm12377_vm12, %v9916_v57, %v9917_v29  ;;  %v9010_v14 = vunpack.c.l.b16 %v8888_v13  ;;  %v9011_v37 = vunpack.c.l.b16 %v8898_v60 }
 0x484   :  { %v10673_v47 = vadd.f32 %v14181_v32, %v10607_v8  ;;  %v11645_v13 = vrot.slane %v9607_v23, 9 }
 0x485   :  { %11403 = vmatmul.msk.bf16.gmra.mxu1 %vm1510_vm7, %v6911_v18  ;;  %v9262_v21 = vpop.f32.mrf.mxu3  ;;  %v14345_v55 = vpop.f32.mrf.mxu2  ;;  %v8174_v18 = vld [vmem:[#allocation2 + $0x19c] sm:$0xf]  ;;  %v7995_v2 = vadd.f32 %v14336_v48, %v7296_v10  ;;  %v8902_v48 = vrot.slane %v8900_v27, 4 }
 0x486   :  { %v10737_v17 = vmax.f32 %v10673_v47, 0.0  ;;  %v9428_v24 = vadd.f32 %v9262_v21, %v7994_v0  ;;  %v10251_v26 = vpop.f32.mrf.mxu0  ;;  %v8909_v20 = vshll.u32 %v8174_v18, 16  ;;  %v8913_v15 = vshrl.u32 %v8174_v18, 16 }
 0x487   :  { %v8905_v47 = vrot.slane %v8903_v11, 5 }
 0x488   :  { %10801 = vst [vmem:[#allocation10 + $0x130] sm:$0xff] %v10737_v17  ;;  %v10414_v56 = vadd.f32 %v10248_v39, %v9428_v24  ;;  %v9915_v39 = vsel %vm12377_vm12, %v11644_v31, %v9914_v38  ;;  %v9997_v38 = vunpack.c.l.b16 %v9918_v49  ;;  %v14371_v53 = vrot.slane %v8909_v20, 5  ;;  %v6488_v17 = vld [vmem:[#allocation2 + $0x18c] sm:$0xe]  ;;  %v6490_v24 = vld [vmem:[#allocation2 + $0x194] sm:$0x1] }
 0x489   :  { %11683 = vmatmul.msk.bf16.gmra.mxu0 %vm1510_vm7, %v10030_v62  ;;  %v9996_v54 = vunpack.c.l.b16 %v9915_v39  ;;  %v8915_v21 = vrot.slane %v8913_v15, 4  ;;  %v6805_v43 = vrot.slane %v6490_v24, 5 }
 0x48a   :  { %v7134_v63 = vpop.f32.mrf.mxu1  ;;  %v10608_v46 = vmul.f32 %v14177_v5, %v10414_v56  ;;  %11611 = vmatmul.msk.bf16.gmra.mxu3 %vm1510_vm7, %v9044_v6  ;;  %11572 = vmatmul.msk.bf16.gmra.mxu2 %vm1510_vm7, %v11792_v1  ;;  %v6802_v6 = vrot.slane %v6489_v51, 5  ;;  %v8175_v1 = vld [vmem:[#allocation2 + $0x1a0] sm:$0x1]  ;;  %v11365_v56 = vrot.slane %v6488_v17, 9  ;;  %v8176_v51 = vld [vmem:[#allocation2 + $0x1a4] sm:$0xf] }
 0x48b   :  { %v7297_v61 = vadd.f32 %v7134_v63, %v13425_v7  ;;  %v10031_v52 = vpack.c.b16 %v9997_v38, %v9996_v54  ;;  %v8906_v7 = vor.u32 %v8905_v47, %v8902_v48  ;;  %v8916_v31 = vor.u32 %v8915_v21, %v14371_v53  ;;  %v8177_v54 = vld [vmem:[#allocation2 + $0x1a8] sm:$0xf] }
 0x48c   :  { %v10674_v35 = vadd.f32 %v14181_v32, %v10608_v46  ;;  %v6804_v10 = vrot.slane %v6802_v6, 4  ;;  %v8919_v63 = vshll.u32 %v8175_v1, 16  ;;  %v9045_v46 = vpack.c.b16 %v9011_v37, %v9010_v14 }
 0x48d   :  { %v9265_v45 = vpop.f32.mrf.mxu3  ;;  %v14363_v36 = vpop.f32.mrf.mxu2  ;;  %v8907_v27 = vrot.slane %v8906_v7, 4  ;;  %v8917_v20 = vrot.slane %v8916_v31, 4  ;;  %v8933_v14 = vshll.u32 %v8177_v54, 16  ;;  %v8937_v37 = vshrl.u32 %v8177_v54, 16 }
 0x48e   :  { %v10738_v34 = vmax.f32 %v10674_v35, 0.0  ;;  %v9429_v3 = vadd.f32 %v9265_v45, %v7995_v2  ;;  %v10253_v8 = vpop.f32.mrf.mxu0  ;;  %v6803_v35 = vsel %vm12377_vm12, %v11365_v56, %v6802_v6  ;;  %v6806_v2 = vsel %vm12377_vm12, %v6804_v10, %v6805_v43  ;;  %v6491_v56 = vld [vmem:[#allocation2 + $0x198] sm:$0xe]  ;;  %v6493_v10 = vld [vmem:[#allocation2 + $0x1a0] sm:$0x1] }
 0x48f   :  { %v8921_v15 = vrot.slane %v8919_v63, 5  ;;  %v6880_v60 = vunpack.c.l.b16 %v6806_v2  ;;  %v8924_v6 = vshrl.u32 %v8176_v51, 16 }
 0x490   :  { %10802 = vst [vmem:[#allocation10 + $0x138] sm:$0xff] %v10738_v34  ;;  %v10415_v0 = vadd.f32 %v10251_v26, %v9429_v3  ;;  %v7996_v26 = vadd.f32 %v14345_v55, %v7297_v61  ;;  %v9609_v55 = vld [vmem:[#allocation2 + $0x1a0] sm:$0x1] }
 0x491   :  { %v9924_v34 = vrot.slane %v9609_v55, 5  ;;  %v8922_v47 = vsel %vm12406_vm15, %v8917_v20, %v8921_v15  ;;  %v8926_v43 = vrot.slane %v8924_v6, 4 }
 0x492   :  { %v7137_v9 = vpop.f32.mrf.mxu1  ;;  %v10609_v62 = vmul.f32 %v14177_v5, %v10415_v0 }
 0x493   :  { %v7298_v49 = vadd.f32 %v7137_v9, %v13442_v28  ;;  %v9923_v28 = vrot.slane %v9921_v59, 4  ;;  %v6492_v9 = vld [vmem:[#allocation2 + $0x19c] sm:$0xf] }
 0x494   :  { %v10675_v40 = vadd.f32 %v14181_v32, %v10609_v62  ;;  %v8927_v62 = vshll.u32 %v8176_v51, 16 }
 0x495   :  { %11404 = vmatmul.msk.bf16.gmra.mxu1 %vm1510_vm7, %v6912_v44  ;;  %v9267_v57 = vpop.f32.mrf.mxu3  ;;  %v14378_v29 = vpop.f32.mrf.mxu2  ;;  %v6879_v44 = vunpack.c.l.b16 %v6803_v35 }
 0x496   :  { %v10739_v33 = vmax.f32 %v10675_v40, 0.0  ;;  %v9430_v30 = vadd.f32 %v9267_v57, %v7996_v26  ;;  %v10256_v18 = vpop.f32.mrf.mxu0  ;;  %v6809_v40 = vrot.slane %v6492_v9, 5  ;;  %v14403_v26 = vld [vmem:[#allocation9] ss:$0 sm:$0xff]  ;;  %v9013_v57 = vunpack.c.l.b16 %v8922_v47 }
 0x497   :  { %v6913_v24 = vpack.c.b16 %v6880_v60, %v6879_v44  ;;  %v8929_v63 = vrot.slane %v8927_v62, 5 }
 0x498   :  { %10803 = vst [vmem:[#allocation10 + $0x140] sm:$0xff] %v10739_v33  ;;  %v10416_v39 = vadd.f32 %v10253_v8, %v9430_v30  ;;  %v7997_v8 = vadd.f32 %v14363_v36, %v7298_v49  ;;  %v9925_v36 = vsel %vm12377_vm12, %v9923_v28, %v9924_v34  ;;  %v8935_v33 = vrot.slane %v8933_v14, 5 }
 0x499   :  { %11684 = vmatmul.msk.bf16.gmra.mxu0 %vm1510_vm7, %v10031_v52  ;;  %v9999_v25 = vunpack.c.l.b16 %v9925_v36  ;;  %v8939_v30 = vrot.slane %v8937_v37, 4  ;;  %v11366_v49 = vrot.slane %v6491_v56, 9  ;;  %v8930_v28 = vor.u32 %v8929_v63, %v8926_v43 }
 0x49a   :  { %v7139_v11 = vpop.f32.mrf.mxu1  ;;  %v10610_v45 = vmul.f32 %v14177_v5, %v10416_v39  ;;  %11612 = vmatmul.msk.bf16.gmra.mxu3 %vm1510_vm7, %v9045_v46  ;;  %11573 = vmatmul.msk.bf16.gmra.mxu2 %vm1510_vm7, %v11793_v12  ;;  %v8912_v5 = vsel %vm12406_vm15, %v8907_v27, %v14371_v53  ;;  %v14406_v46 = vld [vmem:[#allocation9 + $0x1] ss:$0 sm:$0xff]  ;;  %v6811_v27 = vrot.slane %v6809_v40, 4 }
 0x49b   :  { %v7299_v53 = vadd.f32 %v7139_v11, %v13451_v4  ;;  %v9012_v31 = vunpack.c.l.b16 %v8912_v5  ;;  %v6812_v11 = vrot.slane %v6493_v10, 5  ;;  %v8940_v34 = vor.u32 %v8939_v30, %v8935_v33 }
 0x49c   :  { %v10676_v3 = vadd.f32 %v14181_v32, %v10610_v45  ;;  %v9922_v32 = vsel %vm12377_vm12, %v11645_v13, %v9921_v59  ;;  %v8178_v59 = vld [vmem:[#allocation2 + $0x1ac] sm:$0x1]  ;;  %v11794_v45 = vld [vmem:[#allocation2 + $0x1a4] sm:$0xff]  ;;  %v6810_v54 = vsel %vm12377_vm12, %v11366_v49, %v6809_v40 }
 0x49d   :  { %v9270_v38 = vpop.f32.mrf.mxu3  ;;  %v14391_v48 = vpop.f32.mrf.mxu2  ;;  %v9998_v52 = vunpack.c.l.b16 %v9922_v32  ;;  %v7998_v12 = vadd.f32 %v14378_v29, %v7299_v53  ;;  %v9046_v15 = vpack.c.b16 %v9013_v57, %v9012_v31  ;;  %v9612_v29 = vld [vmem:[#allocation2 + $0x1ac] sm:$0x1]  ;;  %v6881_v6 = vunpack.c.l.b16 %v6810_v54 }
 0x49e   :  { %v10740_v0 = vmax.f32 %v10676_v3, 0.0  ;;  %v9431_v61 = vadd.f32 %v9270_v38, %v7997_v8  ;;  %v10258_v21 = vpop.f32.mrf.mxu0  ;;  %v8943_v3 = vshll.u32 %v8178_v59, 16  ;;  %v9610_v8 = vld [vmem:[#allocation2 + $0x1a4] sm:$0xe]  ;;  %v6813_v38 = vsel %vm12377_vm12, %v6811_v27, %v6812_v11 }
 0x49f   :  { %v10032_v55 = vpack.c.b16 %v9999_v25, %v9998_v52  ;;  %v11646_v47 = vrot.slane %v9610_v8, 9  ;;  %v6882_v62 = vunpack.c.l.b16 %v6813_v38 }
 0x4a0   :  { %10804 = vst [vmem:[#allocation10 + $0x148] sm:$0xff] %v10740_v0  ;;  %v10417_v17 = vadd.f32 %v10256_v18, %v9431_v61  ;;  %v9611_v18 = vld [vmem:[#allocation2 + $0x1a8] sm:$0xf]  ;;  %v9931_v61 = vrot.slane %v9612_v29, 5  ;;  %v8945_v32 = vrot.slane %v8943_v3, 5 }
 0x4a1   :  { %v9928_v13 = vrot.slane %v9611_v18, 5  ;;  %v6914_v31 = vpack.c.b16 %v6882_v62, %v6881_v6 }
 0x4a2   :  { %v7142_v1 = vpop.f32.mrf.mxu1  ;;  %v10611_v7 = vmul.f32 %v14403_v26, %v10417_v17 }
 0x4a3   :  { %v7300_v60 = vadd.f32 %v7142_v1, %v13460_v41  ;;  %v9930_v0 = vrot.slane %v9928_v13, 4  ;;  %v8941_v41 = vrot.slane %v8940_v34, 4  ;;  %v9929_v1 = vsel %vm12377_vm12, %v11646_v47, %v9928_v13 }
 0x4a4   :  { %v10677_v4 = vadd.f32 %v14406_v46, %v10611_v7  ;;  %v10000_v56 = vunpack.c.l.b16 %v9929_v1 }
 0x4a5   :  { %11405 = vmatmul.msk.bf16.gmra.mxu1 %vm1510_vm7, %v6913_v24  ;;  %v9272_v23 = vpop.f32.mrf.mxu3  ;;  %v7843_v39 = vpop.f32.mrf.mxu2  ;;  %v7999_v9 = vadd.f32 %v14391_v48, %v7300_v60  ;;  %v9932_v52 = vsel %vm12377_vm12, %v9930_v0, %v9931_v61  ;;  %v8946_v40 = vsel %vm12406_vm15, %v8941_v41, %v8945_v32 }
 0x4a6   :  { %v10741_v35 = vmax.f32 %v10677_v4, 0.0  ;;  %v9432_v2 = vadd.f32 %v9272_v23, %v7998_v12  ;;  %v10261_v20 = vpop.f32.mrf.mxu0  ;;  %v10001_v10 = vunpack.c.l.b16 %v9932_v52  ;;  %v9015_v30 = vunpack.c.l.b16 %v8946_v40 }
 0x4a8   :  { %10805 = vst [vmem:[#allocation10 + $0x150] sm:$0xff] %v10741_v35  ;;  %v10418_v44 = vadd.f32 %v10258_v21, %v9432_v2  ;;  %v8931_v21 = vrot.slane %v8930_v28, 4  ;;  %v10033_v16 = vpack.c.b16 %v10001_v10, %v10000_v56 }
 0x4a9   :  { %11685 = vmatmul.msk.bf16.gmra.mxu0 %vm1510_vm7, %v10032_v55 }
 0x4aa   :  { %v7144_v51 = vpop.f32.mrf.mxu1  ;;  %v10612_v5 = vmul.f32 %v14403_v26, %v10418_v44  ;;  %11613 = vmatmul.msk.bf16.gmra.mxu3 %vm1510_vm7, %v9046_v15  ;;  %11574 = vmatmul.msk.bf16.gmra.mxu2 %vm1510_vm7, %v11794_v45  ;;  %v8936_v25 = vsel %vm12406_vm15, %v8931_v21, %v8935_v33 }
 0x4ab   :  { %v7301_v7 = vadd.f32 %v7144_v51, %v13471_v58  ;;  %v9014_v63 = vunpack.c.l.b16 %v8936_v25 }
 0x4ac   :  { %v10678_v36 = vadd.f32 %v14406_v46, %v10612_v5 }
 0x4ad   :  { %v9275_v14 = vpop.f32.mrf.mxu3  ;;  %v7846_v37 = vpop.f32.mrf.mxu2  ;;  %v8000_v18 = vadd.f32 %v7843_v39, %v7301_v7  ;;  %v9047_v58 = vpack.c.b16 %v9015_v30, %v9014_v63 }
 0x4ae   :  { %v10742_v17 = vmax.f32 %v10678_v36, 0.0  ;;  %v9433_v53 = vadd.f32 %v9275_v14, %v7999_v9  ;;  %v10263_v24 = vpop.f32.mrf.mxu0  ;;  %v14659_v14 = vld [vmem:[#allocation34_spill] sm:$0xff] }
 0x4b0   :  { %10806 = vst [vmem:[#allocation10 + $0x158] sm:$0xff] %v10742_v17  ;;  %v10419_v48 = vadd.f32 %v10261_v20, %v9433_v53 }
 0x4b2   :  { %v7147_v57 = vpop.f32.mrf.mxu1  ;;  %v10613_v43 = vmul.f32 %v14403_v26, %v10419_v48 }
 0x4b3   :  { %v7302_v49 = vadd.f32 %v7147_v57, %v13486_v19 }
 0x4b4   :  { %v10679_v22 = vadd.f32 %v14406_v46, %v10613_v43 }
 0x4b5   :  { %11406 = vmatmul.msk.bf16.gmra.mxu1 %vm1510_vm7, %v6914_v31  ;;  %v9277_v33 = vpop.f32.mrf.mxu3  ;;  %v7848_v4 = vpop.f32.mrf.mxu2  ;;  %v8001_v35 = vadd.f32 %v7846_v37, %v7302_v49  ;;  %v14660_v31 = vld [vmem:[#allocation37_spill] sm:$0xff] }
 0x4b6   :  { %v10743_v12 = vmax.f32 %v10679_v22, 0.0  ;;  %v9434_v59 = vadd.f32 %v9277_v33, %v8000_v18  ;;  %v10266_v23 = vpop.f32.mrf.mxu0 }
 0x4b8   :  { %10807 = vst [vmem:[#allocation10 + $0x160] sm:$0xff] %v10743_v12  ;;  %v10420_v55 = vadd.f32 %v10263_v24, %v9434_v59  ;;  %v14661_v12 = vld [vmem:[#allocation40_spill] sm:$0xff] }
 0x4b9   :  { %11686 = vmatmul.msk.bf16.gmra.mxu0 %vm1510_vm7, %v10033_v16 }
 0x4ba   :  { %v7149_v27 = vpop.f32.mrf.mxu1  ;;  %v10614_v11 = vmul.f32 %v14403_v26, %v10420_v55  ;;  %11614 = vmatmul.msk.bf16.gmra.mxu3 %vm1510_vm7, %v9047_v58 }
 0x4bb   :  { %v7303_v34 = vadd.f32 %v7149_v27, %v13493_v50 }
 0x4bc   :  { %v10680_v39 = vadd.f32 %v14406_v46, %v10614_v11 }
 0x4bd   :  { %v9280_v2 = vpop.f32.mrf.mxu3  ;;  %v7851_v20 = vpop.f32.mrf.mxu2  ;;  %v8002_v29 = vadd.f32 %v7848_v4, %v7303_v34 }
 0x4be   :  { %v10744_v15 = vmax.f32 %v10680_v39, 0.0  ;;  %v9435_v45 = vadd.f32 %v9280_v2, %v8001_v35  ;;  %v10268_v13 = vpop.f32.mrf.mxu0 }
 0x4c0   :  { %10808 = vst [vmem:[#allocation10 + $0x168] sm:$0xff] %v10744_v15  ;;  %v10421_v28 = vadd.f32 %v10266_v23, %v9435_v45  ;;  %v14662_v15 = vld [vmem:[#allocation43_spill] sm:$0xff] }
 0x4c2   :  { %v7152_v19 = vpop.f32.mrf.mxu1  ;;  %v10615_v3 = vmul.f32 %v14403_v26, %v10421_v28 }
 0x4c3   :  { %v7304_v47 = vadd.f32 %v7152_v19, %v13514_v42 }
 0x4c4   :  { %v10681_v8 = vadd.f32 %v14406_v46, %v10615_v3 }
 0x4c5   :  { %v9282_v44 = vpop.f32.mrf.mxu3  ;;  %v7853_v60 = vpop.f32.mrf.mxu2  ;;  %v8003_v21 = vadd.f32 %v7851_v20, %v7304_v47 }
 0x4c6   :  { %v10745_v51 = vmax.f32 %v10681_v8, 0.0  ;;  %v9436_v54 = vadd.f32 %v9282_v44, %v8002_v29  ;;  %v10271_v38 = vpop.f32.mrf.mxu0 }
 0x4c8   :  { %10809 = vst [vmem:[#allocation10 + $0x170] sm:$0xff] %v10745_v51  ;;  %v10422_v5 = vadd.f32 %v10268_v13, %v9436_v54  ;;  %v14663_v54 = vld [vmem:[#allocation46_spill] sm:$0xff] }
 0x4ca   :  { %v7154_v0 = vpop.f32.mrf.mxu1  ;;  %v10616_v61 = vmul.f32 %v14403_v26, %v10422_v5 }
 0x4cb   :  { %v7305_v37 = vadd.f32 %v7154_v0, %v14659_v14 }
 0x4cc   :  { %v10682_v50 = vadd.f32 %v14406_v46, %v10616_v61 }
 0x4cd   :  { %v9285_v41 = vpop.f32.mrf.mxu3  ;;  %v7856_v32 = vpop.f32.mrf.mxu2  ;;  %v8004_v24 = vadd.f32 %v7853_v60, %v7305_v37 }
 0x4ce   :  { %v10746_v36 = vmax.f32 %v10682_v50, 0.0  ;;  %v9437_v9 = vadd.f32 %v9285_v41, %v8003_v21  ;;  %v10273_v6 = vpop.f32.mrf.mxu0 }
 0x4d0   :  { %10810 = vst [vmem:[#allocation10 + $0x178] sm:$0xff] %v10746_v36  ;;  %v10423_v62 = vadd.f32 %v10271_v38, %v9437_v9 }
 0x4d2   :  { %v7157_v17 = vpop.f32.mrf.mxu1  ;;  %v10617_v53 = vmul.f32 %v14403_v26, %v10423_v62 }
 0x4d3   :  { %v7306_v57 = vadd.f32 %v7157_v17, %v14660_v31 }
 0x4d4   :  { %v10683_v42 = vadd.f32 %v14406_v46, %v10617_v53 }
 0x4d5   :  { %v9287_v1 = vpop.f32.mrf.mxu3  ;;  %v7858_v52 = vpop.f32.mrf.mxu2  ;;  %v8005_v63 = vadd.f32 %v7856_v32, %v7306_v57 }
 0x4d6   :  { %v10747_v25 = vmax.f32 %v10683_v42, 0.0  ;;  %v9438_v40 = vadd.f32 %v9287_v1, %v8004_v24  ;;  %v10276_v48 = vpop.f32.mrf.mxu0 }
 0x4d8   :  { %10811 = vst [vmem:[#allocation10 + $0x180] sm:$0xff] %v10747_v25  ;;  %v10424_v7 = vadd.f32 %v10273_v6, %v9438_v40  ;;  %v14664_v6 = vld [vmem:[#allocation49_spill] sm:$0xff] }
 0x4da   :  { %v7159_v56 = vpop.f32.mrf.mxu1  ;;  %v10618_v10 = vmul.f32 %v14403_v26, %v10424_v7 }
 0x4db   :  { %v7307_v59 = vadd.f32 %v7159_v56, %v14661_v12 }
 0x4dc   :  { %v10684_v43 = vadd.f32 %v14406_v46, %v10618_v10 }
 0x4dd   :  { %v9290_v30 = vpop.f32.mrf.mxu3  ;;  %v7861_v22 = vpop.f32.mrf.mxu2  ;;  %v8006_v49 = vadd.f32 %v7858_v52, %v7307_v59 }
 0x4de   :  { %v10748_v18 = vmax.f32 %v10684_v43, 0.0  ;;  %v9439_v33 = vadd.f32 %v9290_v30, %v8005_v63  ;;  %v10278_v16 = vpop.f32.mrf.mxu0 }
 0x4e0   :  { %10812 = vst [vmem:[#allocation10 + $0x188] sm:$0xff] %v10748_v18  ;;  %v10425_v4 = vadd.f32 %v10276_v48, %v9439_v33  ;;  %v14665_v48 = vld [vmem:[#allocation52_spill] sm:$0xff] }
 0x4e2   :  { %v7162_v23 = vpop.f32.mrf.mxu1  ;;  %v10619_v58 = vmul.f32 %v14403_v26, %v10425_v4 }
 0x4e3   :  { %v7308_v45 = vadd.f32 %v7162_v23, %v14662_v15 }
 0x4e4   :  { %v10685_v55 = vadd.f32 %v14406_v46, %v10619_v58 }
 0x4e5   :  { %v9292_v27 = vpop.f32.mrf.mxu3  ;;  %v7863_v11 = vpop.f32.mrf.mxu2  ;;  %v8007_v19 = vadd.f32 %v7861_v22, %v7308_v45 }
 0x4e6   :  { %v10749_v39 = vmax.f32 %v10685_v55, 0.0  ;;  %v9440_v35 = vadd.f32 %v9292_v27, %v8006_v49  ;;  %v10281_v2 = vpop.f32.mrf.mxu0 }
 0x4e8   :  { %10813 = vst [vmem:[#allocation10 + $0x190] sm:$0xff] %v10749_v39  ;;  %v10426_v20 = vadd.f32 %v10278_v16, %v9440_v35  ;;  %v14666_v16 = vld [vmem:[#allocation16_spill] sm:$0xff]  ;;  %v14667_v35 = vld [vmem:[#allocation18_spill] sm:$0xff] }
 0x4ea   :  { %v7164_v13 = vpop.f32.mrf.mxu1  ;;  %v10620_v28 = vmul.f32 %v14403_v26, %v10426_v20 }
 0x4eb   :  { %v7309_v38 = vadd.f32 %v7164_v13, %v14663_v54 }
 0x4ec   :  { %v10686_v34 = vadd.f32 %v14406_v46, %v10620_v28 }
 0x4ed   :  { %v9295_v3 = vpop.f32.mrf.mxu3  ;;  %v7866_v8 = vpop.f32.mrf.mxu2  ;;  %v8008_v61 = vadd.f32 %v7863_v11, %v7309_v38 }
 0x4ee   :  { %v10750_v29 = vmax.f32 %v10686_v34, 0.0  ;;  %v9441_v44 = vadd.f32 %v9295_v3, %v8007_v19  ;;  %v10283_v60 = vpop.f32.mrf.mxu0 }
 0x4f0   :  { %10814 = vst [vmem:[#allocation10 + $0x198] sm:$0xff] %v10750_v29  ;;  %v10427_v51 = vadd.f32 %v10281_v2, %v9441_v44  ;;  %v14668_v44 = vld [vmem:[#allocation20_spill] sm:$0xff] }
 0x4f2   :  { %v7167_v5 = vpop.f32.mrf.mxu1  ;;  %v10621_v47 = vmul.f32 %v14403_v26, %v10427_v51 }
 0x4f3   :  { %v7310_v62 = vadd.f32 %v7167_v5, %v14664_v6 }
 0x4f4   :  { %v10687_v0 = vadd.f32 %v14406_v46, %v10621_v47 }
 0x4f5   :  { %v9297_v50 = vpop.f32.mrf.mxu3  ;;  %v7868_v21 = vpop.f32.mrf.mxu2  ;;  %v8009_v53 = vadd.f32 %v7866_v8, %v7310_v62 }
 0x4f6   :  { %v10751_v41 = vmax.f32 %v10687_v0, 0.0  ;;  %v9442_v32 = vadd.f32 %v9297_v50, %v8008_v61  ;;  %v10286_v36 = vpop.f32.mrf.mxu0 }
 0x4f8   :  { %10815 = vst [vmem:[#allocation10 + $0x1a0] sm:$0xff] %v10751_v41  ;;  %v10428_v9 = vadd.f32 %v10283_v60, %v9442_v32  ;;  %v14669_v32 = vld [vmem:[#allocation22_spill] sm:$0xff] }
 0x4fa   :  { %v7169_v14 = vpop.f32.mrf.mxu1  ;;  %v10622_v37 = vmul.f32 %v14403_v26, %v10428_v9 }
 0x4fb   :  { %v7311_v7 = vadd.f32 %v7169_v14, %v14665_v48 }
 0x4fc   :  { %v10688_v17 = vadd.f32 %v14406_v46, %v10622_v37 }
 0x4fd   :  { %v9300_v42 = vpop.f32.mrf.mxu3  ;;  %v7871_v24 = vpop.f32.mrf.mxu2  ;;  %v8010_v10 = vadd.f32 %v7868_v21, %v7311_v7 }
 0x4fe   :  { %v10752_v1 = vmax.f32 %v10688_v17, 0.0  ;;  %v9443_v52 = vadd.f32 %v9300_v42, %v8009_v53  ;;  %v10288_v25 = vpop.f32.mrf.mxu0 }
 0x500   :  { %10816 = vst [vmem:[#allocation10 + $0x1a8] sm:$0xff] %v10752_v1  ;;  %v10429_v40 = vadd.f32 %v10286_v36, %v9443_v52  ;;  %v14670_v1 = vld [vmem:[#allocation24_spill] sm:$0xff] }
 0x502   :  { %v7172_v31 = vpop.f32.mrf.mxu1  ;;  %v10623_v57 = vmul.f32 %v14403_v26, %v10429_v40 }
 0x503   :  { %v7312_v4 = vadd.f32 %v7172_v31, %v14666_v16 }
 0x504   :  { %v10689_v56 = vadd.f32 %v14406_v46, %v10623_v57 }
 0x505   :  { %v9302_v43 = vpop.f32.mrf.mxu3  ;;  %v7873_v18 = vpop.f32.mrf.mxu2  ;;  %v8011_v58 = vadd.f32 %v7871_v24, %v7312_v4 }
 0x506   :  { %v10753_v63 = vmax.f32 %v10689_v56, 0.0  ;;  %v9444_v30 = vadd.f32 %v9302_v43, %v8010_v10  ;;  %v10291_v22 = vpop.f32.mrf.mxu0 }
 0x508   :  { %10817 = vst [vmem:[#allocation10 + $0x1b0] sm:$0xff] %v10753_v63  ;;  %v10430_v33 = vadd.f32 %v10288_v25, %v9444_v30  ;;  %v14671_v30 = vld [vmem:[#allocation26_spill] sm:$0xff] }
 0x50a   :  { %v7174_v12 = vpop.f32.mrf.mxu1  ;;  %v10624_v59 = vmul.f32 %v14403_v26, %v10430_v33 }
 0x50b   :  { %v7313_v2 = vadd.f32 %v7174_v12, %v14667_v35 }
 0x50c   :  { %v10690_v23 = vadd.f32 %v14406_v46, %v10624_v59 }
 0x50d   :  { %v9305_v55 = vpop.f32.mrf.mxu3  ;;  %v7876_v20 = vpop.f32.mrf.mxu2  ;;  %v8012_v28 = vadd.f32 %v7873_v18, %v7313_v2 }
 0x50e   :  { %v10754_v49 = vmax.f32 %v10690_v23, 0.0  ;;  %v9445_v27 = vadd.f32 %v9305_v55, %v8011_v58  ;;  %v10293_v11 = vpop.f32.mrf.mxu0 }
 0x510   :  { %10818 = vst [vmem:[#allocation10 + $0x1b8] sm:$0xff] %v10754_v49  ;;  %v10431_v39 = vadd.f32 %v10291_v22, %v9445_v27  ;;  %v14672_v49 = vld [vmem:[#allocation30_spill] sm:$0xff] }
 0x512   :  { %v7177_v15 = vpop.f32.mrf.mxu1  ;;  %v10625_v45 = vmul.f32 %v14403_v26, %v10431_v39 }
 0x513   :  { %v7314_v60 = vadd.f32 %v7177_v15, %v14668_v44 }
 0x514   :  { %v10691_v13 = vadd.f32 %v14406_v46, %v10625_v45 }
 0x515   :  { %v9307_v34 = vpop.f32.mrf.mxu3  ;;  %v7878_v38 = vpop.f32.mrf.mxu2  ;;  %v8013_v47 = vadd.f32 %v7876_v20, %v7314_v60 }
 0x516   :  { %v10755_v19 = vmax.f32 %v10691_v13, 0.0  ;;  %v9446_v3 = vadd.f32 %v9307_v34, %v8012_v28  ;;  %v10296_v8 = vpop.f32.mrf.mxu0 }
 0x518   :  { %10819 = vst [vmem:[#allocation10 + $0x1c0] sm:$0xff] %v10755_v19  ;;  %v10432_v29 = vadd.f32 %v10293_v11, %v9446_v3  ;;  %v14673_v19 = vld [vmem:[#allocation33_spill] sm:$0xff] }
 0x51a   :  { %v7179_v51 = vpop.f32.mrf.mxu1  ;;  %v10626_v54 = vmul.f32 %v14403_v26, %v10432_v29 }
 0x51b   :  { %v7315_v36 = vadd.f32 %v7179_v51, %v14669_v32 }
 0x51c   :  { %v10692_v5 = vadd.f32 %v14406_v46, %v10626_v54 }
 0x51d   :  { %v9310_v0 = vpop.f32.mrf.mxu3  ;;  %v8014_v14 = vadd.f32 %v7878_v38, %v7315_v36  ;;  %v7881_v37 = vpop.f32.mrf.mxu2 }
 0x51e   :  { %v10756_v61 = vmax.f32 %v10692_v5, 0.0  ;;  %v9447_v50 = vadd.f32 %v9310_v0, %v8013_v47  ;;  %v10298_v21 = vpop.f32.mrf.mxu0 }
 0x520   :  { %10820 = vst [vmem:[#allocation10 + $0x1c8] sm:$0xff] %v10756_v61  ;;  %v10433_v41 = vadd.f32 %v10296_v8, %v9447_v50 }
 0x522   :  { %v7182_v9 = vpop.f32.mrf.mxu1  ;;  %v10627_v6 = vmul.f32 %v14403_v26, %v10433_v41 }
 0x523   :  { %v7316_v52 = vadd.f32 %v7182_v9, %v14670_v1 }
 0x524   :  { %v10693_v62 = vadd.f32 %v14406_v46, %v10627_v6 }
 0x525   :  { %v9312_v17 = vpop.f32.mrf.mxu3  ;;  %v8015_v31 = vadd.f32 %v7881_v37, %v7316_v52  ;;  %v7883_v43 = vpop.f32.mrf.mxu2 }
 0x526   :  { %v10757_v53 = vmax.f32 %v10693_v62, 0.0  ;;  %v9448_v42 = vadd.f32 %v9312_v17, %v8014_v14  ;;  %v10301_v25 = vpop.f32.mrf.mxu0 }
 0x528   :  { %10821 = vst [vmem:[#allocation10 + $0x1d0] sm:$0xff] %v10757_v53  ;;  %v10434_v24 = vadd.f32 %v10298_v21, %v9448_v42 }
 0x52a   :  { %v7184_v40 = vpop.f32.mrf.mxu1  ;;  %v10628_v48 = vmul.f32 %v14403_v26, %v10434_v24 }
 0x52b   :  { %v7317_v22 = vadd.f32 %v7184_v40, %v14671_v30 }
 0x52c   :  { %v10694_v7 = vadd.f32 %v14406_v46, %v10628_v48 }
 0x52d   :  { %v9315_v57 = vpop.f32.mrf.mxu3  ;;  %v8016_v12 = vadd.f32 %v7883_v43, %v7317_v22  ;;  %v7886_v11 = vpop.f32.mrf.mxu2 }
 0x52e   :  { %v10758_v56 = vmax.f32 %v10694_v7, 0.0  ;;  %v9449_v10 = vadd.f32 %v9315_v57, %v8015_v31  ;;  %v10303_v33 = vpop.f32.mrf.mxu0 }
 0x530   :  { %10822 = vst [vmem:[#allocation10 + $0x1d8] sm:$0xff] %v10758_v56  ;;  %v10435_v63 = vadd.f32 %v10301_v25, %v9449_v10 }
 0x532   :  { %v10629_v18 = vmul.f32 %v14403_v26, %v10435_v63  ;;  %v7187_v16 = vpop.f32.mrf.mxu1 }
 0x533   :  { %v7318_v27 = vadd.f32 %v7187_v16, %v14672_v49 }
 0x534   :  { %v10695_v4 = vadd.f32 %v14406_v46, %v10629_v18 }
 0x535   :  { %v9317_v59 = vpop.f32.mrf.mxu3  ;;  %v8017_v20 = vadd.f32 %v7886_v11, %v7318_v27  ;;  %v7888_v29 = vpop.f32.mrf.mxu2 }
 0x536   :  { %v10759_v23 = vmax.f32 %v10695_v4, 0.0  ;;  %v9450_v58 = vadd.f32 %v9317_v59, %v8016_v12  ;;  %v10306_v2 = vpop.f32.mrf.mxu0 }
 0x538   :  { %10823 = vst [vmem:[#allocation10 + $0x1e0] sm:$0xff] %v10759_v23  ;;  %v10436_v55 = vadd.f32 %v10303_v33, %v9450_v58 }
 0x53a   :  { %v10630_v39 = vmul.f32 %v14403_v26, %v10436_v55  ;;  %v7189_v45 = vpop.f32.mrf.mxu1 }
 0x53b   :  { %v7319_v3 = vadd.f32 %v7189_v45, %v14673_v19 }
 0x53c   :  { %v10696_v35 = vadd.f32 %v14406_v46, %v10630_v39 }
 0x53d   :  { %v9320_v15 = vpop.f32.mrf.mxu3  ;;  %v8018_v60 = vadd.f32 %v7888_v29, %v7319_v3 }
 0x53e   :  { %v10760_v13 = vmax.f32 %v10696_v35, 0.0  ;;  %v9451_v28 = vadd.f32 %v9320_v15, %v8017_v20  ;;  %v10308_v5 = vpop.f32.mrf.mxu0 }
 0x540   :  { %10824 = vst [vmem:[#allocation10 + $0x1e8] sm:$0xff] %v10760_v13  ;;  %v10437_v34 = vadd.f32 %v10306_v2, %v9451_v28 }
 0x542   :  { %v10631_v8 = vmul.f32 %v14403_v26, %v10437_v34 }
 0x544   :  { %v10697_v44 = vadd.f32 %v14406_v46, %v10631_v8 }
 0x545   :  { %v9322_v51 = vpop.f32.mrf.mxu3 }
 0x546   :  { %v10761_v54 = vmax.f32 %v10697_v44, 0.0  ;;  %v9452_v38 = vadd.f32 %v9322_v51, %v8018_v60 }
 0x548   :  { %10825 = vst [vmem:[#allocation10 + $0x1f0] sm:$0xff] %v10761_v54  ;;  %v10438_v47 = vadd.f32 %v10308_v5, %v9452_v38 }
 0x54a   :  { %v10632_v0 = vmul.f32 %v14403_v26, %v10438_v47 }
 0x54c   :  { %v10698_v61 = vadd.f32 %v14406_v46, %v10632_v0 }
 0x54e   :  { %v10762_v50 = vmax.f32 %v10698_v61, 0.0 }
 0x550   :  { %10826 = vst [vmem:[#allocation10 + $0x1f8] sm:$0xff] %v10762_v50 }
 0x551   :  { %10839 = dma.vmem_to_hbm [thread:$0]  %s10832_s29, 8192, %s10834_s5, [#allocation6], %s11930_s24, %s11930_s24, %s11931_s25  }
 0x552   :  { %11924 = dma.done.wait [#allocation6], 8192  }
 0x553   :  { %11925 = vsyncadd [#allocation6], 4294959104 }
 0x554   :  { %10844 = vsyncpa [#allocation5], 1 }
 0x555   :  { %10845 = vsyncpa [#allocation8], 1 }
 0x556   :  { %10846 = vsyncpa [#allocation6], 1 }

</bundles_post_ra>
